<compile_context>
chip_gen: v5e
topology: v5e:2x2
jax: 0.10.0
libtpu: 0.0.40
codegen_flags: <defaults>
</compile_context>

<pallas_src>
import functools

import jax
import jax.numpy as jnp
from jax.experimental import pallas as pl
from jax.experimental.pallas import tpu as pltpu


# ---------------------------------------------------------------------------
# single-block pallas_call helper (whole arrays resident in VMEM)
# ---------------------------------------------------------------------------
def _zero_index_map(ndim):
    def idx(i):
        return (0,) * ndim
    return idx


def _single_block_call(kernel, out_shape, *inputs):
    in_specs = [pl.BlockSpec(a.shape, _zero_index_map(a.ndim)) for a in inputs]
    out_specs = pl.BlockSpec(out_shape.shape, _zero_index_map(len(out_shape.shape)))
    return pl.pallas_call(
        kernel,
        out_shape=out_shape,
        grid=(1,),
        in_specs=in_specs,
        out_specs=out_specs,
        compiler_params=pltpu.CompilerParams(
            dimension_semantics=("arbitrary",),
            vmem_limit_bytes=32 * 1024 * 1024,
        ),
    )(*inputs)


# ---------------------------------------------------------------------------
# Pallas kernels
# ---------------------------------------------------------------------------
def _stn_kernel(x_ref, m_ref, o_ref):
    # (N*C, H*W) f32  @  (H*W, H*W) bf16 interp matrix  -> (N*C, H*W) f32
    o_ref[...] = jnp.dot(
        x_ref[...].astype(jnp.bfloat16), m_ref[...],
        preferred_element_type=jnp.float32)


def _conv_pool_kernel(p_ref, w_ref, b_ref, o_ref, *, n_phase):
    # p_ref: (4, Cin*K*K, Ncols) phase-ordered im2col patches
    # w_ref: (Cout, Cin*K*K)     b_ref: (Cout, 1)
    # out  : (Cout, Ncols) = relu(maxpool(conv) + bias)  (relu/bias commute with max)
    w = w_ref[...]
    m = jnp.dot(w, p_ref[0], preferred_element_type=jnp.float32)
    for d in range(1, n_phase):
        m = jnp.maximum(m, jnp.dot(w, p_ref[d], preferred_element_type=jnp.float32))
    o_ref[...] = jnp.maximum(m + b_ref[...], 0.0)


def _head_kernel(y_ref, w1_ref, b1_ref, w2_ref, b2_ref, o_ref):
    # fc1 (bf16 weight, f32 accumulate) + relu + fc2 + log_softmax, all in VMEM.
    h = jnp.dot(y_ref[...].astype(jnp.bfloat16), w1_ref[...],
                preferred_element_type=jnp.float32) + b1_ref[...]
    h = jnp.maximum(h, 0.0)
    logits = jnp.dot(h, w2_ref[...], preferred_element_type=jnp.float32) + b2_ref[...]
    m = jnp.max(logits, axis=1, keepdims=True)
    s = logits - m
    lse = jnp.log(jnp.sum(jnp.exp(s), axis=1, keepdims=True))
    o_ref[...] = s - lse


# ---------------------------------------------------------------------------
# XLA glue: scatter-free STN matrix + phase-ordered im2col packing
# ---------------------------------------------------------------------------
def build_grid_sample_matrix_T(theta, H, W):
    """Pre-transposed dense operator Mt[(p_in, p_out)] such that
    grid_sample(x, affine_grid(theta)) == x_flat @ Mt   (bilinear, zeros padding,
    align_corners=False).  Built with broadcast one-hot compares (no scatter)."""
    xs = (2.0 * jnp.arange(W, dtype=jnp.float32) + 1.0) / W - 1.0
    ys = (2.0 * jnp.arange(H, dtype=jnp.float32) + 1.0) / H - 1.0
    gx = theta[0, 0] * xs[None, :] + theta[0, 1] * ys[:, None] + theta[0, 2]
    gy = theta[1, 0] * xs[None, :] + theta[1, 1] * ys[:, None] + theta[1, 2]
    ix = ((gx + 1.0) * W - 1.0) / 2.0
    iy = ((gy + 1.0) * H - 1.0) / 2.0
    x0 = jnp.floor(ix); y0 = jnp.floor(iy)
    x1 = x0 + 1.0;      y1 = y0 + 1.0
    wx1 = ix - x0; wx0 = 1.0 - wx1
    wy1 = iy - y0; wy0 = 1.0 - wy1

    P = H * W
    src_iota = jnp.arange(P, dtype=jnp.int32)[:, None]          # (P_in, 1)

    def corner(xc, yc, w):
        inb = (xc >= 0) & (xc <= W - 1) & (yc >= 0) & (yc <= H - 1)
        xi = jnp.clip(xc, 0, W - 1).astype(jnp.int32)
        yi = jnp.clip(yc, 0, H - 1).astype(jnp.int32)
        src = (yi * W + xi).reshape(-1)                          # (P_out,)
        wv = jnp.where(inb, w, 0.0).reshape(-1)                  # (P_out,)
        onehot = (src_iota == src[None, :]).astype(jnp.float32)  # (P_in, P_out)
        return onehot * wv[None, :]

    Mt = (corner(x0, y0, wx0 * wy0) + corner(x1, y0, wx1 * wy0)
          + corner(x0, y1, wx0 * wy1) + corner(x1, y1, wx1 * wy1))
    return Mt                                                    # (P_in, P_out)


def _im2col_pool_phases(x, K):
    """x: (Cin, N, Hi, Wi) -> (4, Cin*K*K, N*(Ho//2)*(Wo//2)) patches for a KxK
    valid conv, columns ordered (n, ph, pw), rows (c, ki, kj), leading axis =
    2x2 pooling phase (dh, dw)."""
    Cin, N, Hi, Wi = x.shape
    Ho, Wo = Hi - K + 1, Wi - K + 1
    Hp, Wp = Ho // 2, Wo // 2
    taps = [x[:, :, ki:ki + Ho, kj:kj + Wo] for ki in range(K) for kj in range(K)]
    P = jnp.stack(taps, axis=1)                     # (c, t, n, ho, wo)
    P = P.reshape(Cin, K * K, N, Hp, 2, Wp, 2)      # (c, t, n, ph, dh, pw, dw)
    P = P.transpose(4, 6, 0, 1, 2, 3, 5)            # (dh, dw, c, t, n, ph, pw)
    return P.reshape(4, Cin * K * K, N * Hp * Wp)


# ---------------------------------------------------------------------------
# Full forward pass (mirrors Net.forward)
# ---------------------------------------------------------------------------
@jax.jit
def net_forward(params, x):
    N, C, H, W = x.shape

    # --- Spatial transformer: affine_grid + grid_sample as one bf16 matmul ---
    Mt = build_grid_sample_matrix_T(params["apms"], H, W).astype(jnp.bfloat16)
    x_flat = x.reshape(N * C, H * W).astype(jnp.float32)
    stn = _single_block_call(
        _stn_kernel, jax.ShapeDtypeStruct((N * C, H * W), jnp.float32),
        x_flat, Mt)                                              # (N*C, 784)

    # --- conv1 + relu + maxpool2x2 (fused), lane-dense (20, N*144) output ---
    xs1 = stn.reshape(N, C, H, W).transpose(1, 0, 2, 3)          # (1, N, 28, 28)
    p1 = _im2col_pool_phases(xs1, 5)                             # (4, 25, N*144)
    y1 = _single_block_call(
        functools.partial(_conv_pool_kernel, n_phase=4),
        jax.ShapeDtypeStruct((20, N * 144), jnp.float32),
        p1,
        params["conv1_w"].reshape(20, 25),
        params["conv1_b"].reshape(20, 1))                        # (20, N*144)

    # --- conv2 + relu + maxpool2x2 (fused), (50, N*16) output ---
    xs2 = y1.reshape(20, N, 12, 12)                              # (c, n, h, w)
    p2 = _im2col_pool_phases(xs2, 5)                             # (4, 500, N*16)
    y2 = _single_block_call(
        functools.partial(_conv_pool_kernel, n_phase=4),
        jax.ShapeDtypeStruct((50, N * 16), jnp.float32),
        p2,
        params["conv2_w"].reshape(50, 500),
        params["conv2_b"].reshape(50, 1))                        # (50, N*16)

    # --- flatten to torch .view(-1, 800) ordering (n, c, h, w) ---
    yf = y2.reshape(50, N, 4, 4).transpose(1, 0, 2, 3).reshape(N, 4 * 4 * 50)

    # --- fc1 + relu + fc2 + log_softmax, fully fused ---
    return _single_block_call(
        _head_kernel, jax.ShapeDtypeStruct((N, 10), jnp.float32),
        yf,
        params["fc1_w"].T.astype(jnp.bfloat16),                  # (800, 500) bf16
        params["fc1_b"].reshape(1, 500),
        params["fc2_w"].T,                                       # (500, 10) f32
        params["fc2_b"].reshape(1, 10))


def init_params(key):
    ks = jax.random.split(key, 9)
    n = lambda k, s, sc: sc * jax.random.normal(k, s, jnp.float32)
    return {
        "apms":    jax.random.uniform(ks[0], (2, 3), jnp.float32),   # torch.rand(2,3)
        "conv1_w": n(ks[1], (20, 1, 5, 5), 0.10),
        "conv1_b": n(ks[2], (20,), 0.10),
        "conv2_w": n(ks[3], (50, 20, 5, 5), 0.05),
        "conv2_b": n(ks[4], (50,), 0.05),
        "fc1_w":   n(ks[5], (500, 800), 0.05),   # PyTorch Linear layout (out, in)
        "fc1_b":   n(ks[6], (500,), 0.05),
        "fc2_w":   n(ks[7], (10, 500), 0.05),
        "fc2_b":   n(ks[8], (10,), 0.05),
    }


if __name__ == "__main__":
    key = jax.random.PRNGKey(0)
    k_x, k_p = jax.random.split(key)
    # fc1 (4*4*50 inputs) forces 28x28 single-channel inputs; batch=2.
    N, C, H, W = 2, 1, 28, 28
    x = jax.random.normal(k_x, (N, C, H, W), jnp.float32)

    params = init_params(k_p)
    out = net_forward(params, x)
    out = jax.block_until_ready(out)

    assert out.shape == (N, 10)
    row_sums = jnp.sum(jnp.exp(out), axis=1)            # log_softmax sanity
    assert bool(jnp.all(jnp.isfinite(out)))
    assert bool(jnp.allclose(row_sums, 1.0, atol=1e-3))
    print("KERNEL_OK")
</pallas_src>

<mosaic_0001>
module attributes {stable_mosaic.version = 11 : i64} {
  func.func @_stn_kernel(%arg0: i32, %arg1: memref<2x784xf32, #tpu.memory_space<vmem>>, %arg2: memref<784x784xbf16, #tpu.memory_space<vmem>>, %arg3: memref<2x784xf32, #tpu.memory_space<vmem>>) attributes {dimension_semantics = [#tpu.dimension_semantics<arbitrary>], iteration_bounds = array<i64: 1>, scalar_prefetch = 0 : i64, scratch_operands = 0 : i64, tpu.core_type = #tpu.core_type<tc>, window_params = [{pipeline_mode = #tpu.pipeline_mode<synchronous>, transform_indices = @transform_0, window_bounds = array<i64: 2, 784>}, {pipeline_mode = #tpu.pipeline_mode<synchronous>, transform_indices = @transform_1, window_bounds = array<i64: 784, 784>}, {pipeline_mode = #tpu.pipeline_mode<synchronous>, transform_indices = @transform_2, window_bounds = array<i64: 2, 784>}]} {
    %c0 = arith.constant 0 : index
    %c0_0 = arith.constant 0 : index
    %0 = vector.load %arg1[%c0, %c0_0] : memref<2x784xf32, #tpu.memory_space<vmem>>, vector<2x784xf32>
    %1 = arith.truncf %0 : vector<2x784xf32> to vector<2x784xbf16>
    %c0_1 = arith.constant 0 : index
    %c0_2 = arith.constant 0 : index
    %2 = vector.load %arg2[%c0_1, %c0_2] : memref<784x784xbf16, #tpu.memory_space<vmem>>, vector<784x784xbf16>
    %cst = arith.constant dense<0.000000e+00> : vector<2x784xf32>
    %3 = tpu.matmul %1, %2, %cst {dimension_numbers = #tpu.dot_dimension_numbers<[1], [0], [0], [1], [0, 0, 1, 1], [], []>} : vector<2x784xbf16>, vector<784x784xbf16>, vector<2x784xf32> -> vector<2x784xf32>
    %c0_3 = arith.constant 0 : index
    %c0_4 = arith.constant 0 : index
    %4 = vector.load %arg3[%c0_3, %c0_4] : memref<2x784xf32, #tpu.memory_space<vmem>>, vector<2x784xf32>
    tpu.vector_store %arg3[%c0_3, %c0_4], %3 {strides = array<i32>} : memref<2x784xf32, #tpu.memory_space<vmem>>, vector<2x784xf32>,
    return
  }
  func.func @transform_0(%arg0: i32) -> (i32, i32) {
    %c0_i32 = arith.constant 0 : i32
    %c0_i32_0 = arith.constant 0 : i32
    %c0_i32_1 = arith.constant 0 : i32
    return %c0_i32, %c0_i32_0 : i32, i32
  }
  func.func @transform_1(%arg0: i32) -> (i32, i32) {
    %c0_i32 = arith.constant 0 : i32
    %c0_i32_0 = arith.constant 0 : i32
    %c0_i32_1 = arith.constant 0 : i32
    return %c0_i32, %c0_i32_0 : i32, i32
  }
  func.func @transform_2(%arg0: i32) -> (i32, i32) {
    %c0_i32 = arith.constant 0 : i32
    %c0_i32_0 = arith.constant 0 : i32
    %c0_i32_1 = arith.constant 0 : i32
    return %c0_i32, %c0_i32_0 : i32, i32
  }
}

module attributes {stable_mosaic.version = 11 : i64} {
  func.func @_conv_pool_kernel(%arg0: i32, %arg1: memref<4x25x288xf32, #tpu.memory_space<vmem>>, %arg2: memref<20x25xf32, #tpu.memory_space<vmem>>, %arg3: memref<20x1xf32, #tpu.memory_space<vmem>>, %arg4: memref<20x288xf32, #tpu.memory_space<vmem>>) attributes {dimension_semantics = [#tpu.dimension_semantics<arbitrary>], iteration_bounds = array<i64: 1>, scalar_prefetch = 0 : i64, scratch_operands = 0 : i64, tpu.core_type = #tpu.core_type<tc>, window_params = [{pipeline_mode = #tpu.pipeline_mode<synchronous>, transform_indices = @transform_0, window_bounds = array<i64: 4, 25, 288>}, {pipeline_mode = #tpu.pipeline_mode<synchronous>, transform_indices = @transform_1, window_bounds = array<i64: 20, 25>}, {pipeline_mode = #tpu.pipeline_mode<synchronous>, transform_indices = @transform_2, window_bounds = array<i64: 20, 1>}, {pipeline_mode = #tpu.pipeline_mode<synchronous>, transform_indices = @transform_3, window_bounds = array<i64: 20, 288>}]} {
    %c0 = arith.constant 0 : index
    %c0_0 = arith.constant 0 : index
    %0 = vector.load %arg2[%c0, %c0_0] : memref<20x25xf32, #tpu.memory_space<vmem>>, vector<20x25xf32>
    %c0_1 = arith.constant 0 : index
    %c0_2 = arith.constant 0 : index
    %c0_3 = arith.constant 0 : index
    %1 = vector.load %arg1[%c0_1, %c0_2, %c0_3] : memref<4x25x288xf32, #tpu.memory_space<vmem>>, vector<1x25x288xf32>
    %2 = vector.shape_cast %1 : vector<1x25x288xf32> to vector<25x288xf32>
    %cst = arith.constant dense<0.000000e+00> : vector<20x288xf32>
    %3 = tpu.matmul %0, %2, %cst {dimension_numbers = #tpu.dot_dimension_numbers<[1], [0], [0], [1], [0, 0, 1, 1], [], []>} : vector<20x25xf32>, vector<25x288xf32>, vector<20x288xf32> -> vector<20x288xf32>
    %c1 = arith.constant 1 : index
    %c0_4 = arith.constant 0 : index
    %c0_5 = arith.constant 0 : index
    %4 = vector.load %arg1[%c1, %c0_4, %c0_5] : memref<4x25x288xf32, #tpu.memory_space<vmem>>, vector<1x25x288xf32>
    %5 = vector.shape_cast %4 : vector<1x25x288xf32> to vector<25x288xf32>
    %cst_6 = arith.constant dense<0.000000e+00> : vector<20x288xf32>
    %6 = tpu.matmul %0, %5, %cst_6 {dimension_numbers = #tpu.dot_dimension_numbers<[1], [0], [0], [1], [0, 0, 1, 1], [], []>} : vector<20x25xf32>, vector<25x288xf32>, vector<20x288xf32> -> vector<20x288xf32>
    %7 = arith.maximumf %3, %6 : vector<20x288xf32>
    %c2 = arith.constant 2 : index
    %c0_7 = arith.constant 0 : index
    %c0_8 = arith.constant 0 : index
    %8 = vector.load %arg1[%c2, %c0_7, %c0_8] : memref<4x25x288xf32, #tpu.memory_space<vmem>>, vector<1x25x288xf32>
    %9 = vector.shape_cast %8 : vector<1x25x288xf32> to vector<25x288xf32>
    %cst_9 = arith.constant dense<0.000000e+00> : vector<20x288xf32>
    %10 = tpu.matmul %0, %9, %cst_9 {dimension_numbers = #tpu.dot_dimension_numbers<[1], [0], [0], [1], [0, 0, 1, 1], [], []>} : vector<20x25xf32>, vector<25x288xf32>, vector<20x288xf32> -> vector<20x288xf32>
    %11 = arith.maximumf %7, %10 : vector<20x288xf32>
    %c3 = arith.constant 3 : index
    %c0_10 = arith.constant 0 : index
    %c0_11 = arith.constant 0 : index
    %12 = vector.load %arg1[%c3, %c0_10, %c0_11] : memref<4x25x288xf32, #tpu.memory_space<vmem>>, vector<1x25x288xf32>
    %13 = vector.shape_cast %12 : vector<1x25x288xf32> to vector<25x288xf32>
    %cst_12 = arith.constant dense<0.000000e+00> : vector<20x288xf32>
    %14 = tpu.matmul %0, %13, %cst_12 {dimension_numbers = #tpu.dot_dimension_numbers<[1], [0], [0], [1], [0, 0, 1, 1], [], []>} : vector<20x25xf32>, vector<25x288xf32>, vector<20x288xf32> -> vector<20x288xf32>
    %15 = arith.maximumf %11, %14 : vector<20x288xf32>
    %c0_13 = arith.constant 0 : index
    %c0_14 = arith.constant 0 : index
    %16 = vector.load %arg3[%c0_13, %c0_14] : memref<20x1xf32, #tpu.memory_space<vmem>>, vector<20x1xf32>
    %17 = vector.broadcast %16 : vector<20x1xf32> to vector<20x288xf32>
    %18 = arith.addf %15, %17 : vector<20x288xf32>
    %cst_15 = arith.constant 0.000000e+00 : f32
    %19 = vector.broadcast %cst_15 : f32 to vector<20x288xf32>
    %20 = arith.maximumf %18, %19 : vector<20x288xf32>
    %c0_16 = arith.constant 0 : index
    %c0_17 = arith.constant 0 : index
    %21 = vector.load %arg4[%c0_16, %c0_17] : memref<20x288xf32, #tpu.memory_space<vmem>>, vector<20x288xf32>
    tpu.vector_store %arg4[%c0_16, %c0_17], %20 {strides = array<i32>} : memref<20x288xf32, #tpu.memory_space<vmem>>, vector<20x288xf32>,
    return
  }
  func.func @transform_0(%arg0: i32) -> (i32, i32, i32) {
    %c0_i32 = arith.constant 0 : i32
    %c0_i32_0 = arith.constant 0 : i32
    %c0_i32_1 = arith.constant 0 : i32
    %c0_i32_2 = arith.constant 0 : i32
    return %c0_i32, %c0_i32_0, %c0_i32_1 : i32, i32, i32
  }
  func.func @transform_1(%arg0: i32) -> (i32, i32) {
    %c0_i32 = arith.constant 0 : i32
    %c0_i32_0 = arith.constant 0 : i32
    %c0_i32_1 = arith.constant 0 : i32
    return %c0_i32, %c0_i32_0 : i32, i32
  }
  func.func @transform_2(%arg0: i32) -> (i32, i32) {
    %c0_i32 = arith.constant 0 : i32
    %c0_i32_0 = arith.constant 0 : i32
    %c0_i32_1 = arith.constant 0 : i32
    return %c0_i32, %c0_i32_0 : i32, i32
  }
  func.func @transform_3(%arg0: i32) -> (i32, i32) {
    %c0_i32 = arith.constant 0 : i32
    %c0_i32_0 = arith.constant 0 : i32
    %c0_i32_1 = arith.constant 0 : i32
    return %c0_i32, %c0_i32_0 : i32, i32
  }
}

module attributes {stable_mosaic.version = 11 : i64} {
  func.func @_conv_pool_kernel(%arg0: i32, %arg1: memref<4x500x32xf32, #tpu.memory_space<vmem>>, %arg2: memref<50x500xf32, #tpu.memory_space<vmem>>, %arg3: memref<50x1xf32, #tpu.memory_space<vmem>>, %arg4: memref<50x32xf32, #tpu.memory_space<vmem>>) attributes {dimension_semantics = [#tpu.dimension_semantics<arbitrary>], iteration_bounds = array<i64: 1>, scalar_prefetch = 0 : i64, scratch_operands = 0 : i64, tpu.core_type = #tpu.core_type<tc>, window_params = [{pipeline_mode = #tpu.pipeline_mode<synchronous>, transform_indices = @transform_0, window_bounds = array<i64: 4, 500, 32>}, {pipeline_mode = #tpu.pipeline_mode<synchronous>, transform_indices = @transform_1, window_bounds = array<i64: 50, 500>}, {pipeline_mode = #tpu.pipeline_mode<synchronous>, transform_indices = @transform_2, window_bounds = array<i64: 50, 1>}, {pipeline_mode = #tpu.pipeline_mode<synchronous>, transform_indices = @transform_3, window_bounds = array<i64: 50, 32>}]} {
    %c0 = arith.constant 0 : index
    %c0_0 = arith.constant 0 : index
    %0 = vector.load %arg2[%c0, %c0_0] : memref<50x500xf32, #tpu.memory_space<vmem>>, vector<50x500xf32>
    %c0_1 = arith.constant 0 : index
    %c0_2 = arith.constant 0 : index
    %c0_3 = arith.constant 0 : index
    %1 = vector.load %arg1[%c0_1, %c0_2, %c0_3] : memref<4x500x32xf32, #tpu.memory_space<vmem>>, vector<1x500x32xf32>
    %2 = vector.shape_cast %1 : vector<1x500x32xf32> to vector<500x32xf32>
    %cst = arith.constant dense<0.000000e+00> : vector<50x32xf32>
    %3 = tpu.matmul %0, %2, %cst {dimension_numbers = #tpu.dot_dimension_numbers<[1], [0], [0], [1], [0, 0, 1, 1], [], []>} : vector<50x500xf32>, vector<500x32xf32>, vector<50x32xf32> -> vector<50x32xf32>
    %c1 = arith.constant 1 : index
    %c0_4 = arith.constant 0 : index
    %c0_5 = arith.constant 0 : index
    %4 = vector.load %arg1[%c1, %c0_4, %c0_5] : memref<4x500x32xf32, #tpu.memory_space<vmem>>, vector<1x500x32xf32>
    %5 = vector.shape_cast %4 : vector<1x500x32xf32> to vector<500x32xf32>
    %cst_6 = arith.constant dense<0.000000e+00> : vector<50x32xf32>
    %6 = tpu.matmul %0, %5, %cst_6 {dimension_numbers = #tpu.dot_dimension_numbers<[1], [0], [0], [1], [0, 0, 1, 1], [], []>} : vector<50x500xf32>, vector<500x32xf32>, vector<50x32xf32> -> vector<50x32xf32>
    %7 = arith.maximumf %3, %6 : vector<50x32xf32>
    %c2 = arith.constant 2 : index
    %c0_7 = arith.constant 0 : index
    %c0_8 = arith.constant 0 : index
    %8 = vector.load %arg1[%c2, %c0_7, %c0_8] : memref<4x500x32xf32, #tpu.memory_space<vmem>>, vector<1x500x32xf32>
    %9 = vector.shape_cast %8 : vector<1x500x32xf32> to vector<500x32xf32>
    %cst_9 = arith.constant dense<0.000000e+00> : vector<50x32xf32>
    %10 = tpu.matmul %0, %9, %cst_9 {dimension_numbers = #tpu.dot_dimension_numbers<[1], [0], [0], [1], [0, 0, 1, 1], [], []>} : vector<50x500xf32>, vector<500x32xf32>, vector<50x32xf32> -> vector<50x32xf32>
    %11 = arith.maximumf %7, %10 : vector<50x32xf32>
    %c3 = arith.constant 3 : index
    %c0_10 = arith.constant 0 : index
    %c0_11 = arith.constant 0 : index
    %12 = vector.load %arg1[%c3, %c0_10, %c0_11] : memref<4x500x32xf32, #tpu.memory_space<vmem>>, vector<1x500x32xf32>
    %13 = vector.shape_cast %12 : vector<1x500x32xf32> to vector<500x32xf32>
    %cst_12 = arith.constant dense<0.000000e+00> : vector<50x32xf32>
    %14 = tpu.matmul %0, %13, %cst_12 {dimension_numbers = #tpu.dot_dimension_numbers<[1], [0], [0], [1], [0, 0, 1, 1], [], []>} : vector<50x500xf32>, vector<500x32xf32>, vector<50x32xf32> -> vector<50x32xf32>
    %15 = arith.maximumf %11, %14 : vector<50x32xf32>
    %c0_13 = arith.constant 0 : index
    %c0_14 = arith.constant 0 : index
    %16 = vector.load %arg3[%c0_13, %c0_14] : memref<50x1xf32, #tpu.memory_space<vmem>>, vector<50x1xf32>
    %17 = vector.broadcast %16 : vector<50x1xf32> to vector<50x32xf32>
    %18 = arith.addf %15, %17 : vector<50x32xf32>
    %cst_15 = arith.constant 0.000000e+00 : f32
    %19 = vector.broadcast %cst_15 : f32 to vector<50x32xf32>
    %20 = arith.maximumf %18, %19 : vector<50x32xf32>
    %c0_16 = arith.constant 0 : index
    %c0_17 = arith.constant 0 : index
    %21 = vector.load %arg4[%c0_16, %c0_17] : memref<50x32xf32, #tpu.memory_space<vmem>>, vector<50x32xf32>
    tpu.vector_store %arg4[%c0_16, %c0_17], %20 {strides = array<i32>} : memref<50x32xf32, #tpu.memory_space<vmem>>, vector<50x32xf32>,
    return
  }
  func.func @transform_0(%arg0: i32) -> (i32, i32, i32) {
    %c0_i32 = arith.constant 0 : i32
    %c0_i32_0 = arith.constant 0 : i32
    %c0_i32_1 = arith.constant 0 : i32
    %c0_i32_2 = arith.constant 0 : i32
    return %c0_i32, %c0_i32_0, %c0_i32_1 : i32, i32, i32
  }
  func.func @transform_1(%arg0: i32) -> (i32, i32) {
    %c0_i32 = arith.constant 0 : i32
    %c0_i32_0 = arith.constant 0 : i32
    %c0_i32_1 = arith.constant 0 : i32
    return %c0_i32, %c0_i32_0 : i32, i32
  }
  func.func @transform_2(%arg0: i32) -> (i32, i32) {
    %c0_i32 = arith.constant 0 : i32
    %c0_i32_0 = arith.constant 0 : i32
    %c0_i32_1 = arith.constant 0 : i32
    return %c0_i32, %c0_i32_0 : i32, i32
  }
  func.func @transform_3(%arg0: i32) -> (i32, i32) {
    %c0_i32 = arith.constant 0 : i32
    %c0_i32_0 = arith.constant 0 : i32
    %c0_i32_1 = arith.constant 0 : i32
    return %c0_i32, %c0_i32_0 : i32, i32
  }
}

module attributes {stable_mosaic.version = 11 : i64} {
  func.func @_head_kernel(%arg0: i32, %arg1: memref<2x800xf32, #tpu.memory_space<vmem>>, %arg2: memref<800x500xbf16, #tpu.memory_space<vmem>>, %arg3: memref<1x500xf32, #tpu.memory_space<vmem>>, %arg4: memref<500x10xf32, #tpu.memory_space<vmem>>, %arg5: memref<1x10xf32, #tpu.memory_space<vmem>>, %arg6: memref<2x10xf32, #tpu.memory_space<vmem>>) attributes {dimension_semantics = [#tpu.dimension_semantics<arbitrary>], iteration_bounds = array<i64: 1>, scalar_prefetch = 0 : i64, scratch_operands = 0 : i64, tpu.core_type = #tpu.core_type<tc>, window_params = [{pipeline_mode = #tpu.pipeline_mode<synchronous>, transform_indices = @transform_0, window_bounds = array<i64: 2, 800>}, {pipeline_mode = #tpu.pipeline_mode<synchronous>, transform_indices = @transform_1, window_bounds = array<i64: 800, 500>}, {pipeline_mode = #tpu.pipeline_mode<synchronous>, transform_indices = @transform_2, window_bounds = array<i64: 1, 500>}, {pipeline_mode = #tpu.pipeline_mode<synchronous>, transform_indices = @transform_3, window_bounds = array<i64: 500, 10>}, {pipeline_mode = #tpu.pipeline_mode<synchronous>, transform_indices = @transform_4, window_bounds = array<i64: 1, 10>}, {pipeline_mode = #tpu.pipeline_mode<synchronous>, transform_indices = @transform_5, window_bounds = array<i64: 2, 10>}]} {
    %c0 = arith.constant 0 : index
    %c0_0 = arith.constant 0 : index
    %0 = vector.load %arg1[%c0, %c0_0] : memref<2x800xf32, #tpu.memory_space<vmem>>, vector<2x800xf32>
    %1 = arith.truncf %0 : vector<2x800xf32> to vector<2x800xbf16>
    %c0_1 = arith.constant 0 : index
    %c0_2 = arith.constant 0 : index
    %2 = vector.load %arg2[%c0_1, %c0_2] : memref<800x500xbf16, #tpu.memory_space<vmem>>, vector<800x500xbf16>
    %cst = arith.constant dense<0.000000e+00> : vector<2x500xf32>
    %3 = tpu.matmul %1, %2, %cst {dimension_numbers = #tpu.dot_dimension_numbers<[1], [0], [0], [1], [0, 0, 1, 1], [], []>} : vector<2x800xbf16>, vector<800x500xbf16>, vector<2x500xf32> -> vector<2x500xf32>
    %c0_3 = arith.constant 0 : index
    %c0_4 = arith.constant 0 : index
    %4 = vector.load %arg3[%c0_3, %c0_4] : memref<1x500xf32, #tpu.memory_space<vmem>>, vector<1x500xf32>
    %5 = vector.broadcast %4 : vector<1x500xf32> to vector<2x500xf32>
    %6 = arith.addf %3, %5 : vector<2x500xf32>
    %cst_5 = arith.constant 0.000000e+00 : f32
    %7 = vector.broadcast %cst_5 : f32 to vector<2x500xf32>
    %8 = arith.maximumf %6, %7 : vector<2x500xf32>
    %c0_6 = arith.constant 0 : index
    %c0_7 = arith.constant 0 : index
    %9 = vector.load %arg4[%c0_6, %c0_7] : memref<500x10xf32, #tpu.memory_space<vmem>>, vector<500x10xf32>
    %cst_8 = arith.constant dense<0.000000e+00> : vector<2x10xf32>
    %10 = tpu.matmul %8, %9, %cst_8 {dimension_numbers = #tpu.dot_dimension_numbers<[1], [0], [0], [1], [0, 0, 1, 1], [], []>} : vector<2x500xf32>, vector<500x10xf32>, vector<2x10xf32> -> vector<2x10xf32>
    %c0_9 = arith.constant 0 : index
    %c0_10 = arith.constant 0 : index
    %11 = vector.load %arg5[%c0_9, %c0_10] : memref<1x10xf32, #tpu.memory_space<vmem>>, vector<1x10xf32>
    %12 = vector.broadcast %11 : vector<1x10xf32> to vector<2x10xf32>
    %13 = arith.addf %10, %12 : vector<2x10xf32>
    %cst_11 = arith.constant dense<0xFF800000> : vector<2xf32>
    %14 = vector.multi_reduction <maximumf>, %13, %cst_11 [1] : vector<2x10xf32> to vector<2xf32>
    %15 = vector.shape_cast %14 : vector<2xf32> to vector<2x1xf32>
    %16 = vector.broadcast %15 : vector<2x1xf32> to vector<2x10xf32>
    %17 = arith.subf %13, %16 : vector<2x10xf32>
    %18 = math.exp %17 : vector<2x10xf32>
    %cst_12 = arith.constant dense<0.000000e+00> : vector<2xf32>
    %19 = vector.multi_reduction <add>, %18, %cst_12 [1] : vector<2x10xf32> to vector<2xf32>
    %20 = vector.shape_cast %19 : vector<2xf32> to vector<2x1xf32>
    %21 = math.log %20 : vector<2x1xf32>
    %22 = vector.broadcast %21 : vector<2x1xf32> to vector<2x10xf32>
    %23 = arith.subf %17, %22 : vector<2x10xf32>
    %c0_13 = arith.constant 0 : index
    %c0_14 = arith.constant 0 : index
    %24 = vector.load %arg6[%c0_13, %c0_14] : memref<2x10xf32, #tpu.memory_space<vmem>>, vector<2x10xf32>
    tpu.vector_store %arg6[%c0_13, %c0_14], %23 {strides = array<i32>} : memref<2x10xf32, #tpu.memory_space<vmem>>, vector<2x10xf32>,
    return
  }
  func.func @transform_0(%arg0: i32) -> (i32, i32) {
    %c0_i32 = arith.constant 0 : i32
    %c0_i32_0 = arith.constant 0 : i32
    %c0_i32_1 = arith.constant 0 : i32
    return %c0_i32, %c0_i32_0 : i32, i32
  }
  func.func @transform_1(%arg0: i32) -> (i32, i32) {
    %c0_i32 = arith.constant 0 : i32
    %c0_i32_0 = arith.constant 0 : i32
    %c0_i32_1 = arith.constant 0 : i32
    return %c0_i32, %c0_i32_0 : i32, i32
  }
  func.func @transform_2(%arg0: i32) -> (i32, i32) {
    %c0_i32 = arith.constant 0 : i32
    %c0_i32_0 = arith.constant 0 : i32
    %c0_i32_1 = arith.constant 0 : i32
    return %c0_i32, %c0_i32_0 : i32, i32
  }
  func.func @transform_3(%arg0: i32) -> (i32, i32) {
    %c0_i32 = arith.constant 0 : i32
    %c0_i32_0 = arith.constant 0 : i32
    %c0_i32_1 = arith.constant 0 : i32
    return %c0_i32, %c0_i32_0 : i32, i32
  }
  func.func @transform_4(%arg0: i32) -> (i32, i32) {
    %c0_i32 = arith.constant 0 : i32
    %c0_i32_0 = arith.constant 0 : i32
    %c0_i32_1 = arith.constant 0 : i32
    return %c0_i32, %c0_i32_0 : i32, i32
  }
  func.func @transform_5(%arg0: i32) -> (i32, i32) {
    %c0_i32 = arith.constant 0 : i32
    %c0_i32_0 = arith.constant 0 : i32
    %c0_i32_1 = arith.constant 0 : i32
    return %c0_i32, %c0_i32_0 : i32, i32
  }
}

</mosaic_0001>

<bundles_post_ra>
// kernel: net_forward.4
= control target key start
LH: loop header
LB: loop body
LE: loop exit
PB: predicated region body
PF: predicated region fallthrough
CT: control target
= control target key end

     0   :  { %vm2196_vm0 = vcmask 130048   ;;  %vm2849_vm1 = vcmask 1041408   ;;  %vm2851_vm2 = vcmask 1045508   ;;  %vm2853_vm3 = vcmask 1043456   ;;  %s6787_s1 = inlined_call_operand.vmem [shape: bf16[784,784], index: 1, kind: input, shape index: {}]   ;;  %s6788_s0 = inlined_call_operand.vmem [shape: f32[2,784], index: 0, kind: input, shape index: {}]   ;;  %s6789_s2 = inlined_call_operand.vmem [shape: f32[2,784], index: 2, kind: output, shape index: {}]  }
   0x1   :  { %v3067_v0 = vld [vmem:[%s6787_s1 + $0x188] sm:$0xf]  ;;  %v4300_v1 = vld [vmem:[%s6787_s1 + $0x1a0] sm:$0xf0]  ;;  %v3039_v11 = vld [vmem:[%s6787_s1 + $0x150] sm:$0xf] }
   0x2   :  { %v3291_v2 = vld [vmem:[%s6787_s1 + $0x348] sm:$0xf]  ;;  %v3068_v3 = vor.u32 %v4300_v1, %v3067_v0  ;;  %v4356_v4 = vld [vmem:[%s6787_s1 + $0x360] sm:$0xf0]  ;;  %v4293_v13 = vld [vmem:[%s6787_s1 + $0x168] sm:$0xf0] }
   0x3   :  { %v3515_v5 = vld [vmem:[%s6787_s1 + $0x508] sm:$0xf]  ;;  %v4412_v6 = vld [vmem:[%s6787_s1 + $0x520] sm:$0xf0]  ;;  %v3292_v7 = vor.u32 %v4356_v4, %v3291_v2  ;;  %v3263_v14 = vld [vmem:[%s6787_s1 + $0x310] sm:$0xf]  ;;  %v3040_v16 = vor.u32 %v4293_v13, %v3039_v11 }
   0x4   :  { %v3516_v8 = vor.u32 %v4412_v6, %v3515_v5  ;;  %v3739_v9 = vld [vmem:[%s6787_s1 + $0x6c8] sm:$0xf]  ;;  %v4468_v10 = vld [vmem:[%s6787_s1 + $0x6e0] sm:$0xf0]  ;;  %2200 = vmatpush.bf16.msra.mxu0 %v3068_v3  ;;  %v4349_v15 = vld [vmem:[%s6787_s1 + $0x328] sm:$0xf0] }
   0x5   :  { %v3740_v12 = vor.u32 %v4468_v10, %v3739_v9  ;;  %2213 = vmatpush.bf16.msra.mxu1 %v3292_v7  ;;  %v3264_v17 = vor.u32 %v4349_v15, %v3263_v14  ;;  %v3487_v18 = vld [vmem:[%s6787_s1 + $0x4d0] sm:$0xf]  ;;  %v4405_v19 = vld [vmem:[%s6787_s1 + $0x4e8] sm:$0xf0]  ;;  %v3011_v23 = vld [vmem:[%s6787_s1 + $0x118] sm:$0xf] }
   0x6   :  { %2226 = vmatpush.bf16.msra.mxu2 %v3516_v8  ;;  %v3711_v20 = vld [vmem:[%s6787_s1 + $0x690] sm:$0xf]  ;;  %v3488_v21 = vor.u32 %v4405_v19, %v3487_v18  ;;  %v4461_v22 = vld [vmem:[%s6787_s1 + $0x6a8] sm:$0xf0]  ;;  %v4286_v24 = vld [vmem:[%s6787_s1 + $0x130] sm:$0xf0] }
   0x7   :  { %2239 = vmatpush.bf16.msra.mxu3 %v3740_v12  ;;  %v3712_v25 = vor.u32 %v4461_v22, %v3711_v20  ;;  %v3235_v26 = vld [vmem:[%s6787_s1 + $0x2d8] sm:$0xf]  ;;  %v4342_v27 = vld [vmem:[%s6787_s1 + $0x2f0] sm:$0xf0]  ;;  %v3012_v29 = vor.u32 %v4286_v24, %v3011_v23  ;;  %v2983_v35 = vld [vmem:[%s6787_s1 + $0xe0] sm:$0xf] }
   0x8   :  { %v3459_v28 = vld [vmem:[%s6787_s1 + $0x498] sm:$0xf]  ;;  %2201 = vmatpush.bf16.msra.mxu0 %v3040_v16  ;;  %v4398_v30 = vld [vmem:[%s6787_s1 + $0x4b0] sm:$0xf0]  ;;  %v3236_v33 = vor.u32 %v4342_v27, %v3235_v26  ;;  %v4279_v36 = vld [vmem:[%s6787_s1 + $0xf8] sm:$0xf0] }
   0x9   :  { %v3683_v31 = vld [vmem:[%s6787_s1 + $0x658] sm:$0xf]  ;;  %v4454_v32 = vld [vmem:[%s6787_s1 + $0x670] sm:$0xf0]  ;;  %2214 = vmatpush.bf16.msra.mxu1 %v3264_v17  ;;  %v3460_v34 = vor.u32 %v4398_v30, %v3459_v28  ;;  %v3207_v37 = vld [vmem:[%s6787_s1 + $0x2a0] sm:$0xf]  ;;  %v2984_v44 = vor.u32 %v4279_v36, %v2983_v35 }
   0xa   :  { %2227 = vmatpush.bf16.msra.mxu2 %v3488_v21  ;;  %v3684_v38 = vor.u32 %v4454_v32, %v3683_v31  ;;  %v4335_v39 = vld [vmem:[%s6787_s1 + $0x2b8] sm:$0xf0]  ;;  %v3431_v40 = vld [vmem:[%s6787_s1 + $0x460] sm:$0xf]  ;;  %v2955_v47 = vld [vmem:[%s6787_s1 + $0xa8] sm:$0xf] }
   0xb   :  { %2240 = vmatpush.bf16.msra.mxu3 %v3712_v25  ;;  %v4391_v41 = vld [vmem:[%s6787_s1 + $0x478] sm:$0xf0]  ;;  %v3655_v42 = vld [vmem:[%s6787_s1 + $0x620] sm:$0xf]  ;;  %v3208_v45 = vor.u32 %v4335_v39, %v3207_v37  ;;  %v4272_v48 = vld [vmem:[%s6787_s1 + $0xc0] sm:$0xf0] }
   0xc   :  { %v4447_v43 = vld [vmem:[%s6787_s1 + $0x638] sm:$0xf0]  ;;  %2202 = vmatpush.bf16.msra.mxu0 %v3012_v29  ;;  %v3432_v46 = vor.u32 %v4391_v41, %v3431_v40  ;;  %v3179_v49 = vld [vmem:[%s6787_s1 + $0x268] sm:$0xf]  ;;  %v4328_v51 = vld [vmem:[%s6787_s1 + $0x280] sm:$0xf0]  ;;  %v2956_v56 = vor.u32 %v4272_v48, %v2955_v47 }
   0xd   :  { %2215 = vmatpush.bf16.msra.mxu1 %v3236_v33  ;;  %v3656_v50 = vor.u32 %v4447_v43, %v3655_v42  ;;  %v3403_v52 = vld [vmem:[%s6787_s1 + $0x428] sm:$0xf]  ;;  %v4384_v53 = vld [vmem:[%s6787_s1 + $0x440] sm:$0xf0]  ;;  %v3180_v57 = vor.u32 %v4328_v51, %v3179_v49  ;;  %v2927_v59 = vld [vmem:[%s6787_s1 + $0x70] sm:$0xf] }
   0xe   :  { %2228 = vmatpush.bf16.msra.mxu2 %v3460_v34  ;;  %v3627_v54 = vld [vmem:[%s6787_s1 + $0x5e8] sm:$0xf]  ;;  %v4440_v55 = vld [vmem:[%s6787_s1 + $0x600] sm:$0xf0]  ;;  %v3404_v58 = vor.u32 %v4384_v53, %v3403_v52  ;;  %v4265_v60 = vld [vmem:[%s6787_s1 + $0x88] sm:$0xf0] }
   0xf   :  { %2241 = vmatpush.bf16.msra.mxu3 %v3684_v38  ;;  %v3151_v61 = vld [vmem:[%s6787_s1 + $0x230] sm:$0xf]  ;;  %v3628_v62 = vor.u32 %v4440_v55, %v3627_v54  ;;  %v4321_v63 = vld [vmem:[%s6787_s1 + $0x248] sm:$0xf0]  ;;  %v2928_v4 = vor.u32 %v4265_v60, %v2927_v59  ;;  %v2899_v7 = vld [vmem:[%s6787_s1 + $0x38] sm:$0xf] }
  0x10   :  { %2203 = vmatpush.bf16.msra.mxu0 %v2984_v44  ;;  %v3375_v0 = vld [vmem:[%s6787_s1 + $0x3f0] sm:$0xf]  ;;  %v4377_v1 = vld [vmem:[%s6787_s1 + $0x408] sm:$0xf0]  ;;  %v3152_v5 = vor.u32 %v4321_v63, %v3151_v61  ;;  %v4258_v8 = vld [vmem:[%s6787_s1 + $0x50] sm:$0xf0] }
  0x11   :  { %2216 = vmatpush.bf16.msra.mxu1 %v3208_v45  ;;  %v3599_v2 = vld [vmem:[%s6787_s1 + $0x5b0] sm:$0xf]  ;;  %v4433_v3 = vld [vmem:[%s6787_s1 + $0x5c8] sm:$0xf0]  ;;  %v3376_v6 = vor.u32 %v4377_v1, %v3375_v0  ;;  %v3123_v9 = vld [vmem:[%s6787_s1 + $0x1f8] sm:$0xf]  ;;  %v2900_v17 = vor.u32 %v4258_v8, %v2899_v7 }
  0x12   :  { %2229 = vmatpush.bf16.msra.mxu2 %v3432_v46  ;;  %v3600_v10 = vor.u32 %v4433_v3, %v3599_v2  ;;  %v4314_v11 = vld [vmem:[%s6787_s1 + $0x210] sm:$0xf0]  ;;  %v3347_v12 = vld [vmem:[%s6787_s1 + $0x3b8] sm:$0xf]  ;;  %v2871_v16 = vld [vmem:[%s6787_s1] sm:$0xf] }
  0x13   :  { %2242 = vmatpush.bf16.msra.mxu3 %v3656_v50  ;;  %v4370_v13 = vld [vmem:[%s6787_s1 + $0x3d0] sm:$0xf0]  ;;  %v3571_v14 = vld [vmem:[%s6787_s1 + $0x578] sm:$0xf]  ;;  %v4251_v18 = vld [vmem:[%s6787_s1 + $0x18] sm:$0xf0]  ;;  %v3124_v21 = vor.u32 %v4314_v11, %v3123_v9 }
  0x14   :  { %2204 = vmatpush.bf16.msra.mxu0 %v2956_v56  ;;  %v4426_v15 = vld [vmem:[%s6787_s1 + $0x590] sm:$0xf0]  ;;  %v3095_v19 = vld [vmem:[%s6787_s1 + $0x1c0] sm:$0xf]  ;;  %v4307_v20 = vld [vmem:[%s6787_s1 + $0x1d8] sm:$0xf0]  ;;  %v3348_v22 = vor.u32 %v4370_v13, %v3347_v12  ;;  %v2872_v32 = vor.u32 %v4251_v18, %v2871_v16 }
  0x15   :  { %2217 = vmatpush.bf16.msra.mxu1 %v3180_v57  ;;  %v3319_v23 = vld [vmem:[%s6787_s1 + $0x380] sm:$0xf]  ;;  %v4363_v24 = vld [vmem:[%s6787_s1 + $0x398] sm:$0xf0]  ;;  %v3572_v26 = vor.u32 %v4426_v15, %v3571_v14  ;;  %v3963_v29 = vld [vmem:[%s6787_s1 + $0x888] sm:$0xf]  ;;  %v3096_v36 = vor.u32 %v4307_v20, %v3095_v19 }
  0x16   :  { %2230 = vmatpush.bf16.msra.mxu2 %v3404_v58  ;;  %v12_v25 = vld [vmem:[%s6788_s0] sm:$0xff]  ;;  %v4419_v28 = vld [vmem:[%s6787_s1 + $0x558] sm:$0xf0]  ;;  %v4187_v31 = vld [vmem:[%s6787_s1 + $0xa48] sm:$0xf]  ;;  %v3320_v37 = vor.u32 %v4363_v24, %v3319_v23  ;;  %vm2860_vm4 = vcmask 1043458  }
  0x17   :  { %2243 = vmatpush.bf16.msra.mxu3 %v3628_v62  ;;  %v3543_v27 = vld [vmem:[%s6787_s1 + $0x540] sm:$0xf]  ;;  %16 = vst [vmem:[#allocation1] ss:$4 sm:$0xff] %v12_v25  ;;  %v4524_v30 = vld [vmem:[%s6787_s1 + $0x8a0] sm:$0xf0]  ;;  %vm2861_vm5 = vmor %vm2860_vm4, %vm2849_vm1 }
  0x18   :  { %2205 = vmatpush.bf16.msra.mxu0 %v2928_v4  ;;  %v4580_v33 = vld [vmem:[%s6787_s1 + $0xa60] sm:$0xf0]  ;;  %v4297_v34 = vld [vmem:[%s6787_s1 + $0x18c] sm:$0xf]  ;;  %v3069_v35 = vld [vmem:[%s6787_s1 + $0x1a4] sm:$0xf0]  ;;  %v3544_v40 = vor.u32 %v4419_v28, %v3543_v27  ;;  %v3964_v41 = vor.u32 %v4524_v30, %v3963_v29 }
  0x19   :  { %2218 = vmatpush.bf16.msra.mxu1 %v3152_v5  ;;  %v4215_v38 = vld [vmem:[%s6787_s1 + $0xa80] sm:$0xf]  ;;  %v4587_v39 = vld [vmem:[%s6787_s1 + $0xa98] sm:$0xf0]  ;;  %v4353_v42 = vld [vmem:[%s6787_s1 + $0x34c] sm:$0xf]  ;;  %v4188_v44 = vor.u32 %v4580_v33, %v4187_v31  ;;  %v3072_v45 = vor.u32 %v4297_v34, %v3069_v35 }
  0x1a   :  { %2231 = vmatpush.bf16.msra.mxu2 %v3376_v6  ;;  %v3293_v43 = vld [vmem:[%s6787_s1 + $0x364] sm:$0xf0]  ;;  %v3935_v46 = vld [vmem:[%s6787_s1 + $0x850] sm:$0xf]  ;;  %v4517_v47 = vld [vmem:[%s6787_s1 + $0x868] sm:$0xf0]  ;;  %v4216_v49 = vor.u32 %v4587_v39, %v4215_v38 }
  0x1b   :  { %2244 = vmatpush.bf16.msra.mxu3 %v3600_v10  ;;  %v4159_v48 = vld [vmem:[%s6787_s1 + $0xa10] sm:$0xf]  ;;  %v4573_v50 = vld [vmem:[%s6787_s1 + $0xa28] sm:$0xf0]  ;;  %v4290_v51 = vld [vmem:[%s6787_s1 + $0x154] sm:$0xf]  ;;  %v3296_v55 = vor.u32 %v4353_v42, %v3293_v43  ;;  %v3936_v56 = vor.u32 %v4517_v47, %v3935_v46 }
  0x1c   :  { %2206 = vmatpush.bf16.msra.mxu0 %v2900_v17  ;;  %v3041_v52 = vld [vmem:[%s6787_s1 + $0x16c] sm:$0xf0]  ;;  %v4346_v57 = vld [vmem:[%s6787_s1 + $0x314] sm:$0xf]  ;;  %v4160_v59 = vor.u32 %v4573_v50, %v4159_v48  ;;  %v3907_v61 = vld [vmem:[%s6787_s1 + $0x818] sm:$0xf] }
  0x1d   :  { %2219 = vmatpush.bf16.msra.mxu1 %v3124_v21  ;;  %v3265_v58 = vld [vmem:[%s6787_s1 + $0x32c] sm:$0xf0]  ;;  %v3044_v60 = vor.u32 %v4290_v51, %v3041_v52  ;;  %v4510_v62 = vld [vmem:[%s6787_s1 + $0x830] sm:$0xf0]  ;;  %v4131_v63 = vld [vmem:[%s6787_s1 + $0x9d8] sm:$0xf] }
  0x1e   :  { %2232 = vmatpush.bf16.msra.mxu2 %v3348_v22  ;;  %v21_v53 = vld.sshfl [vmem:[#allocation1 + $0x10] sm:$0xff pattern:$0x73625140]  ;;  %v4283_v1 = vld [vmem:[%s6787_s1 + $0x11c] sm:$0xf]  ;;  %v3268_v5 = vor.u32 %v4346_v57, %v3265_v58  ;;  %v3908_v6 = vor.u32 %v4510_v62, %v3907_v61  ;;  %vm2862_vm6 = vcmask 128004  }
  0x1f   :  { %2245 = vmatpush.bf16.msra.mxu3 %v3572_v26  ;;  %v4849_v54 = vpack.c.bf16 %v21_v53, %v21_v53  ;;  %v4566_v0 = vld [vmem:[%s6787_s1 + $0x9f0] sm:$0xf0]  ;;  %v3013_v2 = vld [vmem:[%s6787_s1 + $0x134] sm:$0xf0]  ;;  %v4339_v3 = vld [vmem:[%s6787_s1 + $0x2dc] sm:$0xf] }
  0x20   :  { %2207 = vmatpush.bf16.msra.mxu0 %v2872_v32  ;;  %v19_v4 = vld.sshfl [vmem:[#allocation1] sm:$0xff pattern:$0x73625140]  ;;  %v3237_v7 = vld [vmem:[%s6787_s1 + $0x2f4] sm:$0xf0]  ;;  %v4132_v11 = vor.u32 %v4566_v0, %v4131_v63  ;;  %v3016_v12 = vor.u32 %v4283_v1, %v3013_v2  ;;  %vm2863_vm7 = vmor %vm2862_vm6, %vm2861_vm5 }
  0x21   :  { %2220 = vmatpush.bf16.msra.mxu1 %v3096_v36  ;;  %v3879_v8 = vld [vmem:[%s6787_s1 + $0x7e0] sm:$0xf]  ;;  %v4503_v9 = vld [vmem:[%s6787_s1 + $0x7f8] sm:$0xf0]  ;;  %v4888_v10 = vpack.c.bf16 %v19_v4, %v19_v4  ;;  %v4276_v15 = vld [vmem:[%s6787_s1 + $0xe4] sm:$0xf]  ;;  %v3240_v20 = vor.u32 %v4339_v3, %v3237_v7 }
  0x22   :  { %2233 = vmatpush.bf16.msra.mxu2 %v3320_v37  ;;  %v4103_v13 = vld [vmem:[%s6787_s1 + $0x9a0] sm:$0xf]  ;;  %v4559_v14 = vld [vmem:[%s6787_s1 + $0x9b8] sm:$0xf0]  ;;  %v3880_v21 = vor.u32 %v4503_v9, %v3879_v8  ;;  %v4332_v22 = vld [vmem:[%s6787_s1 + $0x2a4] sm:$0xf] }
  0x23   :  { %2246 = vmatpush.bf16.msra.mxu3 %v3544_v40  ;;  %v2985_v16 = vld [vmem:[%s6787_s1 + $0xfc] sm:$0xf0]  ;;  %2208 = vmatmul.bf16.vlgmr.msra.gmra.mxu0 %v4888_v10  ;;  %v20_v17 = vld.sshfl [vmem:[#allocation1 + $0x8] sm:$0xff pattern:$0x73625140]  ;;  %v4104_v25 = vor.u32 %v4559_v14, %v4103_v13 }
  0x24   :  { %2252 = vmatpush.bf16.msrb.mxu0 %v3964_v41  ;;  %v4903_v18 = vpack.c.bf16 %v20_v17, %v20_v17  ;;  %v22_v19 = vld.sshfl [vmem:[#allocation1 + $0x18] sm:$0xff pattern:$0x73625140]  ;;  %v3209_v23 = vld [vmem:[%s6787_s1 + $0x2bc] sm:$0xf0]  ;;  %v2988_v26 = vor.u32 %v4276_v15, %v2985_v16 }
  0x25   :  { %2265 = vmatpush.bf16.msrb.mxu1 %v4188_v44  ;;  %2234 = vmatmul.bf16.vlgmr.msra.gmra.mxu2 %v4849_v54  ;;  %v4911_v24 = vpack.c.bf16 %v22_v19, %v22_v19  ;;  %v3851_v27 = vld [vmem:[%s6787_s1 + $0x7a8] sm:$0xf]  ;;  %v4496_v28 = vld [vmem:[%s6787_s1 + $0x7c0] sm:$0xf0]  ;;  %v4269_v31 = vld [vmem:[%s6787_s1 + $0xac] sm:$0xf]  ;;  %v3212_v33 = vor.u32 %v4332_v22, %v3209_v23 }
  0x26   :  { %2285 = vmatpush.bf16.msrb.mxu2 %v4216_v49  ;;  %v4075_v29 = vld [vmem:[%s6787_s1 + $0x968] sm:$0xf]  ;;  %v4552_v30 = vld [vmem:[%s6787_s1 + $0x980] sm:$0xf0]  ;;  %2221 = vmatmul.bf16.vlgmr.msra.gmra.mxu1 %v4903_v18  ;;  %v3852_v34 = vor.u32 %v4496_v28, %v3851_v27  ;;  %v4325_v35 = vld [vmem:[%s6787_s1 + $0x26c] sm:$0xf] }
  0x27   :  { %2291 = vmatpush.bf16.msrb.mxu3 %v3072_v45  ;;  %v2957_v32 = vld [vmem:[%s6787_s1 + $0xc4] sm:$0xf0]  ;;  %v4076_v37 = vor.u32 %v4552_v30, %v4075_v29  ;;  %v3823_v39 = vld [vmem:[%s6787_s1 + $0x770] sm:$0xf]  ;;  %v4489_v40 = vld [vmem:[%s6787_s1 + $0x788] sm:$0xf0] }
  0x28   :  { %2253 = vmatpush.bf16.msrb.mxu0 %v3936_v56  ;;  %2247 = vmatmul.bf16.vlgmr.msra.gmra.mxu3 %v4911_v24  ;;  %v3181_v36 = vld [vmem:[%s6787_s1 + $0x284] sm:$0xf0]  ;;  %v2960_v38 = vor.u32 %v4269_v31, %v2957_v32  ;;  %v4047_v41 = vld [vmem:[%s6787_s1 + $0x930] sm:$0xf]  ;;  %v4545_v42 = vld [vmem:[%s6787_s1 + $0x948] sm:$0xf0]  ;;  %v3824_v47 = vor.u32 %v4489_v40, %v3823_v39 }
  0x29   :  { %2266 = vmatpush.bf16.msrb.mxu1 %v4160_v59  ;;  %v4262_v43 = vld [vmem:[%s6787_s1 + $0x74] sm:$0xf]  ;;  %v2929_v44 = vld [vmem:[%s6787_s1 + $0x8c] sm:$0xf0]  ;;  %v13_v45 = vld [vmem:[%s6788_s0 + $0x8] sm:$0x3f]  ;;  %v3184_v46 = vor.u32 %v4325_v35, %v3181_v36  ;;  %v4048_v50 = vor.u32 %v4545_v42, %v4047_v41 }
  0x2a   :  { %2304 = vmatpush.bf16.msra.mxu2 %v3296_v55  ;;  %v4318_v48 = vld [vmem:[%s6787_s1 + $0x234] sm:$0xf]  ;;  %v3153_v49 = vld [vmem:[%s6787_s1 + $0x24c] sm:$0xf0]  ;;  %18 = vst [vmem:[#allocation1 + $0x20] ss:$4 sm:$0xff] %v13_v45  ;;  %v2932_v51 = vor.u32 %v4262_v43, %v2929_v44 }
  0x2b   :  { %2292 = vmatpush.bf16.msrb.mxu3 %v3044_v60  ;;  %v3795_v52 = vld [vmem:[%s6787_s1 + $0x738] sm:$0xf]  ;;  %v4482_v53 = vld [vmem:[%s6787_s1 + $0x750] sm:$0xf0]  ;;  %v4255_v57 = vld [vmem:[%s6787_s1 + $0x3c] sm:$0xf]  ;;  %v3156_v63 = vor.u32 %v4318_v48, %v3153_v49 }
  0x2c   :  { %2254 = vmatpush.bf16.msrb.mxu0 %v3908_v6  ;;  %v4019_v55 = vld [vmem:[%s6787_s1 + $0x8f8] sm:$0xf]  ;;  %v4538_v56 = vld [vmem:[%s6787_s1 + $0x910] sm:$0xf0]  ;;  %v4311_v59 = vld [vmem:[%s6787_s1 + $0x1fc] sm:$0xf]  ;;  %v3796_v0 = vor.u32 %v4482_v53, %v3795_v52 }
  0x2d   :  { %2267 = vmatpush.bf16.msrb.mxu1 %v4132_v11  ;;  %v2901_v58 = vld [vmem:[%s6787_s1 + $0x54] sm:$0xf0]  ;;  %v3767_v61 = vld [vmem:[%s6787_s1 + $0x700] sm:$0xf]  ;;  %v4475_v62 = vld [vmem:[%s6787_s1 + $0x718] sm:$0xf0]  ;;  %v4020_v4 = vor.u32 %v4538_v56, %v4019_v55 }
  0x2e   :  { %2305 = vmatpush.bf16.msra.mxu2 %v3268_v5  ;;  %v3125_v60 = vld [vmem:[%s6787_s1 + $0x214] sm:$0xf0]  ;;  %v3991_v1 = vld [vmem:[%s6787_s1 + $0x8c0] sm:$0xf]  ;;  %v4531_v2 = vld [vmem:[%s6787_s1 + $0x8d8] sm:$0xf0]  ;;  %v2904_v5 = vor.u32 %v4255_v57, %v2901_v58  ;;  %v3768_v16 = vor.u32 %v4475_v62, %v3767_v61 }
  0x2f   :  { %2293 = vmatpush.bf16.msrb.mxu3 %v3016_v12  ;;  %v4248_v3 = vld [vmem:[%s6787_s1 + $0x4] sm:$0xf]  ;;  %v2873_v6 = vld [vmem:[%s6787_s1 + $0x1c] sm:$0xf0]  ;;  %v4409_v7 = vld [vmem:[%s6787_s1 + $0x50c] sm:$0xf]  ;;  %v3128_v15 = vor.u32 %v4311_v59, %v3125_v60 }
  0x30   :  { %2255 = vmatpush.bf16.msrb.mxu0 %v3880_v21  ;;  %v3517_v8 = vld [vmem:[%s6787_s1 + $0x524] sm:$0xf0]  ;;  %v4465_v9 = vld [vmem:[%s6787_s1 + $0x6cc] sm:$0xf]  ;;  %v4304_v17 = vld [vmem:[%s6787_s1 + $0x1c4] sm:$0xf]  ;;  %v3992_v21 = vor.u32 %v4531_v2, %v3991_v1  ;;  %v2876_v22 = vor.u32 %v4248_v3, %v2873_v6 }
  0x31   :  { %2268 = vmatpush.bf16.msrb.mxu1 %v4104_v25  ;;  %v3741_v11 = vld [vmem:[%s6787_s1 + $0x6e4] sm:$0xf0]  ;;  %v4521_v12 = vld [vmem:[%s6787_s1 + $0x88c] sm:$0xf]  ;;  %v3097_v23 = vld [vmem:[%s6787_s1 + $0x1dc] sm:$0xf0] }
  0x32   :  { %2306 = vmatpush.bf16.msra.mxu2 %v3240_v20  ;;  %v3965_v13 = vld [vmem:[%s6787_s1 + $0x8a4] sm:$0xf0]  ;;  %v25_v14 = vld.sshfl [vmem:[#allocation1 + $0x30] sm:$0xff pattern:$0x73625140]  ;;  %v3744_v27 = vor.u32 %v4465_v9, %v3741_v11  ;;  %v3100_v36 = vor.u32 %v4304_v17, %v3097_v23 }
  0x33   :  { %2294 = vmatpush.bf16.msrb.mxu3 %v2988_v26  ;;  %v5029_v19 = vpack.c.bf16 %v25_v14, %v25_v14  ;;  %v23_v20 = vld.sshfl [vmem:[#allocation1 + $0x20] sm:$0xff pattern:$0x73625140]  ;;  %v24_v25 = vld.sshfl [vmem:[#allocation1 + $0x28] sm:$0xff pattern:$0x73625140]  ;;  %v3520_v26 = vor.u32 %v4409_v7, %v3517_v8  ;;  %v3968_v31 = vor.u32 %v4521_v12, %v3965_v13 }
  0x34   :  { %2256 = vmatpush.bf16.msrb.mxu0 %v3852_v34  ;;  %v4577_v28 = vld [vmem:[%s6787_s1 + $0xa4c] sm:$0xf]  ;;  %v4189_v29 = vld [vmem:[%s6787_s1 + $0xa64] sm:$0xf0]  ;;  %v4402_v30 = vld [vmem:[%s6787_s1 + $0x4d4] sm:$0xf]  ;;  %v5054_v35 = vpack.c.bf16 %v23_v20, %v23_v20  ;;  %v5062_v39 = vpack.c.bf16 %v24_v25, %v24_v25 }
  0x35   :  { %2269 = vmatpush.bf16.msrb.mxu1 %v4076_v37  ;;  %4241 = vmatmul.msk.bf16.vlgmr.msrb.gmra.mxu2 %vm2196_vm0, %v5029_v19  ;;  %v3489_v32 = vld [vmem:[%s6787_s1 + $0x4ec] sm:$0xf0]  ;;  %v4514_v37 = vld [vmem:[%s6787_s1 + $0x854] sm:$0xf]  ;;  %v4192_v40 = vor.u32 %v4577_v28, %v4189_v29  ;;  %v4395_v45 = vld [vmem:[%s6787_s1 + $0x49c] sm:$0xf] }
  0x36   :  { %2307 = vmatpush.bf16.msra.mxu2 %v3212_v33  ;;  %v4458_v33 = vld [vmem:[%s6787_s1 + $0x694] sm:$0xf]  ;;  %v3713_v34 = vld [vmem:[%s6787_s1 + $0x6ac] sm:$0xf0]  ;;  %v3492_v41 = vor.u32 %v4402_v30, %v3489_v32  ;;  %v4451_v48 = vld [vmem:[%s6787_s1 + $0x65c] sm:$0xf] }
  0x37   :  { %2295 = vmatpush.bf16.msrb.mxu3 %v2960_v38  ;;  %v3937_v38 = vld [vmem:[%s6787_s1 + $0x86c] sm:$0xf0]  ;;  %v3716_v42 = vor.u32 %v4458_v33, %v3713_v34  ;;  %v4570_v43 = vld [vmem:[%s6787_s1 + $0xa14] sm:$0xf]  ;;  %v3685_v49 = vld [vmem:[%s6787_s1 + $0x674] sm:$0xf0] }
  0x38   :  { %2257 = vmatpush.bf16.msrb.mxu0 %v3824_v47  ;;  %v4161_v44 = vld [vmem:[%s6787_s1 + $0xa2c] sm:$0xf0]  ;;  %v3461_v47 = vld [vmem:[%s6787_s1 + $0x4b4] sm:$0xf0]  ;;  %v3688_v55 = vor.u32 %v4451_v48, %v3685_v49  ;;  %v4563_v56 = vld [vmem:[%s6787_s1 + $0x9dc] sm:$0xf] }
  0x39   :  { %2270 = vmatpush.bf16.msrb.mxu1 %v4048_v50  ;;  %v4507_v50 = vld [vmem:[%s6787_s1 + $0x81c] sm:$0xf]  ;;  %v4164_v52 = vor.u32 %v4570_v43, %v4161_v44  ;;  %v3464_v53 = vor.u32 %v4395_v45, %v3461_v47  ;;  %v4133_v57 = vld [vmem:[%s6787_s1 + $0x9f4] sm:$0xf0]  ;;  %v4388_v58 = vld [vmem:[%s6787_s1 + $0x464] sm:$0xf] }
  0x3a   :  { %2308 = vmatpush.bf16.msra.mxu2 %v3184_v46  ;;  %v3940_v46 = vor.u32 %v4514_v37, %v3937_v38  ;;  %v3433_v60 = vld [vmem:[%s6787_s1 + $0x47c] sm:$0xf0]  ;;  %v4444_v61 = vld [vmem:[%s6787_s1 + $0x624] sm:$0xf]  ;;  %v4136_v1 = vor.u32 %v4563_v56, %v4133_v57  ;;  %v4381_v6 = vld [vmem:[%s6787_s1 + $0x42c] sm:$0xf] }
  0x3b   :  { %2296 = vmatpush.bf16.msrb.mxu3 %v2932_v51  ;;  %v3909_v51 = vld [vmem:[%s6787_s1 + $0x834] sm:$0xf0]  ;;  %v3657_v62 = vld [vmem:[%s6787_s1 + $0x63c] sm:$0xf0]  ;;  %v3436_v2 = vor.u32 %v4388_v58, %v3433_v60  ;;  %v3405_v8 = vld [vmem:[%s6787_s1 + $0x444] sm:$0xf0] }
  0x3c   :  { %2258 = vmatpush.bf16.msrb.mxu0 %v3796_v0  ;;  %v3912_v59 = vor.u32 %v4507_v50, %v3909_v51  ;;  %v3881_v0 = vld [vmem:[%s6787_s1 + $0x7fc] sm:$0xf0]  ;;  %v3660_v3 = vor.u32 %v4444_v61, %v3657_v62  ;;  %v4437_v9 = vld [vmem:[%s6787_s1 + $0x5ec] sm:$0xf]  ;;  %v3629_v11 = vld [vmem:[%s6787_s1 + $0x604] sm:$0xf0] }
  0x3d   :  { %2271 = vmatpush.bf16.msrb.mxu1 %v4020_v4  ;;  %v4556_v4 = vld [vmem:[%s6787_s1 + $0x9a4] sm:$0xf]  ;;  %v4493_v12 = vld [vmem:[%s6787_s1 + $0x7ac] sm:$0xf]  ;;  %v3853_v13 = vld [vmem:[%s6787_s1 + $0x7c4] sm:$0xf0] }
  0x3e   :  { %2309 = vmatpush.bf16.msra.mxu2 %v3156_v63  ;;  %v4500_v63 = vld [vmem:[%s6787_s1 + $0x7e4] sm:$0xf]  ;;  %v4549_v17 = vld [vmem:[%s6787_s1 + $0x96c] sm:$0xf]  ;;  %v4077_v20 = vld [vmem:[%s6787_s1 + $0x984] sm:$0xf0] }
  0x3f   :  { %2297 = vmatpush.bf16.msrb.mxu3 %v2904_v5  ;;  %v4105_v5 = vld [vmem:[%s6787_s1 + $0x9bc] sm:$0xf0]  ;;  %v3884_v7 = vor.u32 %v4500_v63, %v3881_v0  ;;  %v3377_v23 = vld [vmem:[%s6787_s1 + $0x40c] sm:$0xf0]  ;;  %v4430_v25 = vld [vmem:[%s6787_s1 + $0x5b4] sm:$0xf]  ;;  %v4080_v29 = vor.u32 %v4549_v17, %v4077_v20 }
  0x40   :  { %2259 = vmatpush.bf16.msrb.mxu0 %v3768_v16  ;;  %v4108_v14 = vor.u32 %v4556_v4, %v4105_v5  ;;  %v3632_v16 = vor.u32 %v4437_v9, %v3629_v11  ;;  %v3825_v28 = vld [vmem:[%s6787_s1 + $0x78c] sm:$0xf0]  ;;  %v4542_v32 = vld [vmem:[%s6787_s1 + $0x934] sm:$0xf]  ;;  %v4367_v34 = vld [vmem:[%s6787_s1 + $0x3bc] sm:$0xf] }
  0x41   :  { %2272 = vmatpush.bf16.msrb.mxu1 %v3992_v21  ;;  %v4374_v21 = vld [vmem:[%s6787_s1 + $0x3f4] sm:$0xf]  ;;  %v4049_v33 = vld [vmem:[%s6787_s1 + $0x94c] sm:$0xf0]  ;;  %v3349_v37 = vld [vmem:[%s6787_s1 + $0x3d4] sm:$0xf0] }
  0x42   :  { %2310 = vmatpush.bf16.msra.mxu2 %v3128_v15  ;;  %v3408_v15 = vor.u32 %v4381_v6, %v3405_v8  ;;  %v3380_v30 = vor.u32 %v4374_v21, %v3377_v23  ;;  %v4423_v38 = vld [vmem:[%s6787_s1 + $0x57c] sm:$0xf]  ;;  %v4052_v43 = vor.u32 %v4542_v32, %v4049_v33  ;;  %v4021_v45 = vld [vmem:[%s6787_s1 + $0x914] sm:$0xf0]  ;;  %v4360_v48 = vld [vmem:[%s6787_s1 + $0x384] sm:$0xf] }
  0x43   :  { %2298 = vmatpush.bf16.msrb.mxu3 %v2876_v22  ;;  %2260 = vmatmul.bf16.vlgmr.msrb.gmra.mxu0 %v5054_v35  ;;  %v3856_v22 = vor.u32 %v4493_v12, %v3853_v13  ;;  %v4535_v44 = vld [vmem:[%s6787_s1 + $0x8fc] sm:$0xf]  ;;  %v3321_v49 = vld [vmem:[%s6787_s1 + $0x39c] sm:$0xf0]  ;;  %v4416_v50 = vld [vmem:[%s6787_s1 + $0x544] sm:$0xf] }
  0x44   :  { %2317 = vmatpush.bf16.msra.mxu0 %v3520_v26  ;;  %2273 = vmatmul.bf16.vlgmr.msrb.gmra.mxu1 %v5062_v39  ;;  %v3601_v26 = vld [vmem:[%s6787_s1 + $0x5cc] sm:$0xf0]  ;;  %v4301_v57 = vld [vmem:[%s6787_s1 + $0x1a8] sm:$0xf0]  ;;  %v4584_v61 = vld [vmem:[%s6787_s1 + $0xa84] sm:$0xf]  ;;  %v3324_v63 = vor.u32 %v4360_v48, %v3321_v49 }
  0x45   :  { %2330 = vmatpush.bf16.msra.mxu1 %v3744_v27  ;;  %v4486_v27 = vld [vmem:[%s6787_s1 + $0x774] sm:$0xf]  ;;  %v3075_v56 = vld [vmem:[%s6787_s1 + $0x190] sm:$0xf]  ;;  %v4357_v60 = vld [vmem:[%s6787_s1 + $0x368] sm:$0xf0] }
  0x46   :  { %2311 = vmatpush.bf16.msra.mxu2 %v3100_v36  ;;  %2299 = vmatmul.bf16.vlgmr.msrb.gmra.mxu3 %v4888_v10  ;;  %v3828_v36 = vor.u32 %v4486_v27, %v3825_v28  ;;  %v3299_v58 = vld [vmem:[%s6787_s1 + $0x350] sm:$0xf]  ;;  %v4217_v62 = vld [vmem:[%s6787_s1 + $0xa9c] sm:$0xf0]  ;;  %v3076_v4 = vor.u32 %v4301_v57, %v3075_v56  ;;  %v4469_v6 = vld [vmem:[%s6787_s1 + $0x6e8] sm:$0xf0] }
  0x47   :  { %2343 = vmatpush.bf16.msra.mxu3 %v3968_v31  ;;  %v3604_v31 = vor.u32 %v4430_v25, %v3601_v26  ;;  %v3747_v5 = vld [vmem:[%s6787_s1 + $0x6d0] sm:$0xf]  ;;  %v3300_v8 = vor.u32 %v4357_v60, %v3299_v58  ;;  %v4294_v9 = vld [vmem:[%s6787_s1 + $0x170] sm:$0xf0]  ;;  %v4220_v11 = vor.u32 %v4584_v61, %v4217_v62  ;;  %v4413_v13 = vld [vmem:[%s6787_s1 + $0x528] sm:$0xf0] }
  0x48   :  { %2318 = vmatpush.bf16.msra.mxu0 %v3492_v41  ;;  %v4479_v41 = vld [vmem:[%s6787_s1 + $0x73c] sm:$0xf]  ;;  %v3523_v12 = vld [vmem:[%s6787_s1 + $0x510] sm:$0xf]  ;;  %v3748_v17 = vor.u32 %v4469_v6, %v3747_v5  ;;  %v3719_v21 = vld [vmem:[%s6787_s1 + $0x698] sm:$0xf] }
  0x49   :  { %2331 = vmatpush.bf16.msra.mxu1 %v3716_v42  ;;  %2312 = vmatmul.bf16.vlgmr.msra.gmra.mxu2 %v4903_v18  ;;  %v3797_v42 = vld [vmem:[%s6787_s1 + $0x754] sm:$0xf0]  ;;  %v3019_v23 = vld [vmem:[%s6787_s1 + $0x120] sm:$0xf]  ;;  %v3524_v25 = vor.u32 %v4413_v13, %v3523_v12  ;;  %v4287_v27 = vld [vmem:[%s6787_s1 + $0x138] sm:$0xf0] }
  0x4a   :  { %2356 = vmatpush.bf16.msrb.mxu2 %v4192_v40  ;;  %v3573_v40 = vld [vmem:[%s6787_s1 + $0x594] sm:$0xf0]  ;;  %v3800_v51 = vor.u32 %v4479_v41, %v3797_v42  ;;  %v3020_v33 = vor.u32 %v4287_v27, %v3019_v23  ;;  %v4280_v41 = vld [vmem:[%s6787_s1 + $0x100] sm:$0xf0]  ;;  %v3467_v42 = vld [vmem:[%s6787_s1 + $0x4a0] sm:$0xf] }
  0x4b   :  { %2344 = vmatpush.bf16.msra.mxu3 %v3940_v46  ;;  %v3352_v46 = vor.u32 %v4367_v34, %v3349_v37  ;;  %v3576_v47 = vor.u32 %v4423_v38, %v3573_v40  ;;  %v3495_v28 = vld [vmem:[%s6787_s1 + $0x4d8] sm:$0xf]  ;;  %v3691_v34 = vld [vmem:[%s6787_s1 + $0x660] sm:$0xf]  ;;  %v2991_v37 = vld [vmem:[%s6787_s1 + $0xe8] sm:$0xf] }
  0x4c   :  { %2319 = vmatpush.bf16.msra.mxu0 %v3464_v53  ;;  %v4472_v53 = vld [vmem:[%s6787_s1 + $0x704] sm:$0xf]  ;;  %v3663_v48 = vld [vmem:[%s6787_s1 + $0x628] sm:$0xf]  ;;  %v3187_v57 = vld [vmem:[%s6787_s1 + $0x270] sm:$0xf] }
  0x4d   :  { %2332 = vmatpush.bf16.msra.mxu1 %v3688_v55  ;;  %v3769_v55 = vld [vmem:[%s6787_s1 + $0x71c] sm:$0xf0]  ;;  %v4448_v49 = vld [vmem:[%s6787_s1 + $0x640] sm:$0xf0]  ;;  %v4329_v58 = vld [vmem:[%s6787_s1 + $0x288] sm:$0xf0] }
  0x4e   :  { %2357 = vmatpush.bf16.msrb.mxu2 %v4164_v52  ;;  %v3545_v52 = vld [vmem:[%s6787_s1 + $0x55c] sm:$0xf0]  ;;  %v4392_v56 = vld [vmem:[%s6787_s1 + $0x480] sm:$0xf0]  ;;  %v3635_v61 = vld [vmem:[%s6787_s1 + $0x5f0] sm:$0xf] }
  0x4f   :  { %2345 = vmatpush.bf16.msra.mxu3 %v3912_v59  ;;  %v4024_v59 = vor.u32 %v4535_v44, %v4021_v45  ;;  %v3548_v0 = vor.u32 %v4416_v50, %v3545_v52  ;;  %v3215_v44 = vld [vmem:[%s6787_s1 + $0x2a8] sm:$0xf]  ;;  %v4336_v45 = vld [vmem:[%s6787_s1 + $0x2c0] sm:$0xf0]  ;;  %v2963_v50 = vld [vmem:[%s6787_s1 + $0xb0] sm:$0xf] }
  0x50   :  { %2320 = vmatpush.bf16.msra.mxu0 %v3436_v2  ;;  %v3993_v2 = vld [vmem:[%s6787_s1 + $0x8dc] sm:$0xf0]  ;;  %v3216_v52 = vor.u32 %v4336_v45, %v3215_v44  ;;  %v4441_v62 = vld [vmem:[%s6787_s1 + $0x608] sm:$0xf0]  ;;  %v3159_v5 = vld [vmem:[%s6787_s1 + $0x238] sm:$0xf] }
  0x51   :  { %2333 = vmatpush.bf16.msra.mxu1 %v3660_v3  ;;  %v3772_v3 = vor.u32 %v4472_v53, %v3769_v55  ;;  %v4273_v53 = vld [vmem:[%s6787_s1 + $0xc8] sm:$0xf0]  ;;  %v3439_v55 = vld [vmem:[%s6787_s1 + $0x468] sm:$0xf]  ;;  %v4322_v6 = vld [vmem:[%s6787_s1 + $0x250] sm:$0xf0] }
  0x52   :  { %2358 = vmatpush.bf16.msrb.mxu2 %v4136_v1  ;;  %v4528_v1 = vld [vmem:[%s6787_s1 + $0x8c4] sm:$0xf]  ;;  %v2964_v60 = vor.u32 %v4273_v53, %v2963_v50  ;;  %v2907_v12 = vld [vmem:[%s6787_s1 + $0x40] sm:$0xf]  ;;  %v2879_v27 = vld [vmem:[%s6787_s1 + $0x8] sm:$0xf] }
  0x53   :  { %2346 = vmatpush.bf16.msra.mxu3 %v3884_v7  ;;  %v3047_v7 = vld [vmem:[%s6787_s1 + $0x158] sm:$0xf]  ;;  %v3579_v23 = vld [vmem:[%s6787_s1 + $0x580] sm:$0xf]  ;;  %v4420_v44 = vld [vmem:[%s6787_s1 + $0x560] sm:$0xf0] }
  0x54   :  { %2321 = vmatpush.bf16.msra.mxu0 %v3408_v15  ;;  %v3271_v15 = vld [vmem:[%s6787_s1 + $0x318] sm:$0xf]  ;;  %v3048_v20 = vor.u32 %v4294_v9, %v3047_v7  ;;  %v3636_v7 = vor.u32 %v4441_v62, %v3635_v61 }
  0x55   :  { %2334 = vmatpush.bf16.msra.mxu1 %v3632_v16  ;;  %v4350_v16 = vld [vmem:[%s6787_s1 + $0x330] sm:$0xf0]  ;;  %v3607_v9 = vld [vmem:[%s6787_s1 + $0x5b8] sm:$0xf] }
  0x56   :  { %2359 = vmatpush.bf16.msrb.mxu2 %v4108_v14  ;;  %v3996_v14 = vor.u32 %v4528_v1, %v3993_v2  ;;  %v3272_v26 = vor.u32 %v4350_v16, %v3271_v15  ;;  %v3188_v1 = vor.u32 %v4329_v58, %v3187_v57  ;;  %v4266_v2 = vld [vmem:[%s6787_s1 + $0x90] sm:$0xf0]  ;;  %v4259_v15 = vld [vmem:[%s6787_s1 + $0x58] sm:$0xf0]  ;;  %v3383_v16 = vld [vmem:[%s6787_s1 + $0x3f8] sm:$0xf] }
  0x57   :  { %2347 = vmatpush.bf16.msra.mxu3 %v3856_v22  ;;  %v4462_v22 = vld [vmem:[%s6787_s1 + $0x6b0] sm:$0xf0]  ;;  %v3943_v50 = vld [vmem:[%s6787_s1 + $0x858] sm:$0xf]  ;;  %v4588_v57 = vld [vmem:[%s6787_s1 + $0xaa0] sm:$0xf0] }
  0x58   :  { %2322 = vmatpush.bf16.msra.mxu0 %v3380_v30  ;;  %v3243_v30 = vld [vmem:[%s6787_s1 + $0x2e0] sm:$0xf]  ;;  %v3720_v32 = vor.u32 %v4462_v22, %v3719_v21  ;;  %v4315_v21 = vld [vmem:[%s6787_s1 + $0x218] sm:$0xf0] }
  0x59   :  { %2335 = vmatpush.bf16.msra.mxu1 %v3604_v31  ;;  %v4343_v31 = vld [vmem:[%s6787_s1 + $0x2f8] sm:$0xf0] }
  0x5a   :  { %2360 = vmatpush.bf16.msrb.mxu2 %v4080_v29  ;;  %v4406_v29 = vld [vmem:[%s6787_s1 + $0x4f0] sm:$0xf0]  ;;  %v3244_v40 = vor.u32 %v4343_v31, %v3243_v30  ;;  %v3103_v31 = vld [vmem:[%s6787_s1 + $0x1c8] sm:$0xf] }
  0x5b   :  { %2348 = vmatpush.bf16.msra.mxu3 %v3828_v36  ;;  %v4455_v36 = vld [vmem:[%s6787_s1 + $0x678] sm:$0xf0]  ;;  %v3496_v38 = vor.u32 %v4406_v29, %v3495_v28  ;;  %v4252_v28 = vld [vmem:[%s6787_s1 + $0x20] sm:$0xf0] }
  0x5c   :  { %2323 = vmatpush.bf16.msra.mxu0 %v3352_v46  ;;  %v3692_v46 = vor.u32 %v4455_v36, %v3691_v34  ;;  %v4308_v34 = vld [vmem:[%s6787_s1 + $0x1e0] sm:$0xf0]  ;;  %v3971_v36 = vld [vmem:[%s6787_s1 + $0x890] sm:$0xf] }
  0x5d   :  { %2336 = vmatpush.bf16.msra.mxu1 %v3576_v47  ;;  %v2992_v47 = vor.u32 %v4280_v41, %v2991_v37  ;;  %v4525_v37 = vld [vmem:[%s6787_s1 + $0x8a8] sm:$0xf0] }
  0x5e   :  { %2361 = vmatpush.bf16.msrb.mxu2 %v4052_v43  ;;  %v4399_v43 = vld [vmem:[%s6787_s1 + $0x4b8] sm:$0xf0]  ;;  %v4581_v41 = vld [vmem:[%s6787_s1 + $0xa68] sm:$0xf0] }
  0x5f   :  { %2349 = vmatpush.bf16.msra.mxu3 %v3800_v51  ;;  %v3468_v51 = vor.u32 %v4399_v43, %v3467_v42  ;;  %v3551_v42 = vld [vmem:[%s6787_s1 + $0x548] sm:$0xf]  ;;  %v2880_v43 = vor.u32 %v4252_v28, %v2879_v27  ;;  %v4277_v27 = vld [vmem:[%s6787_s1 + $0xec] sm:$0xf] }
  0x60   :  { %2324 = vmatpush.bf16.msra.mxu0 %v3324_v63  ;;  %v2935_v63 = vld [vmem:[%s6787_s1 + $0x78] sm:$0xf]  ;;  %v3552_v58 = vor.u32 %v4420_v44, %v3551_v42  ;;  %v2965_v44 = vld [vmem:[%s6787_s1 + $0xcc] sm:$0xf0] }
  0x61   :  { %2337 = vmatpush.bf16.msra.mxu1 %v3548_v0  ;;  %v3440_v0 = vor.u32 %v4392_v56, %v3439_v55  ;;  %v4518_v55 = vld [vmem:[%s6787_s1 + $0x870] sm:$0xf0]  ;;  %v4223_v56 = vld [vmem:[%s6787_s1 + $0xa88] sm:$0xf] }
  0x62   :  { %2362 = vmatpush.bf16.msrb.mxu2 %v4024_v59  ;;  %v3664_v59 = vor.u32 %v4448_v49, %v3663_v48  ;;  %v3104_v48 = vor.u32 %v4308_v34, %v3103_v31  ;;  %v3972_v49 = vor.u32 %v4525_v37, %v3971_v36  ;;  %v4340_v31 = vld [vmem:[%s6787_s1 + $0x2e4] sm:$0xf]  ;;  %v3859_v34 = vld [vmem:[%s6787_s1 + $0x7b0] sm:$0xf]  ;;  %v4497_v36 = vld [vmem:[%s6787_s1 + $0x7c8] sm:$0xf0] }
  0x63   :  { %2350 = vmatpush.bf16.msra.mxu3 %v3772_v3  ;;  %2325 = vmatmul.bf16.vlgmr.msra.gmra.mxu0 %v4849_v54  ;;  %v3411_v3 = vld [vmem:[%s6787_s1 + $0x430] sm:$0xf] }
  0x64   :  { %2376 = vmatpush.bf16.msrb.mxu0 %v4220_v11  ;;  %2338 = vmatmul.bf16.vlgmr.msra.gmra.mxu1 %v4911_v24  ;;  %v4434_v11 = vld [vmem:[%s6787_s1 + $0x5d0] sm:$0xf0]  ;;  %v4083_v37 = vld [vmem:[%s6787_s1 + $0x970] sm:$0xf] }
  0x65   :  { %2382 = vmatpush.bf16.msrb.mxu1 %v3076_v4  ;;  %v4385_v4 = vld [vmem:[%s6787_s1 + $0x448] sm:$0xf0]  ;;  %v3608_v22 = vor.u32 %v4434_v11, %v3607_v9  ;;  %v4567_v9 = vld [vmem:[%s6787_s1 + $0x9f8] sm:$0xf0] }
  0x66   :  { %2363 = vmatpush.bf16.msrb.mxu2 %v3996_v14  ;;  %2351 = vmatmul.bf16.vlgmr.msra.gmra.mxu3 %v5054_v35  ;;  %v3412_v13 = vor.u32 %v4385_v4, %v3411_v3  ;;  %v3160_v14 = vor.u32 %v4322_v6, %v3159_v5  ;;  %v4354_v3 = vld [vmem:[%s6787_s1 + $0x354] sm:$0xf]  ;;  %v3301_v4 = vld [vmem:[%s6787_s1 + $0x36c] sm:$0xf0]  ;;  %v3915_v6 = vld [vmem:[%s6787_s1 + $0x820] sm:$0xf] }
  0x67   :  { %2395 = vmatpush.bf16.msrb.mxu3 %v3300_v8  ;;  %v2936_v8 = vor.u32 %v4266_v2, %v2935_v63  ;;  %v4291_v63 = vld [vmem:[%s6787_s1 + $0x15c] sm:$0xf]  ;;  %v4224_v2 = vor.u32 %v4588_v57, %v4223_v56  ;;  %v2937_v57 = vld [vmem:[%s6787_s1 + $0x94] sm:$0xf0] }
  0x68   :  { %2408 = vmatpush.bf16.msra.mxu0 %v3524_v25  ;;  %v2908_v25 = vor.u32 %v4259_v15, %v2907_v12  ;;  %v4284_v12 = vld [vmem:[%s6787_s1 + $0x124] sm:$0xf]  ;;  %v3021_v15 = vld [vmem:[%s6787_s1 + $0x13c] sm:$0xf0] }
  0x69   :  { %2383 = vmatpush.bf16.msrb.mxu1 %v3048_v20  ;;  %2364 = vmatmul.bf16.vlgmr.msrb.gmra.mxu2 %v5062_v39  ;;  %v3131_v20 = vld [vmem:[%s6787_s1 + $0x200] sm:$0xf] }
  0x6a   :  { %2421 = vmatpush.bf16.msra.mxu2 %v3748_v17  ;;  %v4378_v17 = vld [vmem:[%s6787_s1 + $0x410] sm:$0xf0]  ;;  %v3132_v30 = vor.u32 %v4315_v21, %v3131_v20  ;;  %v3887_v21 = vld [vmem:[%s6787_s1 + $0x7e8] sm:$0xf] }
  0x6b   :  { %2396 = vmatpush.bf16.msrb.mxu3 %v3272_v26  ;;  %v4427_v26 = vld [vmem:[%s6787_s1 + $0x598] sm:$0xf0]  ;;  %v3384_v29 = vor.u32 %v4378_v17, %v3383_v16  ;;  %v3273_v17 = vld [vmem:[%s6787_s1 + $0x334] sm:$0xf0] }
  0x6c   :  { %2409 = vmatpush.bf16.msra.mxu0 %v3496_v38  ;;  %v3580_v38 = vor.u32 %v4427_v26, %v3579_v23  ;;  %v4347_v16 = vld [vmem:[%s6787_s1 + $0x31c] sm:$0xf]  ;;  %v4111_v23 = vld [vmem:[%s6787_s1 + $0x9a8] sm:$0xf]  ;;  %v3024_v26 = vor.u32 %v4284_v12, %v3021_v15  ;;  %v3525_v15 = vld [vmem:[%s6787_s1 + $0x52c] sm:$0xf0] }
  0x6d   :  { %2384 = vmatpush.bf16.msrb.mxu1 %v3020_v33  ;;  %v4371_v33 = vld [vmem:[%s6787_s1 + $0x3d8] sm:$0xf0]  ;;  %v3276_v28 = vor.u32 %v4347_v16, %v3273_v17  ;;  %v3999_v12 = vld [vmem:[%s6787_s1 + $0x8c8] sm:$0xf]  ;;  %v4466_v17 = vld [vmem:[%s6787_s1 + $0x6d4] sm:$0xf] }
  0x6e   :  { %2422 = vmatpush.bf16.msra.mxu2 %v3720_v32  ;;  %v3355_v32 = vld [vmem:[%s6787_s1 + $0x3c0] sm:$0xf] }
  0x6f   :  { %2397 = vmatpush.bf16.msrb.mxu3 %v3244_v40  ;;  %v4195_v40 = vld [vmem:[%s6787_s1 + $0xa50] sm:$0xf]  ;;  %v3356_v45 = vor.u32 %v4371_v33, %v3355_v32  ;;  %v3245_v32 = vld [vmem:[%s6787_s1 + $0x2fc] sm:$0xf0] }
  0x70   :  { %2410 = vmatpush.bf16.msra.mxu0 %v3468_v51  ;;  %v3327_v51 = vld [vmem:[%s6787_s1 + $0x388] sm:$0xf]  ;;  %v4196_v53 = vor.u32 %v4581_v41, %v4195_v40  ;;  %v4270_v41 = vld [vmem:[%s6787_s1 + $0xb4] sm:$0xf]  ;;  %v3248_v42 = vor.u32 %v4340_v31, %v3245_v32  ;;  %v3497_v32 = vld [vmem:[%s6787_s1 + $0x4f4] sm:$0xf0] }
  0x71   :  { %2385 = vmatpush.bf16.msrb.mxu1 %v2992_v47  ;;  %v3077_v47 = vld [vmem:[%s6787_s1 + $0x1ac] sm:$0xf0] }
  0x72   :  { %2423 = vmatpush.bf16.msra.mxu2 %v3692_v46  ;;  %v4298_v46 = vld [vmem:[%s6787_s1 + $0x194] sm:$0xf] }
  0x73   :  { %2398 = vmatpush.bf16.msrb.mxu3 %v3216_v52  ;;  %4242 = vmatmul.msk.bf16.vlgmr.msrb.gmra.mxu0 %vm2196_vm0, %v5029_v19  ;;  %v4364_v52 = vld [vmem:[%s6787_s1 + $0x3a0] sm:$0xf0]  ;;  %v3080_v61 = vor.u32 %v4298_v46, %v3077_v47  ;;  %v3217_v46 = vld [vmem:[%s6787_s1 + $0x2c4] sm:$0xf0] }
  0x74   :  { %2411 = vmatpush.bf16.msra.mxu0 %v3440_v0  ;;  %v3328_v62 = vor.u32 %v4364_v52, %v3327_v51  ;;  %v3944_v0 = vor.u32 %v4518_v55, %v3943_v50  ;;  %v4055_v50 = vld [vmem:[%s6787_s1 + $0x938] sm:$0xf]  ;;  %v4546_v51 = vld [vmem:[%s6787_s1 + $0x950] sm:$0xf0]  ;;  %v2968_v52 = vor.u32 %v4270_v41, %v2965_v44  ;;  %v4515_v41 = vld [vmem:[%s6787_s1 + $0x85c] sm:$0xf] }
  0x75   :  { %2386 = vmatpush.bf16.msrb.mxu1 %v2964_v60  ;;  %v4574_v60 = vld [vmem:[%s6787_s1 + $0xa30] sm:$0xf0]  ;;  %v3945_v44 = vld [vmem:[%s6787_s1 + $0x874] sm:$0xf0] }
  0x76   :  { %2424 = vmatpush.bf16.msra.mxu2 %v3664_v59  ;;  %v4167_v59 = vld [vmem:[%s6787_s1 + $0xa18] sm:$0xf] }
  0x77   :  { %2399 = vmatpush.bf16.msrb.mxu3 %v3188_v1  ;;  %v3049_v1 = vld [vmem:[%s6787_s1 + $0x174] sm:$0xf0]  ;;  %v4168_v5 = vor.u32 %v4574_v60, %v4167_v59  ;;  %v3189_v59 = vld [vmem:[%s6787_s1 + $0x28c] sm:$0xf0]  ;;  %v4056_v60 = vor.u32 %v4546_v51, %v4055_v50  ;;  %v3105_v50 = vld [vmem:[%s6787_s1 + $0x1e4] sm:$0xf0] }
  0x78   :  { %2412 = vmatpush.bf16.msra.mxu0 %v3412_v13  ;;  %v3052_v11 = vor.u32 %v4291_v63, %v3049_v1  ;;  %v3304_v13 = vor.u32 %v4354_v3, %v3301_v4  ;;  %v4027_v63 = vld [vmem:[%s6787_s1 + $0x900] sm:$0xf] }
  0x79   :  { %2387 = vmatpush.bf16.msrb.mxu1 %v2936_v8  ;;  %v4139_v8 = vld [vmem:[%s6787_s1 + $0x9e0] sm:$0xf] }
  0x7a   :  { %2425 = vmatpush.bf16.msra.mxu2 %v3636_v7  ;;  %v4511_v7 = vld [vmem:[%s6787_s1 + $0x838] sm:$0xf0]  ;;  %v4140_v20 = vor.u32 %v4567_v9, %v4139_v8  ;;  %v3775_v9 = vld [vmem:[%s6787_s1 + $0x708] sm:$0xf]  ;;  %v3693_v51 = vld [vmem:[%s6787_s1 + $0x67c] sm:$0xf0] }
  0x7b   :  { %2400 = vmatpush.bf16.msrb.mxu3 %v3160_v14  ;;  %v3916_v14 = vor.u32 %v4511_v7, %v3915_v6  ;;  %v4319_v6 = vld [vmem:[%s6787_s1 + $0x23c] sm:$0xf]  ;;  %v3161_v7 = vld [vmem:[%s6787_s1 + $0x254] sm:$0xf0] }
  0x7c   :  { %2413 = vmatpush.bf16.msra.mxu0 %v3384_v29 }
  0x7d   :  { %2388 = vmatpush.bf16.msrb.mxu1 %v2908_v25  ;;  %v4560_v25 = vld [vmem:[%s6787_s1 + $0x9c0] sm:$0xf0] }
  0x7e   :  { %2426 = vmatpush.bf16.msra.mxu2 %v3608_v22  ;;  %v4504_v22 = vld [vmem:[%s6787_s1 + $0x800] sm:$0xf0]  ;;  %v4112_v33 = vor.u32 %v4560_v25, %v4111_v23  ;;  %v4249_v23 = vld [vmem:[%s6787_s1 + $0xc] sm:$0xf]  ;;  %v2881_v25 = vld [vmem:[%s6787_s1 + $0x24] sm:$0xf0] }
  0x7f   :  { %2401 = vmatpush.bf16.msrb.mxu3 %v3132_v30  ;;  %v3888_v29 = vor.u32 %v4504_v22, %v3887_v21  ;;  %v2993_v30 = vld [vmem:[%s6787_s1 + $0x104] sm:$0xf0]  ;;  %v3164_v21 = vor.u32 %v4319_v6, %v3161_v7  ;;  %v4501_v6 = vld [vmem:[%s6787_s1 + $0x7ec] sm:$0xf] }
  0x80   :  { %2414 = vmatpush.bf16.msra.mxu0 %v3356_v45  ;;  %v2996_v40 = vor.u32 %v4277_v27, %v2993_v30  ;;  %v4333_v45 = vld [vmem:[%s6787_s1 + $0x2ac] sm:$0xf]  ;;  %v4403_v30 = vld [vmem:[%s6787_s1 + $0x4dc] sm:$0xf]  ;;  %v3889_v7 = vld [vmem:[%s6787_s1 + $0x804] sm:$0xf0] }
  0x81   :  { %2389 = vmatpush.bf16.msrb.mxu1 %v2880_v43  ;;  %v3860_v43 = vor.u32 %v4497_v36, %v3859_v34  ;;  %v3220_v55 = vor.u32 %v4333_v45, %v3217_v46  ;;  %v3133_v34 = vld [vmem:[%s6787_s1 + $0x21c] sm:$0xf0]  ;;  %v2884_v36 = vor.u32 %v4249_v23, %v2881_v25  ;;  %v4396_v45 = vld [vmem:[%s6787_s1 + $0x4a4] sm:$0xf] }
  0x82   :  { %2427 = vmatpush.bf16.msra.mxu2 %v3580_v38  ;;  %v4553_v38 = vld [vmem:[%s6787_s1 + $0x988] sm:$0xf0]  ;;  %v3469_v46 = vld [vmem:[%s6787_s1 + $0x4bc] sm:$0xf0] }
  0x83   :  { %2402 = vmatpush.bf16.msrb.mxu3 %v3104_v48  ;;  %v4084_v47 = vor.u32 %v4553_v38, %v4083_v37  ;;  %v3831_v48 = vld [vmem:[%s6787_s1 + $0x778] sm:$0xf]  ;;  %v4459_v37 = vld [vmem:[%s6787_s1 + $0x69c] sm:$0xf] }
  0x84   :  { %2390 = vmatmul.bf16.vlgmr.msrb.gmra.mxu1 %v4888_v10  ;;  %2415 = vmatpush.bf16.msra.mxu0 %v3328_v62  ;;  %v4483_v62 = vld [vmem:[%s6787_s1 + $0x758] sm:$0xf0]  ;;  %v3721_v38 = vld [vmem:[%s6787_s1 + $0x6b4] sm:$0xf0] }
  0x85   :  { %2434 = vmatpush.bf16.msra.mxu1 %v3972_v49  ;;  %v4490_v49 = vld [vmem:[%s6787_s1 + $0x790] sm:$0xf0] }
  0x86   :  { %2428 = vmatpush.bf16.msra.mxu2 %v3552_v58  ;;  %2403 = vmatmul.bf16.vlgmr.msrb.gmra.mxu3 %v4903_v18  ;;  %v3832_v56 = vor.u32 %v4490_v49, %v3831_v48  ;;  %v4326_v58 = vld [vmem:[%s6787_s1 + $0x274] sm:$0xf]  ;;  %v4452_v48 = vld [vmem:[%s6787_s1 + $0x664] sm:$0xf]  ;;  %v4305_v49 = vld [vmem:[%s6787_s1 + $0x1cc] sm:$0xf] }
  0x87   :  { %2447 = vmatpush.bf16.msra.mxu3 %v4196_v53  ;;  %2416 = vmatmul.bf16.vlgmr.msra.gmra.mxu0 %v4849_v54  ;;  %v4263_v53 = vld [vmem:[%s6787_s1 + $0x7c] sm:$0xf]  ;;  %v3192_v3 = vor.u32 %v4326_v58, %v3189_v59  ;;  %v4508_v58 = vld [vmem:[%s6787_s1 + $0x824] sm:$0xf]  ;;  %v3917_v59 = vld [vmem:[%s6787_s1 + $0x83c] sm:$0xf0] }
  0x88   :  { %2467 = vmatpush.bf16.msrb.mxu0 %v4224_v2  ;;  %v2940_v1 = vor.u32 %v4263_v53, %v2937_v57  ;;  %v4256_v2 = vld [vmem:[%s6787_s1 + $0x44] sm:$0xf]  ;;  %v4197_v53 = vld [vmem:[%s6787_s1 + $0xa6c] sm:$0xf0]  ;;  %v3108_v57 = vor.u32 %v4305_v49, %v3105_v50 }
  0x89   :  { %2435 = vmatpush.bf16.msra.mxu1 %v3944_v0  ;;  %2429 = vmatmul.bf16.vlgmr.msra.gmra.mxu2 %v4911_v24  ;;  %v4539_v0 = vld [vmem:[%s6787_s1 + $0x918] sm:$0xf0] }
  0x8a   :  { %2473 = vmatpush.bf16.msrb.mxu2 %v3080_v61  ;;  %v3803_v61 = vld [vmem:[%s6787_s1 + $0x740] sm:$0xf]  ;;  %v4028_v8 = vor.u32 %v4539_v0, %v4027_v63  ;;  %v3441_v63 = vld [vmem:[%s6787_s1 + $0x484] sm:$0xf0]  ;;  %v4445_v0 = vld [vmem:[%s6787_s1 + $0x62c] sm:$0xf] }
  0x8b   :  { %2448 = vmatpush.bf16.msra.mxu3 %v4168_v5  ;;  %v3804_v4 = vor.u32 %v4483_v62, %v3803_v61  ;;  %v2909_v5 = vld [vmem:[%s6787_s1 + $0x5c] sm:$0xf0]  ;;  %v4389_v62 = vld [vmem:[%s6787_s1 + $0x46c] sm:$0xf] }
  0x8c   :  { %2486 = vmatpush.bf16.msra.mxu0 %v3304_v13  ;;  %v4532_v13 = vld [vmem:[%s6787_s1 + $0x8e0] sm:$0xf0]  ;;  %v2912_v16 = vor.u32 %v4256_v2, %v2909_v5  ;;  %v4571_v2 = vld [vmem:[%s6787_s1 + $0xa1c] sm:$0xf]  ;;  %v3444_v5 = vor.u32 %v4389_v62, %v3441_v63  ;;  %v3083_v62 = vld [vmem:[%s6787_s1 + $0x198] sm:$0xf] }
  0x8d   :  { %2436 = vmatpush.bf16.msra.mxu1 %v3916_v14  ;;  %v4410_v14 = vld [vmem:[%s6787_s1 + $0x514] sm:$0xf]  ;;  %v4543_v63 = vld [vmem:[%s6787_s1 + $0x93c] sm:$0xf] }
  0x8e   :  { %2474 = vmatpush.bf16.msrb.mxu2 %v3052_v11  ;;  %v4476_v11 = vld [vmem:[%s6787_s1 + $0x720] sm:$0xf0]  ;;  %v3528_v27 = vor.u32 %v4410_v14, %v3525_v15  ;;  %v3637_v14 = vld [vmem:[%s6787_s1 + $0x60c] sm:$0xf0] }
  0x8f   :  { %2449 = vmatpush.bf16.msra.mxu3 %v4140_v20  ;;  %v3749_v20 = vld [vmem:[%s6787_s1 + $0x6ec] sm:$0xf0]  ;;  %v3776_v22 = vor.u32 %v4476_v11, %v3775_v9  ;;  %v4382_v11 = vld [vmem:[%s6787_s1 + $0x434] sm:$0xf]  ;;  %v4564_v15 = vld [vmem:[%s6787_s1 + $0x9e4] sm:$0xf] }
  0x90   :  { %2487 = vmatpush.bf16.msra.mxu0 %v3276_v28  ;;  %v4522_v28 = vld [vmem:[%s6787_s1 + $0x894] sm:$0xf]  ;;  %v3752_v31 = vor.u32 %v4466_v17, %v3749_v20  ;;  %v3892_v17 = vor.u32 %v4501_v6, %v3889_v7  ;;  %v4473_v7 = vld [vmem:[%s6787_s1 + $0x70c] sm:$0xf] }
  0x91   :  { %2437 = vmatpush.bf16.msra.mxu1 %v3888_v29  ;;  %v3973_v29 = vld [vmem:[%s6787_s1 + $0x8ac] sm:$0xf0] }
  0x92   :  { %2475 = vmatpush.bf16.msrb.mxu2 %v3024_v26  ;;  %v4000_v26 = vor.u32 %v4532_v13, %v3999_v12  ;;  %v3413_v12 = vld [vmem:[%s6787_s1 + $0x44c] sm:$0xf0]  ;;  %v4438_v13 = vld [vmem:[%s6787_s1 + $0x5f4] sm:$0xf] }
  0x93   :  { %2450 = vmatpush.bf16.msra.mxu3 %v4112_v33  ;;  %v4312_v33 = vld [vmem:[%s6787_s1 + $0x204] sm:$0xf]  ;;  %v3416_v20 = vor.u32 %v4382_v11, %v3413_v12  ;;  %v3640_v23 = vor.u32 %v4438_v13, %v3637_v14  ;;  %v3307_v13 = vld [vmem:[%s6787_s1 + $0x358] sm:$0xf]  ;;  %v4358_v14 = vld [vmem:[%s6787_s1 + $0x370] sm:$0xf0] }
  0x94   :  { %2488 = vmatpush.bf16.msra.mxu0 %v3248_v42  ;;  %v3500_v42 = vor.u32 %v4403_v30, %v3497_v32  ;;  %v4557_v30 = vld [vmem:[%s6787_s1 + $0x9ac] sm:$0xf] }
  0x95   :  { %2438 = vmatpush.bf16.msra.mxu1 %v3860_v43  ;;  %v3136_v43 = vor.u32 %v4312_v33, %v3133_v34 }
  0x96   :  { %2476 = vmatpush.bf16.msrb.mxu2 %v2996_v40  ;;  %v3976_v40 = vor.u32 %v4522_v28, %v3973_v29  ;;  %v4431_v28 = vld [vmem:[%s6787_s1 + $0x5bc] sm:$0xf]  ;;  %v3609_v29 = vld [vmem:[%s6787_s1 + $0x5d4] sm:$0xf0] }
  0x97   :  { %2451 = vmatpush.bf16.msra.mxu3 %v4084_v47  ;;  %4243 = vmatmul.msk.bf16.vlgmr.msrb.gmra.mxu0 %vm2196_vm0, %v5029_v19  ;;  %v3724_v47 = vor.u32 %v4459_v37, %v3721_v38  ;;  %v3833_v37 = vld [vmem:[%s6787_s1 + $0x794] sm:$0xf0]  ;;  %v3612_v38 = vor.u32 %v4431_v28, %v3609_v29  ;;  %v3055_v28 = vld [vmem:[%s6787_s1 + $0x160] sm:$0xf]  ;;  %v4295_v29 = vld [vmem:[%s6787_s1 + $0x178] sm:$0xf0] }
  0x98   :  { %2489 = vmatpush.bf16.msra.mxu0 %v3220_v55  ;;  %v3948_v55 = vor.u32 %v4515_v41, %v3945_v44  ;;  %v4368_v41 = vld [vmem:[%s6787_s1 + $0x3c4] sm:$0xf] }
  0x99   :  { %2439 = vmatpush.bf16.msra.mxu1 %v3832_v56  ;;  %v3472_v56 = vor.u32 %v4396_v45, %v3469_v46  ;;  %v3581_v45 = vld [vmem:[%s6787_s1 + $0x59c] sm:$0xf0]  ;;  %v4550_v46 = vld [vmem:[%s6787_s1 + $0x974] sm:$0xf] }
  0x9a   :  { %2477 = vmatpush.bf16.msrb.mxu2 %v2968_v52  ;;  %v4578_v52 = vld [vmem:[%s6787_s1 + $0xa54] sm:$0xf] }
  0x9b   :  { %2452 = vmatpush.bf16.msra.mxu3 %v4056_v60  ;;  %v3696_v60 = vor.u32 %v4452_v48, %v3693_v51  ;;  %v4200_v61 = vor.u32 %v4578_v52, %v4197_v53  ;;  %v4480_v52 = vld [vmem:[%s6787_s1 + $0x744] sm:$0xf]  ;;  %v3805_v53 = vld [vmem:[%s6787_s1 + $0x75c] sm:$0xf0] }
  0x9c   :  { %2490 = vmatpush.bf16.msra.mxu0 %v3192_v3  ;;  %v4169_v3 = vld [vmem:[%s6787_s1 + $0xa34] sm:$0xf0] }
  0x9d   :  { %2440 = vmatpush.bf16.msra.mxu1 %v3804_v4  ;;  %v3920_v4 = vor.u32 %v4508_v58, %v3917_v59  ;;  %v4172_v9 = vor.u32 %v4571_v2, %v4169_v3  ;;  %v3329_v58 = vld [vmem:[%s6787_s1 + $0x3a4] sm:$0xf0]  ;;  %v4417_v59 = vld [vmem:[%s6787_s1 + $0x54c] sm:$0xf]  ;;  %v3808_v2 = vor.u32 %v4480_v52, %v3805_v53  ;;  %v4302_v3 = vld [vmem:[%s6787_s1 + $0x1b0] sm:$0xf0] }
  0x9e   :  { %2478 = vmatpush.bf16.msrb.mxu2 %v2940_v1  ;;  %v3665_v1 = vld [vmem:[%s6787_s1 + $0x644] sm:$0xf0] }
  0x9f   :  { %2453 = vmatpush.bf16.msra.mxu3 %v4028_v8  ;;  %v3668_v8 = vor.u32 %v4445_v0, %v3665_v1  ;;  %v4057_v0 = vld [vmem:[%s6787_s1 + $0x954] sm:$0xf0] }
  0xa0   :  { %2491 = vmatpush.bf16.msra.mxu0 %v3164_v21  ;;  %v4494_v21 = vld [vmem:[%s6787_s1 + $0x7b4] sm:$0xf]  ;;  %v2209_v32 = vpop.f32.mrf.mxu0  ;;  %v4060_v12 = vor.u32 %v4543_v63, %v4057_v0  ;;  %v3223_v63 = vld [vmem:[%s6787_s1 + $0x2b0] sm:$0xf]  ;;  %v4337_v0 = vld [vmem:[%s6787_s1 + $0x2c8] sm:$0xf0] }
  0xa1   :  { %2441 = vmatpush.bf16.msra.mxu1 %v3776_v22  ;;  %v3861_v22 = vld [vmem:[%s6787_s1 + $0x7cc] sm:$0xf0] }
  0xa2   :  { %2479 = vmatpush.bf16.msrb.mxu2 %v2912_v16  ;;  %v4141_v16 = vld [vmem:[%s6787_s1 + $0x9fc] sm:$0xf0]  ;;  %v3864_v33 = vor.u32 %v4494_v21, %v3861_v22  ;;  %v4414_v22 = vld [vmem:[%s6787_s1 + $0x530] sm:$0xf0] }
  0xa3   :  { %2454 = vmatpush.bf16.msra.mxu3 %v4000_v26  ;;  %v4144_v25 = vor.u32 %v4564_v15, %v4141_v16  ;;  %v4375_v26 = vld [vmem:[%s6787_s1 + $0x3fc] sm:$0xf]  ;;  %v2222_v48 = vpop.f32.mrf.mxu1  ;;  %v3531_v15 = vld [vmem:[%s6787_s1 + $0x518] sm:$0xf] }
  0xa4   :  { %2442 = vmatmul.bf16.vlgmr.msra.gmra.mxu1 %v5054_v35  ;;  %2492 = vmatpush.bf16.msra.mxu0 %v3136_v43  ;;  %v4424_v43 = vld [vmem:[%s6787_s1 + $0x584] sm:$0xf]  ;;  %v2223_v50 = vadd.f32 %v2222_v48, %v2209_v32  ;;  %v3532_v32 = vor.u32 %v4414_v22, %v3531_v15 }
  0xa5   :  { %2499 = vmatpush.bf16.msrb.mxu1 %v3528_v27  ;;  %v3385_v27 = vld [vmem:[%s6787_s1 + $0x414] sm:$0xf0] }
  0xa6   :  { %2480 = vmatpush.bf16.msrb.mxu2 %v2884_v36  ;;  %2455 = vmatmul.bf16.vlgmr.msra.gmra.mxu3 %v5062_v39  ;;  %v3388_v34 = vor.u32 %v4375_v26, %v3385_v27  ;;  %v4487_v36 = vld [vmem:[%s6787_s1 + $0x77c] sm:$0xf] }
  0xa7   :  { %2512 = vmatpush.bf16.msrb.mxu3 %v3752_v31  ;;  %v4113_v31 = vld [vmem:[%s6787_s1 + $0x9c4] sm:$0xf0]  ;;  %v3836_v49 = vor.u32 %v4487_v36, %v3833_v37  ;;  %v3503_v37 = vld [vmem:[%s6787_s1 + $0x4e0] sm:$0xf] }
  0xa8   :  { %2493 = vmatpush.bf16.msra.mxu0 %v3108_v57  ;;  %v2235_v44 = vpop.f32.mrf.mxu2  ;;  %v2211_v1 = vpop.f32.mrf.mxu0  ;;  %v3027_v36 = vld [vmem:[%s6787_s1 + $0x128] sm:$0xf] }
  0xa9   :  { %2500 = vmatpush.bf16.msrb.mxu1 %v3500_v42  ;;  %2481 = vmatmul.bf16.vlgmr.msrb.gmra.mxu2 %v4888_v10  ;;  %v3357_v42 = vld [vmem:[%s6787_s1 + $0x3dc] sm:$0xf0] }
  0xaa   :  { %2525 = vmatpush.bf16.msra.mxu2 %v3976_v40  ;;  %v4116_v40 = vor.u32 %v4557_v30, %v4113_v31  ;;  %v3360_v51 = vor.u32 %v4368_v41, %v3357_v42  ;;  %v3308_v30 = vor.u32 %v4358_v14, %v3307_v13  ;;  %v3279_v31 = vld [vmem:[%s6787_s1 + $0x320] sm:$0xf]  ;;  %v4529_v41 = vld [vmem:[%s6787_s1 + $0x8cc] sm:$0xf]  ;;  %v4001_v42 = vld [vmem:[%s6787_s1 + $0x8e4] sm:$0xf0] }
  0xab   :  { %2513 = vmatpush.bf16.msrb.mxu3 %v3724_v47  ;;  %2494 = vmatmul.bf16.vlgmr.msra.gmra.mxu0 %v4903_v18  ;;  %v4085_v47 = vld [vmem:[%s6787_s1 + $0x98c] sm:$0xf0]  ;;  %v2224_v26 = vpop.f32.mrf.mxu1 }
  0xac   :  { %2538 = vmatpush.bf16.msrb.mxu0 %v4200_v61  ;;  %v4088_v57 = vor.u32 %v4550_v46, %v4085_v47  ;;  %v2236_v61 = vadd.f32 %v2235_v44, %v2223_v50  ;;  %v3755_v44 = vld [vmem:[%s6787_s1 + $0x6d8] sm:$0xf]  ;;  %v3251_v50 = vld [vmem:[%s6787_s1 + $0x2e8] sm:$0xf]  ;;  %v4386_v26 = vld [vmem:[%s6787_s1 + $0x450] sm:$0xf0] }
  0xad   :  { %2501 = vmatpush.bf16.msrb.mxu1 %v3472_v56  ;;  %v3584_v56 = vor.u32 %v4424_v43, %v3581_v45  ;;  %v4288_v43 = vld [vmem:[%s6787_s1 + $0x140] sm:$0xf0]  ;;  %v4470_v45 = vld [vmem:[%s6787_s1 + $0x6f0] sm:$0xf0] }
  0xae   :  { %2526 = vmatpush.bf16.msra.mxu2 %v3948_v55  ;;  %v4361_v55 = vld [vmem:[%s6787_s1 + $0x38c] sm:$0xf]  ;;  %v3028_v52 = vor.u32 %v4288_v43, %v3027_v36  ;;  %v3756_v53 = vor.u32 %v4470_v45, %v3755_v44  ;;  %v3643_v43 = vld [vmem:[%s6787_s1 + $0x5f8] sm:$0xf]  ;;  %v4442_v44 = vld [vmem:[%s6787_s1 + $0x610] sm:$0xf0] }
  0xaf   :  { %2514 = vmatpush.bf16.msrb.mxu3 %v3696_v60  ;;  %v3553_v60 = vld [vmem:[%s6787_s1 + $0x564] sm:$0xf0]  ;;  %v3332_v6 = vor.u32 %v4361_v55, %v3329_v58  ;;  %v2999_v55 = vld [vmem:[%s6787_s1 + $0xf0] sm:$0xf]  ;;  %v4281_v58 = vld [vmem:[%s6787_s1 + $0x108] sm:$0xf0] }
  0xb0   :  { %2539 = vmatpush.bf16.msrb.mxu0 %v4172_v9  ;;  %v2248_v9 = vpop.f32.mrf.mxu3  ;;  %v3556_v11 = vor.u32 %v4417_v59, %v3553_v60  ;;  %v3727_v59 = vld [vmem:[%s6787_s1 + $0x6a0] sm:$0xf]  ;;  %v4463_v60 = vld [vmem:[%s6787_s1 + $0x6b8] sm:$0xf0]  ;;  %v3000_v1 = vor.u32 %v4281_v58, %v2999_v55  ;;  %v3644_v55 = vor.u32 %v4442_v44, %v3643_v43  ;;  %v4372_v58 = vld [vmem:[%s6787_s1 + $0x3e0] sm:$0xf0] }
  0xb1   :  { %2502 = vmatpush.bf16.msrb.mxu1 %v3444_v5  ;;  %v4225_v5 = vld [vmem:[%s6787_s1 + $0xaa4] sm:$0xf0]  ;;  %v5831_v16 = vadd.f32 %v2248_v9, %v2236_v61  ;;  %v4456_v9 = vld [vmem:[%s6787_s1 + $0x680] sm:$0xf0] }
  0xb2   :  { %2527 = vmatpush.bf16.msra.mxu2 %v3920_v4  ;;  %v4585_v4 = vld [vmem:[%s6787_s1 + $0xa8c] sm:$0xf] }
  0xb3   :  { %2515 = vmatpush.bf16.msrb.mxu3 %v3668_v8  ;;  %v3777_v8 = vld [vmem:[%s6787_s1 + $0x724] sm:$0xf0]  ;;  %v4228_v21 = vor.u32 %v4585_v4, %v4225_v5  ;;  %v3447_v4 = vld [vmem:[%s6787_s1 + $0x470] sm:$0xf]  ;;  %v4393_v5 = vld [vmem:[%s6787_s1 + $0x488] sm:$0xf0] }
  0xb4   :  { %2540 = vmatpush.bf16.msrb.mxu0 %v4144_v25  ;;  %v4029_v25 = vld [vmem:[%s6787_s1 + $0x91c] sm:$0xf0]  ;;  %v3780_v27 = vor.u32 %v4473_v7, %v3777_v8  ;;  %v4274_v7 = vld [vmem:[%s6787_s1 + $0xd0] sm:$0xf0]  ;;  %v3699_v8 = vld [vmem:[%s6787_s1 + $0x668] sm:$0xf]  ;;  %v3448_v15 = vor.u32 %v4393_v5, %v3447_v4 }
  0xb5   :  { %2503 = vmatpush.bf16.msrb.mxu1 %v3416_v20  ;;  %v3084_v20 = vor.u32 %v4302_v3, %v3083_v62  ;;  %v2971_v3 = vld [vmem:[%s6787_s1 + $0xb8] sm:$0xf]  ;;  %v3335_v4 = vld [vmem:[%s6787_s1 + $0x390] sm:$0xf]  ;;  %v4365_v5 = vld [vmem:[%s6787_s1 + $0x3a8] sm:$0xf0] }
  0xb6   :  { %2528 = vmatpush.bf16.msra.mxu2 %v3892_v17  ;;  %v2237_v17 = vpop.f32.mrf.mxu2 }
  0xb7   :  { %2516 = vmatpush.bf16.msrb.mxu3 %v3640_v23  ;;  %v4536_v23 = vld [vmem:[%s6787_s1 + $0x904] sm:$0xf]  ;;  %v3195_v17 = vld [vmem:[%s6787_s1 + $0x278] sm:$0xf] }
  0xb8   :  { %2541 = vmatpush.bf16.msrb.mxu0 %v4116_v40  ;;  %v4407_v40 = vld [vmem:[%s6787_s1 + $0x4f8] sm:$0xf0]  ;;  %v2250_v47 = vpop.f32.mrf.mxu3 }
  0xb9   :  { %2504 = vmatpush.bf16.msrb.mxu1 %v3388_v34  ;;  %v4351_v34 = vld [vmem:[%s6787_s1 + $0x338] sm:$0xf0]  ;;  %v3504_v48 = vor.u32 %v4407_v40, %v3503_v37  ;;  %v3391_v40 = vld [vmem:[%s6787_s1 + $0x400] sm:$0xf] }
  0xba   :  { %2529 = vmatpush.bf16.msra.mxu2 %v3864_v33  ;;  %v4032_v33 = vor.u32 %v4536_v23, %v4029_v25  ;;  %v3280_v46 = vor.u32 %v4351_v34, %v3279_v31  ;;  %v3700_v23 = vor.u32 %v4456_v9, %v3699_v8  ;;  %v3419_v25 = vld [vmem:[%s6787_s1 + $0x438] sm:$0xf]  ;;  %v4323_v34 = vld [vmem:[%s6787_s1 + $0x258] sm:$0xf0]  ;;  %v4582_v9 = vld [vmem:[%s6787_s1 + $0xa70] sm:$0xf0] }
  0xbb   :  { %2517 = vmatpush.bf16.msrb.mxu3 %v3612_v38  ;;  %v3056_v38 = vor.u32 %v4295_v29, %v3055_v28  ;;  %v3671_v28 = vld [vmem:[%s6787_s1 + $0x630] sm:$0xf]  ;;  %v4449_v29 = vld [vmem:[%s6787_s1 + $0x648] sm:$0xf0]  ;;  %v4203_v8 = vld [vmem:[%s6787_s1 + $0xa58] sm:$0xf] }
  0xbc   :  { %2542 = vmatpush.bf16.msrb.mxu0 %v4088_v57  ;;  %v4400_v57 = vld [vmem:[%s6787_s1 + $0x4c0] sm:$0xf0]  ;;  %v3672_v37 = vor.u32 %v4449_v29, %v3671_v28 }
  0xbd   :  { %2505 = vmatpush.bf16.msrb.mxu1 %v3360_v51  ;;  %v4344_v51 = vld [vmem:[%s6787_s1 + $0x300] sm:$0xf0] }
  0xbe   :  { %2530 = vmatpush.bf16.msra.mxu2 %v3836_v49  ;;  %v4004_v49 = vor.u32 %v4529_v41, %v4001_v42  ;;  %v3252_v61 = vor.u32 %v4344_v51, %v3251_v50  ;;  %v2287_v14 = vpop.f32.mrf.mxu2  ;;  %v4379_v41 = vld [vmem:[%s6787_s1 + $0x418] sm:$0xf0]  ;;  %v4260_v42 = vld [vmem:[%s6787_s1 + $0x60] sm:$0xf0]  ;;  %v3139_v51 = vld [vmem:[%s6787_s1 + $0x208] sm:$0xf] }
  0xbf   :  { %2518 = vmatpush.bf16.msrb.mxu3 %v3584_v56  ;;  %v3475_v56 = vld [vmem:[%s6787_s1 + $0x4a8] sm:$0xf]  ;;  %v3392_v50 = vor.u32 %v4379_v41, %v3391_v40  ;;  %v4512_v40 = vld [vmem:[%s6787_s1 + $0x840] sm:$0xf0]  ;;  %v4299_v41 = vld [vmem:[%s6787_s1 + $0x19c] sm:$0xf] }
  0xc0   :  { %2543 = vmatpush.bf16.msrb.mxu0 %v4060_v12  ;;  %v3476_v62 = vor.u32 %v4400_v57, %v3475_v56  ;;  %v3224_v12 = vor.u32 %v4337_v0, %v3223_v63  ;;  %v2887_v56 = vld [vmem:[%s6787_s1 + $0x10] sm:$0xf]  ;;  %v3363_v57 = vld [vmem:[%s6787_s1 + $0x3c8] sm:$0xf]  ;;  %v3979_v63 = vld [vmem:[%s6787_s1 + $0x898] sm:$0xf] }
  0xc1   :  { %2506 = vmatpush.bf16.msrb.mxu1 %v3332_v6  ;;  %v2261_v6 = vpop.f32.mrf.mxu0  ;;  %v2274_v13 = vpop.f32.mrf.mxu1  ;;  %v4526_v0 = vld [vmem:[%s6787_s1 + $0x8b0] sm:$0xf0] }
  0xc2   :  { %2531 = vmatpush.bf16.msra.mxu2 %v3808_v2  ;;  %v3728_v2 = vor.u32 %v4463_v60, %v3727_v59  ;;  %v4253_v59 = vld [vmem:[%s6787_s1 + $0x28] sm:$0xf0]  ;;  %v3615_v60 = vld [vmem:[%s6787_s1 + $0x5c0] sm:$0xf] }
  0xc3   :  { %2519 = vmatpush.bf16.msrb.mxu3 %v3556_v11  ;;  %v2262_v11 = vadd.f32 %v2261_v6, %v5831_v16  ;;  %v2943_v16 = vld [vmem:[%s6787_s1 + $0x80] sm:$0xf]  ;;  %v2888_v6 = vor.u32 %v4253_v59, %v2887_v56 }
  0xc4   :  { %2507 = vmatmul.bf16.vlgmr.msrb.gmra.mxu1 %v4849_v54  ;;  %2544 = vmatpush.bf16.msrb.mxu0 %v4032_v33  ;;  %v3167_v33 = vld [vmem:[%s6787_s1 + $0x240] sm:$0xf] }
  0xc5   :  { %2558 = vmatpush.bf16.msra.mxu1 %v4228_v21  ;;  %v2972_v21 = vor.u32 %v4274_v7, %v2971_v3  ;;  %v2275_v22 = vadd.f32 %v2274_v13, %v2262_v11  ;;  %v3168_v47 = vor.u32 %v4323_v34, %v3167_v33  ;;  %v4309_v3 = vld [vmem:[%s6787_s1 + $0x1e8] sm:$0xf0]  ;;  %v3587_v11 = vld [vmem:[%s6787_s1 + $0x588] sm:$0xf]  ;;  %v4428_v13 = vld [vmem:[%s6787_s1 + $0x5a0] sm:$0xf0] }
  0xc6   :  { %2532 = vmatpush.bf16.msra.mxu2 %v3780_v27  ;;  %2520 = vmatmul.bf16.vlgmr.msrb.gmra.mxu3 %v4911_v24  ;;  %v4267_v27 = vld [vmem:[%s6787_s1 + $0x98] sm:$0xf0]  ;;  %v3309_v33 = vld [vmem:[%s6787_s1 + $0x374] sm:$0xf0]  ;;  %v3057_v56 = vld [vmem:[%s6787_s1 + $0x17c] sm:$0xf0] }
  0xc7   :  { %2564 = vmatpush.bf16.msra.mxu3 %v3084_v20  ;;  %v4330_v20 = vld [vmem:[%s6787_s1 + $0x290] sm:$0xf0]  ;;  %v2944_v36 = vor.u32 %v4267_v27, %v2943_v16  ;;  %v4204_v16 = vor.u32 %v4582_v9, %v4203_v8  ;;  %v3588_v27 = vor.u32 %v4428_v13, %v3587_v11  ;;  %v4091_v9 = vld [vmem:[%s6787_s1 + $0x978] sm:$0xf] }
  0xc8   :  { %2545 = vmatpush.bf16.msrb.mxu0 %v4004_v49  ;;  %v3196_v31 = vor.u32 %v4330_v20, %v3195_v17  ;;  %v4334_v13 = vld [vmem:[%s6787_s1 + $0x2b4] sm:$0xf] }
  0xc9   :  { %2577 = vmatpush.bf16.msrb.mxu1 %v3308_v30  ;;  %2533 = vmatmul.bf16.vlgmr.msra.gmra.mxu2 %v5054_v35  ;;  %v5955_v30 = vadd.f32 %v2287_v14, %v2275_v22  ;;  %v2263_v45 = vpop.f32.mrf.mxu0  ;;  %v2276_v49 = vpop.f32.mrf.mxu1  ;;  %v4231_v14 = vld [vmem:[%s6787_s1 + $0xa90] sm:$0xf]  ;;  %v4519_v22 = vld [vmem:[%s6787_s1 + $0x878] sm:$0xf0] }
  0xca   :  { %2590 = vmatpush.bf16.msrb.mxu2 %v3532_v32  ;;  %v3420_v32 = vor.u32 %v4386_v26, %v3419_v25  ;;  %v4175_v26 = vld [vmem:[%s6787_s1 + $0xa20] sm:$0xf]  ;;  %v4147_v45 = vld [vmem:[%s6787_s1 + $0x9e8] sm:$0xf] }
  0xcb   :  { %2565 = vmatpush.bf16.msra.mxu3 %v3056_v38  ;;  %2546 = vmatmul.bf16.vlgmr.msrb.gmra.mxu0 %v5062_v39  ;;  %v2915_v38 = vld [vmem:[%s6787_s1 + $0x48] sm:$0xf]  ;;  %v3281_v49 = vld [vmem:[%s6787_s1 + $0x33c] sm:$0xf0] }
  0xcc   :  { %2603 = vmatpush.bf16.msra.mxu0 %v3756_v53  ;;  %v2916_v53 = vor.u32 %v4260_v42, %v2915_v38  ;;  %v4421_v38 = vld [vmem:[%s6787_s1 + $0x568] sm:$0xf0]  ;;  %v3085_v42 = vld [vmem:[%s6787_s1 + $0x1b4] sm:$0xf0] }
  0xcd   :  { %2578 = vmatpush.bf16.msrb.mxu1 %v3280_v46  ;;  %v2300_v46 = vpop.f32.mrf.mxu3 }
  0xce   :  { %2591 = vmatpush.bf16.msrb.mxu2 %v3504_v48  ;;  %v2289_v48 = vpop.f32.mrf.mxu2 }
  0xcf   :  { %2566 = vmatpush.bf16.msra.mxu3 %v3028_v52  ;;  %v4316_v52 = vld [vmem:[%s6787_s1 + $0x220] sm:$0xf0] }
  0xd0   :  { %2604 = vmatpush.bf16.msra.mxu0 %v3728_v2  ;;  %v3364_v2 = vor.u32 %v4372_v58, %v3363_v57  ;;  %v4348_v48 = vld [vmem:[%s6787_s1 + $0x324] sm:$0xf] }
  0xd1   :  { %2579 = vmatpush.bf16.msrb.mxu1 %v3252_v61  ;;  %v4435_v61 = vld [vmem:[%s6787_s1 + $0x5d8] sm:$0xf0]  ;;  %v3284_v58 = vor.u32 %v4348_v48, %v3281_v49  ;;  %v4540_v48 = vld [vmem:[%s6787_s1 + $0x920] sm:$0xf0] }
  0xd2   :  { %2592 = vmatpush.bf16.msrb.mxu2 %v3476_v62  ;;  %v3140_v62 = vor.u32 %v4316_v52, %v3139_v51  ;;  %v3616_v7 = vor.u32 %v4435_v61, %v3615_v60  ;;  %v3088_v51 = vor.u32 %v4299_v41, %v3085_v42  ;;  %v3895_v52 = vld [vmem:[%s6787_s1 + $0x7f0] sm:$0xf]  ;;  %v4561_v61 = vld [vmem:[%s6787_s1 + $0x9c8] sm:$0xf0]  ;;  %v2973_v41 = vld [vmem:[%s6787_s1 + $0xd4] sm:$0xf0] }
  0xd3   :  { %2567 = vmatpush.bf16.msra.mxu3 %v3000_v1  ;;  %v3111_v1 = vld [vmem:[%s6787_s1 + $0x1d0] sm:$0xf]  ;;  %v4320_v49 = vld [vmem:[%s6787_s1 + $0x244] sm:$0xf] }
  0xd4   :  { %2605 = vmatpush.bf16.msra.mxu0 %v3700_v23  ;;  %4244 = vmatmul.msk.bf16.vlgmr.msra.gmra.mxu1 %vm2196_vm0, %v5029_v19  ;;  %v3112_v20 = vor.u32 %v4309_v3, %v3111_v1  ;;  %v3336_v23 = vor.u32 %v4365_v5, %v3335_v4  ;;  %v4119_v60 = vld [vmem:[%s6787_s1 + $0x9b0] sm:$0xf]  ;;  %v4498_v3 = vld [vmem:[%s6787_s1 + $0x7d0] sm:$0xf0]  ;;  %v4285_v4 = vld [vmem:[%s6787_s1 + $0x12c] sm:$0xf] }
  0xd5   :  { %2580 = vmatpush.bf16.msrb.mxu1 %v3224_v12  ;;  %v3980_v12 = vor.u32 %v4526_v0, %v3979_v63  ;;  %v2302_v17 = vpop.f32.mrf.mxu3  ;;  %v3253_v63 = vld [vmem:[%s6787_s1 + $0x304] sm:$0xf0] }
  0xd6   :  { %2593 = vmatpush.bf16.msrb.mxu2 %v3448_v15  ;;  %v4589_v15 = vld [vmem:[%s6787_s1 + $0xaa8] sm:$0xf0]  ;;  %v2313_v25 = vpop.f32.mrf.mxu2  ;;  %v3029_v5 = vld [vmem:[%s6787_s1 + $0x144] sm:$0xf0] }
  0xd7   :  { %2568 = vmatpush.bf16.msra.mxu3 %v2972_v21  ;;  %v3951_v21 = vld [vmem:[%s6787_s1 + $0x860] sm:$0xf]  ;;  %v4232_v28 = vor.u32 %v4589_v15, %v4231_v14  ;;  %v2314_v29 = vadd.f32 %v2313_v25, %v2300_v46  ;;  %v3225_v14 = vld [vmem:[%s6787_s1 + $0x2cc] sm:$0xf0]  ;;  %v3032_v17 = vor.u32 %v4285_v4, %v3029_v5 }
  0xd8   :  { %2606 = vmatpush.bf16.msra.mxu0 %v3672_v37  ;;  %v3952_v34 = vor.u32 %v4519_v22, %v3951_v21  ;;  %v3559_v37 = vld [vmem:[%s6787_s1 + $0x550] sm:$0xf]  ;;  %v4491_v21 = vld [vmem:[%s6787_s1 + $0x798] sm:$0xf0]  ;;  %v4278_v22 = vld [vmem:[%s6787_s1 + $0xf4] sm:$0xf] }
  0xd9   :  { %2581 = vmatpush.bf16.msrb.mxu1 %v3196_v31  ;;  %v4575_v31 = vld [vmem:[%s6787_s1 + $0xa38] sm:$0xf0]  ;;  %v3560_v46 = vor.u32 %v4421_v38, %v3559_v37  ;;  %v4484_v38 = vld [vmem:[%s6787_s1 + $0x760] sm:$0xf0] }
  0xda   :  { %2594 = vmatpush.bf16.msrb.mxu2 %v3420_v32  ;;  %v4355_v32 = vld [vmem:[%s6787_s1 + $0x35c] sm:$0xf]  ;;  %v4176_v43 = vor.u32 %v4575_v31, %v4175_v26  ;;  %v3228_v26 = vor.u32 %v4334_v13, %v3225_v14 }
  0xdb   :  { %2569 = vmatpush.bf16.msra.mxu3 %v2944_v36  ;;  %v3923_v36 = vld [vmem:[%s6787_s1 + $0x828] sm:$0xf]  ;;  %v3312_v44 = vor.u32 %v4355_v32, %v3309_v33  ;;  %v4327_v31 = vld [vmem:[%s6787_s1 + $0x27c] sm:$0xf]  ;;  %v3197_v32 = vld [vmem:[%s6787_s1 + $0x294] sm:$0xf0] }
  0xdc   :  { %2607 = vmatpush.bf16.msra.mxu0 %v3644_v55  ;;  %v4292_v55 = vld [vmem:[%s6787_s1 + $0x164] sm:$0xf] }
  0xdd   :  { %2582 = vmatpush.bf16.msrb.mxu1 %v3168_v47  ;;  %v4568_v47 = vld [vmem:[%s6787_s1 + $0xa00] sm:$0xf0]  ;;  %v3060_v1 = vor.u32 %v4292_v55, %v3057_v56  ;;  %v3783_v55 = vld [vmem:[%s6787_s1 + $0x710] sm:$0xf]  ;;  %v4477_v56 = vld [vmem:[%s6787_s1 + $0x728] sm:$0xf0] }
  0xde   :  { %2595 = vmatpush.bf16.msrb.mxu2 %v3392_v50  ;;  %v3924_v50 = vor.u32 %v4512_v40, %v3923_v36  ;;  %v4148_v57 = vor.u32 %v4568_v47, %v4147_v45  ;;  %v2315_v59 = vpop.f32.mrf.mxu2  ;;  %v3811_v36 = vld [vmem:[%s6787_s1 + $0x748] sm:$0xf]  ;;  %v4271_v40 = vld [vmem:[%s6787_s1 + $0xbc] sm:$0xf]  ;;  %v3200_v45 = vor.u32 %v4327_v31, %v3197_v32  ;;  %v3784_v4 = vor.u32 %v4477_v56, %v3783_v55  ;;  %v4205_v31 = vld [vmem:[%s6787_s1 + $0xa74] sm:$0xf0] }
  0xdf   :  { %2570 = vmatpush.bf16.msra.mxu3 %v2916_v53  ;;  %v4505_v53 = vld [vmem:[%s6787_s1 + $0x808] sm:$0xf0]  ;;  %v4516_v56 = vld [vmem:[%s6787_s1 + $0x864] sm:$0xf] }
  0xe0   :  { %2608 = vmatpush.bf16.msra.mxu0 %v3616_v7  ;;  %v3896_v0 = vor.u32 %v4505_v53, %v3895_v52  ;;  %v4120_v7 = vor.u32 %v4561_v61, %v4119_v60  ;;  %v3812_v52 = vor.u32 %v4484_v38, %v3811_v36  ;;  %v2976_v53 = vor.u32 %v4271_v40, %v2973_v41  ;;  %v4411_v61 = vld [vmem:[%s6787_s1 + $0x51c] sm:$0xf]  ;;  %v4397_v32 = vld [vmem:[%s6787_s1 + $0x4ac] sm:$0xf]  ;;  %v4250_v36 = vld [vmem:[%s6787_s1 + $0x14] sm:$0xf] }
  0xe1   :  { %2583 = vmatpush.bf16.msrb.mxu1 %v3140_v62  ;;  %v4341_v62 = vld [vmem:[%s6787_s1 + $0x2ec] sm:$0xf]  ;;  %v3477_v40 = vld [vmem:[%s6787_s1 + $0x4c4] sm:$0xf0]  ;;  %v4523_v41 = vld [vmem:[%s6787_s1 + $0x89c] sm:$0xf] }
  0xe2   :  { %2596 = vmatpush.bf16.msrb.mxu2 %v3364_v2  ;;  %v3867_v2 = vld [vmem:[%s6787_s1 + $0x7b8] sm:$0xf]  ;;  %v3256_v8 = vor.u32 %v4341_v62, %v3253_v63  ;;  %v4007_v63 = vld [vmem:[%s6787_s1 + $0x8d0] sm:$0xf] }
  0xe3   :  { %2571 = vmatpush.bf16.msra.mxu3 %v2888_v6  ;;  %v2326_v6 = vpop.f32.mrf.mxu0  ;;  %v3868_v15 = vor.u32 %v4498_v3, %v3867_v2  ;;  %v3533_v62 = vld [vmem:[%s6787_s1 + $0x534] sm:$0xf0]  ;;  %v4313_v2 = vld [vmem:[%s6787_s1 + $0x20c] sm:$0xf]  ;;  %v3141_v3 = vld [vmem:[%s6787_s1 + $0x224] sm:$0xf0] }
  0xe4   :  { %2609 = vmatpush.bf16.msra.mxu0 %v3588_v27  ;;  %v2327_v11 = vadd.f32 %v2326_v6, %v2314_v29  ;;  %v4063_v27 = vld [vmem:[%s6787_s1 + $0x940] sm:$0xf]  ;;  %v4547_v29 = vld [vmem:[%s6787_s1 + $0x958] sm:$0xf0] }
  0xe5   :  { %2584 = vmatpush.bf16.msrb.mxu1 %v3112_v20  ;;  %v3839_v20 = vld [vmem:[%s6787_s1 + $0x780] sm:$0xf]  ;;  %v4467_v6 = vld [vmem:[%s6787_s1 + $0x6dc] sm:$0xf] }
  0xe6   :  { %2597 = vmatpush.bf16.msrb.mxu2 %v3336_v23  ;;  %2572 = vmatmul.bf16.vlgmr.msra.gmra.mxu3 %v4888_v10  ;;  %v3001_v23 = vld [vmem:[%s6787_s1 + $0x10c] sm:$0xf0]  ;;  %v3840_v33 = vor.u32 %v4491_v21, %v3839_v20  ;;  %v3505_v20 = vld [vmem:[%s6787_s1 + $0x4fc] sm:$0xf0]  ;;  %v4306_v21 = vld [vmem:[%s6787_s1 + $0x1d4] sm:$0xf] }
  0xe7   :  { %2616 = vmatpush.bf16.msrb.mxu3 %v3980_v12  ;;  %v4554_v12 = vld [vmem:[%s6787_s1 + $0x990] sm:$0xf0] }
  0xe8   :  { %2585 = vmatmul.bf16.vlgmr.msrb.gmra.mxu1 %v4903_v18  ;;  %2610 = vmatpush.bf16.msra.mxu0 %v3560_v46  ;;  %v4092_v25 = vor.u32 %v4554_v12, %v4091_v9  ;;  %v4035_v46 = vld [vmem:[%s6787_s1 + $0x908] sm:$0xf]  ;;  %v4257_v9 = vld [vmem:[%s6787_s1 + $0x4c] sm:$0xf] }
  0xe9   :  { %2629 = vmatpush.bf16.msra.mxu1 %v4204_v16  ;;  %2598 = vmatmul.bf16.vlgmr.msrb.gmra.mxu2 %v4849_v54  ;;  %v2339_v16 = vpop.f32.mrf.mxu1  ;;  %v2352_v37 = vpop.f32.mrf.mxu3  ;;  %v4036_v59 = vor.u32 %v4540_v48, %v4035_v46  ;;  %v4453_v46 = vld [vmem:[%s6787_s1 + $0x66c] sm:$0xf]  ;;  %v3701_v48 = vld [vmem:[%s6787_s1 + $0x684] sm:$0xf0] }
  0xea   :  { %2649 = vmatpush.bf16.msra.mxu2 %v4232_v28  ;;  %v2340_v28 = vadd.f32 %v2339_v16, %v2327_v11  ;;  %v2917_v11 = vld [vmem:[%s6787_s1 + $0x64] sm:$0xf0]  ;;  %v3113_v16 = vld [vmem:[%s6787_s1 + $0x1ec] sm:$0xf0] }
  0xeb   :  { %2617 = vmatpush.bf16.msrb.mxu3 %v3952_v34  ;;  %2611 = vmatmul.bf16.vlgmr.msra.gmra.mxu0 %v4911_v24  ;;  %v3004_v34 = vor.u32 %v4278_v22, %v3001_v23  ;;  %v2328_v42 = vpop.f32.mrf.mxu0  ;;  %v3116_v38 = vor.u32 %v4306_v21, %v3113_v16  ;;  %v4502_v21 = vld [vmem:[%s6787_s1 + $0x7f4] sm:$0xf] }
  0xec   :  { %2655 = vmatpush.bf16.msrb.mxu0 %v3088_v51  ;;  %v2365_v47 = vpop.f32.mrf.mxu2  ;;  %v3981_v42 = vld [vmem:[%s6787_s1 + $0x8b4] sm:$0xf0] }
  0xed   :  { %2630 = vmatpush.bf16.msra.mxu1 %v4176_v43  ;;  %v2353_v43 = vadd.f32 %v2352_v37, %v2340_v28  ;;  %v2920_v28 = vor.u32 %v4257_v9, %v2917_v11  ;;  %v2889_v37 = vld [vmem:[%s6787_s1 + $0x2c] sm:$0xf0]  ;;  %v3645_v11 = vld [vmem:[%s6787_s1 + $0x614] sm:$0xf0] }
  0xee   :  { %2668 = vmatpush.bf16.msrb.mxu2 %v3312_v44  ;;  %v4064_v44 = vor.u32 %v4547_v29, %v4063_v27  ;;  %v4579_v29 = vld [vmem:[%s6787_s1 + $0xa5c] sm:$0xf] }
  0xef   :  { %2618 = vmatpush.bf16.msrb.mxu3 %v3924_v50  ;;  %v3169_v50 = vld [vmem:[%s6787_s1 + $0x25c] sm:$0xf0]  ;;  %v2366_v51 = vadd.f32 %v2365_v47, %v2353_v43  ;;  %v2892_v47 = vor.u32 %v4250_v36, %v2889_v37  ;;  %v4495_v36 = vld [vmem:[%s6787_s1 + $0x7bc] sm:$0xf]  ;;  %v3869_v37 = vld [vmem:[%s6787_s1 + $0x7d4] sm:$0xf0] }
  0xf0   :  { %2656 = vmatpush.bf16.msrb.mxu0 %v3060_v1  ;;  %v3172_v60 = vor.u32 %v4320_v49, %v3169_v50  ;;  %v4533_v1 = vld [vmem:[%s6787_s1 + $0x8e8] sm:$0xf0]  ;;  %v4177_v49 = vld [vmem:[%s6787_s1 + $0xa3c] sm:$0xf0]  ;;  %v3480_v50 = vor.u32 %v4397_v32, %v3477_v40 }
  0xf1   :  { %2631 = vmatpush.bf16.msra.mxu1 %v4148_v57  ;;  %v4264_v57 = vld [vmem:[%s6787_s1 + $0x84] sm:$0xf]  ;;  %v2354_v12 = vpop.f32.mrf.mxu3  ;;  %v4008_v14 = vor.u32 %v4533_v1, %v4007_v63  ;;  %v4149_v63 = vld [vmem:[%s6787_s1 + $0xa04] sm:$0xf0] }
  0xf2   :  { %2669 = vmatpush.bf16.msrb.mxu2 %v3284_v58  ;;  %v2945_v58 = vld [vmem:[%s6787_s1 + $0x9c] sm:$0xf0]  ;;  %v4558_v12 = vld [vmem:[%s6787_s1 + $0x9b4] sm:$0xf] }
  0xf3   :  { %2619 = vmatpush.bf16.msrb.mxu3 %v3896_v0  ;;  %v2341_v0 = vpop.f32.mrf.mxu1  ;;  %v2948_v5 = vor.u32 %v4264_v57, %v2945_v58  ;;  %v2378_v13 = vpop.f32.mrf.mxu0  ;;  %v3953_v57 = vld [vmem:[%s6787_s1 + $0x87c] sm:$0xf0]  ;;  %v3704_v58 = vor.u32 %v4453_v46, %v3701_v48 }
  0xf4   :  { %2657 = vmatpush.bf16.msrb.mxu0 %v3032_v17  ;;  %v4404_v17 = vld [vmem:[%s6787_s1 + $0x4e4] sm:$0xf]  ;;  %v2379_v22 = vadd.f32 %v2378_v13, %v2366_v51  ;;  %v2367_v27 = vpop.f32.mrf.mxu2  ;;  %v3984_v51 = vor.u32 %v4523_v41, %v3981_v42  ;;  %v3956_v1 = vor.u32 %v4516_v56, %v3953_v57  ;;  %v4121_v13 = vld [vmem:[%s6787_s1 + $0x9cc] sm:$0xf0]  ;;  %v4425_v41 = vld [vmem:[%s6787_s1 + $0x58c] sm:$0xf] }
  0xf5   :  { %2632 = vmatpush.bf16.msra.mxu1 %v4120_v7  ;;  %v3757_v7 = vld [vmem:[%s6787_s1 + $0x6f4] sm:$0xf0]  ;;  %v4124_v16 = vor.u32 %v4558_v12, %v4121_v13  ;;  %v3617_v27 = vld [vmem:[%s6787_s1 + $0x5dc] sm:$0xf0]  ;;  %v4530_v13 = vld [vmem:[%s6787_s1 + $0x8d4] sm:$0xf] }
  0xf6   :  { %2670 = vmatpush.bf16.msrb.mxu2 %v3256_v8  ;;  %v3536_v8 = vor.u32 %v4411_v61, %v3533_v62  ;;  %v3760_v23 = vor.u32 %v4467_v6, %v3757_v7  ;;  %v3673_v61 = vld [vmem:[%s6787_s1 + $0x64c] sm:$0xf0]  ;;  %v4565_v62 = vld [vmem:[%s6787_s1 + $0x9ec] sm:$0xf]  ;;  %v4065_v46 = vld [vmem:[%s6787_s1 + $0x95c] sm:$0xf0] }
  0xf7   :  { %2620 = vmatpush.bf16.msrb.mxu3 %v3868_v15  ;;  %v3144_v15 = vor.u32 %v4313_v2, %v3141_v3  ;;  %v4383_v2 = vld [vmem:[%s6787_s1 + $0x43c] sm:$0xf]  ;;  %v3421_v3 = vld [vmem:[%s6787_s1 + $0x454] sm:$0xf0]  ;;  %v4152_v7 = vor.u32 %v4565_v62, %v4149_v63  ;;  %v4537_v62 = vld [vmem:[%s6787_s1 + $0x90c] sm:$0xf] }
  0xf8   :  { %2658 = vmatpush.bf16.msrb.mxu0 %v3004_v34  ;;  %v3508_v34 = vor.u32 %v4404_v17, %v3505_v20  ;;  %v4376_v17 = vld [vmem:[%s6787_s1 + $0x404] sm:$0xf]  ;;  %v3393_v20 = vld [vmem:[%s6787_s1 + $0x41c] sm:$0xf0]  ;;  %v4037_v63 = vld [vmem:[%s6787_s1 + $0x924] sm:$0xf0] }
  0xf9   :  { %2633 = vmatpush.bf16.msra.mxu1 %v4092_v25  ;;  %4245 = vmatmul.msk.bf16.vlgmr.msra.gmra.mxu2 %vm2196_vm0, %v5029_v19  ;;  %v4460_v25 = vld [vmem:[%s6787_s1 + $0x6a4] sm:$0xf]  ;;  %v4040_v12 = vor.u32 %v4537_v62, %v4037_v63  ;;  %v3707_v63 = vld [vmem:[%s6787_s1 + $0x670] sm:$0xf] }
  0xfa   :  { %2671 = vmatpush.bf16.msrb.mxu2 %v3228_v26  ;;  %v3729_v26 = vld [vmem:[%s6787_s1 + $0x6bc] sm:$0xf0] }
  0xfb   :  { %2621 = vmatpush.bf16.msrb.mxu3 %v3840_v33  ;;  %v2844_v33 = vrot.slane %v2379_v22, 6  ;;  %v2380_v55 = vpop.f32.mrf.mxu0  ;;  %v3897_v22 = vld [vmem:[%s6787_s1 + $0x80c] sm:$0xf0] }
  0xfc   :  { %2659 = vmatpush.bf16.msrb.mxu0 %v2976_v53  ;;  %v3449_v53 = vld [vmem:[%s6787_s1 + $0x48c] sm:$0xf0]  ;;  %v3900_v32 = vor.u32 %v4502_v21, %v3897_v22 }
  0xfd   :  { %2634 = vmatpush.bf16.msra.mxu1 %v4064_v44  ;;  %v6279_v43 = vsel %vm2849_vm1, %v5955_v30, %v2844_v33  ;;  %v3732_v44 = vor.u32 %v4460_v25, %v3729_v26  ;;  %v4572_v30 = vld [vmem:[%s6787_s1 + $0xa24] sm:$0xf]  ;;  %v4369_v33 = vld [vmem:[%s6787_s1 + $0x3cc] sm:$0xf] }
  0xfe   :  { %2672 = vmatpush.bf16.msrb.mxu2 %v3200_v45  ;;  %v4208_v45 = vor.u32 %v4579_v29, %v4205_v31  ;;  %v4432_v26 = vld [vmem:[%s6787_s1 + $0x5c4] sm:$0xf]  ;;  %v4093_v29 = vld [vmem:[%s6787_s1 + $0x994] sm:$0xf0]  ;;  %v3396_v31 = vor.u32 %v4376_v17, %v3393_v20  ;;  %v3063_v17 = vld [vmem:[%s6787_s1 + $0x168] sm:$0xf] }
  0xff   :  { %2622 = vmatpush.bf16.msrb.mxu3 %v3812_v52  ;;  %v4390_v52 = vld [vmem:[%s6787_s1 + $0x474] sm:$0xf]  ;;  %v4296_v20 = vld [vmem:[%s6787_s1 + $0x180] sm:$0xf0] }
 0x100   :  { %2660 = vmatpush.bf16.msrb.mxu0 %v2948_v5  ;;  %v3452_v0 = vor.u32 %v4390_v52, %v3449_v53  ;;  %v3925_v5 = vld [vmem:[%s6787_s1 + $0x844] sm:$0xf0]  ;;  %v4488_v52 = vld [vmem:[%s6787_s1 + $0x784] sm:$0xf]  ;;  %v3841_v53 = vld [vmem:[%s6787_s1 + $0x79c] sm:$0xf0] }
 0x101   :  { %2635 = vmatpush.bf16.msra.mxu1 %v4036_v59  ;;  %v4180_v59 = vor.u32 %v4572_v30, %v4177_v49  ;;  %v6335_v9 = vpop.f32.mrf.mxu1  ;;  %v3872_v30 = vor.u32 %v4495_v36, %v3869_v37  ;;  %v4362_v49 = vld [vmem:[%s6787_s1 + $0x394] sm:$0xf]  ;;  %v4415_v36 = vld [vmem:[%s6787_s1 + $0x538] sm:$0xf0] }
 0x102   :  { %2673 = vmatpush.bf16.msrb.mxu2 %v3172_v60  ;;  %v4446_v60 = vld [vmem:[%s6787_s1 + $0x634] sm:$0xf] }
 0x103   :  { %2623 = vmatpush.bf16.msrb.mxu3 %v3784_v4  ;;  %v4509_v4 = vld [vmem:[%s6787_s1 + $0x82c] sm:$0xf]  ;;  %v3676_v6 = vor.u32 %v4446_v60, %v3673_v61  ;;  %v4233_v60 = vld [vmem:[%s6787_s1 + $0xaac] sm:$0xf0] }
 0x104   :  { %2661 = vmatpush.bf16.msrb.mxu0 %v2920_v28  ;;  %v6359_v25 = vpop.f32.mrf.mxu0  ;;  %v4551_v28 = vld [vmem:[%s6787_s1 + $0x97c] sm:$0xf]  ;;  %v3561_v61 = vld [vmem:[%s6787_s1 + $0x56c] sm:$0xf0] }
 0x105   :  { %2636 = vmatpush.bf16.msra.mxu1 %v4008_v14  ;;  %v3424_v14 = vor.u32 %v4383_v2, %v3421_v3  ;;  %v4096_v40 = vor.u32 %v4551_v28, %v4093_v29  ;;  %v3091_v2 = vld [vmem:[%s6787_s1 + $0x1a0] sm:$0xf]  ;;  %v4303_v3 = vld [vmem:[%s6787_s1 + $0x1b8] sm:$0xf0]  ;;  %v4352_v29 = vld [vmem:[%s6787_s1 + $0x340] sm:$0xf0] }
 0x106   :  { %2674 = vmatpush.bf16.msrb.mxu2 %v3144_v15  ;;  %2624 = vmatmul.bf16.vlgmr.msrb.gmra.mxu3 %v5054_v35  ;;  %v3928_v15 = vor.u32 %v4509_v4, %v3925_v5  ;;  %v3315_v4 = vld [vmem:[%s6787_s1 + $0x360] sm:$0xf]  ;;  %v4471_v28 = vld [vmem:[%s6787_s1 + $0x6f8] sm:$0xf0] }
 0x107   :  { %2681 = vmatpush.bf16.msra.mxu3 %v3536_v8  ;;  %v4439_v8 = vld [vmem:[%s6787_s1 + $0x5fc] sm:$0xf] }
 0x108   :  { %2637 = vmatmul.bf16.vlgmr.msra.gmra.mxu1 %v5062_v39  ;;  %2662 = vmatpush.bf16.msrb.mxu0 %v2892_v47 }
 0x109   :  { %2694 = vmatpush.bf16.msrb.mxu1 %v3760_v23  ;;  %v3648_v23 = vor.u32 %v4439_v8, %v3645_v11  ;;  %v2393_v42 = vpop.f32.mrf.mxu1  ;;  %v3813_v8 = vld [vmem:[%s6787_s1 + $0x764] sm:$0xf0] }
 0x10a   :  { %2675 = vmatpush.bf16.msrb.mxu2 %v3116_v38  ;;  %v3620_v38 = vor.u32 %v4432_v26, %v3617_v27  ;;  %v3763_v27 = vld [vmem:[%s6787_s1 + $0x6e0] sm:$0xf] }
 0x10b   :  { %2682 = vmatpush.bf16.msra.mxu3 %v3508_v34  ;;  %2663 = vmatmul.bf16.vlgmr.msrb.gmra.mxu0 %v4888_v10  ;;  %v3365_v34 = vld [vmem:[%s6787_s1 + $0x3e4] sm:$0xf0] }
 0x10c   :  { %2707 = vmatpush.bf16.msra.mxu0 %v3984_v51  ;;  %v6397_v47 = vpop.f32.mrf.mxu2  ;;  %v3368_v48 = vor.u32 %v4369_v33, %v3365_v34  ;;  %v3337_v51 = vld [vmem:[%s6787_s1 + $0x3ac] sm:$0xf0]  ;;  %v2419_v57 = vpop.f32.mrf.mxu0  ;;  %v3539_v34 = vld [vmem:[%s6787_s1 + $0x520] sm:$0xf] }
 0x10d   :  { %2695 = vmatpush.bf16.msrb.mxu1 %v3732_v44  ;;  %2676 = vmatmul.bf16.vlgmr.msrb.gmra.mxu2 %v4903_v18  ;;  %v3589_v44 = vld [vmem:[%s6787_s1 + $0x5a4] sm:$0xf0]  ;;  %v3007_v57 = vld [vmem:[%s6787_s1 + $0xf8] sm:$0xf] }
 0x10e   :  { %2720 = vmatpush.bf16.msra.mxu2 %v4208_v45  ;;  %v4544_v45 = vld [vmem:[%s6787_s1 + $0x944] sm:$0xf]  ;;  %v3592_v55 = vor.u32 %v4425_v41, %v3589_v44  ;;  %v3035_v44 = vld [vmem:[%s6787_s1 + $0x130] sm:$0xf] }
 0x10f   :  { %2683 = vmatpush.bf16.msra.mxu3 %v3480_v50  ;;  %v6402_v50 = vpop.f32.mrf.mxu3  ;;  %v4068_v56 = vor.u32 %v4544_v45, %v4065_v46  ;;  %v4289_v45 = vld [vmem:[%s6787_s1 + $0x148] sm:$0xf0]  ;;  %v3259_v46 = vld [vmem:[%s6787_s1 + $0x2f0] sm:$0xf] }
 0x110   :  { %2708 = vmatpush.bf16.msra.mxu0 %v3956_v1  ;;  %v3844_v1 = vor.u32 %v4488_v52, %v3841_v53  ;;  %v3511_v52 = vld [vmem:[%s6787_s1 + $0x4e8] sm:$0xf]  ;;  %v4408_v53 = vld [vmem:[%s6787_s1 + $0x500] sm:$0xf0] }
 0x111   :  { %2696 = vmatpush.bf16.msrb.mxu1 %v3704_v58  ;;  %v4418_v58 = vld [vmem:[%s6787_s1 + $0x554] sm:$0xf]  ;;  %v3512_v62 = vor.u32 %v4408_v53, %v3511_v52  ;;  %v3623_v53 = vld [vmem:[%s6787_s1 + $0x5c8] sm:$0xf] }
 0x112   :  { %2721 = vmatpush.bf16.msra.mxu2 %v4180_v59  ;;  %v4586_v59 = vld [vmem:[%s6787_s1 + $0xa94] sm:$0xf]  ;;  %v3564_v11 = vor.u32 %v4418_v58, %v3561_v61 }
 0x113   :  { %2684 = vmatpush.bf16.msra.mxu3 %v3452_v0  ;;  %v3340_v0 = vor.u32 %v4362_v49, %v3337_v51  ;;  %v4236_v5 = vor.u32 %v4586_v59, %v4233_v60  ;;  %v3735_v49 = vld [vmem:[%s6787_s1 + $0x6a8] sm:$0xf]  ;;  %v4464_v51 = vld [vmem:[%s6787_s1 + $0x6c0] sm:$0xf0]  ;;  %v4282_v58 = vld [vmem:[%s6787_s1 + $0x110] sm:$0xf0] }
 0x114   :  { %2709 = vmatpush.bf16.msra.mxu0 %v3928_v15  ;;  %v4009_v15 = vld [vmem:[%s6787_s1 + $0x8ec] sm:$0xf0]  ;;  %v2432_v21 = vpop.f32.mrf.mxu2  ;;  %v6485_v37 = vpop.f32.mrf.mxu0  ;;  %v3231_v59 = vld [vmem:[%s6787_s1 + $0x2b8] sm:$0xf]  ;;  %v3736_v60 = vor.u32 %v4464_v51, %v3735_v49  ;;  %v4338_v61 = vld [vmem:[%s6787_s1 + $0x2d0] sm:$0xf0] }
 0x115   :  { %2697 = vmatpush.bf16.msrb.mxu1 %v3676_v6  ;;  %v4359_v6 = vld [vmem:[%s6787_s1 + $0x378] sm:$0xf0]  ;;  %v4012_v33 = vor.u32 %v4530_v13, %v4009_v15  ;;  %v3679_v15 = vld [vmem:[%s6787_s1 + $0x638] sm:$0xf]  ;;  %v4394_v21 = vld [vmem:[%s6787_s1 + $0x490] sm:$0xf0] }
 0x116   :  { %2722 = vmatpush.bf16.msra.mxu2 %v4152_v7  ;;  %v4481_v7 = vld [vmem:[%s6787_s1 + $0x74c] sm:$0xf]  ;;  %v3316_v22 = vor.u32 %v4359_v6, %v3315_v4  ;;  %v3232_v6 = vor.u32 %v4338_v61, %v3231_v59  ;;  %v4331_v13 = vld [vmem:[%s6787_s1 + $0x298] sm:$0xf0]  ;;  %v2895_v59 = vld [vmem:[%s6787_s1 + $0x18] sm:$0xf] }
 0x117   :  { %2685 = vmatpush.bf16.msra.mxu3 %v3424_v14  ;;  %v3092_v14 = vor.u32 %v4303_v3, %v3091_v2  ;;  %v2406_v26 = vpop.f32.mrf.mxu3  ;;  %v4401_v2 = vld [vmem:[%s6787_s1 + $0x4c8] sm:$0xf0]  ;;  %v4254_v61 = vld [vmem:[%s6787_s1 + $0x30] sm:$0xf0] }
 0x118   :  { %2710 = vmatpush.bf16.msra.mxu0 %v3900_v32  ;;  %v3785_v32 = vld [vmem:[%s6787_s1 + $0x72c] sm:$0xf0]  ;;  %v4268_v26 = vld [vmem:[%s6787_s1 + $0xa0] sm:$0xf0]  ;;  %v4317_v51 = vld [vmem:[%s6787_s1 + $0x228] sm:$0xf0] }
 0x119   :  { %2698 = vmatpush.bf16.msrb.mxu1 %v3648_v23  ;;  %v3816_v23 = vor.u32 %v4481_v7, %v3813_v8  ;;  %v2979_v7 = vld [vmem:[%s6787_s1 + $0xc0] sm:$0xf]  ;;  %v4275_v8 = vld [vmem:[%s6787_s1 + $0xd8] sm:$0xf0] }
 0x11a   :  { %2723 = vmatpush.bf16.msra.mxu2 %v4124_v16  ;;  %v3287_v16 = vld [vmem:[%s6787_s1 + $0x328] sm:$0xf] }
 0x11b   :  { %2686 = vmatpush.bf16.msra.mxu3 %v3396_v31  ;;  %v4474_v31 = vld [vmem:[%s6787_s1 + $0x714] sm:$0xf]  ;;  %v3288_v41 = vor.u32 %v4352_v29, %v3287_v16  ;;  %v2951_v16 = vld [vmem:[%s6787_s1 + $0x88] sm:$0xf]  ;;  %v4324_v29 = vld [vmem:[%s6787_s1 + $0x260] sm:$0xf0] }
 0x11c   :  { %2711 = vmatpush.bf16.msra.mxu0 %v3872_v30  ;;  %v3788_v42 = vor.u32 %v4474_v31, %v3785_v32  ;;  %v3540_v30 = vor.u32 %v4415_v36, %v3539_v34  ;;  %v2471_v3 = vpop.f32.mrf.mxu0  ;;  %v3651_v32 = vld [vmem:[%s6787_s1 + $0x600] sm:$0xf] }
 0x11d   :  { %2699 = vmatpush.bf16.msrb.mxu1 %v3620_v38  ;;  %v3064_v38 = vor.u32 %v4296_v20, %v3063_v17  ;;  %v4450_v17 = vld [vmem:[%s6787_s1 + $0x650] sm:$0xf0]  ;;  %v3455_v20 = vld [vmem:[%s6787_s1 + $0x478] sm:$0xf]  ;;  %v3427_v36 = vld [vmem:[%s6787_s1 + $0x440] sm:$0xf] }
 0x11e   :  { %2724 = vmatpush.bf16.msra.mxu2 %v4096_v40  ;;  %v3764_v40 = vor.u32 %v4471_v28, %v3763_v27  ;;  %v3175_v27 = vld [vmem:[%s6787_s1 + $0x248] sm:$0xf]  ;;  %v3680_v28 = vor.u32 %v4450_v17, %v3679_v15  ;;  %v3456_v31 = vor.u32 %v4394_v21, %v3455_v20  ;;  %v4211_v3 = vld [vmem:[%s6787_s1 + $0xa60] sm:$0xf] }
 0x11f   :  { %2687 = vmatpush.bf16.msra.mxu3 %v3368_v48  ;;  %v4345_v48 = vld [vmem:[%s6787_s1 + $0x308] sm:$0xf0]  ;;  %v3959_v20 = vld [vmem:[%s6787_s1 + $0x868] sm:$0xf] }
 0x120   :  { %2712 = vmatpush.bf16.msra.mxu0 %v3844_v1  ;;  %v3483_v1 = vld [vmem:[%s6787_s1 + $0x4b0] sm:$0xf] }
 0x121   :  { %2700 = vmatpush.bf16.msrb.mxu1 %v3592_v55  ;;  %v3036_v55 = vor.u32 %v4289_v45, %v3035_v44  ;;  %v6538_v4 = vpop.f32.mrf.mxu1  ;;  %v2923_v44 = vld [vmem:[%s6787_s1 + $0x50] sm:$0xf]  ;;  %v4261_v45 = vld [vmem:[%s6787_s1 + $0x68] sm:$0xf0] }
 0x122   :  { %2725 = vmatpush.bf16.msra.mxu2 %v4068_v56  ;;  %v3260_v56 = vor.u32 %v4345_v48, %v3259_v46  ;;  %v3147_v46 = vld [vmem:[%s6787_s1 + $0x210] sm:$0xf] }
 0x123   :  { %2688 = vmatpush.bf16.msra.mxu3 %v3340_v0  ;;  %v4457_v0 = vld [vmem:[%s6787_s1 + $0x688] sm:$0xf0] }
 0x124   :  { %2713 = vmatpush.bf16.msra.mxu0 %v3816_v23 }
 0x125   :  { %2701 = vmatpush.bf16.msrb.mxu1 %v3564_v11  ;;  %v3203_v11 = vld [vmem:[%s6787_s1 + $0x280] sm:$0xf] }
 0x126   :  { %2726 = vmatpush.bf16.msra.mxu2 %v4040_v12  ;;  %2689 = vmatmul.bf16.vlgmr.msra.gmra.mxu3 %v4849_v54  ;;  %v3708_v12 = vor.u32 %v4457_v0, %v3707_v63  ;;  %v3204_v23 = vor.u32 %v4331_v13, %v3203_v11  ;;  %v4310_v63 = vld [vmem:[%s6787_s1 + $0x1f0] sm:$0xf0]  ;;  %v3595_v13 = vld [vmem:[%s6787_s1 + $0x590] sm:$0xf] }
 0x127   :  { %2740 = vmatpush.bf16.msrb.mxu3 %v4236_v5  ;;  %v3008_v5 = vor.u32 %v4282_v58, %v3007_v57  ;;  %v4380_v57 = vld [vmem:[%s6787_s1 + $0x420] sm:$0xf0]  ;;  %v2924_v58 = vor.u32 %v4261_v45, %v2923_v44  ;;  %v3931_v44 = vld [vmem:[%s6787_s1 + $0x830] sm:$0xf]  ;;  %v4513_v45 = vld [vmem:[%s6787_s1 + $0x848] sm:$0xf0] }
 0x128   :  { %2702 = vmatmul.bf16.vlgmr.msrb.gmra.mxu1 %v4911_v24  ;;  %2714 = vmatpush.bf16.msra.mxu0 %v3788_v42  ;;  %v3176_v42 = vor.u32 %v4324_v29, %v3175_v27  ;;  %v6604_v49 = vpop.f32.mrf.mxu0  ;;  %v4576_v27 = vld [vmem:[%s6787_s1 + $0xa40] sm:$0xf0]  ;;  %v3343_v29 = vld [vmem:[%s6787_s1 + $0x398] sm:$0xf] }
 0x129   :  { %2746 = vmatpush.bf16.msra.mxu1 %v3092_v14  ;;  %v3484_v14 = vor.u32 %v4401_v2, %v3483_v1  ;;  %v6583_v34 = vpop.f32.mrf.mxu3  ;;  %v3987_v1 = vld [vmem:[%s6787_s1 + $0x8a0] sm:$0xf]  ;;  %v4527_v2 = vld [vmem:[%s6787_s1 + $0x8b8] sm:$0xf0] }
 0x12a   :  { %2727 = vmatpush.bf16.msra.mxu2 %v4012_v33  ;;  %v4443_v33 = vld [vmem:[%s6787_s1 + $0x618] sm:$0xf0]  ;;  %v3988_v17 = vor.u32 %v4527_v2, %v3987_v1 }
 0x12b   :  { %2759 = vmatpush.bf16.msra.mxu3 %v3316_v22  ;;  %2715 = vmatmul.bf16.vlgmr.msra.gmra.mxu0 %v5054_v35  ;;  %v2980_v22 = vor.u32 %v4275_v8, %v2979_v7  ;;  %v3371_v7 = vld [vmem:[%s6787_s1 + $0x3d0] sm:$0xf]  ;;  %v4373_v8 = vld [vmem:[%s6787_s1 + $0x3e8] sm:$0xf0]  ;;  %v4499_v1 = vld [vmem:[%s6787_s1 + $0x7d8] sm:$0xf0] }
 0x12c   :  { %2772 = vmatpush.bf16.msrb.mxu0 %v3540_v30  ;;  %v6602_v48 = vpop.f32.mrf.mxu2  ;;  %v3652_v30 = vor.u32 %v4443_v33, %v3651_v32  ;;  %v3567_v33 = vld [vmem:[%s6787_s1 + $0x558] sm:$0xf] }
 0x12d   :  { %2747 = vmatpush.bf16.msra.mxu1 %v3064_v38  ;;  %2728 = vmatmul.bf16.vlgmr.msra.gmra.mxu2 %v5062_v39  ;;  %v4387_v38 = vld [vmem:[%s6787_s1 + $0x458] sm:$0xf0] }
 0x12e   :  { %2785 = vmatpush.bf16.msrb.mxu2 %v3764_v40  ;;  %v2952_v40 = vor.u32 %v4268_v26, %v2951_v16  ;;  %v3428_v52 = vor.u32 %v4387_v38, %v3427_v36  ;;  %v4520_v16 = vld [vmem:[%s6787_s1 + $0x880] sm:$0xf0]  ;;  %v4183_v26 = vld [vmem:[%s6787_s1 + $0xa28] sm:$0xf]  ;;  %v4422_v36 = vld [vmem:[%s6787_s1 + $0x570] sm:$0xf0] }
 0x12f   :  { %2760 = vmatpush.bf16.msra.mxu3 %v3288_v41  ;;  %v2445_v41 = vpop.f32.mrf.mxu1  ;;  %v4239_v38 = vld [vmem:[%s6787_s1 + $0xa98] sm:$0xf] }
 0x130   :  { %2773 = vmatpush.bf16.msrb.mxu0 %v3512_v62  ;;  %v3119_v62 = vld [vmem:[%s6787_s1 + $0x1d8] sm:$0xf]  ;;  %v3960_v41 = vor.u32 %v4520_v16, %v3959_v20  ;;  %v3819_v20 = vld [vmem:[%s6787_s1 + $0x750] sm:$0xf] }
 0x131   :  { %2748 = vmatpush.bf16.msra.mxu1 %v3036_v55  ;;  %v4436_v55 = vld [vmem:[%s6787_s1 + $0x5e0] sm:$0xf0]  ;;  %v2458_v11 = vpop.f32.mrf.mxu3  ;;  %v3120_v15 = vor.u32 %v4310_v63, %v3119_v62 }
 0x132   :  { %2786 = vmatpush.bf16.msrb.mxu2 %v3736_v60  ;;  %v3148_v60 = vor.u32 %v4317_v51, %v3147_v46  ;;  %v3624_v0 = vor.u32 %v4436_v55, %v3623_v53  ;;  %v4569_v51 = vld [vmem:[%s6787_s1 + $0xa08] sm:$0xf0]  ;;  %v3932_v55 = vor.u32 %v4513_v45, %v3931_v44 }
 0x133   :  { %2761 = vmatpush.bf16.msra.mxu3 %v3260_v56  ;;  %v3399_v56 = vld [vmem:[%s6787_s1 + $0x408] sm:$0xf] }
 0x134   :  { %2774 = vmatpush.bf16.msrb.mxu0 %v3484_v14  ;;  %v4429_v14 = vld [vmem:[%s6787_s1 + $0x5a8] sm:$0xf0]  ;;  %v2484_v21 = vpop.f32.mrf.mxu2 }
 0x135   :  { %2749 = vmatpush.bf16.msra.mxu1 %v3008_v5  ;;  %v3400_v5 = vor.u32 %v4380_v57, %v3399_v56  ;;  %v3596_v32 = vor.u32 %v4429_v14, %v3595_v13  ;;  %v3903_v57 = vld [vmem:[%s6787_s1 + $0x7f8] sm:$0xf]  ;;  %v4485_v21 = vld [vmem:[%s6787_s1 + $0x768] sm:$0xf0] }
 0x136   :  { %2787 = vmatpush.bf16.msrb.mxu2 %v3708_v12  ;;  %4246 = vmatmul.msk.bf16.vlgmr.msrb.gmra.mxu3 %vm2196_vm0, %v5029_v19  ;;  %v2896_v12 = vor.u32 %v4254_v61, %v2895_v59  ;;  %v2405_v59 = vadd.f32 %v6402_v50, %v6335_v9  ;;  %v4099_v9 = vld [vmem:[%s6787_s1 + $0x980] sm:$0xf]  ;;  %v3820_v16 = vor.u32 %v4485_v21, %v3819_v20 }
 0x137   :  { %2762 = vmatpush.bf16.msra.mxu3 %v3232_v6  ;;  %v4583_v6 = vld [vmem:[%s6787_s1 + $0xa78] sm:$0xf0] }
 0x138   :  { %2775 = vmatpush.bf16.msrb.mxu0 %v3456_v31  ;;  %v4366_v31 = vld [vmem:[%s6787_s1 + $0x3b0] sm:$0xf0]  ;;  %v2418_v50 = vadd.f32 %v6359_v25, %v2405_v59  ;;  %v4548_v25 = vld [vmem:[%s6787_s1 + $0x960] sm:$0xf0] }
 0x139   :  { %2750 = vmatpush.bf16.msra.mxu1 %v2980_v22  ;;  %v2497_v22 = vpop.f32.mrf.mxu0  ;;  %v3344_v46 = vor.u32 %v4366_v31, %v3343_v29  ;;  %v4015_v29 = vld [vmem:[%s6787_s1 + $0x8d8] sm:$0xf] }
 0x13a   :  { %2788 = vmatpush.bf16.msrb.mxu2 %v3680_v28  ;;  %v3372_v28 = vor.u32 %v4373_v8, %v3371_v7 }
 0x13b   :  { %2763 = vmatpush.bf16.msra.mxu3 %v3204_v23  ;;  %v4212_v23 = vor.u32 %v4583_v6, %v4211_v3  ;;  %v3847_v3 = vld [vmem:[%s6787_s1 + $0x788] sm:$0xf]  ;;  %v2431_v6 = vadd.f32 %v6397_v47, %v2418_v50  ;;  %v4043_v47 = vld [vmem:[%s6787_s1 + $0x910] sm:$0xf] }
 0x13c   :  { %2776 = vmatpush.bf16.msrb.mxu0 %v3428_v52  ;;  %v3568_v52 = vor.u32 %v4422_v36, %v3567_v33 }
 0x13d   :  { %2751 = vmatpush.bf16.msra.mxu1 %v2952_v40  ;;  %v4590_v40 = vld [vmem:[%s6787_s1 + $0xab0] sm:$0xf0]  ;;  %v2444_v13 = vadd.f32 %v6538_v4, %v2431_v6  ;;  %v4541_v4 = vld [vmem:[%s6787_s1 + $0x928] sm:$0xf0] }
 0x13e   :  { %2789 = vmatpush.bf16.msrb.mxu2 %v3652_v30  ;;  %v4155_v30 = vld [vmem:[%s6787_s1 + $0x9f0] sm:$0xf]  ;;  %v4240_v53 = vor.u32 %v4590_v40, %v4239_v38 }
 0x13f   :  { %2764 = vmatpush.bf16.msra.mxu3 %v3176_v42  ;;  %v4184_v42 = vor.u32 %v4576_v27, %v4183_v26  ;;  %v4156_v56 = vor.u32 %v4569_v51, %v4155_v30  ;;  %v2457_v22 = vadd.f32 %v6583_v34, %v2444_v13  ;;  %v4044_v26 = vor.u32 %v4541_v4, %v4043_v47  ;;  %v3791_v27 = vld [vmem:[%s6787_s1 + $0x718] sm:$0xf]  ;;  %v4534_v34 = vld [vmem:[%s6787_s1 + $0x8f0] sm:$0xf0] }
 0x140   :  { %2777 = vmatpush.bf16.msrb.mxu0 %v3400_v5  ;;  %v4071_v5 = vld [vmem:[%s6787_s1 + $0x948] sm:$0xf] }
 0x141   :  { %2752 = vmatpush.bf16.msra.mxu1 %v2924_v58  ;;  %v4506_v58 = vld [vmem:[%s6787_s1 + $0x810] sm:$0xf0]  ;;  %v2508_v61 = vpop.f32.mrf.mxu1  ;;  %v2470_v31 = vadd.f32 %v6485_v37, %v2457_v22 }
 0x142   :  { %2790 = vmatpush.bf16.msrb.mxu2 %v3624_v0  ;;  %v3904_v62 = vor.u32 %v4506_v58, %v3903_v57  ;;  %v3875_v0 = vld [vmem:[%s6787_s1 + $0x7c0] sm:$0xf] }
 0x143   :  { %2765 = vmatpush.bf16.msra.mxu3 %v3148_v60  ;;  %v2496_v60 = vadd.f32 %v6604_v49, %v6602_v48  ;;  %v3876_v49 = vor.u32 %v4499_v1, %v3875_v0  ;;  %v2845_v45 = vrot.slane %v2470_v31, 4 }
 0x144   :  { %2778 = vmatpush.bf16.msrb.mxu0 %v3372_v28  ;;  %v4478_v28 = vld [vmem:[%s6787_s1 + $0x730] sm:$0xf0] }
 0x145   :  { %2753 = vmatpush.bf16.msra.mxu1 %v2896_v12  ;;  %v2509_v48 = vadd.f32 %v2508_v61, %v2496_v60  ;;  %v3792_v38 = vor.u32 %v4478_v28, %v3791_v27 }
 0x146   :  { %2791 = vmatpush.bf16.msrb.mxu2 %v3596_v32 }
 0x147   :  { %2766 = vmatpush.bf16.msra.mxu3 %v3120_v15 }
 0x148   :  { %2754 = vmatmul.bf16.vlgmr.msra.gmra.mxu1 %v4888_v10  ;;  %2779 = vmatpush.bf16.msrb.mxu0 %v3344_v46  ;;  %v4127_v10 = vld [vmem:[%s6787_s1 + $0x9b8] sm:$0xf]  ;;  %v2547_v15 = vpop.f32.mrf.mxu0 }
 0x149   :  { %2798 = vmatpush.bf16.msrb.mxu1 %v3988_v17  ;;  %v2521_v7 = vpop.f32.mrf.mxu3  ;;  %v2510_v11 = vpop.f32.mrf.mxu1  ;;  %v4072_v17 = vor.u32 %v4548_v25, %v4071_v5 }
 0x14a   :  { %2767 = vmatmul.bf16.vlgmr.msra.gmra.mxu3 %v4903_v18  ;;  %v4562_v18 = vld [vmem:[%s6787_s1 + $0x9d0] sm:$0xf0]  ;;  %2792 = vmatpush.bf16.msrb.mxu2 %v3568_v52  ;;  %v2522_v8 = vadd.f32 %v2521_v7, %v2509_v48 }
 0x14b   :  { %2811 = vmatpush.bf16.msrb.mxu3 %v4212_v23  ;;  %2780 = vmatmul.bf16.vlgmr.msrb.gmra.mxu0 %v4849_v54  ;;  %v4128_v63 = vor.u32 %v4562_v18, %v4127_v10  ;;  %v4555_v54 = vld [vmem:[%s6787_s1 + $0x998] sm:$0xf0] }
 0x14c   :  { %2831 = vmatpush.bf16.msra.mxu0 %v4240_v53  ;;  %v4100_v2 = vor.u32 %v4555_v54, %v4099_v9  ;;  %v2534_v14 = vpop.f32.mrf.mxu2 }
 0x14d   :  { %2799 = vmatpush.bf16.msrb.mxu1 %v3960_v41  ;;  %2793 = vmatmul.bf16.vlgmr.msrb.gmra.mxu2 %v4911_v24  ;;  %v4492_v24 = vld [vmem:[%s6787_s1 + $0x7a0] sm:$0xf0]  ;;  %v2535_v23 = vadd.f32 %v2534_v14, %v2522_v8  ;;  %v4016_v41 = vor.u32 %v4534_v34, %v4015_v29 }
 0x14e   :  { %v3848_v12 = vor.u32 %v4492_v24, %v3847_v3 }
 0x14f   :  { %2812 = vmatpush.bf16.msrb.mxu3 %v4184_v42  ;;  %v2548_v32 = vadd.f32 %v2547_v15, %v2535_v23 }
 0x150   :  { %v2549_v44 = vpop.f32.mrf.mxu0 }
 0x151   :  { %2800 = vmatpush.bf16.msrb.mxu1 %v3932_v55  ;;  %v2523_v33 = vpop.f32.mrf.mxu3  ;;  %v2560_v36 = vpop.f32.mrf.mxu1 }
 0x152   :  { %v2561_v40 = vadd.f32 %v2560_v36, %v2548_v32 }
 0x153   :  { %2813 = vmatpush.bf16.msrb.mxu3 %v4156_v56 }
 0x154   :  { %v2536_v42 = vpop.f32.mrf.mxu2  ;;  %v2846_v46 = vrot.slane %v2561_v40, 2 }
 0x155   :  { %2801 = vmatpush.bf16.msrb.mxu1 %v3904_v62 }
 0x156   :  { %v2852_v30 = vsel %vm2851_vm2, %v2845_v45, %v2846_v46 }
 0x157   :  { %2814 = vmatpush.bf16.msrb.mxu3 %v4128_v63  ;;  %v2854_v37 = vsel %vm2853_vm3, %v6279_v43, %v2852_v30 }
 0x158   :  { %2859 = vst [vmem:[%s6789_s2] sm:$0xff] %v2854_v37 }
 0x159   :  { %2802 = vmatpush.bf16.msrb.mxu1 %v3876_v49 }
 0x15b   :  { %2815 = vmatpush.bf16.msrb.mxu3 %v4100_v2  ;;  %4247 = vmatmul.msk.bf16.vlgmr.msra.gmra.mxu0 %vm2196_vm0, %v5029_v19  ;;  %v2562_v19 = vpop.f32.mrf.mxu1 }
 0x15d   :  { %2803 = vmatpush.bf16.msrb.mxu1 %v3848_v12 }
 0x15f   :  { %2816 = vmatpush.bf16.msrb.mxu3 %v4072_v17 }
 0x161   :  { %2804 = vmatpush.bf16.msrb.mxu1 %v3820_v16 }
 0x163   :  { %2817 = vmatpush.bf16.msrb.mxu3 %v4044_v26 }
 0x165   :  { %2805 = vmatpush.bf16.msrb.mxu1 %v3792_v38  ;;  %v2586_v51 = vpop.f32.mrf.mxu1 }
 0x167   :  { %2818 = vmatpush.bf16.msrb.mxu3 %v4016_v41 }
 0x168   :  { %2806 = vmatmul.bf16.vlgmr.msrb.gmra.mxu1 %v5054_v35  ;;  %v2612_v57 = vpop.f32.mrf.mxu0 }
 0x169   :  { %v2573_v52 = vpop.f32.mrf.mxu3 }
 0x16a   :  { %2819 = vmatmul.bf16.vlgmr.msrb.gmra.mxu3 %v5062_v39  ;;  %v2587_v55 = vadd.f32 %v2586_v51, %v2573_v52 }
 0x16c   :  { %v2599_v53 = vpop.f32.mrf.mxu2 }
 0x16d   :  { %v2588_v56 = vpop.f32.mrf.mxu1  ;;  %v2600_v58 = vadd.f32 %v2599_v53, %v2587_v55 }
 0x16f   :  { %v2613_v10 = vadd.f32 %v2612_v57, %v2600_v58 }
 0x170   :  { %v2614_v43 = vpop.f32.mrf.mxu0 }
 0x171   :  { %v2575_v18 = vpop.f32.mrf.mxu3 }
 0x174   :  { %v2601_v59 = vpop.f32.mrf.mxu2 }
 0x17c   :  { %v2651_v60 = vpop.f32.mrf.mxu2 }
 0x184   :  { %v2653_v62 = vpop.f32.mrf.mxu2 }
 0x185   :  { %v2638_v61 = vpop.f32.mrf.mxu1 }
 0x188   :  { %v2664_v1 = vpop.f32.mrf.mxu0 }
 0x189   :  { %v2625_v63 = vpop.f32.mrf.mxu3 }
 0x18a   :  { %v2626_v0 = vadd.f32 %v2625_v63, %v2613_v10 }
 0x18c   :  { %v2639_v35 = vadd.f32 %v2638_v61, %v2626_v0 }
 0x18d   :  { %v2640_v39 = vpop.f32.mrf.mxu1 }
 0x18e   :  { %v2652_v9 = vadd.f32 %v2651_v60, %v2639_v35 }
 0x190   :  { %v2677_v54 = vpop.f32.mrf.mxu2  ;;  %v2666_v49 = vpop.f32.mrf.mxu0 }
 0x191   :  { %v2627_v50 = vpop.f32.mrf.mxu3  ;;  %v2678_v48 = vadd.f32 %v2677_v54, %v2664_v1 }
 0x198   :  { %v2679_v2 = vpop.f32.mrf.mxu2 }
 0x1a5   :  { %v2703_v3 = vpop.f32.mrf.mxu1 }
 0x1a8   :  { %v2716_v5 = vpop.f32.mrf.mxu0 }
 0x1a9   :  { %v2690_v24 = vpop.f32.mrf.mxu3 }
 0x1aa   :  { %v2691_v25 = vadd.f32 %v2690_v24, %v2678_v48 }
 0x1ac   :  { %v2704_v8 = vadd.f32 %v2703_v3, %v2691_v25 }
 0x1ad   :  { %v2705_v6 = vpop.f32.mrf.mxu1 }
 0x1ae   :  { %v2717_v13 = vadd.f32 %v2716_v5, %v2704_v8 }
 0x1b0   :  { %v2729_v7 = vpop.f32.mrf.mxu2  ;;  %v2718_v12 = vpop.f32.mrf.mxu0 }
 0x1b1   :  { %v2692_v11 = vpop.f32.mrf.mxu3  ;;  %v2730_v15 = vadd.f32 %v2729_v7, %v2717_v13 }
 0x1b8   :  { %v2731_v14 = vpop.f32.mrf.mxu2 }
 0x1b9   :  { %v2742_v17 = vpop.f32.mrf.mxu3 }
 0x1ba   :  { %v2743_v20 = vadd.f32 %v2742_v17, %v2730_v15 }
 0x1bc   :  { %v2847_v21 = vrot.slane %v2743_v20, 6 }
 0x1be   :  { %v2855_v47 = vsel %vm2849_vm1, %v2652_v9, %v2847_v21 }
 0x1c1   :  { %v2744_v4 = vpop.f32.mrf.mxu3 }
 0x1c5   :  { %v2755_v22 = vpop.f32.mrf.mxu1 }
 0x1c8   :  { %v2781_v23 = vpop.f32.mrf.mxu0 }
 0x1cd   :  { %v2768_v16 = vpop.f32.mrf.mxu3  ;;  %v2757_v26 = vpop.f32.mrf.mxu1 }
 0x1ce   :  { %v2769_v32 = vadd.f32 %v2768_v16, %v2755_v22 }
 0x1d0   :  { %v2794_v27 = vpop.f32.mrf.mxu2  ;;  %v2783_v28 = vpop.f32.mrf.mxu0  ;;  %v2782_v33 = vadd.f32 %v2781_v23, %v2769_v32 }
 0x1d2   :  { %v2795_v40 = vadd.f32 %v2794_v27, %v2782_v33 }
 0x1d5   :  { %v2770_v29 = vpop.f32.mrf.mxu3 }
 0x1d8   :  { %v2796_v34 = vpop.f32.mrf.mxu2  ;;  %v2833_v31 = vpop.f32.mrf.mxu0 }
 0x1e0   :  { %v2835_v38 = vpop.f32.mrf.mxu0 }
 0x1e5   :  { %v2807_v36 = vpop.f32.mrf.mxu1 }
 0x1e6   :  { %v2808_v41 = vadd.f32 %v2807_v36, %v2795_v40 }
 0x1ed   :  { %v2820_v42 = vpop.f32.mrf.mxu3  ;;  %v2809_v45 = vpop.f32.mrf.mxu1 }
 0x1ee   :  { %v2821_v44 = vadd.f32 %v2820_v42, %v2808_v41 }
 0x1f0   :  { %v2834_v46 = vadd.f32 %v2833_v31, %v2821_v44 }
 0x1f2   :  { %v2848_v30 = vrot.slane %v2834_v46, 4 }
 0x1f4   :  { %v2856_v37 = vsel %vm2853_vm3, %v2855_v47, %v2848_v30 }
 0x1f5   :  { %2864 = vst.msk [vmem:[%s6789_s2 + $0x8] sm:$0x3f] %vm2863_vm7, %v2856_v37  ;;  %v2822_v19 = vpop.f32.mrf.mxu3 }

// kernel: net_forward.5
= control target key start
LH: loop header
LB: loop body
LE: loop exit
PB: predicated region body
PF: predicated region fallthrough
CT: control target
= control target key end

     0   :  { %vm39_vm0 = vcmask 1040384   ;;  %vm29_vm1 = vcmask 203776   ;;  %v592_v52 = vmov 0   ;;  %vm492_vm2 = vcmask 261120   ;;  %s886_s0 = inlined_call_operand.vmem [shape: f32[4,25,288], index: 0, kind: input, shape index: {}]   ;;  %s887_s1 = inlined_call_operand.vmem [shape: f32[20,25], index: 1, kind: input, shape index: {}]   ;;  %s888_s2 = inlined_call_operand.vmem [shape: f32[20,1], index: 2, kind: input, shape index: {}]   ;;  %s889_s3 = inlined_call_operand.vmem [shape: f32[20,288], index: 3, kind: output, shape index: {}]  }
   0x1   :  { %v26_v0 = vld [vmem:[%s886_s0 + $0x48] sm:$0x1]  ;;  %v27_v1 = vld [vmem:[%s886_s0 + $0x50] sm:$0x1]  ;;  %v28_v2 = vld [vmem:[%s886_s0 + $0x58] sm:$0x1]  ;;  %590 = vset.pattern.permute.xlu0 %v592_v52  ;;  %591 = vset.pattern.permute.xlu1 %v592_v52 }
   0x2   :  { %505 = vmatpush.msk.msra.mxu0 %vm39_vm0, %v26_v0  ;;  %509 = vmatpush.msk.msra.mxu1 %vm39_vm0, %v27_v1  ;;  %v526_v3 = vld [vmem:[%s886_s0 + $0xa8] sm:$0x1]  ;;  %v23_v4 = vld [vmem:[%s886_s0 + $0x30] sm:$0xff]  ;;  %v24_v5 = vld [vmem:[%s886_s0 + $0x38] sm:$0xff]  ;;  %vm499_vm3 = vcmask 257024  }
   0x3   :  { %513 = vmatpush.msk.msra.mxu2 %vm39_vm0, %v28_v2  ;;  %529 = vmatpush.msk.msra.mxu3 %vm39_vm0, %v526_v3  ;;  %v25_v6 = vld [vmem:[%s886_s0 + $0x40] sm:$0xff]  ;;  %v523_v7 = vld [vmem:[%s886_s0 + $0x90] sm:$0xff]  ;;  %v20_v8 = vld [vmem:[%s886_s0 + $0x18] sm:$0xff] }
   0x4   :  { %62 = vmatpush.msra.mxu0 %v23_v4  ;;  %88 = vmatpush.msra.mxu1 %v24_v5  ;;  %v21_v9 = vld [vmem:[%s886_s0 + $0x20] sm:$0xff]  ;;  %v22_v10 = vld [vmem:[%s886_s0 + $0x28] sm:$0xff]  ;;  %v520_v11 = vld [vmem:[%s886_s0 + $0x78] sm:$0xff] }
   0x5   :  { %114 = vmatpush.msra.mxu2 %v25_v6  ;;  %162 = vmatpush.msra.mxu3 %v523_v7  ;;  %v17_v12 = vld [vmem:[%s886_s0] sm:$0xff]  ;;  %v18_v13 = vld [vmem:[%s886_s0 + $0x8] sm:$0xff]  ;;  %v19_v14 = vld [vmem:[%s886_s0 + $0x10] sm:$0xff] }
   0x6   :  { %63 = vmatpush.msra.mxu0 %v20_v8  ;;  %89 = vmatpush.msra.mxu1 %v21_v9  ;;  %v517_v15 = vld [vmem:[%s886_s0 + $0x60] sm:$0xff]  ;;  %v550_v17 = vld [vmem:[%s886_s0 + $0x108] sm:$0x1]  ;;  %v551_v18 = vld [vmem:[%s886_s0 + $0x110] sm:$0x1] }
   0x7   :  { %115 = vmatpush.msra.mxu2 %v22_v10  ;;  %163 = vmatpush.msra.mxu3 %v520_v11  ;;  %v668_v16 = vld [vmem:[%s887_s1] sm:$0xff]  ;;  %v527_v19 = vld [vmem:[%s886_s0 + $0xb0] sm:$0x1]  ;;  %v528_v20 = vld [vmem:[%s886_s0 + $0xb8] sm:$0x1] }
   0x8   :  { %64 = vmatpush.msra.mxu0 %v17_v12  ;;  %90 = vmatpush.msra.mxu1 %v18_v13  ;;  %v547_v21 = vld [vmem:[%s886_s0 + $0xf0] sm:$0xff]  ;;  %v548_v22 = vld [vmem:[%s886_s0 + $0xf8] sm:$0xff]  ;;  %v525_v24 = vld [vmem:[%s886_s0 + $0xa0] sm:$0xff] }
   0x9   :  { %116 = vmatpush.msra.mxu2 %v19_v14  ;;  %164 = vmatpush.msra.mxu3 %v517_v15  ;;  %v524_v23 = vld [vmem:[%s886_s0 + $0x98] sm:$0xff]  ;;  %v545_v26 = vld [vmem:[%s886_s0 + $0xe0] sm:$0xff]  ;;  %v522_v28 = vld [vmem:[%s886_s0 + $0x88] sm:$0xff] }
   0xa   :  { %506 = vmatmul.msk.f32.vlgmr.msra.gmra.mxu0 %vm29_vm1, %v668_v16  ;;  %510 = vmatmul.msk.f32.vlgmr.msra.gmra.mxu1 %vm29_vm1, %v668_v16  ;;  %v544_v25 = vld [vmem:[%s886_s0 + $0xd8] sm:$0xff]  ;;  %v521_v27 = vld [vmem:[%s886_s0 + $0x80] sm:$0xff]  ;;  %v721_v29 = vld [vmem:[%s887_s1 + $0x8] sm:$0xff] }
   0xb   :  { %514 = vmatmul.msk.f32.vlgmr.msra.gmra.mxu2 %vm29_vm1, %v668_v16  ;;  %530 = vmatmul.msk.f32.vlgmr.msra.gmra.mxu3 %vm29_vm1, %v668_v16  ;;  %v541_v30 = vld [vmem:[%s886_s0 + $0xc0] sm:$0xff]  ;;  %v542_v31 = vld [vmem:[%s886_s0 + $0xc8] sm:$0xff]  ;;  %v519_v33 = vld [vmem:[%s886_s0 + $0x70] sm:$0xff] }
   0xc   :  { %553 = vmatpush.msk.msrb.mxu2 %vm39_vm0, %v550_v17  ;;  %557 = vmatpush.msk.msrb.mxu3 %vm39_vm0, %v551_v18  ;;  %v518_v32 = vld [vmem:[%s886_s0 + $0x68] sm:$0xff]  ;;  %v575_v34 = vld [vmem:[%s886_s0 + $0x170] sm:$0x1]  ;;  %v576_v35 = vld [vmem:[%s886_s0 + $0x178] sm:$0x1] }
   0xd   :  { %533 = vmatpush.msk.msrb.mxu0 %vm39_vm0, %v527_v19  ;;  %537 = vmatpush.msk.msrb.mxu1 %vm39_vm0, %v528_v20  ;;  %v552_v36 = vld [vmem:[%s886_s0 + $0x118] sm:$0x1]  ;;  %v574_v37 = vld [vmem:[%s886_s0 + $0x168] sm:$0x1]  ;;  %v573_v39 = vld [vmem:[%s886_s0 + $0x160] sm:$0xff] }
   0xe   :  { %271 = vmatpush.msrb.mxu2 %v547_v21  ;;  %297 = vmatpush.msrb.mxu3 %v548_v22  ;;  %v572_v38 = vld [vmem:[%s886_s0 + $0x158] sm:$0xff]  ;;  %v549_v40 = vld [vmem:[%s886_s0 + $0x100] sm:$0xff]  ;;  %v571_v41 = vld [vmem:[%s886_s0 + $0x150] sm:$0xff] }
   0xf   :  { %188 = vmatpush.msrb.mxu0 %v524_v23  ;;  %214 = vmatpush.msrb.mxu1 %v525_v24  ;;  %v16_v42 = vld [vmem:[%s887_s1 + $0x10] sm:$0xf]  ;;  %v569_v43 = vld [vmem:[%s886_s0 + $0x140] sm:$0xff]  ;;  %v570_v44 = vld [vmem:[%s886_s0 + $0x148] sm:$0xff] }
  0x10   :  { %272 = vmatpush.msrb.mxu2 %v544_v25  ;;  %298 = vmatpush.msrb.mxu3 %v545_v26  ;;  %v546_v45 = vld [vmem:[%s886_s0 + $0xe8] sm:$0xff]  ;;  %v568_v46 = vld [vmem:[%s886_s0 + $0x138] sm:$0xff]  ;;  %v567_v48 = vld [vmem:[%s886_s0 + $0x130] sm:$0xff] }
  0x11   :  { %189 = vmatpush.msrb.mxu0 %v521_v27  ;;  %215 = vmatpush.msrb.mxu1 %v522_v28  ;;  %v566_v47 = vld [vmem:[%s886_s0 + $0x128] sm:$0xff]  ;;  %v543_v49 = vld [vmem:[%s886_s0 + $0xd0] sm:$0xff]  ;;  %v565_v50 = vld [vmem:[%s886_s0 + $0x120] sm:$0xff] }
  0x12   :  { %507 = vmatmul.msk.f32.gmra.mxu0 %vm29_vm1, %v721_v29  ;;  %511 = vmatmul.msk.f32.gmra.mxu1 %vm29_vm1, %v721_v29  ;;  %v454_v51 = vld [vmem:[%s888_s2] sm:$0xff]  ;;  %v455_v53 = vld [vmem:[%s888_s2 + $0x8] sm:$0xff]  ;;  %v456_v54 = vld [vmem:[%s888_s2 + $0x10] sm:$0xf] }
  0x13   :  { %515 = vmatmul.msk.f32.gmra.mxu2 %vm29_vm1, %v721_v29  ;;  %531 = vmatmul.msk.f32.gmra.mxu3 %vm29_vm1, %v721_v29 }
  0x14   :  { %273 = vmatpush.msrb.mxu2 %v541_v30  ;;  %299 = vmatpush.msrb.mxu3 %v542_v31 }
  0x15   :  { %190 = vmatpush.msrb.mxu0 %v518_v32  ;;  %216 = vmatpush.msrb.mxu1 %v519_v33 }
  0x16   :  { %581 = vmatpush.msk.msra.mxu2 %vm39_vm0, %v575_v34  ;;  %585 = vmatpush.msk.msra.mxu3 %vm39_vm0, %v576_v35 }
  0x17   :  { %561 = vmatpush.msk.msra.mxu0 %vm39_vm0, %v552_v36  ;;  %577 = vmatpush.msk.msra.mxu1 %vm39_vm0, %v574_v37 }
  0x18   :  { %406 = vmatpush.msra.mxu2 %v572_v38  ;;  %432 = vmatpush.msra.mxu3 %v573_v39 }
  0x19   :  { %323 = vmatpush.msra.mxu0 %v549_v40  ;;  %380 = vmatpush.msra.mxu1 %v571_v41 }
  0x1a   :  { %508 = vmatmul.msk.f32.gmra.mxu0 %vm29_vm1, %v16_v42  ;;  %512 = vmatmul.msk.f32.gmra.mxu1 %vm29_vm1, %v16_v42 }
  0x1b   :  { %516 = vmatmul.msk.f32.gmra.mxu2 %vm29_vm1, %v16_v42  ;;  %532 = vmatmul.msk.f32.gmra.mxu3 %vm29_vm1, %v16_v42 }
  0x1c   :  { %407 = vmatpush.msra.mxu2 %v569_v43  ;;  %433 = vmatpush.msra.mxu3 %v570_v44 }
  0x1d   :  { %324 = vmatpush.msra.mxu0 %v546_v45  ;;  %381 = vmatpush.msra.mxu1 %v568_v46 }
  0x1e   :  { %408 = vmatpush.msra.mxu2 %v566_v47  ;;  %434 = vmatpush.msra.mxu3 %v567_v48 }
  0x1f   :  { %325 = vmatpush.msra.mxu0 %v543_v49  ;;  %382 = vmatpush.msra.mxu1 %v565_v50 }
  0x20   :  { %459 = vperm.xlu0 %590, %v454_v51   ;;  %469 = vperm.xlu1 %591, %v456_v54  }
  0x22   :  { %534 = vmatmul.msk.f32.vlgmr.msrb.gmra.mxu0 %vm29_vm1, %v668_v16  ;;  %538 = vmatmul.msk.f32.vlgmr.msrb.gmra.mxu1 %vm29_vm1, %v668_v16 }
  0x23   :  { %554 = vmatmul.msk.f32.vlgmr.msrb.gmra.mxu2 %vm29_vm1, %v668_v16  ;;  %558 = vmatmul.msk.f32.vlgmr.msrb.gmra.mxu3 %vm29_vm1, %v668_v16 }
  0x28   :  { %464 = vperm.xlu0 %590, %v455_v53  }
  0x2a   :  { %535 = vmatmul.msk.f32.gmra.mxu0 %vm29_vm1, %v721_v29  ;;  %539 = vmatmul.msk.f32.gmra.mxu1 %vm29_vm1, %v721_v29 }
  0x2b   :  { %555 = vmatmul.msk.f32.gmra.mxu2 %vm29_vm1, %v721_v29  ;;  %559 = vmatmul.msk.f32.gmra.mxu3 %vm29_vm1, %v721_v29 }
  0x32   :  { %536 = vmatmul.msk.f32.gmra.mxu0 %vm29_vm1, %v16_v42  ;;  %540 = vmatmul.msk.f32.gmra.mxu1 %vm29_vm1, %v16_v42 }
  0x33   :  { %556 = vmatmul.msk.f32.gmra.mxu2 %vm29_vm1, %v16_v42  ;;  %560 = vmatmul.msk.f32.gmra.mxu3 %vm29_vm1, %v16_v42 }
  0x3a   :  { %562 = vmatmul.msk.f32.vlgmr.msra.gmra.mxu0 %vm29_vm1, %v668_v16  ;;  %578 = vmatmul.msk.f32.vlgmr.msra.gmra.mxu1 %vm29_vm1, %v668_v16 }
  0x3b   :  { %582 = vmatmul.msk.f32.vlgmr.msra.gmra.mxu2 %vm29_vm1, %v668_v16  ;;  %586 = vmatmul.msk.f32.vlgmr.msra.gmra.mxu3 %vm29_vm1, %v668_v16 }
  0x42   :  { %563 = vmatmul.msk.f32.gmra.mxu0 %vm29_vm1, %v721_v29  ;;  %579 = vmatmul.msk.f32.gmra.mxu1 %vm29_vm1, %v721_v29 }
  0x43   :  { %583 = vmatmul.msk.f32.gmra.mxu2 %vm29_vm1, %v721_v29  ;;  %587 = vmatmul.msk.f32.gmra.mxu3 %vm29_vm1, %v721_v29 }
  0x4a   :  { %564 = vmatmul.msk.f32.gmra.mxu0 %vm29_vm1, %v16_v42  ;;  %580 = vmatmul.msk.f32.gmra.mxu1 %vm29_vm1, %v16_v42 }
  0x4b   :  { %584 = vmatmul.msk.f32.gmra.mxu2 %vm29_vm1, %v16_v42  ;;  %588 = vmatmul.msk.f32.gmra.mxu3 %vm29_vm1, %v16_v42 }
  0x87   :  { %v66_v55 = vpop.f32.mrf.mxu0  ;;  %v92_v56 = vpop.f32.mrf.mxu1 }
  0x8e   :  { %v118_v57 = vpop.f32.mrf.mxu2  ;;  %v166_v58 = vpop.f32.mrf.mxu3 }
  0x8f   :  { %v69_v59 = vpop.f32.mrf.mxu0  ;;  %v95_v60 = vpop.f32.mrf.mxu1  ;;  %v227_v13 = vmax.f32 %v66_v55, %v166_v58 }
  0x92   :  { %v460_v14 = vpop.permute.xlu0 %459  ;;  %v470_v54 = vpop.permute.xlu1 %469 }
  0x96   :  { %v121_v61 = vpop.f32.mrf.mxu2  ;;  %v169_v62 = vpop.f32.mrf.mxu3 }
  0x97   :  { %v72_v63 = vpop.f32.mrf.mxu0  ;;  %v851_v0 = vpop.f32.mrf.mxu1  ;;  %v230_v24 = vmax.f32 %v69_v59, %v169_v62 }
  0x9a   :  { %v465_v34 = vpop.permute.xlu0 %464 }
  0x9e   :  { %v853_v1 = vpop.f32.mrf.mxu2  ;;  %v172_v2 = vpop.f32.mrf.mxu3 }
  0x9f   :  { %v192_v3 = vpop.f32.mrf.mxu0  ;;  %v218_v4 = vpop.f32.mrf.mxu1  ;;  %v233_v44 = vmax.f32 %v72_v63, %v172_v2 }
  0xa0   :  { %v228_v22 = vmax.f32 %v92_v56, %v192_v3  ;;  %v229_v23 = vmax.f32 %v118_v57, %v218_v4 }
  0xa6   :  { %v275_v5 = vpop.f32.mrf.mxu2  ;;  %v301_v6 = vpop.f32.mrf.mxu3 }
  0xa7   :  { %v195_v7 = vpop.f32.mrf.mxu0  ;;  %v221_v8 = vpop.f32.mrf.mxu1  ;;  %v336_v15 = vmax.f32 %v227_v13, %v275_v5  ;;  %v337_v26 = vmax.f32 %v228_v22, %v301_v6 }
  0xa8   :  { %v231_v40 = vmax.f32 %v95_v60, %v195_v7  ;;  %v232_v41 = vmax.f32 %v121_v61, %v221_v8 }
  0xae   :  { %v278_v9 = vpop.f32.mrf.mxu2  ;;  %v304_v10 = vpop.f32.mrf.mxu3 }
  0xaf   :  { %v198_v11 = vpop.f32.mrf.mxu0  ;;  %v224_v12 = vpop.f32.mrf.mxu1  ;;  %v339_v28 = vmax.f32 %v230_v24, %v278_v9  ;;  %v340_v46 = vmax.f32 %v231_v40, %v304_v10 }
  0xb0   :  { %v234_v60 = vmax.f32 %v851_v0, %v198_v11  ;;  %v235_v61 = vmax.f32 %v853_v1, %v224_v12 }
  0xb6   :  { %v281_v16 = vpop.f32.mrf.mxu2  ;;  %v307_v17 = vpop.f32.mrf.mxu3 }
  0xb7   :  { %v327_v18 = vpop.f32.mrf.mxu0  ;;  %v384_v19 = vpop.f32.mrf.mxu1  ;;  %v342_v48 = vmax.f32 %v233_v44, %v281_v16  ;;  %v343_v3 = vmax.f32 %v234_v60, %v307_v17 }
  0xb8   :  { %v445_v20 = vmax.f32 %v336_v15, %v384_v19  ;;  %v338_v27 = vmax.f32 %v229_v23, %v327_v18 }
  0xba   :  { %v472_v21 = vadd.f32 %v460_v14, %v445_v20 }
  0xbc   :  { %v481_v25 = vmax.f32 %v472_v21, 0.0 }
  0xbe   :  { %490 = vst [vmem:[%s889_s3] sm:$0xff] %v481_v25  ;;  %v410_v29 = vpop.f32.mrf.mxu2  ;;  %v436_v30 = vpop.f32.mrf.mxu3 }
  0xbf   :  { %v446_v31 = vmax.f32 %v337_v26, %v410_v29  ;;  %v447_v32 = vmax.f32 %v338_v27, %v436_v30  ;;  %v387_v33 = vpop.f32.mrf.mxu1  ;;  %v330_v35 = vpop.f32.mrf.mxu0 }
  0xc0   :  { %v448_v36 = vmax.f32 %v339_v28, %v387_v33  ;;  %v341_v47 = vmax.f32 %v232_v41, %v330_v35 }
  0xc1   :  { %v473_v37 = vadd.f32 %v460_v14, %v446_v31  ;;  %v474_v38 = vadd.f32 %v460_v14, %v447_v32 }
  0xc2   :  { %v475_v39 = vadd.f32 %v465_v34, %v448_v36 }
  0xc3   :  { %v482_v42 = vmax.f32 %v473_v37, 0.0  ;;  %v483_v43 = vmax.f32 %v474_v38, 0.0 }
  0xc4   :  { %v484_v45 = vmax.f32 %v475_v39, 0.0 }
  0xc5   :  { %491 = vst [vmem:[%s889_s3 + $0x8] sm:$0xff] %v482_v42 }
  0xc6   :  { %493 = vst.msk [vmem:[%s889_s3 + $0x10] sm:$0xff] %vm492_vm2, %v483_v43  ;;  %v413_v49 = vpop.f32.mrf.mxu2  ;;  %v439_v50 = vpop.f32.mrf.mxu3 }
  0xc7   :  { %494 = vst [vmem:[%s889_s3 + $0x18] sm:$0xff] %v484_v45  ;;  %v449_v51 = vmax.f32 %v340_v46, %v413_v49  ;;  %v450_v52 = vmax.f32 %v341_v47, %v439_v50  ;;  %v390_v53 = vpop.f32.mrf.mxu1  ;;  %v333_v58 = vpop.f32.mrf.mxu0 }
  0xc8   :  { %v451_v55 = vmax.f32 %v342_v48, %v390_v53  ;;  %v344_v4 = vmax.f32 %v235_v61, %v333_v58 }
  0xc9   :  { %v476_v56 = vadd.f32 %v465_v34, %v449_v51  ;;  %v477_v57 = vadd.f32 %v465_v34, %v450_v52 }
  0xca   :  { %v478_v59 = vadd.f32 %v470_v54, %v451_v55 }
  0xcb   :  { %v485_v62 = vmax.f32 %v476_v56, 0.0  ;;  %v486_v63 = vmax.f32 %v477_v57, 0.0 }
  0xcc   :  { %v487_v2 = vmax.f32 %v478_v59, 0.0 }
  0xcd   :  { %495 = vst [vmem:[%s889_s3 + $0x20] sm:$0xff] %v485_v62 }
  0xce   :  { %496 = vst.msk [vmem:[%s889_s3 + $0x28] sm:$0xff] %vm492_vm2, %v486_v63  ;;  %v416_v5 = vpop.f32.mrf.mxu2  ;;  %v442_v6 = vpop.f32.mrf.mxu3 }
  0xcf   :  { %497 = vst [vmem:[%s889_s3 + $0x30] sm:$0xf] %v487_v2  ;;  %v452_v0 = vmax.f32 %v343_v3, %v416_v5  ;;  %v453_v1 = vmax.f32 %v344_v4, %v442_v6 }
  0xd1   :  { %v479_v7 = vadd.f32 %v470_v54, %v452_v0  ;;  %v480_v8 = vadd.f32 %v470_v54, %v453_v1 }
  0xd3   :  { %v488_v9 = vmax.f32 %v479_v7, 0.0  ;;  %v489_v10 = vmax.f32 %v480_v8, 0.0 }
  0xd5   :  { %498 = vst [vmem:[%s889_s3 + $0x38] sm:$0xf] %v488_v9 }
  0xd6   :  { %500 = vst.msk [vmem:[%s889_s3 + $0x40] sm:$0xf] %vm499_vm3, %v489_v10 }

// kernel: net_forward.6
= control target key start
LH: loop header
LB: loop body
LE: loop exit
PB: predicated region body
PF: predicated region fallthrough
CT: control target
= control target key end

     0   :  { %vm127_vm0 = vcmask 1043456   ;;  %vm105_vm1 = vcmask 949248   ;;  %vm1017_vm2 = vcmask 261120   ;;  %vm1024_vm3 = vcmask 254976   ;;  %s2493_s0 = inlined_call_operand.vmem [shape: f32[4,500,32], index: 0, kind: input, shape index: {}]   ;;  %s2494_s1 = inlined_call_operand.vmem [shape: f32[50,500], index: 1, kind: input, shape index: {}]   ;;  %s2495_s2 = inlined_call_operand.vmem [shape: f32[50,1], index: 2, kind: input, shape index: {}]   ;;  %s2496_s3 = inlined_call_operand.vmem [shape: f32[50,32], index: 3, kind: output, shape index: {}]  }
   0x1   :  { %v89_v0 = vld [vmem:[%s2493_s0 + $0x178] sm:$0xff]  ;;  %v104_v1 = vld [vmem:[%s2493_s0 + $0x1f0] sm:$0xf]  ;;  %v103_v3 = vld [vmem:[%s2493_s0 + $0x1e8] sm:$0xff] }
   0x2   :  { %v88_v2 = vld [vmem:[%s2493_s0 + $0x170] sm:$0xff]  ;;  %207 = vmatpush.msra.mxu2 %v89_v0  ;;  %1030 = vmatpush.msk.msra.mxu3 %vm127_vm0, %v104_v1  ;;  %v57_v4 = vld [vmem:[%s2493_s0 + $0x78] sm:$0xff]  ;;  %v87_v6 = vld [vmem:[%s2493_s0 + $0x168] sm:$0xff] }
   0x3   :  { %v73_v5 = vld [vmem:[%s2493_s0 + $0xf8] sm:$0xff]  ;;  %131 = vmatpush.msra.mxu0 %v57_v4  ;;  %v102_v7 = vld [vmem:[%s2493_s0 + $0x1e0] sm:$0xff]  ;;  %v56_v8 = vld [vmem:[%s2493_s0 + $0x70] sm:$0xff] }
   0x4   :  { %169 = vmatpush.msra.mxu1 %v73_v5  ;;  %208 = vmatpush.msra.mxu2 %v88_v2  ;;  %v72_v9 = vld [vmem:[%s2493_s0 + $0xf0] sm:$0xff]  ;;  %v86_v10 = vld [vmem:[%s2493_s0 + $0x160] sm:$0xff]  ;;  %v101_v11 = vld [vmem:[%s2493_s0 + $0x1d8] sm:$0xff] }
   0x5   :  { %247 = vmatpush.msra.mxu3 %v103_v3  ;;  %132 = vmatpush.msra.mxu0 %v56_v8  ;;  %v55_v12 = vld [vmem:[%s2493_s0 + $0x68] sm:$0xff]  ;;  %v54_v14 = vld [vmem:[%s2493_s0 + $0x60] sm:$0xff]  ;;  %v85_v16 = vld [vmem:[%s2493_s0 + $0x158] sm:$0xff] }
   0x6   :  { %170 = vmatpush.msra.mxu1 %v72_v9  ;;  %v71_v13 = vld [vmem:[%s2493_s0 + $0xe8] sm:$0xff]  ;;  %209 = vmatpush.msra.mxu2 %v87_v6  ;;  %v70_v15 = vld [vmem:[%s2493_s0 + $0xe0] sm:$0xff]  ;;  %v100_v17 = vld [vmem:[%s2493_s0 + $0x1d0] sm:$0xff] }
   0x7   :  { %248 = vmatpush.msra.mxu3 %v102_v7  ;;  %133 = vmatpush.msra.mxu0 %v55_v12  ;;  %v53_v18 = vld [vmem:[%s2493_s0 + $0x58] sm:$0xff]  ;;  %v84_v20 = vld [vmem:[%s2493_s0 + $0x150] sm:$0xff]  ;;  %v99_v21 = vld [vmem:[%s2493_s0 + $0x1c8] sm:$0xff] }
   0x8   :  { %171 = vmatpush.msra.mxu1 %v71_v13  ;;  %210 = vmatpush.msra.mxu2 %v86_v10  ;;  %v69_v19 = vld [vmem:[%s2493_s0 + $0xd8] sm:$0xff]  ;;  %v52_v22 = vld [vmem:[%s2493_s0 + $0x50] sm:$0xff]  ;;  %v83_v24 = vld [vmem:[%s2493_s0 + $0x148] sm:$0xff] }
   0x9   :  { %249 = vmatpush.msra.mxu3 %v101_v11  ;;  %134 = vmatpush.msra.mxu0 %v54_v14  ;;  %v68_v23 = vld [vmem:[%s2493_s0 + $0xd0] sm:$0xff]  ;;  %v98_v25 = vld [vmem:[%s2493_s0 + $0x1c0] sm:$0xff]  ;;  %v51_v26 = vld [vmem:[%s2493_s0 + $0x48] sm:$0xff] }
   0xa   :  { %172 = vmatpush.msra.mxu1 %v70_v15  ;;  %211 = vmatpush.msra.mxu2 %v85_v16  ;;  %v67_v27 = vld [vmem:[%s2493_s0 + $0xc8] sm:$0xff]  ;;  %v82_v28 = vld [vmem:[%s2493_s0 + $0x140] sm:$0xff]  ;;  %v97_v29 = vld [vmem:[%s2493_s0 + $0x1b8] sm:$0xff] }
   0xb   :  { %250 = vmatpush.msra.mxu3 %v100_v17  ;;  %135 = vmatpush.msra.mxu0 %v53_v18  ;;  %v50_v30 = vld [vmem:[%s2493_s0 + $0x40] sm:$0xff]  ;;  %v81_v32 = vld [vmem:[%s2493_s0 + $0x138] sm:$0xff]  ;;  %v96_v33 = vld [vmem:[%s2493_s0 + $0x1b0] sm:$0xff] }
   0xc   :  { %173 = vmatpush.msra.mxu1 %v69_v19  ;;  %212 = vmatpush.msra.mxu2 %v84_v20  ;;  %v66_v31 = vld [vmem:[%s2493_s0 + $0xc0] sm:$0xff]  ;;  %v49_v34 = vld [vmem:[%s2493_s0 + $0x38] sm:$0xff]  ;;  %v80_v36 = vld [vmem:[%s2493_s0 + $0x130] sm:$0xff] }
   0xd   :  { %251 = vmatpush.msra.mxu3 %v99_v21  ;;  %136 = vmatpush.msra.mxu0 %v52_v22  ;;  %v65_v35 = vld [vmem:[%s2493_s0 + $0xb8] sm:$0xff]  ;;  %v95_v37 = vld [vmem:[%s2493_s0 + $0x1a8] sm:$0xff]  ;;  %v48_v38 = vld [vmem:[%s2493_s0 + $0x30] sm:$0xff] }
   0xe   :  { %174 = vmatpush.msra.mxu1 %v68_v23  ;;  %213 = vmatpush.msra.mxu2 %v83_v24  ;;  %v64_v39 = vld [vmem:[%s2493_s0 + $0xb0] sm:$0xff]  ;;  %v79_v40 = vld [vmem:[%s2493_s0 + $0x128] sm:$0xff]  ;;  %v94_v41 = vld [vmem:[%s2493_s0 + $0x1a0] sm:$0xff] }
   0xf   :  { %252 = vmatpush.msra.mxu3 %v98_v25  ;;  %137 = vmatpush.msra.mxu0 %v51_v26  ;;  %v47_v42 = vld [vmem:[%s2493_s0 + $0x28] sm:$0xff]  ;;  %v78_v44 = vld [vmem:[%s2493_s0 + $0x120] sm:$0xff]  ;;  %v93_v45 = vld [vmem:[%s2493_s0 + $0x198] sm:$0xff] }
  0x10   :  { %175 = vmatpush.msra.mxu1 %v67_v27  ;;  %214 = vmatpush.msra.mxu2 %v82_v28  ;;  %v63_v43 = vld [vmem:[%s2493_s0 + $0xa8] sm:$0xff]  ;;  %v46_v46 = vld [vmem:[%s2493_s0 + $0x20] sm:$0xff]  ;;  %v77_v48 = vld [vmem:[%s2493_s0 + $0x118] sm:$0xff] }
  0x11   :  { %253 = vmatpush.msra.mxu3 %v97_v29  ;;  %138 = vmatpush.msra.mxu0 %v50_v30  ;;  %v62_v47 = vld [vmem:[%s2493_s0 + $0xa0] sm:$0xff]  ;;  %v92_v49 = vld [vmem:[%s2493_s0 + $0x190] sm:$0xff]  ;;  %v45_v50 = vld [vmem:[%s2493_s0 + $0x18] sm:$0xff] }
  0x12   :  { %176 = vmatpush.msra.mxu1 %v66_v31  ;;  %215 = vmatpush.msra.mxu2 %v81_v32  ;;  %v61_v51 = vld [vmem:[%s2493_s0 + $0x98] sm:$0xff]  ;;  %v76_v52 = vld [vmem:[%s2493_s0 + $0x110] sm:$0xff]  ;;  %v91_v53 = vld [vmem:[%s2493_s0 + $0x188] sm:$0xff] }
  0x13   :  { %254 = vmatpush.msra.mxu3 %v96_v33  ;;  %139 = vmatpush.msra.mxu0 %v49_v34  ;;  %v44_v54 = vld [vmem:[%s2493_s0 + $0x10] sm:$0xff]  ;;  %v75_v56 = vld [vmem:[%s2493_s0 + $0x108] sm:$0xff]  ;;  %v90_v57 = vld [vmem:[%s2493_s0 + $0x180] sm:$0xff] }
  0x14   :  { %177 = vmatpush.msra.mxu1 %v65_v35  ;;  %216 = vmatpush.msra.mxu2 %v80_v36  ;;  %v60_v55 = vld [vmem:[%s2493_s0 + $0x90] sm:$0xff]  ;;  %v1463_v58 = vld [vmem:[%s2494_s1 + $0x18] sm:$0xff]  ;;  %v43_v59 = vld [vmem:[%s2493_s0 + $0x8] sm:$0xff] }
  0x15   :  { %255 = vmatpush.msra.mxu3 %v95_v37  ;;  %140 = vmatpush.msra.mxu0 %v48_v38  ;;  %v1053_v60 = vld [vmem:[%s2493_s0 + $0x270] sm:$0xff]  ;;  %v74_v61 = vld [vmem:[%s2493_s0 + $0x100] sm:$0xff]  ;;  %v59_v63 = vld [vmem:[%s2493_s0 + $0x88] sm:$0xff] }
  0x16   :  { %178 = vmatpush.msra.mxu1 %v64_v39  ;;  %217 = vmatpush.msra.mxu2 %v79_v40  ;;  %v1477_v62 = vld [vmem:[%s2494_s1 + $0x10] sm:$0xff]  ;;  %v1052_v0 = vld [vmem:[%s2493_s0 + $0x268] sm:$0xff]  ;;  %v42_v2 = vld [vmem:[%s2493_s0] sm:$0xff] }
  0x17   :  { %256 = vmatpush.msra.mxu3 %v94_v41  ;;  %141 = vmatpush.msra.mxu0 %v47_v42  ;;  %v1100_v1 = vld [vmem:[%s2493_s0 + $0x3e8] sm:$0xf]  ;;  %v58_v3 = vld [vmem:[%s2493_s0 + $0x80] sm:$0xff]  ;;  %v1069_v6 = vld [vmem:[%s2493_s0 + $0x2f0] sm:$0xff] }
  0x18   :  { %179 = vmatpush.msra.mxu1 %v63_v43  ;;  %218 = vmatpush.msra.mxu2 %v78_v44  ;;  %v1500_v4 = vld [vmem:[%s2494_s1] sm:$0xff]  ;;  %v1505_v5 = vld [vmem:[%s2494_s1 + $0x8] sm:$0xff]  ;;  %v1085_v8 = vld [vmem:[%s2493_s0 + $0x370] sm:$0xff] }
  0x19   :  { %257 = vmatpush.msra.mxu3 %v93_v45  ;;  %142 = vmatpush.msra.mxu0 %v46_v46  ;;  %v1051_v7 = vld [vmem:[%s2493_s0 + $0x260] sm:$0xff]  ;;  %v1525_v10 = vld [vmem:[%s2494_s1 + $0x38] sm:$0xff]  ;;  %v1068_v11 = vld [vmem:[%s2493_s0 + $0x2e8] sm:$0xff] }
  0x1a   :  { %180 = vmatpush.msra.mxu1 %v62_v47  ;;  %219 = vmatpush.msra.mxu2 %v77_v48  ;;  %v1099_v9 = vld [vmem:[%s2493_s0 + $0x3e0] sm:$0xff]  ;;  %v1050_v12 = vld [vmem:[%s2493_s0 + $0x258] sm:$0xff]  ;;  %v1084_v13 = vld [vmem:[%s2493_s0 + $0x368] sm:$0xff] }
  0x1b   :  { %258 = vmatpush.msra.mxu3 %v92_v49  ;;  %143 = vmatpush.msra.mxu0 %v45_v50  ;;  %v1539_v14 = vld [vmem:[%s2494_s1 + $0x30] sm:$0xff]  ;;  %v1067_v15 = vld [vmem:[%s2493_s0 + $0x2e0] sm:$0xff]  ;;  %v1098_v16 = vld [vmem:[%s2493_s0 + $0x3d8] sm:$0xff] }
  0x1c   :  { %181 = vmatpush.msra.mxu1 %v61_v51  ;;  %220 = vmatpush.msra.mxu2 %v76_v52  ;;  %v1049_v17 = vld [vmem:[%s2493_s0 + $0x250] sm:$0xff]  ;;  %v1083_v18 = vld [vmem:[%s2493_s0 + $0x360] sm:$0xff]  ;;  %v1066_v19 = vld [vmem:[%s2493_s0 + $0x2d8] sm:$0xff] }
  0x1d   :  { %259 = vmatpush.msra.mxu3 %v91_v53  ;;  %144 = vmatpush.msra.mxu0 %v44_v54  ;;  %v1562_v20 = vld [vmem:[%s2494_s1 + $0x20] sm:$0xff]  ;;  %v1567_v21 = vld [vmem:[%s2494_s1 + $0x28] sm:$0xff]  ;;  %v1097_v22 = vld [vmem:[%s2493_s0 + $0x3d0] sm:$0xff] }
  0x1e   :  { %182 = vmatpush.msra.mxu1 %v60_v55  ;;  %221 = vmatpush.msra.mxu2 %v75_v56  ;;  %v1048_v23 = vld [vmem:[%s2493_s0 + $0x248] sm:$0xff]  ;;  %v1082_v24 = vld [vmem:[%s2493_s0 + $0x358] sm:$0xff]  ;;  %v1065_v25 = vld [vmem:[%s2493_s0 + $0x2d0] sm:$0xff] }
  0x1f   :  { %260 = vmatpush.msra.mxu3 %v90_v57  ;;  %145 = vmatpush.msra.mxu0 %v43_v59  ;;  %v1586_v26 = vld [vmem:[%s2494_s1 + $0x58] sm:$0xff]  ;;  %v1096_v27 = vld [vmem:[%s2493_s0 + $0x3c8] sm:$0xff]  ;;  %v1047_v28 = vld [vmem:[%s2493_s0 + $0x240] sm:$0xff] }
  0x20   :  { %1031 = vmatmul.msk.f32.vlgmr.msra.gmra.mxu3 %vm105_vm1, %v1463_v58  ;;  %222 = vmatpush.msra.mxu2 %v74_v61  ;;  %v1081_v29 = vld [vmem:[%s2493_s0 + $0x350] sm:$0xff]  ;;  %v1064_v31 = vld [vmem:[%s2493_s0 + $0x2c8] sm:$0xff]  ;;  %v1095_v32 = vld [vmem:[%s2493_s0 + $0x3c0] sm:$0xff] }
  0x21   :  { %350 = vmatpush.msrb.mxu3 %v1053_v60  ;;  %223 = vmatmul.f32.vlgmr.msra.gmra.mxu2 %v1477_v62  ;;  %v1600_v30 = vld [vmem:[%s2494_s1 + $0x50] sm:$0xff]  ;;  %v1046_v33 = vld [vmem:[%s2493_s0 + $0x238] sm:$0xff]  ;;  %v1080_v34 = vld [vmem:[%s2493_s0 + $0x348] sm:$0xff] }
  0x22   :  { %183 = vmatpush.msra.mxu1 %v59_v63  ;;  %1101 = vmatpush.msk.msrb.mxu2 %vm127_vm0, %v1100_v1  ;;  %v1063_v35 = vld [vmem:[%s2493_s0 + $0x2c0] sm:$0xff]  ;;  %v1628_v37 = vld [vmem:[%s2494_s1 + $0x48] sm:$0xff]  ;;  %v1094_v38 = vld [vmem:[%s2493_s0 + $0x3b8] sm:$0xff] }
  0x23   :  { %351 = vmatpush.msrb.mxu3 %v1052_v0  ;;  %146 = vmatpush.msra.mxu0 %v42_v2  ;;  %v1623_v36 = vld [vmem:[%s2494_s1 + $0x40] sm:$0xff]  ;;  %v1045_v39 = vld [vmem:[%s2493_s0 + $0x230] sm:$0xff]  ;;  %v1062_v41 = vld [vmem:[%s2493_s0 + $0x2b8] sm:$0xff] }
  0x24   :  { %184 = vmatpush.msra.mxu1 %v58_v3  ;;  %147 = vmatmul.f32.vlgmr.msra.gmra.mxu0 %v1500_v4  ;;  %v1079_v40 = vld [vmem:[%s2493_s0 + $0x340] sm:$0xff]  ;;  %v1647_v42 = vld [vmem:[%s2494_s1 + $0x78] sm:$0xff]  ;;  %v1093_v43 = vld [vmem:[%s2493_s0 + $0x3b0] sm:$0xff] }
  0x25   :  { %185 = vmatmul.f32.vlgmr.msra.gmra.mxu1 %v1505_v5  ;;  %388 = vmatpush.msrb.mxu0 %v1069_v6  ;;  %v1044_v44 = vld [vmem:[%s2493_s0 + $0x228] sm:$0xff]  ;;  %v1078_v45 = vld [vmem:[%s2493_s0 + $0x338] sm:$0xff]  ;;  %v1661_v46 = vld [vmem:[%s2494_s1 + $0x70] sm:$0xff] }
  0x26   :  { %352 = vmatpush.msrb.mxu3 %v1051_v7  ;;  %426 = vmatpush.msrb.mxu1 %v1085_v8  ;;  %v1061_v47 = vld [vmem:[%s2493_s0 + $0x2b0] sm:$0xff]  ;;  %v1092_v48 = vld [vmem:[%s2493_s0 + $0x3a8] sm:$0xff]  ;;  %v1043_v49 = vld [vmem:[%s2493_s0 + $0x220] sm:$0xff] }
  0x27   :  { %466 = vmatpush.msrb.mxu2 %v1099_v9  ;;  %389 = vmatpush.msrb.mxu0 %v1068_v11  ;;  %v1077_v50 = vld [vmem:[%s2493_s0 + $0x330] sm:$0xff]  ;;  %v1060_v51 = vld [vmem:[%s2493_s0 + $0x2a8] sm:$0xff]  ;;  %v1684_v52 = vld [vmem:[%s2494_s1 + $0x60] sm:$0xff] }
  0x28   :  { %1032 = vmatmul.msk.f32.gmra.mxu3 %vm105_vm1, %v1525_v10  ;;  %427 = vmatpush.msrb.mxu1 %v1084_v13  ;;  %v1689_v53 = vld [vmem:[%s2494_s1 + $0x68] sm:$0xff]  ;;  %v1091_v54 = vld [vmem:[%s2493_s0 + $0x3a0] sm:$0xff]  ;;  %v1042_v55 = vld [vmem:[%s2493_s0 + $0x218] sm:$0xff] }
  0x29   :  { %353 = vmatpush.msrb.mxu3 %v1050_v12  ;;  %226 = vmatmul.f32.gmra.mxu2 %v1539_v14  ;;  %v1076_v56 = vld [vmem:[%s2493_s0 + $0x328] sm:$0xff]  ;;  %v1059_v57 = vld [vmem:[%s2493_s0 + $0x2a0] sm:$0xff]  ;;  %v1708_v59 = vld [vmem:[%s2494_s1 + $0x98] sm:$0xff] }
  0x2a   :  { %390 = vmatpush.msrb.mxu0 %v1067_v15  ;;  %467 = vmatpush.msrb.mxu2 %v1098_v16  ;;  %v1090_v60 = vld [vmem:[%s2493_s0 + $0x398] sm:$0xff]  ;;  %v1041_v61 = vld [vmem:[%s2493_s0 + $0x210] sm:$0xff]  ;;  %v1075_v63 = vld [vmem:[%s2493_s0 + $0x320] sm:$0xff] }
  0x2b   :  { %354 = vmatpush.msrb.mxu3 %v1049_v17  ;;  %428 = vmatpush.msrb.mxu1 %v1083_v18  ;;  %v1722_v0 = vld [vmem:[%s2494_s1 + $0x90] sm:$0xff]  ;;  %v1058_v1 = vld [vmem:[%s2493_s0 + $0x298] sm:$0xff]  ;;  %v1040_v2 = vld [vmem:[%s2493_s0 + $0x208] sm:$0xff] }
  0x2c   :  { %391 = vmatpush.msrb.mxu0 %v1066_v19  ;;  %468 = vmatpush.msrb.mxu2 %v1097_v22  ;;  %v1089_v3 = vld [vmem:[%s2493_s0 + $0x390] sm:$0xff]  ;;  %v1074_v6 = vld [vmem:[%s2493_s0 + $0x318] sm:$0xff]  ;;  %v1745_v8 = vld [vmem:[%s2494_s1 + $0x80] sm:$0xff] }
  0x2d   :  { %150 = vmatmul.f32.gmra.mxu0 %v1562_v20  ;;  %188 = vmatmul.f32.gmra.mxu1 %v1567_v21  ;;  %v1057_v7 = vld [vmem:[%s2493_s0 + $0x290] sm:$0xff]  ;;  %v1750_v9 = vld [vmem:[%s2494_s1 + $0x88] sm:$0xff]  ;;  %v1039_v11 = vld [vmem:[%s2493_s0 + $0x200] sm:$0xff] }
  0x2e   :  { %355 = vmatpush.msrb.mxu3 %v1048_v23  ;;  %429 = vmatpush.msrb.mxu1 %v1082_v24  ;;  %v1088_v12 = vld [vmem:[%s2493_s0 + $0x388] sm:$0xff]  ;;  %v1073_v13 = vld [vmem:[%s2493_s0 + $0x310] sm:$0xff]  ;;  %v1769_v16 = vld [vmem:[%s2494_s1 + $0xb8] sm:$0xff] }
  0x2f   :  { %392 = vmatpush.msrb.mxu0 %v1065_v25  ;;  %469 = vmatpush.msrb.mxu2 %v1096_v27  ;;  %v1056_v15 = vld [vmem:[%s2493_s0 + $0x288] sm:$0xff]  ;;  %v1087_v17 = vld [vmem:[%s2493_s0 + $0x380] sm:$0xff]  ;;  %v1038_v18 = vld [vmem:[%s2493_s0 + $0x1f8] sm:$0xff] }
  0x30   :  { %1033 = vmatmul.msk.f32.gmra.mxu3 %vm105_vm1, %v1586_v26  ;;  %430 = vmatpush.msrb.mxu1 %v1081_v29  ;;  %v1072_v19 = vld [vmem:[%s2493_s0 + $0x308] sm:$0xff]  ;;  %v1783_v22 = vld [vmem:[%s2494_s1 + $0xb0] sm:$0xff]  ;;  %v1055_v23 = vld [vmem:[%s2493_s0 + $0x280] sm:$0xff] }
  0x31   :  { %356 = vmatpush.msrb.mxu3 %v1047_v28  ;;  %229 = vmatmul.f32.gmra.mxu2 %v1600_v30  ;;  %v1124_v24 = vld [vmem:[%s2493_s0 + $0x468] sm:$0xff]  ;;  %v1071_v25 = vld [vmem:[%s2493_s0 + $0x300] sm:$0xff]  ;;  %v1086_v27 = vld [vmem:[%s2493_s0 + $0x378] sm:$0xff] }
  0x32   :  { %393 = vmatpush.msrb.mxu0 %v1064_v31  ;;  %470 = vmatpush.msrb.mxu2 %v1095_v32  ;;  %v1054_v28 = vld [vmem:[%s2493_s0 + $0x278] sm:$0xff]  ;;  %v1806_v29 = vld [vmem:[%s2494_s1 + $0xa0] sm:$0xff]  ;;  %v1811_v31 = vld [vmem:[%s2494_s1 + $0xa8] sm:$0xff] }
  0x33   :  { %357 = vmatpush.msrb.mxu3 %v1046_v33  ;;  %431 = vmatpush.msrb.mxu1 %v1080_v34  ;;  %v1123_v32 = vld [vmem:[%s2493_s0 + $0x460] sm:$0xff]  ;;  %v1070_v34 = vld [vmem:[%s2493_s0 + $0x2f8] sm:$0xff] }
  0x34   :  { %394 = vmatpush.msrb.mxu0 %v1063_v35  ;;  %471 = vmatpush.msrb.mxu2 %v1094_v38  ;;  %v1171_v33 = vld [vmem:[%s2493_s0 + $0x5e0] sm:$0xf]  ;;  %v1140_v35 = vld [vmem:[%s2493_s0 + $0x4e8] sm:$0xff]  ;;  %v1830_v38 = vld [vmem:[%s2494_s1 + $0xd8] sm:$0x3] }
  0x35   :  { %153 = vmatmul.f32.gmra.mxu0 %v1623_v36  ;;  %191 = vmatmul.f32.gmra.mxu1 %v1628_v37 }
  0x36   :  { %358 = vmatpush.msrb.mxu3 %v1045_v39  ;;  %432 = vmatpush.msrb.mxu1 %v1079_v40  ;;  %v1156_v39 = vld [vmem:[%s2493_s0 + $0x568] sm:$0xff]  ;;  %v1122_v40 = vld [vmem:[%s2493_s0 + $0x458] sm:$0xff] }
  0x37   :  { %395 = vmatpush.msrb.mxu0 %v1062_v41  ;;  %472 = vmatpush.msrb.mxu2 %v1093_v43  ;;  %v1170_v41 = vld [vmem:[%s2493_s0 + $0x5d8] sm:$0xff]  ;;  %v1845_v43 = vld [vmem:[%s2494_s1 + $0xd0] sm:$0x3] }
  0x38   :  { %1034 = vmatmul.msk.f32.gmra.mxu3 %vm105_vm1, %v1647_v42  ;;  %433 = vmatpush.msrb.mxu1 %v1078_v45  ;;  %v1121_v45 = vld [vmem:[%s2493_s0 + $0x450] sm:$0xff] }
  0x39   :  { %359 = vmatpush.msrb.mxu3 %v1044_v44  ;;  %232 = vmatmul.f32.gmra.mxu2 %v1661_v46  ;;  %v1139_v44 = vld [vmem:[%s2493_s0 + $0x4e0] sm:$0xff] }
  0x3a   :  { %396 = vmatpush.msrb.mxu0 %v1061_v47  ;;  %473 = vmatpush.msrb.mxu2 %v1092_v48  ;;  %v1155_v47 = vld [vmem:[%s2493_s0 + $0x560] sm:$0xff]  ;;  %v1169_v48 = vld [vmem:[%s2493_s0 + $0x5d0] sm:$0xff] }
  0x3b   :  { %360 = vmatpush.msrb.mxu3 %v1043_v49  ;;  %434 = vmatpush.msrb.mxu1 %v1077_v50  ;;  %v1138_v49 = vld [vmem:[%s2493_s0 + $0x4d8] sm:$0xff]  ;;  %v1868_v50 = vld [vmem:[%s2494_s1 + $0xc0] sm:$0x3] }
  0x3c   :  { %397 = vmatpush.msrb.mxu0 %v1060_v51  ;;  %474 = vmatpush.msrb.mxu2 %v1091_v54  ;;  %v1873_v51 = vld [vmem:[%s2494_s1 + $0xc8] sm:$0x3] }
  0x3d   :  { %156 = vmatmul.f32.gmra.mxu0 %v1684_v52  ;;  %194 = vmatmul.f32.gmra.mxu1 %v1689_v53  ;;  %v1120_v54 = vld [vmem:[%s2493_s0 + $0x448] sm:$0xff] }
  0x3e   :  { %361 = vmatpush.msrb.mxu3 %v1042_v55  ;;  %435 = vmatpush.msrb.mxu1 %v1076_v56  ;;  %v1154_v55 = vld [vmem:[%s2493_s0 + $0x558] sm:$0xff]  ;;  %v1168_v56 = vld [vmem:[%s2493_s0 + $0x5c8] sm:$0xff] }
  0x3f   :  { %398 = vmatpush.msrb.mxu0 %v1059_v57  ;;  %475 = vmatpush.msrb.mxu2 %v1090_v60  ;;  %v1137_v57 = vld [vmem:[%s2493_s0 + $0x4d0] sm:$0xff] }
  0x40   :  { %1035 = vmatmul.msk.f32.gmra.mxu3 %vm105_vm1, %v1708_v59  ;;  %436 = vmatpush.msrb.mxu1 %v1075_v63  ;;  %v1153_v60 = vld [vmem:[%s2493_s0 + $0x550] sm:$0xff]  ;;  %v1167_v63 = vld [vmem:[%s2493_s0 + $0x5c0] sm:$0xff] }
  0x41   :  { %362 = vmatpush.msrb.mxu3 %v1041_v61  ;;  %235 = vmatmul.f32.gmra.mxu2 %v1722_v0  ;;  %v1119_v61 = vld [vmem:[%s2493_s0 + $0x440] sm:$0xff] }
  0x42   :  { %399 = vmatpush.msrb.mxu0 %v1058_v1  ;;  %476 = vmatpush.msrb.mxu2 %v1089_v3  ;;  %v1136_v1 = vld [vmem:[%s2493_s0 + $0x4c8] sm:$0xff] }
  0x43   :  { %363 = vmatpush.msrb.mxu3 %v1040_v2  ;;  %437 = vmatpush.msrb.mxu1 %v1074_v6  ;;  %v1118_v2 = vld [vmem:[%s2493_s0 + $0x438] sm:$0xff]  ;;  %v1152_v3 = vld [vmem:[%s2493_s0 + $0x548] sm:$0xff] }
  0x44   :  { %400 = vmatpush.msrb.mxu0 %v1057_v7  ;;  %477 = vmatpush.msrb.mxu2 %v1088_v12  ;;  %v1166_v6 = vld [vmem:[%s2493_s0 + $0x5b8] sm:$0xff]  ;;  %v1135_v7 = vld [vmem:[%s2493_s0 + $0x4c0] sm:$0xff] }
  0x45   :  { %159 = vmatmul.f32.gmra.mxu0 %v1745_v8  ;;  %197 = vmatmul.f32.gmra.mxu1 %v1750_v9  ;;  %v1151_v12 = vld [vmem:[%s2493_s0 + $0x540] sm:$0xff] }
  0x46   :  { %364 = vmatpush.msrb.mxu3 %v1039_v11  ;;  %438 = vmatpush.msrb.mxu1 %v1073_v13  ;;  %v1117_v11 = vld [vmem:[%s2493_s0 + $0x430] sm:$0xff]  ;;  %v1134_v13 = vld [vmem:[%s2493_s0 + $0x4b8] sm:$0xff] }
  0x47   :  { %401 = vmatpush.msrb.mxu0 %v1056_v15  ;;  %478 = vmatpush.msrb.mxu2 %v1087_v17  ;;  %v1165_v15 = vld [vmem:[%s2493_s0 + $0x5b0] sm:$0xff]  ;;  %v1150_v17 = vld [vmem:[%s2493_s0 + $0x538] sm:$0xff] }
  0x48   :  { %1036 = vmatmul.msk.f32.gmra.mxu3 %vm105_vm1, %v1769_v16  ;;  %439 = vmatpush.msrb.mxu1 %v1072_v19  ;;  %v1133_v19 = vld [vmem:[%s2493_s0 + $0x4b0] sm:$0xff] }
  0x49   :  { %365 = vmatpush.msrb.mxu3 %v1038_v18  ;;  %238 = vmatmul.f32.gmra.mxu2 %v1783_v22  ;;  %v1116_v18 = vld [vmem:[%s2493_s0 + $0x428] sm:$0xff] }
  0x4a   :  { %402 = vmatpush.msrb.mxu0 %v1055_v23  ;;  %440 = vmatpush.msrb.mxu1 %v1071_v25  ;;  %v1149_v23 = vld [vmem:[%s2493_s0 + $0x530] sm:$0xff]  ;;  %v1115_v25 = vld [vmem:[%s2493_s0 + $0x420] sm:$0xff] }
  0x4b   :  { %576 = vmatpush.msra.mxu3 %v1124_v24  ;;  %479 = vmatpush.msrb.mxu2 %v1086_v27  ;;  %v1164_v24 = vld [vmem:[%s2493_s0 + $0x5a8] sm:$0xff] }
  0x4c   :  { %403 = vmatpush.msrb.mxu0 %v1054_v28  ;;  %441 = vmatpush.msrb.mxu1 %v1070_v34  ;;  %v1132_v27 = vld [vmem:[%s2493_s0 + $0x4a8] sm:$0xff]  ;;  %v1131_v34 = vld [vmem:[%s2493_s0 + $0x4a0] sm:$0xff] }
  0x4d   :  { %162 = vmatmul.f32.gmra.mxu0 %v1806_v29  ;;  %200 = vmatmul.f32.gmra.mxu1 %v1811_v31  ;;  %v1148_v28 = vld [vmem:[%s2493_s0 + $0x528] sm:$0xff] }
  0x4e   :  { %577 = vmatpush.msra.mxu3 %v1123_v32  ;;  %1172 = vmatpush.msk.msra.mxu2 %vm127_vm0, %v1171_v33  ;;  %v1163_v32 = vld [vmem:[%s2493_s0 + $0x5a0] sm:$0xff]  ;;  %v1114_v33 = vld [vmem:[%s2493_s0 + $0x418] sm:$0xff] }
  0x4f   :  { %614 = vmatpush.msra.mxu0 %v1140_v35  ;;  %652 = vmatpush.msra.mxu1 %v1156_v39  ;;  %v1147_v35 = vld [vmem:[%s2493_s0 + $0x520] sm:$0xff]  ;;  %v1162_v39 = vld [vmem:[%s2493_s0 + $0x598] sm:$0xff] }
  0x50   :  { %1037 = vmatmul.msk.f32.gmra.mxu3 %vm105_vm1, %v1830_v38  ;;  %692 = vmatpush.msra.mxu2 %v1170_v41  ;;  %v1130_v41 = vld [vmem:[%s2493_s0 + $0x498] sm:$0xff] }
  0x51   :  { %578 = vmatpush.msra.mxu3 %v1122_v40  ;;  %241 = vmatmul.f32.gmra.mxu2 %v1845_v43  ;;  %v1113_v40 = vld [vmem:[%s2493_s0 + $0x410] sm:$0xff] }
  0x52   :  { %615 = vmatpush.msra.mxu0 %v1139_v44  ;;  %653 = vmatpush.msra.mxu1 %v1155_v47  ;;  %v1146_v44 = vld [vmem:[%s2493_s0 + $0x518] sm:$0xff]  ;;  %v1161_v47 = vld [vmem:[%s2493_s0 + $0x590] sm:$0xff] }
  0x53   :  { %579 = vmatpush.msra.mxu3 %v1121_v45  ;;  %693 = vmatpush.msra.mxu2 %v1169_v48  ;;  %v1112_v45 = vld [vmem:[%s2493_s0 + $0x408] sm:$0xff]  ;;  %v1129_v48 = vld [vmem:[%s2493_s0 + $0x490] sm:$0xff] }
  0x54   :  { %616 = vmatpush.msra.mxu0 %v1138_v49  ;;  %654 = vmatpush.msra.mxu1 %v1154_v55  ;;  %v1145_v49 = vld [vmem:[%s2493_s0 + $0x510] sm:$0xff]  ;;  %v1160_v55 = vld [vmem:[%s2493_s0 + $0x588] sm:$0xff] }
  0x55   :  { %165 = vmatmul.f32.gmra.mxu0 %v1868_v50  ;;  %203 = vmatmul.f32.gmra.mxu1 %v1873_v51 }
  0x56   :  { %580 = vmatpush.msra.mxu3 %v1120_v54  ;;  %694 = vmatpush.msra.mxu2 %v1168_v56  ;;  %v1111_v54 = vld [vmem:[%s2493_s0 + $0x400] sm:$0xff]  ;;  %v1128_v56 = vld [vmem:[%s2493_s0 + $0x488] sm:$0xff] }
  0x57   :  { %617 = vmatpush.msra.mxu0 %v1137_v57  ;;  %655 = vmatpush.msra.mxu1 %v1153_v60  ;;  %v1144_v57 = vld [vmem:[%s2493_s0 + $0x508] sm:$0xff]  ;;  %v1159_v60 = vld [vmem:[%s2493_s0 + $0x580] sm:$0xff] }
  0x58   :  { %366 = vmatmul.f32.vlgmr.msrb.gmra.mxu3 %v1500_v4  ;;  %695 = vmatpush.msra.mxu2 %v1167_v63  ;;  %v1127_v63 = vld [vmem:[%s2493_s0 + $0x480] sm:$0xff] }
  0x59   :  { %581 = vmatpush.msra.mxu3 %v1119_v61  ;;  %1102 = vmatmul.msk.f32.vlgmr.msrb.gmra.mxu2 %vm105_vm1, %v1463_v58  ;;  %v1110_v61 = vld [vmem:[%s2493_s0 + $0x3f8] sm:$0xff] }
  0x5a   :  { %618 = vmatpush.msra.mxu0 %v1136_v1  ;;  %656 = vmatpush.msra.mxu1 %v1152_v3  ;;  %v1143_v1 = vld [vmem:[%s2493_s0 + $0x500] sm:$0xff]  ;;  %v1158_v3 = vld [vmem:[%s2493_s0 + $0x578] sm:$0xff] }
  0x5b   :  { %582 = vmatpush.msra.mxu3 %v1118_v2  ;;  %696 = vmatpush.msra.mxu2 %v1166_v6  ;;  %v1109_v2 = vld [vmem:[%s2493_s0 + $0x3f0] sm:$0xff]  ;;  %v1126_v6 = vld [vmem:[%s2493_s0 + $0x478] sm:$0xff] }
  0x5c   :  { %619 = vmatpush.msra.mxu0 %v1135_v7  ;;  %657 = vmatpush.msra.mxu1 %v1151_v12  ;;  %v1195_v7 = vld [vmem:[%s2493_s0 + $0x660] sm:$0xff]  ;;  %v1157_v12 = vld [vmem:[%s2493_s0 + $0x570] sm:$0xff] }
  0x5d   :  { %404 = vmatmul.f32.vlgmr.msrb.gmra.mxu0 %v1505_v5  ;;  %442 = vmatmul.f32.vlgmr.msrb.gmra.mxu1 %v1477_v62 }
  0x5e   :  { %583 = vmatpush.msra.mxu3 %v1117_v11  ;;  %620 = vmatpush.msra.mxu0 %v1134_v13  ;;  %v1142_v11 = vld [vmem:[%s2493_s0 + $0x4f8] sm:$0xff]  ;;  %v1125_v13 = vld [vmem:[%s2493_s0 + $0x470] sm:$0xff] }
  0x5f   :  { %697 = vmatpush.msra.mxu2 %v1165_v15  ;;  %658 = vmatpush.msra.mxu1 %v1150_v17  ;;  %v1194_v15 = vld [vmem:[%s2493_s0 + $0x658] sm:$0xff] }
  0x60   :  { %369 = vmatmul.f32.gmra.mxu3 %v1562_v20  ;;  %621 = vmatpush.msra.mxu0 %v1133_v19  ;;  %v1242_v17 = vld [vmem:[%s2493_s0 + $0x7d8] sm:$0xf]  ;;  %v1211_v19 = vld [vmem:[%s2493_s0 + $0x6e0] sm:$0xff] }
  0x61   :  { %584 = vmatpush.msra.mxu3 %v1116_v18  ;;  %1103 = vmatmul.msk.f32.gmra.mxu2 %vm105_vm1, %v1525_v10  ;;  %v1141_v18 = vld [vmem:[%s2493_s0 + $0x4f0] sm:$0xff] }
  0x62   :  { %659 = vmatpush.msra.mxu1 %v1149_v23  ;;  %698 = vmatpush.msra.mxu2 %v1164_v24  ;;  %v1193_v23 = vld [vmem:[%s2493_s0 + $0x650] sm:$0xff]  ;;  %v1227_v24 = vld [vmem:[%s2493_s0 + $0x760] sm:$0xff] }
  0x63   :  { %585 = vmatpush.msra.mxu3 %v1115_v25  ;;  %622 = vmatpush.msra.mxu0 %v1132_v27  ;;  %v1241_v25 = vld [vmem:[%s2493_s0 + $0x7d0] sm:$0xff]  ;;  %v1210_v27 = vld [vmem:[%s2493_s0 + $0x6d8] sm:$0xff] }
  0x64   :  { %660 = vmatpush.msra.mxu1 %v1148_v28  ;;  %699 = vmatpush.msra.mxu2 %v1163_v32  ;;  %v1192_v28 = vld [vmem:[%s2493_s0 + $0x648] sm:$0xff]  ;;  %v1226_v32 = vld [vmem:[%s2493_s0 + $0x758] sm:$0xff] }
  0x65   :  { %407 = vmatmul.f32.gmra.mxu0 %v1567_v21  ;;  %445 = vmatmul.f32.gmra.mxu1 %v1539_v14 }
  0x66   :  { %586 = vmatpush.msra.mxu3 %v1114_v33  ;;  %623 = vmatpush.msra.mxu0 %v1131_v34  ;;  %v1240_v33 = vld [vmem:[%s2493_s0 + $0x7c8] sm:$0xff]  ;;  %v1209_v34 = vld [vmem:[%s2493_s0 + $0x6d0] sm:$0xff] }
  0x67   :  { %661 = vmatpush.msra.mxu1 %v1147_v35  ;;  %700 = vmatpush.msra.mxu2 %v1162_v39  ;;  %v1191_v35 = vld [vmem:[%s2493_s0 + $0x640] sm:$0xff]  ;;  %v1225_v39 = vld [vmem:[%s2493_s0 + $0x750] sm:$0xff] }
  0x68   :  { %372 = vmatmul.f32.gmra.mxu3 %v1623_v36  ;;  %624 = vmatpush.msra.mxu0 %v1130_v41  ;;  %v1208_v41 = vld [vmem:[%s2493_s0 + $0x6c8] sm:$0xff] }
  0x69   :  { %587 = vmatpush.msra.mxu3 %v1113_v40  ;;  %1104 = vmatmul.msk.f32.gmra.mxu2 %vm105_vm1, %v1586_v26  ;;  %v1239_v40 = vld [vmem:[%s2493_s0 + $0x7c0] sm:$0xff] }
  0x6a   :  { %662 = vmatpush.msra.mxu1 %v1146_v44  ;;  %701 = vmatpush.msra.mxu2 %v1161_v47  ;;  %v1190_v44 = vld [vmem:[%s2493_s0 + $0x638] sm:$0xff] }
  0x6b   :  { %588 = vmatpush.msra.mxu3 %v1112_v45  ;;  %625 = vmatpush.msra.mxu0 %v1129_v48  ;;  %v1224_v45 = vld [vmem:[%s2493_s0 + $0x748] sm:$0xff]  ;;  %v1238_v47 = vld [vmem:[%s2493_s0 + $0x7b8] sm:$0xff]  ;;  %v1207_v48 = vld [vmem:[%s2493_s0 + $0x6c0] sm:$0xff] }
  0x6c   :  { %663 = vmatpush.msra.mxu1 %v1145_v49  ;;  %702 = vmatpush.msra.mxu2 %v1160_v55  ;;  %v1189_v49 = vld [vmem:[%s2493_s0 + $0x630] sm:$0xff] }
  0x6d   :  { %410 = vmatmul.f32.gmra.mxu0 %v1628_v37  ;;  %448 = vmatmul.f32.gmra.mxu1 %v1600_v30  ;;  %v1237_v55 = vld [vmem:[%s2493_s0 + $0x7b0] sm:$0xff] }
  0x6e   :  { %589 = vmatpush.msra.mxu3 %v1111_v54  ;;  %626 = vmatpush.msra.mxu0 %v1128_v56  ;;  %v1223_v54 = vld [vmem:[%s2493_s0 + $0x740] sm:$0xff]  ;;  %v1206_v56 = vld [vmem:[%s2493_s0 + $0x6b8] sm:$0xff] }
  0x6f   :  { %664 = vmatpush.msra.mxu1 %v1144_v57  ;;  %703 = vmatpush.msra.mxu2 %v1159_v60  ;;  %v1188_v57 = vld [vmem:[%s2493_s0 + $0x628] sm:$0xff]  ;;  %v1222_v60 = vld [vmem:[%s2493_s0 + $0x738] sm:$0xff] }
  0x70   :  { %375 = vmatmul.f32.gmra.mxu3 %v1684_v52  ;;  %627 = vmatpush.msra.mxu0 %v1127_v63  ;;  %v1236_v63 = vld [vmem:[%s2493_s0 + $0x7a8] sm:$0xff] }
  0x71   :  { %590 = vmatpush.msra.mxu3 %v1110_v61  ;;  %1105 = vmatmul.msk.f32.gmra.mxu2 %vm105_vm1, %v1647_v42  ;;  %v1205_v61 = vld [vmem:[%s2493_s0 + $0x6b0] sm:$0xff] }
  0x72   :  { %665 = vmatpush.msra.mxu1 %v1143_v1  ;;  %704 = vmatpush.msra.mxu2 %v1158_v3  ;;  %v1187_v1 = vld [vmem:[%s2493_s0 + $0x620] sm:$0xff]  ;;  %v1204_v3 = vld [vmem:[%s2493_s0 + $0x6a8] sm:$0xff] }
  0x73   :  { %591 = vmatpush.msra.mxu3 %v1109_v2  ;;  %628 = vmatpush.msra.mxu0 %v1126_v6  ;;  %v1221_v2 = vld [vmem:[%s2493_s0 + $0x730] sm:$0xff]  ;;  %v1235_v6 = vld [vmem:[%s2493_s0 + $0x7a0] sm:$0xff] }
  0x74   :  { %666 = vmatpush.msra.mxu1 %v1142_v11  ;;  %705 = vmatpush.msra.mxu2 %v1157_v12  ;;  %v1203_v11 = vld [vmem:[%s2493_s0 + $0x6a0] sm:$0xff]  ;;  %v1234_v12 = vld [vmem:[%s2493_s0 + $0x798] sm:$0xff] }
  0x75   :  { %802 = vmatpush.msrb.mxu3 %v1195_v7  ;;  %413 = vmatmul.f32.gmra.mxu0 %v1689_v53  ;;  %v1186_v7 = vld [vmem:[%s2493_s0 + $0x618] sm:$0xff] }
  0x76   :  { %451 = vmatmul.f32.gmra.mxu1 %v1661_v46  ;;  %629 = vmatpush.msra.mxu0 %v1125_v13  ;;  %v1185_v13 = vld [vmem:[%s2493_s0 + $0x610] sm:$0xff] }
  0x77   :  { %803 = vmatpush.msrb.mxu3 %v1194_v15  ;;  %1243 = vmatpush.msk.msrb.mxu2 %vm127_vm0, %v1242_v17  ;;  %v1219_v15 = vld [vmem:[%s2493_s0 + $0x720] sm:$0xff]  ;;  %v1233_v17 = vld [vmem:[%s2493_s0 + $0x790] sm:$0xff] }
  0x78   :  { %378 = vmatmul.f32.gmra.mxu3 %v1745_v8  ;;  %667 = vmatpush.msra.mxu1 %v1141_v18  ;;  %v1184_v18 = vld [vmem:[%s2493_s0 + $0x608] sm:$0xff] }
  0x79   :  { %840 = vmatpush.msrb.mxu0 %v1211_v19  ;;  %1106 = vmatmul.msk.f32.gmra.mxu2 %vm105_vm1, %v1708_v59  ;;  %v1183_v19 = vld [vmem:[%s2493_s0 + $0x600] sm:$0xff] }
  0x7a   :  { %804 = vmatpush.msrb.mxu3 %v1193_v23  ;;  %878 = vmatpush.msrb.mxu1 %v1227_v24  ;;  %v1232_v23 = vld [vmem:[%s2493_s0 + $0x788] sm:$0xff]  ;;  %v1217_v24 = vld [vmem:[%s2493_s0 + $0x710] sm:$0xff] }
  0x7b   :  { %918 = vmatpush.msrb.mxu2 %v1241_v25  ;;  %841 = vmatpush.msrb.mxu0 %v1210_v27  ;;  %v1182_v25 = vld [vmem:[%s2493_s0 + $0x5f8] sm:$0xff]  ;;  %v1231_v27 = vld [vmem:[%s2493_s0 + $0x780] sm:$0xff] }
  0x7c   :  { %805 = vmatpush.msrb.mxu3 %v1192_v28  ;;  %879 = vmatpush.msrb.mxu1 %v1226_v32  ;;  %v1181_v28 = vld [vmem:[%s2493_s0 + $0x5f0] sm:$0xff] }
  0x7d   :  { %416 = vmatmul.f32.gmra.mxu0 %v1750_v9  ;;  %919 = vmatpush.msrb.mxu2 %v1240_v33 }
  0x7e   :  { %454 = vmatmul.f32.gmra.mxu1 %v1722_v0  ;;  %842 = vmatpush.msrb.mxu0 %v1209_v34  ;;  %v1215_v34 = vld [vmem:[%s2493_s0 + $0x700] sm:$0xff] }
  0x7f   :  { %806 = vmatpush.msrb.mxu3 %v1191_v35  ;;  %880 = vmatpush.msrb.mxu1 %v1225_v39 }
  0x80   :  { %381 = vmatmul.f32.gmra.mxu3 %v1806_v29  ;;  %920 = vmatpush.msrb.mxu2 %v1239_v40  ;;  %v1230_v40 = vld [vmem:[%s2493_s0 + $0x778] sm:$0xff] }
  0x81   :  { %843 = vmatpush.msrb.mxu0 %v1208_v41  ;;  %1107 = vmatmul.msk.f32.gmra.mxu2 %vm105_vm1, %v1769_v16  ;;  %v1198_v41 = vld [vmem:[%s2493_s0 + $0x678] sm:$0xff] }
  0x82   :  { %807 = vmatpush.msrb.mxu3 %v1190_v44  ;;  %881 = vmatpush.msrb.mxu1 %v1224_v45  ;;  %v1180_v45 = vld [vmem:[%s2493_s0 + $0x5e8] sm:$0xff] }
  0x83   :  { %921 = vmatpush.msrb.mxu2 %v1238_v47  ;;  %844 = vmatpush.msrb.mxu0 %v1207_v48  ;;  %v1229_v48 = vld [vmem:[%s2493_s0 + $0x770] sm:$0xff] }
  0x84   :  { %808 = vmatpush.msrb.mxu3 %v1189_v49  ;;  %882 = vmatpush.msrb.mxu1 %v1223_v54  ;;  %v1197_v49 = vld [vmem:[%s2493_s0 + $0x670] sm:$0xff] }
  0x85   :  { %419 = vmatmul.f32.gmra.mxu0 %v1811_v31  ;;  %922 = vmatpush.msrb.mxu2 %v1237_v55  ;;  %v1213_v54 = vld [vmem:[%s2493_s0 + $0x6f0] sm:$0xff]  ;;  %v1228_v55 = vld [vmem:[%s2493_s0 + $0x768] sm:$0xff] }
  0x86   :  { %457 = vmatmul.f32.gmra.mxu1 %v1783_v22  ;;  %845 = vmatpush.msrb.mxu0 %v1206_v56 }
  0x87   :  { %809 = vmatpush.msrb.mxu3 %v1188_v57  ;;  %883 = vmatpush.msrb.mxu1 %v1222_v60 }
  0x88   :  { %384 = vmatmul.f32.gmra.mxu3 %v1868_v50  ;;  %846 = vmatpush.msrb.mxu0 %v1205_v61 }
  0x89   :  { %1108 = vmatmul.msk.f32.gmra.mxu2 %vm105_vm1, %v1830_v38  ;;  %810 = vmatpush.msrb.mxu3 %v1187_v1 }
  0x8a   :  { %923 = vmatpush.msrb.mxu2 %v1236_v63  ;;  %884 = vmatpush.msrb.mxu1 %v1221_v2  ;;  %v1196_v63 = vld [vmem:[%s2493_s0 + $0x668] sm:$0xff] }
  0x8b   :  { %847 = vmatpush.msrb.mxu0 %v1204_v3  ;;  %811 = vmatpush.msrb.mxu3 %v1186_v7  ;;  %v1212_v3 = vld [vmem:[%s2493_s0 + $0x6e8] sm:$0xff] }
  0x8c   :  { %924 = vmatpush.msrb.mxu2 %v1235_v6 }
  0x8d   :  { %422 = vmatmul.f32.gmra.mxu0 %v1873_v51  ;;  %812 = vmatpush.msrb.mxu3 %v1185_v13 }
  0x8e   :  { %460 = vmatmul.f32.gmra.mxu1 %v1845_v43  ;;  %848 = vmatpush.msrb.mxu0 %v1203_v11 }
  0x8f   :  { %925 = vmatpush.msrb.mxu2 %v1234_v12  ;;  %813 = vmatpush.msrb.mxu3 %v1184_v18 }
  0x90   :  { %592 = vmatmul.f32.vlgmr.msra.gmra.mxu3 %v1500_v4  ;;  %v1220_v4 = vld [vmem:[%s2493_s0 + $0x728] sm:$0xff] }
  0x91   :  { %1173 = vmatmul.msk.f32.vlgmr.msra.gmra.mxu2 %vm105_vm1, %v1463_v58  ;;  %885 = vmatpush.msrb.mxu1 %v1220_v4  ;;  %v1202_v58 = vld [vmem:[%s2493_s0 + $0x698] sm:$0xff] }
  0x92   :  { %849 = vmatpush.msrb.mxu0 %v1202_v58  ;;  %926 = vmatpush.msrb.mxu2 %v1233_v17 }
  0x93   :  { %886 = vmatpush.msrb.mxu1 %v1219_v15  ;;  %814 = vmatpush.msrb.mxu3 %v1183_v19 }
  0x94   :  { %927 = vmatpush.msrb.mxu2 %v1232_v23 }
  0x95   :  { %630 = vmatmul.f32.vlgmr.msra.gmra.mxu0 %v1505_v5  ;;  %v1201_v5 = vld [vmem:[%s2493_s0 + $0x690] sm:$0xff]  ;;  %815 = vmatpush.msrb.mxu3 %v1182_v25  ;;  %v961_v25 = vld [vmem:[%s2495_s2] sm:$0xff] }
  0x96   :  { %668 = vmatmul.f32.vlgmr.msra.gmra.mxu1 %v1477_v62  ;;  %v1218_v62 = vld [vmem:[%s2493_s0 + $0x718] sm:$0xff]  ;;  %850 = vmatpush.msrb.mxu0 %v1201_v5 }
  0x97   :  { %887 = vmatpush.msrb.mxu1 %v1218_v62  ;;  %928 = vmatpush.msrb.mxu2 %v1231_v27 }
  0x98   :  { %595 = vmatmul.f32.gmra.mxu3 %v1562_v20 }
  0x99   :  { %1174 = vmatmul.msk.f32.gmra.mxu2 %vm105_vm1, %v1525_v10  ;;  %888 = vmatpush.msrb.mxu1 %v1217_v24  ;;  %v1200_v10 = vld [vmem:[%s2493_s0 + $0x688] sm:$0xff] }
  0x9a   :  { %851 = vmatpush.msrb.mxu0 %v1200_v10  ;;  %816 = vmatpush.msrb.mxu3 %v1181_v28  ;;  %v1264_v10 = vmov 0  }
  0x9b   :  { %929 = vmatpush.msrb.mxu2 %v1230_v40  ;;  %1252 = vset.pattern.permute.xlu0 %v1264_v10 }
  0x9c   :  { %817 = vmatpush.msrb.mxu3 %v1180_v45  ;;  %970 = vperm.xlu0 %1252, %v961_v25  }
  0x9d   :  { %633 = vmatmul.f32.gmra.mxu0 %v1567_v21  ;;  %v1199_v21 = vld [vmem:[%s2493_s0 + $0x680] sm:$0xff]  ;;  %930 = vmatpush.msrb.mxu2 %v1229_v48 }
  0x9e   :  { %671 = vmatmul.f32.gmra.mxu1 %v1539_v14  ;;  %v1216_v14 = vld [vmem:[%s2493_s0 + $0x708] sm:$0xff]  ;;  %852 = vmatpush.msrb.mxu0 %v1199_v21 }
  0x9f   :  { %889 = vmatpush.msrb.mxu1 %v1216_v14  ;;  %931 = vmatpush.msrb.mxu2 %v1228_v55 }
  0xa0   :  { %598 = vmatmul.f32.gmra.mxu3 %v1623_v36  ;;  %853 = vmatpush.msrb.mxu0 %v1198_v41 }
  0xa1   :  { %v148_v32 = vpop.f32.mrf.mxu0  ;;  %1175 = vmatmul.msk.f32.gmra.mxu2 %vm105_vm1, %v1586_v26  ;;  %890 = vmatpush.msrb.mxu1 %v1215_v34 }
  0xa2   :  { %v186_v33 = vpop.f32.mrf.mxu1  ;;  %854 = vmatpush.msrb.mxu0 %v1197_v49  ;;  %1253 = vset.pattern.permute.xlu1 %v1264_v10  ;;  %v1258_v49 = vld [vmem:[%s2494_s1 + $0x10] sm:$0xff] }
  0xa3   :  { %v187_v35 = vadd.f32 %v186_v33, %v148_v32  ;;  %v262_v39 = vpop.f32.mrf.mxu3  ;;  %1254 = vset.pattern.permute.xlu2 %v1264_v10 }
  0xa4   :  { %v224_v26 = vpop.f32.mrf.mxu2  ;;  %855 = vmatpush.msrb.mxu0 %v1196_v63 }
  0xa5   :  { %636 = vmatmul.f32.gmra.mxu0 %v1628_v37  ;;  %v225_v44 = vadd.f32 %v224_v26, %v187_v35  ;;  %v1255_v35 = vld [vmem:[%s2494_s1] sm:$0xff]  ;;  %v1256_v26 = vld [vmem:[%s2494_s1 + $0x18] sm:$0xff] }
  0xa6   :  { %674 = vmatmul.f32.gmra.mxu1 %v1600_v30  ;;  %v1214_v30 = vld [vmem:[%s2493_s0 + $0x6f8] sm:$0xff] }
  0xa7   :  { %v2249_v47 = vadd.f32 %v262_v39, %v225_v44  ;;  %891 = vmatpush.msrb.mxu1 %v1214_v30  ;;  %v962_v39 = vld [vmem:[%s2495_s2 + $0x8] sm:$0xff] }
  0xa8   :  { %601 = vmatmul.f32.gmra.mxu3 %v1684_v52  ;;  %975 = vperm.xlu0 %1252, %v962_v39   ;;  %v1257_v30 = vld [vmem:[%s2494_s1 + $0x8] sm:$0xff] }
  0xa9   :  { %1176 = vmatmul.msk.f32.gmra.mxu2 %vm105_vm1, %v1647_v42  ;;  %892 = vmatpush.msrb.mxu1 %v1213_v54 }
  0xaa   :  { %v151_v56 = vpop.f32.mrf.mxu0  ;;  %v189_v57 = vpop.f32.mrf.mxu1 }
  0xab   :  { %v190_v60 = vadd.f32 %v189_v57, %v151_v56  ;;  %v265_v61 = vpop.f32.mrf.mxu3  ;;  %893 = vmatpush.msrb.mxu1 %v1212_v3  ;;  %v963_v56 = vld [vmem:[%s2495_s2 + $0x10] sm:$0xff] }
  0xac   :  { %v227_v1 = vpop.f32.mrf.mxu2  ;;  %980 = vperm.xlu1 %1253, %v963_v56   ;;  %v1261_v3 = vld [vmem:[%s2494_s1 + $0x30] sm:$0xff]  ;;  %v966_v56 = vld [vmem:[%s2495_s2 + $0x28] sm:$0xff] }
  0xad   :  { %639 = vmatmul.f32.gmra.mxu0 %v1689_v53  ;;  %v228_v2 = vadd.f32 %v227_v1, %v190_v60 }
  0xae   :  { %677 = vmatmul.f32.gmra.mxu1 %v1661_v46 }
  0xaf   :  { %v2277_v6 = vadd.f32 %v265_v61, %v228_v2  ;;  %v1259_v61 = vld [vmem:[%s2494_s1 + $0x38] sm:$0xff] }
  0xb0   :  { %604 = vmatmul.f32.gmra.mxu3 %v1745_v8 }
  0xb1   :  { %1177 = vmatmul.msk.f32.gmra.mxu2 %vm105_vm1, %v1708_v59 }
  0xb2   :  { %v154_v7 = vpop.f32.mrf.mxu0  ;;  %v192_v4 = vpop.f32.mrf.mxu1 }
  0xb3   :  { %v193_v11 = vadd.f32 %v192_v4, %v154_v7  ;;  %v268_v12 = vpop.f32.mrf.mxu3 }
  0xb4   :  { %v230_v13 = vpop.f32.mrf.mxu2 }
  0xb5   :  { %642 = vmatmul.f32.gmra.mxu0 %v1750_v9  ;;  %v231_v15 = vadd.f32 %v230_v13, %v193_v11  ;;  %v964_v11 = vld [vmem:[%s2495_s2 + $0x18] sm:$0xff] }
  0xb6   :  { %680 = vmatmul.f32.gmra.mxu1 %v1722_v0  ;;  %985 = vperm.xlu1 %1253, %v964_v11   ;;  %v1262_v13 = vld [vmem:[%s2494_s1 + $0x58] sm:$0xff] }
  0xb7   :  { %v2284_v58 = vadd.f32 %v268_v12, %v231_v15 }
  0xb8   :  { %607 = vmatmul.f32.gmra.mxu3 %v1806_v29 }
  0xb9   :  { %1178 = vmatmul.msk.f32.gmra.mxu2 %vm105_vm1, %v1769_v16 }
  0xba   :  { %v157_v17 = vpop.f32.mrf.mxu0  ;;  %v195_v18 = vpop.f32.mrf.mxu1 }
  0xbb   :  { %v196_v62 = vadd.f32 %v195_v18, %v157_v17  ;;  %v271_v5 = vpop.f32.mrf.mxu3 }
  0xbc   :  { %v233_v19 = vpop.f32.mrf.mxu2 }
  0xbd   :  { %645 = vmatmul.f32.gmra.mxu0 %v1811_v31  ;;  %v234_v23 = vadd.f32 %v233_v19, %v196_v62 }
  0xbe   :  { %683 = vmatmul.f32.gmra.mxu1 %v1783_v22 }
  0xbf   :  { %v2291_v24 = vadd.f32 %v271_v5, %v234_v23  ;;  %v967_v23 = vld [vmem:[%s2495_s2 + $0x30] sm:$0x3] }
  0xc0   :  { %610 = vmatmul.f32.gmra.mxu3 %v1868_v50  ;;  %1000 = vperm.xlu0 %1252, %v967_v23  }
  0xc1   :  { %1179 = vmatmul.msk.f32.gmra.mxu2 %vm105_vm1, %v1830_v38 }
  0xc2   :  { %v160_v27 = vpop.f32.mrf.mxu0  ;;  %v198_v14 = vpop.f32.mrf.mxu1 }
  0xc3   :  { %v199_v21 = vadd.f32 %v198_v14, %v160_v27  ;;  %v274_v28 = vpop.f32.mrf.mxu3 }
  0xc4   :  { %v236_v32 = vpop.f32.mrf.mxu2 }
  0xc5   :  { %648 = vmatmul.f32.gmra.mxu0 %v1873_v51  ;;  %v237_v33 = vadd.f32 %v236_v32, %v199_v21 }
  0xc6   :  { %686 = vmatmul.f32.gmra.mxu1 %v1845_v43 }
  0xc7   :  { %v2301_v34 = vadd.f32 %v274_v28, %v237_v33 }
  0xc8   :  { %818 = vmatmul.f32.vlgmr.msrb.gmra.mxu3 %v1255_v35 }
  0xc9   :  { %1244 = vmatmul.msk.f32.vlgmr.msrb.gmra.mxu2 %vm105_vm1, %v1256_v26 }
  0xca   :  { %v163_v40 = vpop.f32.mrf.mxu0  ;;  %v201_v41 = vpop.f32.mrf.mxu1 }
  0xcb   :  { %v202_v44 = vadd.f32 %v201_v41, %v163_v40  ;;  %v277_v45 = vpop.f32.mrf.mxu3 }
  0xcc   :  { %v239_v48 = vpop.f32.mrf.mxu2 }
  0xcd   :  { %856 = vmatmul.f32.vlgmr.msrb.gmra.mxu0 %v1257_v30  ;;  %v240_v54 = vadd.f32 %v239_v48, %v202_v44 }
  0xce   :  { %894 = vmatmul.f32.vlgmr.msrb.gmra.mxu1 %v1258_v49 }
  0xcf   :  { %v2319_v55 = vadd.f32 %v277_v45, %v240_v54 }
  0xd0   :  { %821 = vmatmul.f32.gmra.mxu3 %v1562_v20  ;;  %v1260_v20 = vld [vmem:[%s2494_s1 + $0x28] sm:$0xff] }
  0xd1   :  { %1245 = vmatmul.msk.f32.gmra.mxu2 %vm105_vm1, %v1259_v61 }
  0xd2   :  { %v166_v57 = vpop.f32.mrf.mxu0  ;;  %v204_v60 = vpop.f32.mrf.mxu1 }
  0xd3   :  { %v205_v63 = vadd.f32 %v204_v60, %v166_v57  ;;  %v280_v1 = vpop.f32.mrf.mxu3 }
  0xd4   :  { %v242_v2 = vpop.f32.mrf.mxu2 }
  0xd5   :  { %859 = vmatmul.f32.gmra.mxu0 %v1260_v20  ;;  %v243_v7 = vadd.f32 %v242_v2, %v205_v63 }
  0xd6   :  { %897 = vmatmul.f32.gmra.mxu1 %v1261_v3 }
  0xd7   :  { %v2335_v4 = vadd.f32 %v280_v1, %v243_v7 }
  0xd8   :  { %824 = vmatmul.f32.gmra.mxu3 %v1623_v36  ;;  %v1263_v36 = vld [vmem:[%s2494_s1 + $0x50] sm:$0xff] }
  0xd9   :  { %1246 = vmatmul.msk.f32.gmra.mxu2 %vm105_vm1, %v1262_v13 }
  0xda   :  { %v405_v12 = vpop.f32.mrf.mxu0  ;;  %v443_v15 = vpop.f32.mrf.mxu1 }
  0xdb   :  { %v367_v17 = vpop.f32.mrf.mxu3 }
  0xdc   :  { %v406_v18 = vadd.f32 %v405_v12, %v367_v17  ;;  %v481_v62 = vpop.f32.mrf.mxu2 }
  0xdd   :  { %862 = vmatmul.f32.gmra.mxu0 %v1628_v37 }
  0xde   :  { %900 = vmatmul.f32.gmra.mxu1 %v1263_v36  ;;  %v444_v5 = vadd.f32 %v443_v15, %v406_v18 }
  0xe0   :  { %v2349_v19 = vadd.f32 %v481_v62, %v444_v5  ;;  %827 = vmatmul.f32.gmra.mxu3 %v1684_v52 }
  0xe1   :  { %1247 = vmatmul.msk.f32.gmra.mxu2 %vm105_vm1, %v1647_v42 }
  0xe2   :  { %v502_v10 = vmax.f32 %v2249_v47, %v2349_v19  ;;  %v408_v37 = vpop.f32.mrf.mxu0  ;;  %v446_v25 = vpop.f32.mrf.mxu1 }
  0xe3   :  { %v370_v27 = vpop.f32.mrf.mxu3 }
  0xe4   :  { %v409_v14 = vadd.f32 %v408_v37, %v370_v27  ;;  %v484_v21 = vpop.f32.mrf.mxu2 }
  0xe5   :  { %865 = vmatmul.f32.gmra.mxu0 %v1689_v53 }
  0xe6   :  { %903 = vmatmul.f32.gmra.mxu1 %v1661_v46  ;;  %v447_v52 = vadd.f32 %v446_v25, %v409_v14 }
  0xe8   :  { %v2361_v28 = vadd.f32 %v484_v21, %v447_v52  ;;  %830 = vmatmul.f32.gmra.mxu3 %v1745_v8 }
  0xe9   :  { %1248 = vmatmul.msk.f32.gmra.mxu2 %vm105_vm1, %v1708_v59 }
  0xea   :  { %v503_v32 = vmax.f32 %v2277_v6, %v2361_v28  ;;  %v411_v33 = vpop.f32.mrf.mxu0  ;;  %v449_v42 = vpop.f32.mrf.mxu1 }
  0xeb   :  { %v373_v35 = vpop.f32.mrf.mxu3 }
  0xec   :  { %v412_v39 = vadd.f32 %v411_v33, %v373_v35  ;;  %v487_v53 = vpop.f32.mrf.mxu2 }
  0xed   :  { %868 = vmatmul.f32.gmra.mxu0 %v1750_v9 }
  0xee   :  { %906 = vmatmul.f32.gmra.mxu1 %v1722_v0  ;;  %v450_v46 = vadd.f32 %v449_v42, %v412_v39 }
  0xf0   :  { %v2370_v40 = vadd.f32 %v487_v53, %v450_v46  ;;  %833 = vmatmul.f32.gmra.mxu3 %v1806_v29  ;;  %v965_v29 = vld [vmem:[%s2495_s2 + $0x20] sm:$0xff] }
  0xf1   :  { %1249 = vmatmul.msk.f32.gmra.mxu2 %vm105_vm1, %v1769_v16  ;;  %990 = vperm.xlu2 %1254, %v965_v29  }
  0xf2   :  { %v504_v8 = vmax.f32 %v2284_v58, %v2370_v40  ;;  %v414_v41 = vpop.f32.mrf.mxu0 }
  0xf3   :  { %v452_v59 = vpop.f32.mrf.mxu1  ;;  %v376_v26 = vpop.f32.mrf.mxu3 }
  0xf4   :  { %v415_v44 = vadd.f32 %v414_v41, %v376_v26  ;;  %v490_v9 = vpop.f32.mrf.mxu2 }
  0xf5   :  { %871 = vmatmul.f32.gmra.mxu0 %v1811_v31 }
  0xf6   :  { %909 = vmatmul.f32.gmra.mxu1 %v1783_v22  ;;  %v453_v0 = vadd.f32 %v452_v59, %v415_v44 }
  0xf8   :  { %v2379_v45 = vadd.f32 %v490_v9, %v453_v0  ;;  %836 = vmatmul.f32.gmra.mxu3 %v1868_v50 }
  0xf9   :  { %1250 = vmatmul.msk.f32.gmra.mxu2 %vm105_vm1, %v1830_v38  ;;  %995 = vperm.xlu2 %1254, %v966_v56  }
  0xfa   :  { %v505_v16 = vmax.f32 %v2291_v24, %v2379_v45  ;;  %v417_v48 = vpop.f32.mrf.mxu0 }
  0xfb   :  { %v455_v31 = vpop.f32.mrf.mxu1  ;;  %v379_v30 = vpop.f32.mrf.mxu3 }
  0xfc   :  { %v418_v22 = vadd.f32 %v417_v48, %v379_v30  ;;  %v493_v49 = vpop.f32.mrf.mxu2 }
  0xfd   :  { %874 = vmatmul.f32.gmra.mxu0 %v1873_v51 }
  0xfe   :  { %912 = vmatmul.f32.gmra.mxu1 %v1845_v43  ;;  %v456_v50 = vadd.f32 %v455_v31, %v418_v22 }
 0x100   :  { %v2391_v54 = vadd.f32 %v493_v49, %v456_v50 }
 0x102   :  { %v420_v38 = vpop.f32.mrf.mxu0 }
 0x103   :  { %v458_v60 = vpop.f32.mrf.mxu1  ;;  %v382_v61 = vpop.f32.mrf.mxu3 }
 0x104   :  { %v421_v63 = vadd.f32 %v420_v38, %v382_v61  ;;  %v496_v1 = vpop.f32.mrf.mxu2 }
 0x106   :  { %v459_v51 = vadd.f32 %v458_v60, %v421_v63 }
 0x108   :  { %v2398_v2 = vadd.f32 %v496_v1, %v459_v51 }
 0x10a   :  { %v423_v20 = vpop.f32.mrf.mxu0 }
 0x10b   :  { %v461_v3 = vpop.f32.mrf.mxu1  ;;  %v385_v7 = vpop.f32.mrf.mxu3 }
 0x10c   :  { %v424_v11 = vadd.f32 %v423_v20, %v385_v7  ;;  %v499_v12 = vpop.f32.mrf.mxu2 }
 0x10e   :  { %v462_v13 = vadd.f32 %v461_v3, %v424_v11  ;;  %v971_v3 = vpop.permute.xlu0 %970 }
 0x110   :  { %v2402_v15 = vadd.f32 %v499_v12, %v462_v13 }
 0x112   :  { %v631_v18 = vpop.f32.mrf.mxu0 }
 0x113   :  { %v669_v62 = vpop.f32.mrf.mxu1  ;;  %v593_v36 = vpop.f32.mrf.mxu3 }
 0x114   :  { %v707_v5 = vpop.f32.mrf.mxu2  ;;  %v632_v22 = vadd.f32 %v631_v18, %v593_v36 }
 0x116   :  { %v670_v50 = vadd.f32 %v669_v62, %v632_v22 }
 0x118   :  { %v708_v61 = vadd.f32 %v707_v5, %v670_v50 }
 0x11a   :  { %v634_v23 = vpop.f32.mrf.mxu0  ;;  %v728_v7 = vmax.f32 %v502_v10, %v708_v61  ;;  %v976_v10 = vpop.permute.xlu0 %975 }
 0x11b   :  { %v672_v37 = vpop.f32.mrf.mxu1  ;;  %v596_v25 = vpop.f32.mrf.mxu3 }
 0x11c   :  { %v710_v27 = vpop.f32.mrf.mxu2  ;;  %v635_v63 = vadd.f32 %v634_v23, %v596_v25 }
 0x11e   :  { %v673_v11 = vadd.f32 %v672_v37, %v635_v63  ;;  %v981_v28 = vpop.permute.xlu1 %980 }
 0x120   :  { %v711_v62 = vadd.f32 %v710_v27, %v673_v11 }
 0x122   :  { %v637_v14 = vpop.f32.mrf.mxu0  ;;  %v729_v50 = vmax.f32 %v503_v32, %v711_v62 }
 0x123   :  { %v675_v21 = vpop.f32.mrf.mxu1  ;;  %v599_v52 = vpop.f32.mrf.mxu3 }
 0x124   :  { %v713_v33 = vpop.f32.mrf.mxu2  ;;  %v638_v22 = vadd.f32 %v637_v14, %v599_v52 }
 0x126   :  { %v676_v47 = vadd.f32 %v675_v21, %v638_v22 }
 0x128   :  { %v714_v52 = vadd.f32 %v713_v33, %v676_v47  ;;  %v986_v11 = vpop.permute.xlu1 %985 }
 0x12a   :  { %v640_v42 = vpop.f32.mrf.mxu0  ;;  %v730_v32 = vmax.f32 %v504_v8, %v714_v52 }
 0x12b   :  { %v678_v35 = vpop.f32.mrf.mxu1  ;;  %v602_v39 = vpop.f32.mrf.mxu3 }
 0x12c   :  { %v2406_v53 = vpop.f32.mrf.mxu2 }
 0x132   :  { %v2408_v46 = vpop.f32.mrf.mxu0 }
 0x133   :  { %v2410_v41 = vpop.f32.mrf.mxu1  ;;  %v2412_v59 = vpop.f32.mrf.mxu3 }
 0x134   :  { %v2414_v26 = vpop.f32.mrf.mxu2 }
 0x13a   :  { %v2416_v44 = vpop.f32.mrf.mxu0 }
 0x13b   :  { %v2418_v9 = vpop.f32.mrf.mxu1  ;;  %v2420_v0 = vpop.f32.mrf.mxu3 }
 0x13c   :  { %v2422_v29 = vpop.f32.mrf.mxu2 }
 0x142   :  { %v2424_v48 = vpop.f32.mrf.mxu0 }
 0x143   :  { %v2426_v31 = vpop.f32.mrf.mxu1  ;;  %v2428_v30 = vpop.f32.mrf.mxu3 }
 0x144   :  { %v2430_v49 = vpop.f32.mrf.mxu2 }
 0x14a   :  { %v857_v56 = vpop.f32.mrf.mxu0 }
 0x14b   :  { %v895_v38 = vpop.f32.mrf.mxu1  ;;  %v819_v60 = vpop.f32.mrf.mxu3 }
 0x14c   :  { %v858_v1 = vadd.f32 %v857_v56, %v819_v60  ;;  %v933_v51 = vpop.f32.mrf.mxu2  ;;  %v641_v56 = vadd.f32 %v640_v42, %v602_v39  ;;  %v991_v22 = vpop.permute.xlu2 %990 }
 0x14e   :  { %v896_v20 = vadd.f32 %v895_v38, %v858_v1  ;;  %v679_v21 = vadd.f32 %v678_v35, %v641_v56 }
 0x150   :  { %v934_v12 = vadd.f32 %v933_v51, %v896_v20  ;;  %v717_v1 = vadd.f32 %v2406_v53, %v679_v21  ;;  %v644_v51 = vadd.f32 %v2408_v46, %v2412_v59 }
 0x152   :  { %v954_v13 = vmax.f32 %v728_v7, %v934_v12  ;;  %v860_v18 = vpop.f32.mrf.mxu0  ;;  %v731_v35 = vmax.f32 %v505_v16, %v717_v1  ;;  %v682_v7 = vadd.f32 %v2410_v41, %v644_v51 }
 0x153   :  { %v898_v36 = vpop.f32.mrf.mxu1  ;;  %v822_v17 = vpop.f32.mrf.mxu3 }
 0x154   :  { %v1003_v43 = vadd.f32 %v971_v3, %v954_v13  ;;  %v861_v57 = vadd.f32 %v860_v18, %v822_v17  ;;  %v936_v5 = vpop.f32.mrf.mxu2  ;;  %v720_v18 = vadd.f32 %v2414_v26, %v682_v7  ;;  %v996_v56 = vpop.permute.xlu2 %995 }
 0x156   :  { %v1010_v23 = vmax.f32 %v1003_v43, 0.0  ;;  %v899_v25 = vadd.f32 %v898_v36, %v861_v57  ;;  %v647_v36 = vadd.f32 %v2416_v44, %v2420_v0 }
 0x158   :  { %1018 = vst.msk [vmem:[%s2496_s3] sm:$0xff] %vm1017_vm2, %v1010_v23  ;;  %v937_v19 = vadd.f32 %v936_v5, %v899_v25  ;;  %v2497_v5 = vmax.f32 %v2301_v34, %v2391_v54  ;;  %v685_v25 = vadd.f32 %v2418_v9, %v647_v36 }
 0x15a   :  { %v955_v37 = vmax.f32 %v729_v50, %v937_v19  ;;  %v863_v27 = vpop.f32.mrf.mxu0  ;;  %v732_v23 = vmax.f32 %v2497_v5, %v720_v18  ;;  %v723_v19 = vadd.f32 %v2422_v29, %v685_v25 }
 0x15b   :  { %v901_v14 = vpop.f32.mrf.mxu1  ;;  %v825_v17 = vpop.f32.mrf.mxu3 }
 0x15c   :  { %v1004_v43 = vadd.f32 %v976_v10, %v955_v37  ;;  %v864_v57 = vadd.f32 %v863_v27, %v825_v17  ;;  %v939_v38 = vpop.f32.mrf.mxu2  ;;  %v650_v10 = vadd.f32 %v2424_v48, %v2428_v30 }
 0x15e   :  { %v1011_v60 = vmax.f32 %v1004_v43, 0.0  ;;  %v902_v6 = vadd.f32 %v901_v14, %v864_v57  ;;  %v2498_v14 = vmax.f32 %v2319_v55, %v2398_v2  ;;  %v688_v52 = vadd.f32 %v2426_v31, %v650_v10 }
 0x15f   :  { %v2499_v31 = vmax.f32 %v2335_v4, %v2402_v15 }
 0x160   :  { %1019 = vst.msk [vmem:[%s2496_s3 + $0x8] sm:$0xff] %vm1017_vm2, %v1011_v60  ;;  %v940_v61 = vadd.f32 %v939_v38, %v902_v6  ;;  %v733_v17 = vmax.f32 %v2498_v14, %v723_v19  ;;  %v726_v38 = vadd.f32 %v2430_v49, %v688_v52 }
 0x162   :  { %v956_v63 = vmax.f32 %v730_v32, %v940_v61  ;;  %v866_v33 = vpop.f32.mrf.mxu0  ;;  %v734_v32 = vmax.f32 %v2499_v31, %v726_v38 }
 0x163   :  { %v904_v42 = vpop.f32.mrf.mxu1  ;;  %v828_v39 = vpop.f32.mrf.mxu3 }
 0x164   :  { %v1005_v20 = vadd.f32 %v981_v28, %v956_v63  ;;  %v867_v3 = vadd.f32 %v866_v33, %v828_v39  ;;  %v942_v58 = vpop.f32.mrf.mxu2  ;;  %v1001_v63 = vpop.permute.xlu0 %1000 }
 0x166   :  { %v1012_v40 = vmax.f32 %v1005_v20, 0.0  ;;  %v905_v8 = vadd.f32 %v904_v42, %v867_v3 }
 0x168   :  { %1020 = vst.msk [vmem:[%s2496_s3 + $0x10] sm:$0xff] %vm1017_vm2, %v1012_v40  ;;  %v943_v53 = vadd.f32 %v942_v58, %v905_v8 }
 0x16a   :  { %v957_v12 = vmax.f32 %v731_v35, %v943_v53  ;;  %v869_v46 = vpop.f32.mrf.mxu0 }
 0x16b   :  { %v907_v59 = vpop.f32.mrf.mxu1  ;;  %v831_v13 = vpop.f32.mrf.mxu3 }
 0x16c   :  { %v1006_v24 = vadd.f32 %v986_v11, %v957_v12  ;;  %v870_v45 = vadd.f32 %v869_v46, %v831_v13  ;;  %v945_v16 = vpop.f32.mrf.mxu2 }
 0x16e   :  { %v1013_v41 = vmax.f32 %v1006_v24, 0.0  ;;  %v908_v62 = vadd.f32 %v907_v59, %v870_v45 }
 0x170   :  { %1021 = vst.msk [vmem:[%s2496_s3 + $0x18] sm:$0xff] %vm1017_vm2, %v1013_v41  ;;  %v946_v26 = vadd.f32 %v945_v16, %v908_v62 }
 0x172   :  { %v958_v50 = vmax.f32 %v732_v23, %v946_v26  ;;  %v872_v44 = vpop.f32.mrf.mxu0 }
 0x173   :  { %v910_v0 = vpop.f32.mrf.mxu1  ;;  %v834_v47 = vpop.f32.mrf.mxu3 }
 0x174   :  { %v1007_v37 = vadd.f32 %v991_v22, %v958_v50  ;;  %v873_v34 = vadd.f32 %v872_v44, %v834_v47  ;;  %v948_v54 = vpop.f32.mrf.mxu2 }
 0x176   :  { %v1014_v27 = vmax.f32 %v1007_v37, 0.0  ;;  %v911_v9 = vadd.f32 %v910_v0, %v873_v34 }
 0x178   :  { %1022 = vst.msk [vmem:[%s2496_s3 + $0x20] sm:$0xff] %vm1017_vm2, %v1014_v27  ;;  %v949_v29 = vadd.f32 %v948_v54, %v911_v9 }
 0x17a   :  { %v959_v43 = vmax.f32 %v733_v17, %v949_v29  ;;  %v875_v48 = vpop.f32.mrf.mxu0 }
 0x17b   :  { %v837_v30 = vpop.f32.mrf.mxu3  ;;  %v913_v57 = vpop.f32.mrf.mxu1 }
 0x17c   :  { %v1008_v60 = vadd.f32 %v996_v56, %v959_v43  ;;  %v876_v6 = vadd.f32 %v875_v48, %v837_v30  ;;  %v951_v28 = vpop.f32.mrf.mxu2 }
 0x17e   :  { %v1015_v55 = vmax.f32 %v1008_v60, 0.0  ;;  %v914_v2 = vadd.f32 %v913_v57, %v876_v6 }
 0x180   :  { %1023 = vst.msk [vmem:[%s2496_s3 + $0x28] sm:$0xff] %vm1017_vm2, %v1015_v55  ;;  %v952_v21 = vadd.f32 %v951_v28, %v914_v2 }
 0x182   :  { %v960_v61 = vmax.f32 %v734_v32, %v952_v21 }
 0x184   :  { %v1009_v33 = vadd.f32 %v1001_v63, %v960_v61 }
 0x186   :  { %v1016_v49 = vmax.f32 %v1009_v33, 0.0 }
 0x188   :  { %1025 = vst.msk [vmem:[%s2496_s3 + $0x30] sm:$0x3] %vm1024_vm3, %v1016_v49 }

// kernel: net_forward.7
= control target key start
LH: loop header
LB: loop body
LE: loop exit
PB: predicated region body
PF: predicated region fallthrough
CT: control target
= control target key end

     0   :  { %vm1260_vm0 = vcmask 261120   ;;  %s4360_s0 = inlined_call_operand.vmem [shape: f32[2,800], index: 0, kind: input, shape index: {}]   ;;  %s4361_s1 = inlined_call_operand.vmem [shape: bf16[800,500], index: 1, kind: input, shape index: {}]   ;;  %s4362_s2 = inlined_call_operand.vmem [shape: f32[1,500], index: 2, kind: input, shape index: {}]   ;;  %s4363_s3 = inlined_call_operand.vmem [shape: f32[500,10], index: 3, kind: input, shape index: {}]   ;;  %s4364_s4 = inlined_call_operand.vmem [shape: f32[1,10], index: 4, kind: input, shape index: {}]   ;;  %s4365_s5 = inlined_call_operand.hbm [shape: f32[2,10], index: 5, kind: output, shape index: {}]  }
   0x1   :  { %v1931_v0 = vld [vmem:[%s4361_s1 + $0xe0] sm:$0xf]  ;;  %v2653_v1 = vld [vmem:[%s4361_s1 + $0xec] sm:$0xf0] }
   0x2   :  { %v2059_v2 = vld [vmem:[%s4361_s1 + $0x1e0] sm:$0xf]  ;;  %v1932_v3 = vor.u32 %v2653_v1, %v1931_v0  ;;  %v2685_v4 = vld [vmem:[%s4361_s1 + $0x1ec] sm:$0xf0] }
   0x3   :  { %v2187_v5 = vld [vmem:[%s4361_s1 + $0x2e0] sm:$0xf]  ;;  %v2717_v6 = vld [vmem:[%s4361_s1 + $0x2ec] sm:$0xf0]  ;;  %v2060_v7 = vor.u32 %v2685_v4, %v2059_v2 }
   0x4   :  { %v2188_v8 = vor.u32 %v2717_v6, %v2187_v5  ;;  %v2315_v9 = vld [vmem:[%s4361_s1 + $0x3e0] sm:$0xf]  ;;  %v2749_v10 = vld [vmem:[%s4361_s1 + $0x3ec] sm:$0xf0]  ;;  %1264 = vmatpush.bf16.msra.mxu0 %v1932_v3 }
   0x5   :  { %v1915_v11 = vld [vmem:[%s4361_s1 + $0xc0] sm:$0xf]  ;;  %v2316_v12 = vor.u32 %v2749_v10, %v2315_v9  ;;  %v2649_v13 = vld [vmem:[%s4361_s1 + $0xcc] sm:$0xf0]  ;;  %1277 = vmatpush.bf16.msra.mxu1 %v2060_v7 }
   0x6   :  { %v2043_v14 = vld [vmem:[%s4361_s1 + $0x1c0] sm:$0xf]  ;;  %v2681_v15 = vld [vmem:[%s4361_s1 + $0x1cc] sm:$0xf0]  ;;  %1290 = vmatpush.bf16.msra.mxu2 %v2188_v8  ;;  %v1916_v16 = vor.u32 %v2649_v13, %v1915_v11 }
   0x7   :  { %v2044_v17 = vor.u32 %v2681_v15, %v2043_v14  ;;  %v2171_v18 = vld [vmem:[%s4361_s1 + $0x2c0] sm:$0xf]  ;;  %v2713_v19 = vld [vmem:[%s4361_s1 + $0x2cc] sm:$0xf0]  ;;  %1303 = vmatpush.bf16.msra.mxu3 %v2316_v12 }
   0x8   :  { %v2299_v20 = vld [vmem:[%s4361_s1 + $0x3c0] sm:$0xf]  ;;  %v2172_v21 = vor.u32 %v2713_v19, %v2171_v18  ;;  %v2745_v22 = vld [vmem:[%s4361_s1 + $0x3cc] sm:$0xf0]  ;;  %1265 = vmatpush.bf16.msra.mxu0 %v1916_v16 }
   0x9   :  { %v1899_v23 = vld [vmem:[%s4361_s1 + $0xa0] sm:$0xf]  ;;  %v2645_v24 = vld [vmem:[%s4361_s1 + $0xac] sm:$0xf0]  ;;  %v2300_v25 = vor.u32 %v2745_v22, %v2299_v20  ;;  %1278 = vmatpush.bf16.msra.mxu1 %v2044_v17 }
   0xa   :  { %v2027_v26 = vld [vmem:[%s4361_s1 + $0x1a0] sm:$0xf]  ;;  %v2677_v27 = vld [vmem:[%s4361_s1 + $0x1ac] sm:$0xf0]  ;;  %v1900_v29 = vor.u32 %v2645_v24, %v1899_v23  ;;  %1291 = vmatpush.bf16.msra.mxu2 %v2172_v21 }
   0xb   :  { %v2155_v28 = vld [vmem:[%s4361_s1 + $0x2a0] sm:$0xf]  ;;  %v2709_v30 = vld [vmem:[%s4361_s1 + $0x2ac] sm:$0xf0]  ;;  %v2028_v33 = vor.u32 %v2677_v27, %v2027_v26  ;;  %1304 = vmatpush.bf16.msra.mxu3 %v2300_v25 }
   0xc   :  { %v2283_v31 = vld [vmem:[%s4361_s1 + $0x3a0] sm:$0xf]  ;;  %v2741_v32 = vld [vmem:[%s4361_s1 + $0x3ac] sm:$0xf0]  ;;  %v2156_v34 = vor.u32 %v2709_v30, %v2155_v28  ;;  %1266 = vmatpush.bf16.msra.mxu0 %v1900_v29 }
   0xd   :  { %v1883_v35 = vld [vmem:[%s4361_s1 + $0x80] sm:$0xf]  ;;  %v2641_v36 = vld [vmem:[%s4361_s1 + $0x8c] sm:$0xf0]  ;;  %v2284_v38 = vor.u32 %v2741_v32, %v2283_v31  ;;  %1279 = vmatpush.bf16.msra.mxu1 %v2028_v33 }
   0xe   :  { %v2011_v37 = vld [vmem:[%s4361_s1 + $0x180] sm:$0xf]  ;;  %v2673_v39 = vld [vmem:[%s4361_s1 + $0x18c] sm:$0xf0]  ;;  %v1884_v44 = vor.u32 %v2641_v36, %v1883_v35  ;;  %1292 = vmatpush.bf16.msra.mxu2 %v2156_v34 }
   0xf   :  { %v2139_v40 = vld [vmem:[%s4361_s1 + $0x280] sm:$0xf]  ;;  %v2705_v41 = vld [vmem:[%s4361_s1 + $0x28c] sm:$0xf0]  ;;  %v2012_v45 = vor.u32 %v2673_v39, %v2011_v37  ;;  %1305 = vmatpush.bf16.msra.mxu3 %v2284_v38  ;;  %v2651_v38 = vld [vmem:[%s4361_s1 + $0xe4] sm:$0xf] }
  0x10   :  { %v2267_v42 = vld [vmem:[%s4361_s1 + $0x380] sm:$0xf]  ;;  %v2737_v43 = vld [vmem:[%s4361_s1 + $0x38c] sm:$0xf0]  ;;  %v2140_v46 = vor.u32 %v2705_v41, %v2139_v40  ;;  %1267 = vmatpush.bf16.msra.mxu0 %v1884_v44  ;;  %v1933_v39 = vld [vmem:[%s4361_s1 + $0xf0] sm:$0xf0] }
  0x11   :  { %v1867_v47 = vld [vmem:[%s4361_s1 + $0x60] sm:$0xf]  ;;  %v2637_v48 = vld [vmem:[%s4361_s1 + $0x6c] sm:$0xf0]  ;;  %v2268_v50 = vor.u32 %v2737_v43, %v2267_v42  ;;  %1280 = vmatpush.bf16.msra.mxu1 %v2012_v45 }
  0x12   :  { %v1995_v49 = vld [vmem:[%s4361_s1 + $0x160] sm:$0xf]  ;;  %v2669_v51 = vld [vmem:[%s4361_s1 + $0x16c] sm:$0xf0]  ;;  %v1868_v56 = vor.u32 %v2637_v48, %v1867_v47  ;;  %1293 = vmatpush.bf16.msra.mxu2 %v2140_v46 }
  0x13   :  { %v2123_v52 = vld [vmem:[%s4361_s1 + $0x260] sm:$0xf]  ;;  %v2701_v53 = vld [vmem:[%s4361_s1 + $0x26c] sm:$0xf0]  ;;  %v1996_v57 = vor.u32 %v2669_v51, %v1995_v49  ;;  %1306 = vmatpush.bf16.msra.mxu3 %v2268_v50  ;;  %v2647_v50 = vld [vmem:[%s4361_s1 + $0xc4] sm:$0xf]  ;;  %v1936_v51 = vor.u32 %v2651_v38, %v1933_v39 }
  0x14   :  { %v2251_v54 = vld [vmem:[%s4361_s1 + $0x360] sm:$0xf]  ;;  %v2733_v55 = vld [vmem:[%s4361_s1 + $0x36c] sm:$0xf0]  ;;  %v2124_v58 = vor.u32 %v2701_v53, %v2123_v52  ;;  %1268 = vmatpush.bf16.msra.mxu0 %v1868_v56  ;;  %v1917_v52 = vld [vmem:[%s4361_s1 + $0xd0] sm:$0xf0] }
  0x15   :  { %v1851_v59 = vld [vmem:[%s4361_s1 + $0x40] sm:$0xf]  ;;  %v2633_v60 = vld [vmem:[%s4361_s1 + $0x4c] sm:$0xf0]  ;;  %v2252_v62 = vor.u32 %v2733_v55, %v2251_v54  ;;  %1281 = vmatpush.bf16.msra.mxu1 %v1996_v57  ;;  %v2683_v53 = vld [vmem:[%s4361_s1 + $0x1e4] sm:$0xf] }
  0x16   :  { %v1979_v61 = vld [vmem:[%s4361_s1 + $0x140] sm:$0xf]  ;;  %v2665_v63 = vld [vmem:[%s4361_s1 + $0x14c] sm:$0xf0]  ;;  %v1852_v4 = vor.u32 %v2633_v60, %v1851_v59  ;;  %1294 = vmatpush.bf16.msra.mxu2 %v2124_v58  ;;  %v2061_v54 = vld [vmem:[%s4361_s1 + $0x1f0] sm:$0xf0] }
  0x17   :  { %v2107_v0 = vld [vmem:[%s4361_s1 + $0x240] sm:$0xf]  ;;  %v2697_v1 = vld [vmem:[%s4361_s1 + $0x24c] sm:$0xf0]  ;;  %v1980_v5 = vor.u32 %v2665_v63, %v1979_v61  ;;  %1307 = vmatpush.bf16.msra.mxu3 %v2252_v62 }
  0x18   :  { %v2235_v2 = vld [vmem:[%s4361_s1 + $0x340] sm:$0xf]  ;;  %v2729_v3 = vld [vmem:[%s4361_s1 + $0x34c] sm:$0xf0]  ;;  %v2108_v6 = vor.u32 %v2697_v1, %v2107_v0  ;;  %1269 = vmatpush.bf16.msra.mxu0 %v1852_v4  ;;  %v1920_v4 = vor.u32 %v2647_v50, %v1917_v52 }
  0x19   :  { %v1835_v7 = vld [vmem:[%s4361_s1 + $0x20] sm:$0xf]  ;;  %v2629_v8 = vld [vmem:[%s4361_s1 + $0x2c] sm:$0xf0]  ;;  %v2236_v10 = vor.u32 %v2729_v3, %v2235_v2  ;;  %1282 = vmatpush.bf16.msra.mxu1 %v1980_v5  ;;  %v2064_v5 = vor.u32 %v2683_v53, %v2061_v54 }
  0x1a   :  { %v1963_v9 = vld [vmem:[%s4361_s1 + $0x120] sm:$0xf]  ;;  %v2661_v11 = vld [vmem:[%s4361_s1 + $0x12c] sm:$0xf0]  ;;  %v1836_v17 = vor.u32 %v2629_v8, %v1835_v7  ;;  %1295 = vmatpush.bf16.msra.mxu2 %v2108_v6  ;;  %v2643_v8 = vld [vmem:[%s4361_s1 + $0xa4] sm:$0xf] }
  0x1b   :  { %v2091_v12 = vld [vmem:[%s4361_s1 + $0x220] sm:$0xf]  ;;  %v2693_v13 = vld [vmem:[%s4361_s1 + $0x22c] sm:$0xf0]  ;;  %v1964_v21 = vor.u32 %v2661_v11, %v1963_v9  ;;  %1308 = vmatpush.bf16.msra.mxu3 %v2236_v10  ;;  %v1901_v9 = vld [vmem:[%s4361_s1 + $0xb0] sm:$0xf0] }
  0x1c   :  { %v2219_v14 = vld [vmem:[%s4361_s1 + $0x320] sm:$0xf]  ;;  %v2725_v15 = vld [vmem:[%s4361_s1 + $0x32c] sm:$0xf0]  ;;  %v2092_v22 = vor.u32 %v2693_v13, %v2091_v12  ;;  %1270 = vmatpush.bf16.msra.mxu0 %v1836_v17  ;;  %v2679_v10 = vld [vmem:[%s4361_s1 + $0x1c4] sm:$0xf] }
  0x1d   :  { %v1819_v16 = vld [vmem:[%s4361_s1] sm:$0xf]  ;;  %v2625_v18 = vld [vmem:[%s4361_s1 + $0xc] sm:$0xf0]  ;;  %v2220_v26 = vor.u32 %v2725_v15, %v2219_v14  ;;  %1283 = vmatpush.bf16.msra.mxu1 %v1964_v21  ;;  %v2045_v11 = vld [vmem:[%s4361_s1 + $0x1d0] sm:$0xf0] }
  0x1e   :  { %v1947_v19 = vld [vmem:[%s4361_s1 + $0x100] sm:$0xf]  ;;  %v2657_v20 = vld [vmem:[%s4361_s1 + $0x10c] sm:$0xf0]  ;;  %v1820_v32 = vor.u32 %v2625_v18, %v1819_v16  ;;  %1296 = vmatpush.bf16.msra.mxu2 %v2092_v22  ;;  %v1904_v16 = vor.u32 %v2643_v8, %v1901_v9  ;;  %v2048_v17 = vor.u32 %v2679_v10, %v2045_v11  ;;  %v1885_v21 = vld [vmem:[%s4361_s1 + $0x90] sm:$0xf0] }
  0x1f   :  { %v2075_v23 = vld [vmem:[%s4361_s1 + $0x200] sm:$0xf]  ;;  %v2689_v24 = vld [vmem:[%s4361_s1 + $0x20c] sm:$0xf0]  ;;  %v1948_v36 = vor.u32 %v2657_v20, %v1947_v19  ;;  %1309 = vmatpush.bf16.msra.mxu3 %v2220_v26  ;;  %v2639_v20 = vld [vmem:[%s4361_s1 + $0x84] sm:$0xf] }
  0x20   :  { %v22_v25 = vld [vmem:[%s4360_s0] sm:$0xff]  ;;  %v2721_v28 = vld [vmem:[%s4361_s1 + $0x30c] sm:$0xf0]  ;;  %v2076_v37 = vor.u32 %v2689_v24, %v2075_v23  ;;  %1271 = vmatpush.bf16.msra.mxu0 %v1820_v32  ;;  %v2029_v23 = vld [vmem:[%s4361_s1 + $0x1b0] sm:$0xf0] }
  0x21   :  { %v2203_v27 = vld [vmem:[%s4361_s1 + $0x300] sm:$0xf]  ;;  %26 = vst [vmem:[#allocation1] ss:$4 sm:$0xff] %v22_v25  ;;  %v2781_v30 = vld [vmem:[%s4361_s1 + $0x4ec] sm:$0xf0]  ;;  %1284 = vmatpush.bf16.msra.mxu1 %v1948_v36 }
  0x22   :  { %v2443_v29 = vld [vmem:[%s4361_s1 + $0x4e0] sm:$0xf]  ;;  %v2813_v33 = vld [vmem:[%s4361_s1 + $0x5ec] sm:$0xf0]  ;;  %v2204_v41 = vor.u32 %v2721_v28, %v2203_v27  ;;  %1297 = vmatpush.bf16.msra.mxu2 %v2076_v37  ;;  %v2675_v22 = vld [vmem:[%s4361_s1 + $0x1a4] sm:$0xf] }
  0x23   :  { %v2571_v31 = vld [vmem:[%s4361_s1 + $0x5e0] sm:$0xf]  ;;  %v2821_v35 = vld [vmem:[%s4361_s1 + $0x62c] sm:$0xf0]  ;;  %v2444_v42 = vor.u32 %v2781_v30, %v2443_v29  ;;  %v1888_v29 = vor.u32 %v2639_v20, %v1885_v21  ;;  %v2032_v30 = vor.u32 %v2675_v22, %v2029_v23  ;;  %v2635_v32 = vld [vmem:[%s4361_s1 + $0x64] sm:$0xf] }
  0x24   :  { %v2603_v34 = vld [vmem:[%s4361_s1 + $0x620] sm:$0xf]  ;;  %v2777_v43 = vld [vmem:[%s4361_s1 + $0x4cc] sm:$0xf0]  ;;  %v2572_v46 = vor.u32 %v2813_v33, %v2571_v31  ;;  %1310 = vmatpush.bf16.msra.mxu3 %v2204_v41  ;;  %v1869_v33 = vld [vmem:[%s4361_s1 + $0x70] sm:$0xf0] }
  0x25   :  { %v2427_v40 = vld [vmem:[%s4361_s1 + $0x4c0] sm:$0xf]  ;;  %v2809_v45 = vld [vmem:[%s4361_s1 + $0x5cc] sm:$0xf0]  ;;  %v2604_v47 = vor.u32 %v2821_v35, %v2603_v34  ;;  %1316 = vmatpush.bf16.msrb.mxu0 %v2444_v42  ;;  %v2671_v34 = vld [vmem:[%s4361_s1 + $0x184] sm:$0xf]  ;;  %v1872_v41 = vor.u32 %v2635_v32, %v1869_v33 }
  0x26   :  { %v2555_v44 = vld [vmem:[%s4361_s1 + $0x5c0] sm:$0xf]  ;;  %v2817_v49 = vld [vmem:[%s4361_s1 + $0x60c] sm:$0xf0]  ;;  %v2428_v56 = vor.u32 %v2777_v43, %v2427_v40  ;;  %1329 = vmatpush.bf16.msrb.mxu1 %v2572_v46  ;;  %v2013_v35 = vld [vmem:[%s4361_s1 + $0x190] sm:$0xf0] }
  0x27   :  { %v2587_v48 = vld [vmem:[%s4361_s1 + $0x600] sm:$0xf]  ;;  %v2556_v59 = vor.u32 %v2809_v45, %v2555_v44  ;;  %1348 = vmatpush.bf16.msrb.mxu2 %v2604_v47  ;;  %v2773_v1 = vld [vmem:[%s4361_s1 + $0x4ac] sm:$0xf0]  ;;  %v23_v36 = vld [vmem:[%s4360_s0 + $0x8] sm:$0x3f]  ;;  %v2016_v42 = vor.u32 %v2671_v34, %v2013_v35 }
  0x28   :  { %v31_v55 = vld.sshfl [vmem:[#allocation1 + $0x10] sm:$0xff pattern:$0x73625140]  ;;  %v29_v57 = vld.sshfl [vmem:[#allocation1] sm:$0xff pattern:$0x73625140]  ;;  %v2588_v63 = vor.u32 %v2817_v49, %v2587_v48  ;;  %1355 = vmatpush.bf16.msrb.mxu3 %v1936_v51 }
  0x29   :  { %v3135_v58 = vpack.c.bf16 %v31_v55, %v31_v55  ;;  %v3137_v60 = vpack.c.bf16 %v29_v57, %v29_v57  ;;  %v32_v61 = vld.sshfl [vmem:[#allocation1 + $0x18] sm:$0xff pattern:$0x73625140]  ;;  %v30_v62 = vld.sshfl [vmem:[#allocation1 + $0x8] sm:$0xff pattern:$0x73625140]  ;;  %1317 = vmatpush.bf16.msrb.mxu0 %v2428_v56 }
  0x2a   :  { %v2411_v0 = vld [vmem:[%s4361_s1 + $0x4a0] sm:$0xf]  ;;  %v3145_v2 = vpack.c.bf16 %v32_v61, %v32_v61  ;;  %v3147_v3 = vpack.c.bf16 %v30_v62, %v30_v62  ;;  %v2805_v7 = vld [vmem:[%s4361_s1 + $0x5ac] sm:$0xf0]  ;;  %1330 = vmatpush.bf16.msrb.mxu1 %v2556_v59  ;;  %28 = vst [vmem:[#allocation1 + $0x20] ss:$4 sm:$0xff] %v23_v36 }
  0x2b   :  { %1298 = vmatmul.bf16.vlgmr.msra.gmra.mxu2 %v3135_v58  ;;  %v2539_v6 = vld [vmem:[%s4361_s1 + $0x5a0] sm:$0xf]  ;;  %1272 = vmatmul.bf16.vlgmr.msra.gmra.mxu0 %v3137_v60  ;;  %v2412_v12 = vor.u32 %v2773_v1, %v2411_v0  ;;  %v2769_v15 = vld [vmem:[%s4361_s1 + $0x48c] sm:$0xf0]  ;;  %v2631_v45 = vld [vmem:[%s4361_s1 + $0x44] sm:$0xf] }
  0x2c   :  { %1311 = vmatmul.bf16.vlgmr.msra.gmra.mxu3 %v3145_v2  ;;  %1285 = vmatmul.bf16.vlgmr.msra.gmra.mxu1 %v3147_v3  ;;  %v2540_v13 = vor.u32 %v2805_v7, %v2539_v6  ;;  %v2395_v14 = vld [vmem:[%s4361_s1 + $0x480] sm:$0xf]  ;;  %v2801_v19 = vld [vmem:[%s4361_s1 + $0x58c] sm:$0xf0]  ;;  %v1853_v46 = vld [vmem:[%s4361_s1 + $0x50] sm:$0xf0] }
  0x2d   :  { %1349 = vmatpush.bf16.msrb.mxu2 %v2588_v63  ;;  %1356 = vmatpush.bf16.msrb.mxu3 %v1920_v4  ;;  %v2523_v18 = vld [vmem:[%s4361_s1 + $0x580] sm:$0xf]  ;;  %v2396_v24 = vor.u32 %v2769_v15, %v2395_v14  ;;  %v2765_v27 = vld [vmem:[%s4361_s1 + $0x46c] sm:$0xf0]  ;;  %v2667_v47 = vld [vmem:[%s4361_s1 + $0x164] sm:$0xf]  ;;  %v1856_v55 = vor.u32 %v2631_v45, %v1853_v46 }
  0x2e   :  { %1318 = vmatpush.bf16.msrb.mxu0 %v2412_v12  ;;  %1331 = vmatpush.bf16.msrb.mxu1 %v2540_v13  ;;  %v2524_v25 = vor.u32 %v2801_v19, %v2523_v18  ;;  %v2379_v26 = vld [vmem:[%s4361_s1 + $0x460] sm:$0xf]  ;;  %v2797_v31 = vld [vmem:[%s4361_s1 + $0x56c] sm:$0xf0]  ;;  %v1997_v48 = vld [vmem:[%s4361_s1 + $0x170] sm:$0xf0] }
  0x2f   :  { %v2507_v28 = vld [vmem:[%s4361_s1 + $0x560] sm:$0xf]  ;;  %v2380_v37 = vor.u32 %v2765_v27, %v2379_v26  ;;  %v2761_v40 = vld [vmem:[%s4361_s1 + $0x44c] sm:$0xf0]  ;;  %v2000_v56 = vor.u32 %v2667_v47, %v1997_v48  ;;  %v2627_v57 = vld [vmem:[%s4361_s1 + $0x24] sm:$0xf] }
  0x30   :  { %v2508_v38 = vor.u32 %v2797_v31, %v2507_v28  ;;  %v2363_v39 = vld [vmem:[%s4361_s1 + $0x440] sm:$0xf]  ;;  %v2793_v44 = vld [vmem:[%s4361_s1 + $0x54c] sm:$0xf0]  ;;  %v1837_v59 = vld [vmem:[%s4361_s1 + $0x30] sm:$0xf0] }
  0x31   :  { %1368 = vmatpush.bf16.msra.mxu2 %v2064_v5  ;;  %1357 = vmatpush.bf16.msrb.mxu3 %v1904_v16  ;;  %v2491_v43 = vld [vmem:[%s4361_s1 + $0x540] sm:$0xf]  ;;  %v2364_v49 = vor.u32 %v2761_v40, %v2363_v39  ;;  %v2757_v52 = vld [vmem:[%s4361_s1 + $0x42c] sm:$0xf0]  ;;  %v2663_v61 = vld [vmem:[%s4361_s1 + $0x144] sm:$0xf]  ;;  %v1840_v10 = vor.u32 %v2627_v57, %v1837_v59 }
  0x32   :  { %1319 = vmatpush.bf16.msrb.mxu0 %v2396_v24  ;;  %1332 = vmatpush.bf16.msrb.mxu1 %v2524_v25  ;;  %v2347_v50 = vld [vmem:[%s4361_s1 + $0x420] sm:$0xf]  ;;  %v2492_v51 = vor.u32 %v2793_v44, %v2491_v43  ;;  %v2789_v54 = vld [vmem:[%s4361_s1 + $0x52c] sm:$0xf0]  ;;  %v1981_v62 = vld [vmem:[%s4361_s1 + $0x150] sm:$0xf0] }
  0x33   :  { %v2475_v53 = vld [vmem:[%s4361_s1 + $0x520] sm:$0xf]  ;;  %v35_v63 = vld.sshfl [vmem:[#allocation1 + $0x30] sm:$0xff pattern:$0x73625140]  ;;  %v2348_v0 = vor.u32 %v2757_v52, %v2347_v50  ;;  %v1984_v11 = vor.u32 %v2663_v61, %v1981_v62 }
  0x34   :  { %v2331_v1 = vld [vmem:[%s4361_s1 + $0x400] sm:$0xf]  ;;  %v2753_v4 = vld [vmem:[%s4361_s1 + $0x40c] sm:$0xf0]  ;;  %v3276_v5 = vpack.c.bf16 %v35_v63, %v35_v63  ;;  %v2476_v6 = vor.u32 %v2789_v54, %v2475_v53  ;;  %v2623_v9 = vld [vmem:[%s4361_s1 + $0x4] sm:$0xf] }
  0x35   :  { %1369 = vmatpush.bf16.msra.mxu2 %v2048_v17  ;;  %1358 = vmatpush.bf16.msrb.mxu3 %v1888_v29  ;;  %v2459_v7 = vld [vmem:[%s4361_s1 + $0x500] sm:$0xf]  ;;  %v2785_v8 = vld [vmem:[%s4361_s1 + $0x50c] sm:$0xf0]  ;;  %v1821_v12 = vld [vmem:[%s4361_s1 + $0x10] sm:$0xf0]  ;;  %v2332_v18 = vor.u32 %v2753_v4, %v2331_v1 }
  0x36   :  { %1320 = vmatpush.bf16.msrb.mxu0 %v2380_v37  ;;  %1333 = vmatpush.bf16.msrb.mxu1 %v2508_v38  ;;  %v2715_v13 = vld [vmem:[%s4361_s1 + $0x2e4] sm:$0xf]  ;;  %v2189_v14 = vld [vmem:[%s4361_s1 + $0x2f0] sm:$0xf0]  ;;  %v2460_v22 = vor.u32 %v2785_v8, %v2459_v7  ;;  %v1824_v26 = vor.u32 %v2623_v9, %v1821_v12 }
  0x37   :  { %v2659_v15 = vld [vmem:[%s4361_s1 + $0x124] sm:$0xf]  ;;  %v1965_v16 = vld [vmem:[%s4361_s1 + $0x130] sm:$0xf0]  ;;  %v2192_v23 = vor.u32 %v2715_v13, %v2189_v14 }
  0x38   :  { %v2747_v17 = vld [vmem:[%s4361_s1 + $0x3e4] sm:$0xf]  ;;  %v2317_v19 = vld [vmem:[%s4361_s1 + $0x3f0] sm:$0xf0]  ;;  %v1968_v27 = vor.u32 %v2659_v15, %v1965_v16 }
  0x39   :  { %1370 = vmatpush.bf16.msra.mxu2 %v2032_v30  ;;  %1359 = vmatpush.bf16.msrb.mxu3 %v1872_v41  ;;  %v2779_v20 = vld [vmem:[%s4361_s1 + $0x4e4] sm:$0xf]  ;;  %v2445_v21 = vld [vmem:[%s4361_s1 + $0x4f0] sm:$0xf0]  ;;  %v2320_v30 = vor.u32 %v2747_v17, %v2317_v19 }
  0x3a   :  { %1321 = vmatpush.bf16.msrb.mxu0 %v2364_v49  ;;  %1334 = vmatpush.bf16.msrb.mxu1 %v2492_v51  ;;  %v33_v24 = vld.sshfl [vmem:[#allocation1 + $0x20] sm:$0xff pattern:$0x73625140]  ;;  %v34_v25 = vld.sshfl [vmem:[#allocation1 + $0x28] sm:$0xff pattern:$0x73625140]  ;;  %v2448_v31 = vor.u32 %v2779_v20, %v2445_v21 }
  0x3b   :  { %2617 = vmatmul.msk.bf16.vlgmr.msrb.gmra.mxu2 %vm1260_vm0, %v3276_v5  ;;  %v2711_v28 = vld [vmem:[%s4361_s1 + $0x2c4] sm:$0xf]  ;;  %v2173_v29 = vld [vmem:[%s4361_s1 + $0x2d0] sm:$0xf0]  ;;  %v3331_v35 = vpack.c.bf16 %v33_v24, %v33_v24  ;;  %v3333_v36 = vpack.c.bf16 %v34_v25, %v34_v25 }
  0x3c   :  { %v2655_v32 = vld [vmem:[%s4361_s1 + $0x104] sm:$0xf]  ;;  %v1949_v33 = vld [vmem:[%s4361_s1 + $0x110] sm:$0xf0]  ;;  %v2176_v40 = vor.u32 %v2711_v28, %v2173_v29 }
  0x3d   :  { %1371 = vmatpush.bf16.msra.mxu2 %v2016_v42  ;;  %1360 = vmatpush.bf16.msrb.mxu3 %v1856_v55  ;;  %v2743_v34 = vld [vmem:[%s4361_s1 + $0x3c4] sm:$0xf]  ;;  %v2301_v37 = vld [vmem:[%s4361_s1 + $0x3d0] sm:$0xf0]  ;;  %v1952_v43 = vor.u32 %v2655_v32, %v1949_v33 }
  0x3e   :  { %1322 = vmatpush.bf16.msrb.mxu0 %v2348_v0  ;;  %1335 = vmatpush.bf16.msrb.mxu1 %v2476_v6  ;;  %v2775_v38 = vld [vmem:[%s4361_s1 + $0x4c4] sm:$0xf]  ;;  %v2429_v39 = vld [vmem:[%s4361_s1 + $0x4d0] sm:$0xf0]  ;;  %v2304_v46 = vor.u32 %v2743_v34, %v2301_v37 }
  0x3f   :  { %v2811_v41 = vld [vmem:[%s4361_s1 + $0x5e4] sm:$0xf]  ;;  %v2573_v42 = vld [vmem:[%s4361_s1 + $0x5f0] sm:$0xf0]  ;;  %v2432_v47 = vor.u32 %v2775_v38, %v2429_v39 }
  0x40   :  { %v2707_v44 = vld [vmem:[%s4361_s1 + $0x2a4] sm:$0xf]  ;;  %v2157_v45 = vld [vmem:[%s4361_s1 + $0x2b0] sm:$0xf0]  ;;  %v2576_v49 = vor.u32 %v2811_v41, %v2573_v42 }
  0x41   :  { %1372 = vmatpush.bf16.msra.mxu2 %v2000_v56  ;;  %1361 = vmatpush.bf16.msrb.mxu3 %v1840_v10  ;;  %v2739_v48 = vld [vmem:[%s4361_s1 + $0x3a4] sm:$0xf]  ;;  %v2285_v50 = vld [vmem:[%s4361_s1 + $0x3b0] sm:$0xf0]  ;;  %v2160_v53 = vor.u32 %v2707_v44, %v2157_v45 }
  0x42   :  { %1323 = vmatpush.bf16.msrb.mxu0 %v2332_v18  ;;  %1336 = vmatpush.bf16.msrb.mxu1 %v2460_v22  ;;  %v2771_v51 = vld [vmem:[%s4361_s1 + $0x4a4] sm:$0xf]  ;;  %v2413_v52 = vld [vmem:[%s4361_s1 + $0x4b0] sm:$0xf0]  ;;  %v2288_v59 = vor.u32 %v2739_v48, %v2285_v50 }
  0x43   :  { %v2807_v54 = vld [vmem:[%s4361_s1 + $0x5c4] sm:$0xf]  ;;  %v2557_v55 = vld [vmem:[%s4361_s1 + $0x5d0] sm:$0xf0]  ;;  %v2416_v61 = vor.u32 %v2771_v51, %v2413_v52 }
  0x44   :  { %v2703_v56 = vld [vmem:[%s4361_s1 + $0x284] sm:$0xf]  ;;  %v2141_v57 = vld [vmem:[%s4361_s1 + $0x290] sm:$0xf0]  ;;  %v2560_v63 = vor.u32 %v2807_v54, %v2557_v55  ;;  %v2718_v54 = vld [vmem:[%s4361_s1 + $0x2f4] sm:$0xf0] }
  0x45   :  { %1373 = vmatpush.bf16.msra.mxu2 %v1984_v11  ;;  %1362 = vmatpush.bf16.msrb.mxu3 %v1824_v26  ;;  %v2735_v62 = vld [vmem:[%s4361_s1 + $0x384] sm:$0xf]  ;;  %v2269_v0 = vld [vmem:[%s4361_s1 + $0x390] sm:$0xf0]  ;;  %v2144_v6 = vor.u32 %v2703_v56, %v2141_v57 }
  0x46   :  { %1381 = vmatpush.bf16.msra.mxu0 %v2192_v23  ;;  %1394 = vmatpush.bf16.msra.mxu1 %v2320_v30  ;;  %v2767_v1 = vld [vmem:[%s4361_s1 + $0x484] sm:$0xf]  ;;  %v2397_v4 = vld [vmem:[%s4361_s1 + $0x490] sm:$0xf0]  ;;  %v2272_v11 = vor.u32 %v2735_v62, %v2269_v0 }
  0x47   :  { %1324 = vmatmul.bf16.vlgmr.msrb.gmra.mxu0 %v3331_v35  ;;  %1337 = vmatmul.bf16.vlgmr.msrb.gmra.mxu1 %v3333_v36  ;;  %v2803_v7 = vld [vmem:[%s4361_s1 + $0x5a4] sm:$0xf]  ;;  %v2541_v8 = vld [vmem:[%s4361_s1 + $0x5b0] sm:$0xf0]  ;;  %v2400_v12 = vor.u32 %v2767_v1, %v2397_v4  ;;  %v1939_v1 = vld [vmem:[%s4361_s1 + $0xe8] sm:$0xf] }
  0x48   :  { %1363 = vmatmul.bf16.vlgmr.msrb.gmra.mxu3 %v3137_v60  ;;  %v2699_v9 = vld [vmem:[%s4361_s1 + $0x264] sm:$0xf]  ;;  %v2125_v10 = vld [vmem:[%s4361_s1 + $0x270] sm:$0xf0]  ;;  %v2544_v14 = vor.u32 %v2803_v7, %v2541_v8  ;;  %v2654_v4 = vld [vmem:[%s4361_s1 + $0xf4] sm:$0xf0] }
  0x49   :  { %1374 = vmatpush.bf16.msra.mxu2 %v1968_v27  ;;  %1407 = vmatpush.bf16.msra.mxu3 %v2448_v31  ;;  %v2731_v13 = vld [vmem:[%s4361_s1 + $0x364] sm:$0xf]  ;;  %v2253_v15 = vld [vmem:[%s4361_s1 + $0x370] sm:$0xf0]  ;;  %v2128_v18 = vor.u32 %v2699_v9, %v2125_v10 }
  0x4a   :  { %1382 = vmatpush.bf16.msra.mxu0 %v2176_v40  ;;  %1395 = vmatpush.bf16.msra.mxu1 %v2304_v46  ;;  %v2763_v16 = vld [vmem:[%s4361_s1 + $0x464] sm:$0xf]  ;;  %v2381_v17 = vld [vmem:[%s4361_s1 + $0x470] sm:$0xf0]  ;;  %v2256_v23 = vor.u32 %v2731_v13, %v2253_v15  ;;  %v2179_v13 = vld [vmem:[%s4361_s1 + $0x2c8] sm:$0xf]  ;;  %v1940_v15 = vor.u32 %v2654_v4, %v1939_v1 }
  0x4b   :  { %v2799_v19 = vld [vmem:[%s4361_s1 + $0x584] sm:$0xf]  ;;  %v2525_v20 = vld [vmem:[%s4361_s1 + $0x590] sm:$0xf0]  ;;  %v2384_v24 = vor.u32 %v2763_v16, %v2381_v17 }
  0x4c   :  { %v2695_v21 = vld [vmem:[%s4361_s1 + $0x244] sm:$0xf]  ;;  %v2109_v22 = vld [vmem:[%s4361_s1 + $0x250] sm:$0xf0]  ;;  %v2528_v26 = vor.u32 %v2799_v19, %v2525_v20  ;;  %v2650_v19 = vld [vmem:[%s4361_s1 + $0xd4] sm:$0xf0] }
  0x4d   :  { %1375 = vmatpush.bf16.msra.mxu2 %v1952_v43  ;;  %1408 = vmatpush.bf16.msra.mxu3 %v2432_v47  ;;  %v2727_v25 = vld [vmem:[%s4361_s1 + $0x344] sm:$0xf]  ;;  %v2237_v27 = vld [vmem:[%s4361_s1 + $0x350] sm:$0xf0]  ;;  %v2112_v30 = vor.u32 %v2695_v21, %v2109_v22  ;;  %v2067_v20 = vld [vmem:[%s4361_s1 + $0x1e8] sm:$0xf] }
  0x4e   :  { %1383 = vmatpush.bf16.msra.mxu0 %v2160_v53  ;;  %1396 = vmatpush.bf16.msra.mxu1 %v2288_v59  ;;  %v2759_v28 = vld [vmem:[%s4361_s1 + $0x444] sm:$0xf]  ;;  %v2365_v29 = vld [vmem:[%s4361_s1 + $0x450] sm:$0xf0]  ;;  %v2240_v37 = vor.u32 %v2727_v25, %v2237_v27  ;;  %v2195_v53 = vld [vmem:[%s4361_s1 + $0x2e8] sm:$0xf] }
  0x4f   :  { %v2795_v31 = vld [vmem:[%s4361_s1 + $0x564] sm:$0xf]  ;;  %v2509_v32 = vld [vmem:[%s4361_s1 + $0x570] sm:$0xf0]  ;;  %v2368_v38 = vor.u32 %v2759_v28, %v2365_v29  ;;  %v2686_v21 = vld [vmem:[%s4361_s1 + $0x1f4] sm:$0xf0] }
  0x50   :  { %1376 = vmatmul.bf16.vlgmr.msra.gmra.mxu2 %v3147_v3  ;;  %v2691_v33 = vld [vmem:[%s4361_s1 + $0x224] sm:$0xf]  ;;  %v2093_v34 = vld [vmem:[%s4361_s1 + $0x230] sm:$0xf0]  ;;  %v2512_v40 = vor.u32 %v2795_v31, %v2509_v32  ;;  %v2323_v22 = vld [vmem:[%s4361_s1 + $0x3e8] sm:$0xf] }
  0x51   :  { %1420 = vmatpush.bf16.msrb.mxu2 %v2576_v49  ;;  %1409 = vmatpush.bf16.msra.mxu3 %v2416_v61  ;;  %v2723_v39 = vld [vmem:[%s4361_s1 + $0x324] sm:$0xf]  ;;  %v2221_v41 = vld [vmem:[%s4361_s1 + $0x330] sm:$0xf0]  ;;  %v2096_v44 = vor.u32 %v2691_v33, %v2093_v34  ;;  %v2163_v27 = vld [vmem:[%s4361_s1 + $0x2a8] sm:$0xf] }
  0x52   :  { %1384 = vmatpush.bf16.msra.mxu0 %v2144_v6  ;;  %1397 = vmatpush.bf16.msra.mxu1 %v2272_v11  ;;  %v2755_v42 = vld [vmem:[%s4361_s1 + $0x424] sm:$0xf]  ;;  %v2349_v43 = vld [vmem:[%s4361_s1 + $0x430] sm:$0xf0]  ;;  %v2224_v50 = vor.u32 %v2723_v39, %v2221_v41  ;;  %v2196_v6 = vor.u32 %v2718_v54, %v2195_v53  ;;  %v2710_v28 = vld [vmem:[%s4361_s1 + $0x2b4] sm:$0xf0] }
  0x53   :  { %v2791_v45 = vld [vmem:[%s4361_s1 + $0x544] sm:$0xf]  ;;  %v2493_v46 = vld [vmem:[%s4361_s1 + $0x550] sm:$0xf0]  ;;  %v2352_v51 = vor.u32 %v2755_v42, %v2349_v43  ;;  %v1907_v31 = vld [vmem:[%s4361_s1 + $0xa8] sm:$0xf] }
  0x54   :  { %v2687_v47 = vld [vmem:[%s4361_s1 + $0x204] sm:$0xf]  ;;  %v2077_v48 = vld [vmem:[%s4361_s1 + $0x210] sm:$0xf0]  ;;  %v2496_v55 = vor.u32 %v2791_v45, %v2493_v46  ;;  %v2646_v33 = vld [vmem:[%s4361_s1 + $0xb4] sm:$0xf0] }
  0x55   :  { %1421 = vmatpush.bf16.msrb.mxu2 %v2560_v63  ;;  %1410 = vmatpush.bf16.msra.mxu3 %v2400_v12  ;;  %v2719_v49 = vld [vmem:[%s4361_s1 + $0x304] sm:$0xf]  ;;  %v2205_v52 = vld [vmem:[%s4361_s1 + $0x310] sm:$0xf0]  ;;  %v2080_v61 = vor.u32 %v2687_v47, %v2077_v48  ;;  %v2051_v34 = vld [vmem:[%s4361_s1 + $0x1c8] sm:$0xf]  ;;  %v1908_v43 = vor.u32 %v2646_v33, %v1907_v31 }
  0x56   :  { %1385 = vmatpush.bf16.msra.mxu0 %v2128_v18  ;;  %1398 = vmatpush.bf16.msra.mxu1 %v2256_v23  ;;  %v2751_v56 = vld [vmem:[%s4361_s1 + $0x404] sm:$0xf]  ;;  %v2333_v57 = vld [vmem:[%s4361_s1 + $0x410] sm:$0xf0]  ;;  %v2208_v7 = vor.u32 %v2719_v49, %v2205_v52  ;;  %v1923_v18 = vld [vmem:[%s4361_s1 + $0xc8] sm:$0xf] }
  0x57   :  { %v2787_v59 = vld [vmem:[%s4361_s1 + $0x524] sm:$0xf]  ;;  %v2477_v62 = vld [vmem:[%s4361_s1 + $0x530] sm:$0xf0]  ;;  %v2336_v8 = vor.u32 %v2751_v56, %v2333_v57  ;;  %v2750_v23 = vld [vmem:[%s4361_s1 + $0x3f4] sm:$0xf0]  ;;  %v1924_v29 = vor.u32 %v2650_v19, %v1923_v18 }
  0x58   :  { %v2819_v63 = vld [vmem:[%s4361_s1 + $0x624] sm:$0xf]  ;;  %v2605_v0 = vld [vmem:[%s4361_s1 + $0x630] sm:$0xf0]  ;;  %v2480_v10 = vor.u32 %v2787_v59, %v2477_v62  ;;  %v2324_v32 = vor.u32 %v2750_v23, %v2323_v22  ;;  %v2746_v39 = vld [vmem:[%s4361_s1 + $0x3d4] sm:$0xf0] }
  0x59   :  { %1422 = vmatpush.bf16.msrb.mxu2 %v2544_v14  ;;  %1411 = vmatpush.bf16.msra.mxu3 %v2384_v24  ;;  %v2783_v9 = vld [vmem:[%s4361_s1 + $0x504] sm:$0xf]  ;;  %v2608_v11 = vor.u32 %v2819_v63, %v2605_v0  ;;  %v2461_v12 = vld [vmem:[%s4361_s1 + $0x510] sm:$0xf0]  ;;  %v2714_v14 = vld [vmem:[%s4361_s1 + $0x2d4] sm:$0xf0] }
  0x5a   :  { %1386 = vmatpush.bf16.msra.mxu0 %v2112_v30  ;;  %1399 = vmatpush.bf16.msra.mxu1 %v2240_v37  ;;  %v2815_v16 = vld [vmem:[%s4361_s1 + $0x604] sm:$0xf]  ;;  %v2589_v17 = vld [vmem:[%s4361_s1 + $0x610] sm:$0xf0]  ;;  %v2180_v24 = vor.u32 %v2714_v14, %v2179_v13  ;;  %v2464_v25 = vor.u32 %v2783_v9, %v2461_v12  ;;  %v2068_v30 = vor.u32 %v2686_v21, %v2067_v20  ;;  %v2682_v37 = vld [vmem:[%s4361_s1 + $0x1d4] sm:$0xf0] }
  0x5b   :  { %v2147_v41 = vld [vmem:[%s4361_s1 + $0x288] sm:$0xf]  ;;  %v2706_v42 = vld [vmem:[%s4361_s1 + $0x294] sm:$0xf0] }
  0x5c   :  { %v1891_v45 = vld [vmem:[%s4361_s1 + $0x88] sm:$0xf]  ;;  %v2642_v47 = vld [vmem:[%s4361_s1 + $0x94] sm:$0xf0]  ;;  %v2148_v52 = vor.u32 %v2706_v42, %v2147_v41 }
  0x5d   :  { %1423 = vmatpush.bf16.msrb.mxu2 %v2528_v26  ;;  %1412 = vmatpush.bf16.msra.mxu3 %v2368_v38  ;;  %v2592_v26 = vor.u32 %v2815_v16, %v2589_v17  ;;  %v2307_v38 = vld [vmem:[%s4361_s1 + $0x3c8] sm:$0xf]  ;;  %v2678_v49 = vld [vmem:[%s4361_s1 + $0x1b4] sm:$0xf0] }
  0x5e   :  { %1387 = vmatpush.bf16.msra.mxu0 %v2096_v44  ;;  %1400 = vmatpush.bf16.msra.mxu1 %v2224_v50  ;;  %v2052_v44 = vor.u32 %v2682_v37, %v2051_v34  ;;  %v2308_v46 = vor.u32 %v2746_v39, %v2307_v38  ;;  %v2035_v48 = vld [vmem:[%s4361_s1 + $0x1a8] sm:$0xf]  ;;  %v2702_v54 = vld [vmem:[%s4361_s1 + $0x274] sm:$0xf0] }
  0x5f   :  { %v2291_v50 = vld [vmem:[%s4361_s1 + $0x3a8] sm:$0xf]  ;;  %v2036_v56 = vor.u32 %v2678_v49, %v2035_v48  ;;  %v2638_v59 = vld [vmem:[%s4361_s1 + $0x74] sm:$0xf0] }
  0x60   :  { %v2131_v53 = vld [vmem:[%s4361_s1 + $0x268] sm:$0xf]  ;;  %v2674_v63 = vld [vmem:[%s4361_s1 + $0x194] sm:$0xf0] }
  0x61   :  { %1424 = vmatpush.bf16.msrb.mxu2 %v2512_v40  ;;  %1413 = vmatpush.bf16.msra.mxu3 %v2352_v51  ;;  %v2164_v40 = vor.u32 %v2710_v28, %v2163_v27  ;;  %v2742_v51 = vld [vmem:[%s4361_s1 + $0x3b4] sm:$0xf0]  ;;  %v1875_v57 = vld [vmem:[%s4361_s1 + $0x68] sm:$0xf] }
  0x62   :  { %1388 = vmatpush.bf16.msra.mxu0 %v2080_v61  ;;  %1401 = vmatpush.bf16.msra.mxu1 %v2208_v7  ;;  %v2292_v61 = vor.u32 %v2742_v51, %v2291_v50  ;;  %v2019_v62 = vld [vmem:[%s4361_s1 + $0x188] sm:$0xf] }
  0x65   :  { %1425 = vmatpush.bf16.msrb.mxu2 %v2496_v55  ;;  %1414 = vmatpush.bf16.msra.mxu3 %v2336_v8  ;;  %v1892_v55 = vor.u32 %v2642_v47, %v1891_v45 }
  0x66   :  { %1472 = vmatpush.bf16.msrb.mxu0 %v2196_v6  ;;  %1446 = vmatpush.bf16.msrb.mxu1 %v1940_v15 }
  0x67   :  { %1389 = vmatmul.bf16.vlgmr.msra.gmra.mxu0 %v3135_v58  ;;  %1402 = vmatmul.bf16.vlgmr.msra.gmra.mxu1 %v3145_v2 }
  0x68   :  { %1415 = vmatmul.bf16.vlgmr.msra.gmra.mxu3 %v3331_v35 }
  0x69   :  { %1426 = vmatpush.bf16.msrb.mxu2 %v2480_v10  ;;  %1439 = vmatpush.bf16.msrb.mxu3 %v2608_v11 }
  0x6a   :  { %1473 = vmatpush.bf16.msrb.mxu0 %v2180_v24  ;;  %1447 = vmatpush.bf16.msrb.mxu1 %v1924_v29 }
  0x6d   :  { %1427 = vmatpush.bf16.msrb.mxu2 %v2464_v25  ;;  %1440 = vmatpush.bf16.msrb.mxu3 %v2592_v26 }
  0x6e   :  { %1474 = vmatpush.bf16.msrb.mxu0 %v2164_v40  ;;  %1448 = vmatpush.bf16.msrb.mxu1 %v1908_v43 }
  0x70   :  { %1428 = vmatmul.bf16.vlgmr.msrb.gmra.mxu2 %v3333_v36 }
  0x71   :  { %1459 = vmatpush.bf16.msra.mxu3 %v2068_v30  ;;  %1485 = vmatpush.bf16.msra.mxu2 %v2324_v32 }
  0x75   :  { %1460 = vmatpush.bf16.msra.mxu3 %v2052_v44  ;;  %1486 = vmatpush.bf16.msra.mxu2 %v2308_v46 }
  0x76   :  { %10 = vsyncpa [#allocation3], 0  ;;  %1475 = vmatpush.bf16.msrb.mxu0 %v2148_v52  ;;  %v2275_v0 = vld [vmem:[%s4361_s1 + $0x388] sm:$0xf]  ;;  %v2738_v1 = vld [vmem:[%s4361_s1 + $0x394] sm:$0xf0]  ;;  %v2132_v4 = vor.u32 %v2702_v54, %v2131_v53  ;;  %1449 = vmatpush.bf16.msrb.mxu1 %v1892_v55  ;;  %v1876_v8 = vor.u32 %v2638_v59, %v1875_v57  ;;  %v2020_v9 = vor.u32 %v2674_v63, %v2019_v62 }
  0x77   :  { %v2115_v6 = vld [vmem:[%s4361_s1 + $0x248] sm:$0xf]  ;;  %v2698_v7 = vld [vmem:[%s4361_s1 + $0x254] sm:$0xf0]  ;;  %v2276_v11 = vor.u32 %v2738_v1, %v2275_v0  ;;  %v2069_v62 = vld [vmem:[%s4361_s1 + $0x1f8] sm:$0xf0] }
  0x78   :  { %v1859_v10 = vld [vmem:[%s4361_s1 + $0x48] sm:$0xf]  ;;  %v2634_v12 = vld [vmem:[%s4361_s1 + $0x54] sm:$0xf0]  ;;  %v2116_v17 = vor.u32 %v2698_v7, %v2115_v6  ;;  %2618 = vmatmul.msk.bf16.vlgmr.msrb.gmra.mxu3 %vm1260_vm0, %v3276_v5  ;;  %v2652_v6 = vld [vmem:[%s4361_s1 + $0xec] sm:$0xf] }
  0x79   :  { %1461 = vmatpush.bf16.msra.mxu3 %v2036_v56  ;;  %1487 = vmatpush.bf16.msra.mxu2 %v2292_v61  ;;  %v2003_v13 = vld [vmem:[%s4361_s1 + $0x168] sm:$0xf]  ;;  %v2670_v14 = vld [vmem:[%s4361_s1 + $0x174] sm:$0xf0]  ;;  %v1860_v20 = vor.u32 %v2634_v12, %v1859_v10  ;;  %v2684_v61 = vld [vmem:[%s4361_s1 + $0x1ec] sm:$0xf] }
  0x7a   :  { %1476 = vmatpush.bf16.msrb.mxu0 %v2132_v4  ;;  %v2259_v15 = vld [vmem:[%s4361_s1 + $0x368] sm:$0xf]  ;;  %v2734_v16 = vld [vmem:[%s4361_s1 + $0x374] sm:$0xf0]  ;;  %1450 = vmatpush.bf16.msrb.mxu1 %v1876_v8  ;;  %v2004_v21 = vor.u32 %v2670_v14, %v2003_v13  ;;  %v1941_v7 = vld [vmem:[%s4361_s1 + $0xf8] sm:$0xf0]  ;;  %v2072_v10 = vor.u32 %v2684_v61, %v2069_v62 }
  0x7b   :  { %v2099_v18 = vld [vmem:[%s4361_s1 + $0x228] sm:$0xf]  ;;  %v2694_v19 = vld [vmem:[%s4361_s1 + $0x234] sm:$0xf0]  ;;  %v2260_v23 = vor.u32 %v2734_v16, %v2259_v15  ;;  %v2680_v13 = vld [vmem:[%s4361_s1 + $0x1cc] sm:$0xf]  ;;  %v1944_v16 = vor.u32 %v2652_v6, %v1941_v7 }
  0x7c   :  { %v1843_v22 = vld [vmem:[%s4361_s1 + $0x28] sm:$0xf]  ;;  %v2630_v24 = vld [vmem:[%s4361_s1 + $0x34] sm:$0xf0]  ;;  %v2100_v29 = vor.u32 %v2694_v19, %v2099_v18  ;;  %v2053_v14 = vld [vmem:[%s4361_s1 + $0x1d8] sm:$0xf0] }
  0x7d   :  { %1462 = vmatpush.bf16.msra.mxu3 %v2020_v9  ;;  %1488 = vmatpush.bf16.msra.mxu2 %v2276_v11  ;;  %v1987_v25 = vld [vmem:[%s4361_s1 + $0x148] sm:$0xf]  ;;  %v2666_v26 = vld [vmem:[%s4361_s1 + $0x154] sm:$0xf0]  ;;  %v1844_v33 = vor.u32 %v2630_v24, %v1843_v22  ;;  %v1925_v22 = vld [vmem:[%s4361_s1 + $0xd8] sm:$0xf0] }
  0x7e   :  { %1477 = vmatpush.bf16.msrb.mxu0 %v2116_v17  ;;  %v2243_v27 = vld [vmem:[%s4361_s1 + $0x348] sm:$0xf]  ;;  %v2730_v28 = vld [vmem:[%s4361_s1 + $0x354] sm:$0xf0]  ;;  %1451 = vmatpush.bf16.msrb.mxu1 %v1860_v20  ;;  %v1988_v34 = vor.u32 %v2666_v26, %v1987_v25  ;;  %v2676_v25 = vld [vmem:[%s4361_s1 + $0x1ac] sm:$0xf] }
  0x7f   :  { %v1827_v30 = vld [vmem:[%s4361_s1 + $0x8] sm:$0xf]  ;;  %v2690_v32 = vld [vmem:[%s4361_s1 + $0x214] sm:$0xf0]  ;;  %v2244_v40 = vor.u32 %v2730_v28, %v2243_v27  ;;  %v2037_v26 = vld [vmem:[%s4361_s1 + $0x1b8] sm:$0xf0] }
  0x80   :  { %v2083_v31 = vld [vmem:[%s4361_s1 + $0x208] sm:$0xf]  ;;  %v2626_v37 = vld [vmem:[%s4361_s1 + $0x14] sm:$0xf0]  ;;  %v2636_v61 = vld [vmem:[%s4361_s1 + $0x6c] sm:$0xf] }
  0x81   :  { %1463 = vmatpush.bf16.msra.mxu3 %v2004_v21  ;;  %v2611_v38 = vld [vmem:[%s4361_s1 + $0x628] sm:$0xf]  ;;  %v2822_v39 = vld [vmem:[%s4361_s1 + $0x634] sm:$0xf0]  ;;  %1489 = vmatpush.bf16.msra.mxu2 %v2260_v23  ;;  %v2084_v47 = vor.u32 %v2690_v32, %v2083_v31  ;;  %v1828_v51 = vor.u32 %v2626_v37, %v1827_v30  ;;  %v2648_v21 = vld [vmem:[%s4361_s1 + $0xcc] sm:$0xf]  ;;  %v2056_v23 = vor.u32 %v2680_v13, %v2053_v14 }
  0x82   :  { %v1971_v41 = vld [vmem:[%s4361_s1 + $0x128] sm:$0xf]  ;;  %v2662_v42 = vld [vmem:[%s4361_s1 + $0x134] sm:$0xf0]  ;;  %1478 = vmatpush.bf16.msrb.mxu0 %v2100_v29  ;;  %v2612_v48 = vor.u32 %v2822_v39, %v2611_v38  ;;  %1452 = vmatpush.bf16.msrb.mxu1 %v1844_v33  ;;  %v1928_v28 = vor.u32 %v2648_v21, %v1925_v22  ;;  %v2644_v33 = vld [vmem:[%s4361_s1 + $0xac] sm:$0xf]  ;;  %v2040_v37 = vor.u32 %v2676_v25, %v2037_v26 }
  0x83   :  { %v2227_v43 = vld [vmem:[%s4361_s1 + $0x328] sm:$0xf]  ;;  %v2726_v44 = vld [vmem:[%s4361_s1 + $0x334] sm:$0xf0]  ;;  %v1972_v52 = vor.u32 %v2662_v42, %v1971_v41  ;;  %v2672_v39 = vld [vmem:[%s4361_s1 + $0x18c] sm:$0xf] }
  0x84   :  { %v2451_v45 = vld [vmem:[%s4361_s1 + $0x4e8] sm:$0xf]  ;;  %v2782_v46 = vld [vmem:[%s4361_s1 + $0x4f4] sm:$0xf0]  ;;  %v2228_v56 = vor.u32 %v2726_v44, %v2227_v43  ;;  %v1877_v62 = vld [vmem:[%s4361_s1 + $0x78] sm:$0xf0] }
  0x85   :  { %v1955_v49 = vld [vmem:[%s4361_s1 + $0x108] sm:$0xf]  ;;  %v2658_v50 = vld [vmem:[%s4361_s1 + $0x114] sm:$0xf0]  ;;  %1464 = vmatpush.bf16.msra.mxu3 %v1988_v34  ;;  %1490 = vmatpush.bf16.msra.mxu2 %v2244_v40  ;;  %v2452_v57 = vor.u32 %v2782_v46, %v2451_v45  ;;  %v1909_v34 = vld [vmem:[%s4361_s1 + $0xb8] sm:$0xf0]  ;;  %v1880_v7 = vor.u32 %v2636_v61, %v1877_v62 }
  0x86   :  { %v2211_v53 = vld [vmem:[%s4361_s1 + $0x308] sm:$0xf]  ;;  %v2818_v55 = vld [vmem:[%s4361_s1 + $0x614] sm:$0xf0]  ;;  %1479 = vmatpush.bf16.msrb.mxu0 %v2084_v47  ;;  %1453 = vmatpush.bf16.msrb.mxu1 %v1828_v51  ;;  %v1956_v9 = vor.u32 %v2658_v50, %v1955_v49  ;;  %v2021_v40 = vld [vmem:[%s4361_s1 + $0x198] sm:$0xf0]  ;;  %v1912_v42 = vor.u32 %v2644_v33, %v1909_v34 }
  0x87   :  { %v2595_v54 = vld [vmem:[%s4361_s1 + $0x608] sm:$0xf]  ;;  %v2722_v59 = vld [vmem:[%s4361_s1 + $0x314] sm:$0xf0]  ;;  %v2640_v47 = vld [vmem:[%s4361_s1 + $0x8c] sm:$0xf]  ;;  %v2024_v49 = vor.u32 %v2672_v39, %v2021_v40 }
  0x88   :  { %v2435_v63 = vld [vmem:[%s4361_s1 + $0x4c8] sm:$0xf]  ;;  %v2778_v0 = vld [vmem:[%s4361_s1 + $0x4d4] sm:$0xf0]  ;;  %v2596_v8 = vor.u32 %v2818_v55, %v2595_v54  ;;  %v2212_v11 = vor.u32 %v2722_v59, %v2211_v53  ;;  %v2668_v51 = vld [vmem:[%s4361_s1 + $0x16c] sm:$0xf] }
  0x89   :  { %v2579_v1 = vld [vmem:[%s4361_s1 + $0x5e8] sm:$0xf]  ;;  %v2814_v4 = vld [vmem:[%s4361_s1 + $0x5f4] sm:$0xf0]  ;;  %1465 = vmatpush.bf16.msra.mxu3 %v1972_v52  ;;  %1491 = vmatpush.bf16.msra.mxu2 %v2228_v56  ;;  %v2436_v12 = vor.u32 %v2778_v0, %v2435_v63  ;;  %v2005_v52 = vld [vmem:[%s4361_s1 + $0x178] sm:$0xf0] }
  0x8a   :  { %1530 = vmatpush.bf16.msra.mxu0 %v2612_v48  ;;  %1498 = vmatpush.bf16.msra.mxu1 %v2452_v57  ;;  %v2580_v15 = vor.u32 %v2814_v4, %v2579_v1  ;;  %v2419_v17 = vld [vmem:[%s4361_s1 + $0x4a8] sm:$0xf]  ;;  %v2774_v18 = vld [vmem:[%s4361_s1 + $0x4b4] sm:$0xf0]  ;;  %v1893_v48 = vld [vmem:[%s4361_s1 + $0x98] sm:$0xf0]  ;;  %v2008_v63 = vor.u32 %v2668_v51, %v2005_v52 }
  0x8b   :  { %1480 = vmatmul.bf16.vlgmr.msrb.gmra.mxu0 %v3135_v58  ;;  %v2563_v19 = vld [vmem:[%s4361_s1 + $0x5c8] sm:$0xf]  ;;  %v2810_v20 = vld [vmem:[%s4361_s1 + $0x5d4] sm:$0xf0]  ;;  %1454 = vmatmul.bf16.vlgmr.msrb.gmra.mxu1 %v3137_v60  ;;  %v2420_v24 = vor.u32 %v2774_v18, %v2419_v17  ;;  %v1896_v54 = vor.u32 %v2640_v47, %v1893_v48  ;;  %v2664_v1 = vld [vmem:[%s4361_s1 + $0x14c] sm:$0xf] }
  0x8c   :  { %v2564_v27 = vor.u32 %v2810_v20, %v2563_v19  ;;  %v2403_v29 = vld [vmem:[%s4361_s1 + $0x488] sm:$0xf]  ;;  %v2770_v30 = vld [vmem:[%s4361_s1 + $0x494] sm:$0xf0]  ;;  %v1989_v4 = vld [vmem:[%s4361_s1 + $0x158] sm:$0xf0] }
  0x8d   :  { %1466 = vmatpush.bf16.msra.mxu3 %v1956_v9  ;;  %1492 = vmatpush.bf16.msra.mxu2 %v2212_v11  ;;  %v2547_v31 = vld [vmem:[%s4361_s1 + $0x5a8] sm:$0xf]  ;;  %v2806_v32 = vld [vmem:[%s4361_s1 + $0x5b4] sm:$0xf0]  ;;  %v2404_v38 = vor.u32 %v2770_v30, %v2403_v29  ;;  %v1861_v13 = vld [vmem:[%s4361_s1 + $0x58] sm:$0xf0]  ;;  %v1992_v14 = vor.u32 %v2664_v1, %v1989_v4 }
  0x8e   :  { %1531 = vmatpush.bf16.msra.mxu0 %v2596_v8  ;;  %1499 = vmatpush.bf16.msra.mxu1 %v2436_v12  ;;  %v2548_v41 = vor.u32 %v2806_v32, %v2547_v31  ;;  %v2387_v43 = vld [vmem:[%s4361_s1 + $0x468] sm:$0xf]  ;;  %v2766_v44 = vld [vmem:[%s4361_s1 + $0x474] sm:$0xf0]  ;;  %v2632_v12 = vld [vmem:[%s4361_s1 + $0x4c] sm:$0xf] }
  0x8f   :  { %v2531_v45 = vld [vmem:[%s4361_s1 + $0x588] sm:$0xf]  ;;  %v2802_v46 = vld [vmem:[%s4361_s1 + $0x594] sm:$0xf0]  ;;  %v2388_v50 = vor.u32 %v2766_v44, %v2387_v43  ;;  %v1973_v17 = vld [vmem:[%s4361_s1 + $0x138] sm:$0xf0]  ;;  %v1864_v19 = vor.u32 %v2632_v12, %v1861_v13 }
  0x90   :  { %1467 = vmatmul.bf16.vlgmr.msra.gmra.mxu3 %v3147_v3  ;;  %1493 = vmatmul.bf16.vlgmr.msra.gmra.mxu2 %v3145_v2  ;;  %v2532_v53 = vor.u32 %v2802_v46, %v2531_v45  ;;  %v2371_v55 = vld [vmem:[%s4361_s1 + $0x448] sm:$0xf]  ;;  %v2762_v56 = vld [vmem:[%s4361_s1 + $0x454] sm:$0xf0]  ;;  %v1845_v25 = vld [vmem:[%s4361_s1 + $0x38] sm:$0xf0] }
  0x91   :  { %1511 = vmatpush.bf16.msrb.mxu3 %v2580_v15  ;;  %1537 = vmatpush.bf16.msrb.mxu2 %v1944_v16  ;;  %v2515_v57 = vld [vmem:[%s4361_s1 + $0x568] sm:$0xf]  ;;  %v2798_v59 = vld [vmem:[%s4361_s1 + $0x574] sm:$0xf0]  ;;  %v2372_v0 = vor.u32 %v2762_v56, %v2371_v55  ;;  %v2660_v16 = vld [vmem:[%s4361_s1 + $0x12c] sm:$0xf] }
  0x92   :  { %1550 = vmatpush.bf16.msrb.mxu0 %v2072_v10  ;;  %1500 = vmatpush.bf16.msra.mxu1 %v2420_v24  ;;  %v2516_v6 = vor.u32 %v2798_v59, %v2515_v57  ;;  %v2355_v8 = vld [vmem:[%s4361_s1 + $0x428] sm:$0xf]  ;;  %v2758_v9 = vld [vmem:[%s4361_s1 + $0x434] sm:$0xf0]  ;;  %v2628_v24 = vld [vmem:[%s4361_s1 + $0x2c] sm:$0xf] }
  0x93   :  { %v2499_v10 = vld [vmem:[%s4361_s1 + $0x548] sm:$0xf]  ;;  %v2794_v11 = vld [vmem:[%s4361_s1 + $0x554] sm:$0xf0]  ;;  %v2356_v15 = vor.u32 %v2758_v9, %v2355_v8  ;;  %v2716_v26 = vld [vmem:[%s4361_s1 + $0x2ec] sm:$0xf]  ;;  %v1848_v34 = vor.u32 %v2628_v24, %v1845_v25 }
  0x94   :  { %v2500_v18 = vor.u32 %v2794_v11, %v2499_v10  ;;  %v2339_v20 = vld [vmem:[%s4361_s1 + $0x408] sm:$0xf]  ;;  %v2754_v21 = vld [vmem:[%s4361_s1 + $0x414] sm:$0xf0]  ;;  %v2656_v31 = vld [vmem:[%s4361_s1 + $0x10c] sm:$0xf] }
  0x95   :  { %1512 = vmatpush.bf16.msrb.mxu3 %v2564_v27  ;;  %1538 = vmatpush.bf16.msrb.mxu2 %v1928_v28  ;;  %v2483_v22 = vld [vmem:[%s4361_s1 + $0x528] sm:$0xf]  ;;  %v2197_v27 = vld [vmem:[%s4361_s1 + $0x2f8] sm:$0xf0]  ;;  %v1976_v28 = vor.u32 %v2660_v16, %v1973_v17  ;;  %v2340_v29 = vor.u32 %v2754_v21, %v2339_v20  ;;  %v2712_v43 = vld [vmem:[%s4361_s1 + $0x2cc] sm:$0xf] }
  0x96   :  { %1551 = vmatpush.bf16.msrb.mxu0 %v2056_v23  ;;  %1501 = vmatpush.bf16.msra.mxu1 %v2404_v38  ;;  %v2790_v23 = vld [vmem:[%s4361_s1 + $0x534] sm:$0xf0]  ;;  %v2467_v30 = vld [vmem:[%s4361_s1 + $0x508] sm:$0xf]  ;;  %v1957_v32 = vld [vmem:[%s4361_s1 + $0x118] sm:$0xf0]  ;;  %v2200_v40 = vor.u32 %v2716_v26, %v2197_v27 }
  0x97   :  { %v2484_v33 = vor.u32 %v2790_v23, %v2483_v22  ;;  %v2812_v38 = vld [vmem:[%s4361_s1 + $0x5ec] sm:$0xf]  ;;  %v2581_v39 = vld [vmem:[%s4361_s1 + $0x5f8] sm:$0xf0]  ;;  %v1960_v47 = vor.u32 %v2656_v31, %v1957_v32  ;;  %vm1703_vm1 = vcmask 1043456   ;;  %vm1699_vm2 = vcmask 949248  }
  0x98   :  { %v2181_v44 = vld [vmem:[%s4361_s1 + $0x2d8] sm:$0xf0]  ;;  %v2748_v45 = vld [vmem:[%s4361_s1 + $0x3ec] sm:$0xf]  ;;  %vm1787_vm3 = vcmask 74752   ;;  %s1808_s16 = sshll.u32 %s4365_s5, 4  ;;  %s1809_s16 = int_to_ptr.hbm [resolvable:$true] %s1808_s16 }
  0x99   :  { %1513 = vmatpush.bf16.msrb.mxu3 %v2548_v41  ;;  %1539 = vmatpush.bf16.msrb.mxu2 %v1912_v42  ;;  %v2624_v41 = vld [vmem:[%s4361_s1 + $0xc] sm:$0xf]  ;;  %v1829_v42 = vld [vmem:[%s4361_s1 + $0x18] sm:$0xf0]  ;;  %v2184_v55 = vor.u32 %v2712_v43, %v2181_v44 }
  0x9a   :  { %1552 = vmatpush.bf16.msrb.mxu0 %v2040_v37  ;;  %1502 = vmatpush.bf16.msra.mxu1 %v2388_v50  ;;  %v2786_v37 = vld [vmem:[%s4361_s1 + $0x514] sm:$0xf0]  ;;  %v2325_v46 = vld [vmem:[%s4361_s1 + $0x3f8] sm:$0xf0]  ;;  %v2780_v48 = vld [vmem:[%s4361_s1 + $0x4ec] sm:$0xf]  ;;  %v2584_v50 = vor.u32 %v2812_v38, %v2581_v39  ;;  %v1832_v52 = vor.u32 %v2624_v41, %v1829_v42 }
  0x9b   :  { %2619 = vmatmul.msk.bf16.vlgmr.msra.gmra.mxu0 %vm1260_vm0, %v3276_v5  ;;  %v2468_v51 = vor.u32 %v2786_v37, %v2467_v30  ;;  %v2328_v56 = vor.u32 %v2748_v45, %v2325_v46  ;;  %v2708_v57 = vld [vmem:[%s4361_s1 + $0x2ac] sm:$0xf]  ;;  %v2165_v61 = vld [vmem:[%s4361_s1 + $0x2b8] sm:$0xf0] }
  0x9c   :  { %v2744_v62 = vld [vmem:[%s4361_s1 + $0x3cc] sm:$0xf]  ;;  %v2437_v1 = vld [vmem:[%s4361_s1 + $0x4d8] sm:$0xf0]  ;;  %v2168_v8 = vor.u32 %v2708_v57, %v2165_v61 }
  0x9d   :  { %1514 = vmatpush.bf16.msrb.mxu3 %v2532_v53  ;;  %1540 = vmatpush.bf16.msrb.mxu2 %v1896_v54  ;;  %v2808_v53 = vld [vmem:[%s4361_s1 + $0x5cc] sm:$0xf]  ;;  %v2565_v54 = vld [vmem:[%s4361_s1 + $0x5d8] sm:$0xf0] }
  0x9e   :  { %1553 = vmatpush.bf16.msrb.mxu0 %v2024_v49  ;;  %1503 = vmatpush.bf16.msra.mxu1 %v2372_v0  ;;  %v2453_v49 = vld [vmem:[%s4361_s1 + $0x4f8] sm:$0xf0]  ;;  %v2776_v0 = vld [vmem:[%s4361_s1 + $0x4cc] sm:$0xf]  ;;  %v2568_v4 = vor.u32 %v2808_v53, %v2565_v54 }
  0x9f   :  { %v2456_v59 = vor.u32 %v2780_v48, %v2453_v49  ;;  %v2704_v10 = vld [vmem:[%s4361_s1 + $0x28c] sm:$0xf]  ;;  %v2440_v11 = vor.u32 %v2776_v0, %v2437_v1  ;;  %v2149_v12 = vld [vmem:[%s4361_s1 + $0x298] sm:$0xf0] }
  0xa0   :  { %v2740_v13 = vld [vmem:[%s4361_s1 + $0x3ac] sm:$0xf]  ;;  %v2421_v16 = vld [vmem:[%s4361_s1 + $0x4b8] sm:$0xf0] }
  0xa1   :  { %1515 = vmatpush.bf16.msrb.mxu3 %v2516_v6  ;;  %1541 = vmatpush.bf16.msrb.mxu2 %v1880_v7  ;;  %v2804_v6 = vld [vmem:[%s4361_s1 + $0x5ac] sm:$0xf]  ;;  %v2549_v7 = vld [vmem:[%s4361_s1 + $0x5b8] sm:$0xf0] }
  0xa2   :  { %1554 = vmatpush.bf16.msrb.mxu0 %v2008_v63  ;;  %1504 = vmatpush.bf16.msra.mxu1 %v2356_v15  ;;  %v2309_v63 = vld [vmem:[%s4361_s1 + $0x3d8] sm:$0xf0]  ;;  %v2772_v15 = vld [vmem:[%s4361_s1 + $0x4ac] sm:$0xf]  ;;  %v2552_v17 = vor.u32 %v2804_v6, %v2549_v7 }
  0xa3   :  { %v2312_v9 = vor.u32 %v2744_v62, %v2309_v63  ;;  %v2700_v21 = vld [vmem:[%s4361_s1 + $0x26c] sm:$0xf]  ;;  %v2133_v23 = vld [vmem:[%s4361_s1 + $0x278] sm:$0xf0] }
  0xa4   :  { %v2736_v24 = vld [vmem:[%s4361_s1 + $0x38c] sm:$0xf]  ;;  %v2277_v25 = vld [vmem:[%s4361_s1 + $0x398] sm:$0xf0]  ;;  %v2136_v32 = vor.u32 %v2700_v21, %v2133_v23 }
  0xa5   :  { %1516 = vmatpush.bf16.msrb.mxu3 %v2500_v18  ;;  %1542 = vmatpush.bf16.msrb.mxu2 %v1864_v19  ;;  %v2800_v18 = vld [vmem:[%s4361_s1 + $0x58c] sm:$0xf]  ;;  %v2152_v19 = vor.u32 %v2704_v10, %v2149_v12  ;;  %v2517_v31 = vld [vmem:[%s4361_s1 + $0x578] sm:$0xf0] }
  0xa6   :  { %1555 = vmatpush.bf16.msrb.mxu0 %v1992_v14  ;;  %1505 = vmatpush.bf16.msra.mxu1 %v2340_v29  ;;  %v2293_v14 = vld [vmem:[%s4361_s1 + $0x3b8] sm:$0xf0]  ;;  %v2768_v27 = vld [vmem:[%s4361_s1 + $0x48c] sm:$0xf] }
  0xa7   :  { %v2296_v20 = vor.u32 %v2740_v13, %v2293_v14  ;;  %v2796_v30 = vld [vmem:[%s4361_s1 + $0x56c] sm:$0xf]  ;;  %v2117_v39 = vld [vmem:[%s4361_s1 + $0x258] sm:$0xf0] }
  0xa8   :  { %v4015_v22 = vpop.f32.mrf.mxu0  ;;  %v2261_v41 = vld [vmem:[%s4361_s1 + $0x378] sm:$0xf0]  ;;  %v2764_v42 = vld [vmem:[%s4361_s1 + $0x46c] sm:$0xf]  ;;  %v2520_v44 = vor.u32 %v2796_v30, %v2517_v31 }
  0xa9   :  { %1517 = vmatpush.bf16.msrb.mxu3 %v2484_v33  ;;  %1543 = vmatpush.bf16.msrb.mxu2 %v1848_v34  ;;  %v4026_v26 = vpop.f32.mrf.mxu1  ;;  %v2280_v33 = vor.u32 %v2736_v24, %v2277_v25  ;;  %v2696_v34 = vld [vmem:[%s4361_s1 + $0x24c] sm:$0xf]  ;;  %v2389_v43 = vld [vmem:[%s4361_s1 + $0x478] sm:$0xf0] }
  0xaa   :  { %1556 = vmatpush.bf16.msrb.mxu0 %v1976_v28  ;;  %1563 = vmatpush.bf16.msrb.mxu1 %v2200_v40  ;;  %v2405_v28 = vld [vmem:[%s4361_s1 + $0x498] sm:$0xf0]  ;;  %v2732_v40 = vld [vmem:[%s4361_s1 + $0x36c] sm:$0xf]  ;;  %v2120_v48 = vor.u32 %v2696_v34, %v2117_v39 }
  0xab   :  { %1506 = vmatmul.bf16.vlgmr.msra.gmra.mxu1 %v3331_v35  ;;  %v2408_v38 = vor.u32 %v2768_v27, %v2405_v28  ;;  %v2792_v46 = vld [vmem:[%s4361_s1 + $0x54c] sm:$0xf]  ;;  %v2264_v49 = vor.u32 %v2732_v40, %v2261_v41  ;;  %v2101_v53 = vld [vmem:[%s4361_s1 + $0x238] sm:$0xf0]  ;;  %v1646_v40 = vld [vmem:[%s4363_s3 + $0x70] sm:$0xff] }
  0xac   :  { %v2728_v54 = vld [vmem:[%s4361_s1 + $0x34c] sm:$0xf]  ;;  %v2485_v63 = vld [vmem:[%s4361_s1 + $0x538] sm:$0xf0] }
  0xad   :  { %1518 = vmatpush.bf16.msrb.mxu3 %v2468_v51  ;;  %1544 = vmatpush.bf16.msrb.mxu2 %v1832_v52  ;;  %v2392_v52 = vor.u32 %v2764_v42, %v2389_v43  ;;  %v2760_v57 = vld [vmem:[%s4361_s1 + $0x44c] sm:$0xf]  ;;  %v2085_v6 = vld [vmem:[%s4361_s1 + $0x218] sm:$0xf0] }
  0xae   :  { %1557 = vmatpush.bf16.msrb.mxu0 %v1960_v47  ;;  %1564 = vmatpush.bf16.msrb.mxu1 %v2184_v55  ;;  %v4043_v37 = vpop.f32.mrf.mxu2  ;;  %v2501_v47 = vld [vmem:[%s4361_s1 + $0x558] sm:$0xf0]  ;;  %v2788_v62 = vld [vmem:[%s4361_s1 + $0x52c] sm:$0xf] }
  0xaf   :  { %v4060_v45 = vpop.f32.mrf.mxu3  ;;  %v2245_v55 = vld [vmem:[%s4361_s1 + $0x358] sm:$0xf0]  ;;  %v2504_v61 = vor.u32 %v2792_v46, %v2501_v47  ;;  %v2488_v13 = vor.u32 %v2788_v62, %v2485_v63  ;;  %v2820_v14 = vld [vmem:[%s4361_s1 + $0x62c] sm:$0xf]  ;;  %v1644_v46 = vld [vmem:[%s4363_s3 + $0x60] sm:$0xff] }
  0xb0   :  { %1519 = vmatmul.bf16.vlgmr.msrb.gmra.mxu3 %v3333_v36  ;;  %1545 = vmatmul.bf16.vlgmr.msrb.gmra.mxu2 %v3137_v60  ;;  %v2424_v60 = vor.u32 %v2772_v15, %v2421_v16  ;;  %v1275_v51 = vpop.f32.mrf.mxu0  ;;  %v2248_v1 = vor.u32 %v2728_v54, %v2245_v55  ;;  %v2229_v10 = vld [vmem:[%s4361_s1 + $0x338] sm:$0xf0]  ;;  %v2752_v24 = vld [vmem:[%s4361_s1 + $0x40c] sm:$0xf]  ;;  %v1660_v47 = vld [vmem:[%s4363_s3 + $0xe0] sm:$0xff] }
  0xb1   :  { %1576 = vmatpush.bf16.msra.mxu3 %v2328_v56  ;;  %1589 = vmatpush.bf16.msra.mxu2 %v2456_v59  ;;  %v1288_v56 = vpop.f32.mrf.mxu1  ;;  %v2373_v59 = vld [vmem:[%s4361_s1 + $0x458] sm:$0xf0]  ;;  %v2816_v28 = vld [vmem:[%s4361_s1 + $0x60c] sm:$0xf]  ;;  %v1658_v51 = vld [vmem:[%s4363_s3 + $0xd0] sm:$0xff] }
  0xb2   :  { %1602 = vmatpush.bf16.msra.mxu0 %v2584_v50  ;;  %1565 = vmatpush.bf16.msrb.mxu1 %v2168_v8  ;;  %v2692_v50 = vld [vmem:[%s4361_s1 + $0x22c] sm:$0xf]  ;;  %v2376_v8 = vor.u32 %v2760_v57, %v2373_v59  ;;  %v2357_v12 = vld [vmem:[%s4361_s1 + $0x438] sm:$0xf0]  ;;  %v1640_v54 = vld [vmem:[%s4363_s3 + $0x40] sm:$0xff] }
  0xb3   :  { %1558 = vmatmul.bf16.vlgmr.msrb.gmra.mxu0 %v3147_v3  ;;  %v2533_v3 = vld [vmem:[%s4361_s1 + $0x598] sm:$0xf0]  ;;  %v2104_v0 = vor.u32 %v2692_v50, %v2101_v53  ;;  %v1645_v42 = vld [vmem:[%s4363_s3 + $0x68] sm:$0xff]  ;;  %v1638_v62 = vld [vmem:[%s4363_s3 + $0x30] sm:$0xff] }
  0xb4   :  { %v2536_v29 = vor.u32 %v2800_v18, %v2533_v3  ;;  %v2613_v15 = vld [vmem:[%s4361_s1 + $0x638] sm:$0xf0]  ;;  %v1657_v57 = vld [vmem:[%s4363_s3 + $0xc8] sm:$0xff] }
  0xb5   :  { %1577 = vmatpush.bf16.msra.mxu3 %v2312_v9  ;;  %1590 = vmatpush.bf16.msra.mxu2 %v2440_v11  ;;  %v2724_v9 = vld [vmem:[%s4361_s1 + $0x32c] sm:$0xf]  ;;  %v2469_v18 = vld [vmem:[%s4361_s1 + $0x518] sm:$0xf0]  ;;  %v2616_v21 = vor.u32 %v2820_v14, %v2613_v15  ;;  %v1650_v15 = vld [vmem:[%s4363_s3 + $0x90] sm:$0xff] }
  0xb6   :  { %1603 = vmatpush.bf16.msra.mxu0 %v2568_v4  ;;  %1566 = vmatpush.bf16.msrb.mxu1 %v2152_v19  ;;  %v2688_v4 = vld [vmem:[%s4361_s1 + $0x20c] sm:$0xf]  ;;  %v1301_v7 = vpop.f32.mrf.mxu2  ;;  %v2232_v19 = vor.u32 %v2724_v9, %v2229_v10  ;;  %v2213_v23 = vld [vmem:[%s4361_s1 + $0x318] sm:$0xf0]  ;;  %v1652_v10 = vld [vmem:[%s4363_s3 + $0xa0] sm:$0xff] }
  0xb7   :  { %v2756_v11 = vld [vmem:[%s4361_s1 + $0x42c] sm:$0xf]  ;;  %v1314_v16 = vpop.f32.mrf.mxu3  ;;  %v2088_v3 = vor.u32 %v2688_v4, %v2085_v6  ;;  %v2341_v25 = vld [vmem:[%s4361_s1 + $0x418] sm:$0xf0]  ;;  %v1636_v6 = vld [vmem:[%s4363_s3 + $0x20] sm:$0xff] }
  0xb8   :  { %v2344_v31 = vor.u32 %v2752_v24, %v2341_v25  ;;  %v1639_v59 = vld [vmem:[%s4363_s3 + $0x38] sm:$0xff]  ;;  %v1653_v7 = vld [vmem:[%s4363_s3 + $0xa8] sm:$0xff] }
  0xb9   :  { %1578 = vmatpush.bf16.msra.mxu3 %v2296_v20  ;;  %1591 = vmatpush.bf16.msra.mxu2 %v2424_v60  ;;  %v2360_v20 = vor.u32 %v2756_v11, %v2357_v12  ;;  %v2720_v60 = vld [vmem:[%s4361_s1 + $0x30c] sm:$0xf]  ;;  %v1635_v9 = vld [vmem:[%s4363_s3 + $0x18] sm:$0xff]  ;;  %v1634_v11 = vld [vmem:[%s4363_s3 + $0x10] sm:$0xff] }
  0xba   :  { %1604 = vmatpush.bf16.msra.mxu0 %v2552_v17  ;;  %1567 = vmatpush.bf16.msrb.mxu1 %v2136_v32  ;;  %v2784_v17 = vld [vmem:[%s4361_s1 + $0x50c] sm:$0xf]  ;;  %v2216_v30 = vor.u32 %v2720_v60, %v2213_v23  ;;  %v4143_v32 = vld [vmem:[%s4362_s2] sm:$0xf]  ;;  %v1651_v12 = vld [vmem:[%s4363_s3 + $0x98] sm:$0xff] }
  0xbb   :  { %v2472_v27 = vor.u32 %v2784_v17, %v2469_v18  ;;  %v252_v39 = vperm.slane %v4143_v32, 0  ;;  %v1633_v14 = vld [vmem:[%s4363_s3 + $0x8] sm:$0xff]  ;;  %v1632_v17 = vld [vmem:[%s4363_s3] sm:$0xff]  ;;  %v253_v60 = vperm.slane %v4143_v32, 1 }
  0xbc   :  { %v1649_v18 = vld [vmem:[%s4363_s3 + $0x88] sm:$0xff] }
  0xbd   :  { %1579 = vmatpush.bf16.msra.mxu3 %v2280_v33  ;;  %1592 = vmatpush.bf16.msra.mxu2 %v2408_v38  ;;  %v1647_v33 = vld [vmem:[%s4363_s3 + $0x78] sm:$0xff]  ;;  %v1274_v43 = vadd.f32 %v4015_v22, %v252_v39 }
  0xbe   :  { %1605 = vmatpush.bf16.msra.mxu0 %v2536_v29  ;;  %1568 = vmatpush.bf16.msrb.mxu1 %v2120_v48  ;;  %v2597_v29 = vld [vmem:[%s4361_s1 + $0x618] sm:$0xf0]  ;;  %v4157_v41 = vpop.f32.mrf.mxu2 }
  0xbf   :  { %v2600_v34 = vor.u32 %v2816_v28, %v2597_v29  ;;  %v1663_v38 = vld [vmem:[%s4363_s3 + $0xf8] sm:$0xff]  ;;  %v1287_v48 = vadd.f32 %v4026_v26, %v1274_v43  ;;  %v1674_v43 = vld [vmem:[%s4363_s3 + $0x150] sm:$0xff] }
  0xc0   :  { %v1659_v22 = vld [vmem:[%s4363_s3 + $0xd8] sm:$0xff] }
  0xc1   :  { %1580 = vmatpush.bf16.msra.mxu3 %v2264_v49  ;;  %1593 = vmatpush.bf16.msra.mxu2 %v2392_v52  ;;  %v1642_v49 = vld [vmem:[%s4363_s3 + $0x50] sm:$0xff]  ;;  %v1641_v52 = vld [vmem:[%s4363_s3 + $0x48] sm:$0xff]  ;;  %v1300_v26 = vadd.f32 %v4043_v37, %v1287_v48  ;;  %v1656_v37 = vld [vmem:[%s4363_s3 + $0xc0] sm:$0xff] }
  0xc2   :  { %1606 = vmatpush.bf16.msra.mxu0 %v2520_v44  ;;  %1569 = vmatpush.bf16.msrb.mxu1 %v2104_v0  ;;  %v1637_v0 = vld [vmem:[%s4363_s3 + $0x28] sm:$0xff] }
  0xc4   :  { %v1325_v44 = vpop.f32.mrf.mxu0 }
  0xc5   :  { %1581 = vmatpush.bf16.msra.mxu3 %v2248_v1  ;;  %1594 = vmatpush.bf16.msra.mxu2 %v2376_v8  ;;  %v1654_v1 = vld [vmem:[%s4363_s3 + $0xb0] sm:$0xff] }
  0xc6   :  { %1607 = vmatpush.bf16.msra.mxu0 %v2504_v61  ;;  %1570 = vmatpush.bf16.msrb.mxu1 %v2088_v3  ;;  %v1353_v50 = vpop.f32.mrf.mxu2  ;;  %v1313_v61 = vadd.f32 %v4060_v45, %v1300_v26 }
  0xc8   :  { %v1326_v63 = vadd.f32 %v1325_v44, %v1313_v61  ;;  %v1664_v61 = vld [vmem:[%s4363_s3 + $0x100] sm:$0xff] }
  0xc9   :  { %1582 = vmatpush.bf16.msra.mxu3 %v2232_v19  ;;  %1595 = vmatpush.bf16.msra.mxu2 %v2360_v20  ;;  %v1648_v19 = vld [vmem:[%s4363_s3 + $0x80] sm:$0xff] }
  0xca   :  { %1608 = vmatpush.bf16.msra.mxu0 %v2488_v13  ;;  %1621 = vmatpush.bf16.msra.mxu1 %v2616_v21 }
  0xcb   :  { %1571 = vmatmul.bf16.vlgmr.msrb.gmra.mxu1 %v3135_v58  ;;  %v1662_v58 = vld [vmem:[%s4363_s3 + $0xf0] sm:$0xff]  ;;  %v1364_v53 = vpop.f32.mrf.mxu3 }
  0xcc   :  { %v1327_v55 = vpop.f32.mrf.mxu0  ;;  %v1365_v24 = vadd.f32 %v1364_v53, %v253_v60  ;;  %v1668_v53 = vld [vmem:[%s4363_s3 + $0x120] sm:$0xff] }
  0xcd   :  { %1583 = vmatpush.bf16.msra.mxu3 %v2216_v30  ;;  %1596 = vmatpush.bf16.msra.mxu2 %v2344_v31  ;;  %v1679_v31 = vld [vmem:[%s4363_s3 + $0x178] sm:$0xff] }
  0xce   :  { %1609 = vmatpush.bf16.msra.mxu0 %v2472_v27  ;;  %1622 = vmatpush.bf16.msra.mxu1 %v2600_v34  ;;  %v1667_v55 = vld [vmem:[%s4363_s3 + $0x118] sm:$0xff] }
  0xd0   :  { %1584 = vmatmul.bf16.vlgmr.msra.gmra.mxu3 %v3145_v2  ;;  %1597 = vmatmul.bf16.vlgmr.msra.gmra.mxu2 %v3331_v35  ;;  %v1338_v2 = vpop.f32.mrf.mxu1  ;;  %v1643_v35 = vld [vmem:[%s4363_s3 + $0x58] sm:$0xff] }
  0xd1   :  { %1707 = vmatpush.msrb.mxu3 %v1647_v33  ;;  %1610 = vmatmul.bf16.vlgmr.msra.gmra.mxu0 %v3333_v36  ;;  %v1661_v36 = vld [vmem:[%s4363_s3 + $0xe8] sm:$0xff]  ;;  %v1339_v8 = vadd.f32 %v1338_v2, %v1326_v63  ;;  %v1678_v33 = vld [vmem:[%s4363_s3 + $0x170] sm:$0xff] }
  0xd2   :  { %1727 = vmatpush.msrb.mxu1 %v1663_v38  ;;  %1747 = vmatpush.msrb.mxu2 %v1679_v31  ;;  %v1677_v38 = vld [vmem:[%s4363_s3 + $0x168] sm:$0xff] }
  0xd3   :  { %1708 = vmatpush.msrb.mxu3 %v1646_v40  ;;  %v1366_v45 = vpop.f32.mrf.mxu3  ;;  %v1377_v4 = vpop.f32.mrf.mxu2  ;;  %v1352_v13 = vadd.f32 %v4157_v41, %v1339_v8  ;;  %v1676_v40 = vld [vmem:[%s4363_s3 + $0x160] sm:$0xff]  ;;  %v1673_v2 = vld [vmem:[%s4363_s3 + $0x148] sm:$0xff] }
  0xd4   :  { %1728 = vmatpush.msrb.mxu1 %v1662_v58  ;;  %v1378_v28 = vadd.f32 %v1377_v4, %v1365_v24  ;;  %1748 = vmatpush.msrb.mxu2 %v1678_v33  ;;  %v1693_v63 = vld [vmem:[%s4363_s3 + $0x1e8] sm:$0xff]  ;;  %v1691_v4 = vld [vmem:[%s4363_s3 + $0x1d8] sm:$0xff]  ;;  %v1680_v33 = vld [vmem:[%s4363_s3 + $0x180] sm:$0xff] }
  0xd5   :  { %1709 = vmatpush.msrb.mxu3 %v1645_v42  ;;  %v1628_v3 = vmax.f32 %v1352_v13, 0.0  ;;  %v1675_v42 = vld [vmem:[%s4363_s3 + $0x158] sm:$0xff]  ;;  %v1688_v13 = vld [vmem:[%s4363_s3 + $0x1c0] sm:$0xff]  ;;  %v1681_v31 = vld [vmem:[%s4363_s3 + $0x188] sm:$0xff] }
  0xd6   :  { %1729 = vmatpush.msrb.mxu1 %v1661_v36  ;;  %1749 = vmatpush.msrb.mxu2 %v1677_v38 }
  0xd7   :  { %1710 = vmatpush.msrb.mxu3 %v1644_v46 }
  0xd8   :  { %1730 = vmatpush.msrb.mxu1 %v1660_v47  ;;  %v1340_v56 = vpop.f32.mrf.mxu1  ;;  %1750 = vmatpush.msrb.mxu2 %v1676_v40 }
  0xd9   :  { %1711 = vmatpush.msrb.mxu3 %v1643_v35  ;;  %v1672_v35 = vld [vmem:[%s4363_s3 + $0x140] sm:$0xff] }
  0xda   :  { %1731 = vmatpush.msrb.mxu1 %v1659_v22  ;;  %1751 = vmatpush.msrb.mxu2 %v1675_v42  ;;  %v1671_v22 = vld [vmem:[%s4363_s3 + $0x138] sm:$0xff] }
  0xdb   :  { %1712 = vmatpush.msrb.mxu3 %v1642_v49  ;;  %2620 = vmatmul.msk.bf16.vlgmr.msra.gmra.mxu1 %vm1260_vm0, %v3276_v5  ;;  %v1655_v5 = vld [vmem:[%s4363_s3 + $0xb8] sm:$0xff]  ;;  %v1379_v16 = vpop.f32.mrf.mxu2 }
  0xdc   :  { %1732 = vmatpush.msrb.mxu1 %v1658_v51  ;;  %1752 = vmatpush.msrb.mxu2 %v1674_v43  ;;  %v1670_v51 = vld [vmem:[%s4363_s3 + $0x130] sm:$0xff] }
  0xdd   :  { %1713 = vmatpush.msrb.mxu3 %v1641_v52  ;;  %v1669_v52 = vld [vmem:[%s4363_s3 + $0x128] sm:$0xff] }
  0xde   :  { %1733 = vmatpush.msrb.mxu1 %v1657_v57  ;;  %1753 = vmatpush.msrb.mxu2 %v1673_v2  ;;  %v1666_v57 = vld [vmem:[%s4363_s3 + $0x110] sm:$0xff] }
  0xdf   :  { %1714 = vmatpush.msrb.mxu3 %v1640_v54 }
  0xe0   :  { %1734 = vmatpush.msrb.mxu1 %v1656_v37  ;;  %1754 = vmatpush.msrb.mxu2 %v1672_v35  ;;  %v1665_v37 = vld [vmem:[%s4363_s3 + $0x108] sm:$0xff] }
  0xe1   :  { %1715 = vmatpush.msrb.mxu3 %v1639_v59 }
  0xe2   :  { %1735 = vmatpush.msrb.mxu1 %v1655_v5  ;;  %1755 = vmatpush.msrb.mxu2 %v1671_v22 }
  0xe3   :  { %1716 = vmatpush.msrb.mxu3 %v1638_v62  ;;  %v1694_v62 = vld [vmem:[%s4363_s3 + $0x1f0] sm:$0xf] }
  0xe4   :  { %1736 = vmatpush.msrb.mxu1 %v1654_v1  ;;  %v1390_v20 = vpop.f32.mrf.mxu0  ;;  %v1403_v21 = vpop.f32.mrf.mxu1  ;;  %1756 = vmatpush.msrb.mxu2 %v1670_v51 }
  0xe5   :  { %1717 = vmatpush.msrb.mxu3 %v1637_v0  ;;  %v1391_v30 = vadd.f32 %v1390_v20, %v1378_v28  ;;  %2621 = vmatpush.msk.msrb.mxu0 %vm1703_vm1, %v1694_v62  ;;  %v1692_v0 = vld [vmem:[%s4363_s3 + $0x1e0] sm:$0xff] }
  0xe6   :  { %1737 = vmatpush.msrb.mxu1 %v1653_v7  ;;  %1757 = vmatpush.msrb.mxu2 %v1669_v52 }
  0xe7   :  { %1718 = vmatpush.msrb.mxu3 %v1636_v6  ;;  %v1404_v39 = vadd.f32 %v1403_v21, %v1391_v30  ;;  %1769 = vmatpush.msrb.mxu0 %v1693_v63  ;;  %v254_v6 = vperm.slane %v4143_v32, 2  ;;  %v1684_v21 = vld [vmem:[%s4363_s3 + $0x1a0] sm:$0xff] }
  0xe8   :  { %1738 = vmatpush.msrb.mxu1 %v1652_v10  ;;  %1758 = vmatpush.msrb.mxu2 %v1668_v53  ;;  %v1689_v10 = vld [vmem:[%s4363_s3 + $0x1c8] sm:$0xff]  ;;  %v2824_v53 = vld [vmem:[%s4364_s4] ss:$0 sm:$0xff]  ;;  %s2855_s4 = smov [#allocation2]  }
  0xe9   :  { %1719 = vmatpush.msrb.mxu3 %v1635_v9  ;;  %1770 = vmatpush.msrb.mxu0 %v1692_v0  ;;  %v1690_v9 = vld [vmem:[%s4363_s3 + $0x1d0] sm:$0xff]  ;;  %s1806_s14 = sshll.u32 %s2855_s4, 4  ;;  %s1807_s14 = int_to_ptr.vmem [resolvable:$true] %s1806_s14 }
  0xea   :  { %1739 = vmatpush.msrb.mxu1 %v1651_v12  ;;  %1759 = vmatpush.msrb.mxu2 %v1667_v55 }
  0xeb   :  { %1720 = vmatpush.msrb.mxu3 %v1634_v11  ;;  %v1416_v23 = vpop.f32.mrf.mxu3  ;;  %1771 = vmatpush.msrb.mxu0 %v1691_v4 }
  0xec   :  { %1740 = vmatpush.msrb.mxu1 %v1650_v15  ;;  %v1392_v25 = vpop.f32.mrf.mxu0  ;;  %v1405_v27 = vpop.f32.mrf.mxu1  ;;  %v1417_v41 = vadd.f32 %v1416_v23, %v1404_v39  ;;  %1760 = vmatpush.msrb.mxu2 %v1666_v57  ;;  %v1683_v23 = vld [vmem:[%s4363_s3 + $0x198] sm:$0xff]  ;;  %v255_v39 = vperm.slane %v4143_v32, 3 }
  0xed   :  { %1721 = vmatpush.msrb.mxu3 %v1633_v14  ;;  %1772 = vmatpush.msrb.mxu0 %v1690_v9  ;;  %v1687_v14 = vld [vmem:[%s4363_s3 + $0x1b8] sm:$0xff] }
  0xee   :  { %1741 = vmatpush.msrb.mxu1 %v1649_v18  ;;  %1761 = vmatpush.msrb.mxu2 %v1665_v37 }
  0xef   :  { %1722 = vmatpush.msrb.mxu3 %v1632_v17  ;;  %1773 = vmatpush.msrb.mxu0 %v1689_v10  ;;  %v1686_v17 = vld [vmem:[%s4363_s3 + $0x1b0] sm:$0xff] }
  0xf0   :  { %1723 = vmatmul.f32.vlgmr.msrb.gmra.mxu3 %v1628_v3  ;;  %1742 = vmatpush.msrb.mxu1 %v1648_v19  ;;  %v1685_v19 = vld [vmem:[%s4363_s3 + $0x1a8] sm:$0xff] }
  0xf1   :  { %1762 = vmatpush.msrb.mxu2 %v1664_v61  ;;  %1774 = vmatpush.msrb.mxu0 %v1688_v13 }
  0xf3   :  { %v1429_v29 = vpop.f32.mrf.mxu2  ;;  %v1418_v34 = vpop.f32.mrf.mxu3  ;;  %1775 = vmatpush.msrb.mxu0 %v1687_v14 }
  0xf4   :  { %v1430_v36 = vadd.f32 %v1429_v29, %v1417_v41  ;;  %v1682_v29 = vld [vmem:[%s4363_s3 + $0x190] sm:$0xff] }
  0xf5   :  { %1776 = vmatpush.msrb.mxu0 %v1686_v17 }
  0xf7   :  { %1777 = vmatpush.msrb.mxu0 %v1685_v19 }
  0xf9   :  { %1778 = vmatpush.msrb.mxu0 %v1684_v21 }
  0xfb   :  { %v1431_v58 = vpop.f32.mrf.mxu2  ;;  %v1442_v44 = vpop.f32.mrf.mxu3  ;;  %1779 = vmatpush.msrb.mxu0 %v1683_v23 }
  0xfc   :  { %v1443_v46 = vadd.f32 %v1442_v44, %v1430_v36 }
  0xfd   :  { %1780 = vmatpush.msrb.mxu0 %v1682_v29 }
  0xfe   :  { %v1629_v47 = vmax.f32 %v1443_v46, 0.0 }
  0xff   :  { %1781 = vmatpush.msrb.mxu0 %v1681_v31 }
 0x100   :  { %1743 = vmatmul.f32.vlgmr.msrb.gmra.mxu1 %v1629_v47 }
 0x101   :  { %1782 = vmatpush.msrb.mxu0 %v1680_v33 }
 0x103   :  { %v1444_v49 = vpop.f32.mrf.mxu3 }
 0x108   :  { %v1481_v48 = vpop.f32.mrf.mxu0  ;;  %v1455_v50 = vpop.f32.mrf.mxu1 }
 0x109   :  { %v1456_v8 = vadd.f32 %v1455_v50, %v254_v6 }
 0x110   :  { %v1483_v26 = vpop.f32.mrf.mxu0  ;;  %v1457_v54 = vpop.f32.mrf.mxu1 }
 0x113   :  { %v1468_v56 = vpop.f32.mrf.mxu3  ;;  %v1494_v59 = vpop.f32.mrf.mxu2 }
 0x114   :  { %v1469_v11 = vadd.f32 %v1468_v56, %v1456_v8 }
 0x116   :  { %v1482_v15 = vadd.f32 %v1481_v48, %v1469_v11 }
 0x118   :  { %v1533_v5 = vpop.f32.mrf.mxu0  ;;  %v1495_v18 = vadd.f32 %v1494_v59, %v1482_v15 }
 0x11b   :  { %v1470_v1 = vpop.f32.mrf.mxu3  ;;  %v1496_v45 = vpop.f32.mrf.mxu2 }
 0x120   :  { %v1535_v7 = vpop.f32.mrf.mxu0 }
 0x128   :  { %v1507_v12 = vpop.f32.mrf.mxu1 }
 0x129   :  { %v1508_v20 = vadd.f32 %v1507_v12, %v1495_v18 }
 0x130   :  { %v1559_v16 = vpop.f32.mrf.mxu0  ;;  %v1509_v3 = vpop.f32.mrf.mxu1 }
 0x133   :  { %v1520_v60 = vpop.f32.mrf.mxu3  ;;  %v1546_v25 = vpop.f32.mrf.mxu2 }
 0x134   :  { %v1521_v24 = vadd.f32 %v1520_v60, %v1508_v20  ;;  %v1547_v41 = vadd.f32 %v1546_v25, %v255_v39 }
 0x136   :  { %v1534_v28 = vadd.f32 %v1533_v5, %v1521_v24  ;;  %v1560_v42 = vadd.f32 %v1559_v16, %v1547_v41 }
 0x138   :  { %v1561_v27 = vpop.f32.mrf.mxu0  ;;  %v1630_v30 = vmax.f32 %v1534_v28, 0.0 }
 0x13a   :  { %1763 = vmatmul.f32.vlgmr.msrb.gmra.mxu2 %v1630_v30 }
 0x13b   :  { %v1522_v34 = vpop.f32.mrf.mxu3  ;;  %v1548_v38 = vpop.f32.mrf.mxu2 }
 0x148   :  { %v1572_v40 = vpop.f32.mrf.mxu1 }
 0x149   :  { %v1573_v43 = vadd.f32 %v1572_v40, %v1560_v42 }
 0x14e   :  { %v1611_v58 = vpop.f32.mrf.mxu0 }
 0x150   :  { %v1574_v36 = vpop.f32.mrf.mxu1 }
 0x153   :  { %v1585_v44 = vpop.f32.mrf.mxu3  ;;  %v1598_v2 = vpop.f32.mrf.mxu2 }
 0x154   :  { %v1586_v46 = vadd.f32 %v1585_v44, %v1573_v43 }
 0x156   :  { %v1613_v47 = vpop.f32.mrf.mxu0  ;;  %v1599_v35 = vadd.f32 %v1598_v2, %v1586_v46 }
 0x158   :  { %v1612_v22 = vadd.f32 %v1611_v58, %v1599_v35  ;;  %v1624_v48 = vpop.f32.mrf.mxu1 }
 0x15a   :  { %v1625_v49 = vadd.f32 %v1624_v48, %v1612_v22 }
 0x15b   :  { %v1587_v50 = vpop.f32.mrf.mxu3  ;;  %v1600_v52 = vpop.f32.mrf.mxu2 }
 0x15c   :  { %v1631_v51 = vmax.f32 %v1625_v49, 0.0 }
 0x15e   :  { %2622 = vmatmul.msk.f32.vlgmr.msrb.gmra.mxu0 %vm1699_vm2, %v1631_v51 }
 0x160   :  { %v1626_v32 = vpop.f32.mrf.mxu1 }
 0x173   :  { %v1724_v26 = vpop.f32.mrf.mxu3 }
 0x174   :  { %v1725_v55 = vadd.f32 %v2824_v53, %v1724_v26 }
 0x17d   :  { %v1744_v54 = vpop.f32.mrf.mxu1 }
 0x17e   :  { %v1745_v57 = vadd.f32 %v1744_v54, %v1725_v55 }
 0x1bd   :  { %v1764_v56 = vpop.f32.mrf.mxu2 }
 0x1be   :  { %v1765_v59 = vadd.f32 %v1764_v56, %v1745_v57 }
 0x1db   :  { %v1784_v37 = vpop.f32.mrf.mxu0 }
 0x1dc   :  { %v1785_v61 = vadd.f32 %v1784_v37, %v1765_v59 }
 0x1de   :  { %v1788_v62 = vsel %vm1787_vm3, %v1785_v61, -inf }
 0x1df   :  { %1789 = vmax.xlane.f32.xlu0 %v1788_v62 }
 0x252   :  { %v1790_v5 = vpop.xlane.xlu0 %1789 }
 0x253   :  { %v1791_v63 = vsub.f32 %v1785_v61, %v1790_v5 }
 0x255   :  { %v1792_v0 = vmul.f32 1.442695, %v1791_v63 }
 0x257   :  { %2825 = vpow2.f32 %v1792_v0 }
 0x25d   :  { %v2826_v1 = vpop.eup %2825 }
 0x25e   :  { %v1794_v45 = vsel %vm1787_vm3, %v2826_v1, 0.0 }
 0x25f   :  { %1795 = vadd.xlane.f32.xlu0 %v1794_v45 }
 0x2d2   :  { %v1796_v4 = vpop.xlane.xlu0 %1795 }
 0x2d3   :  { %2827 = vlog2.f32 %v1796_v4 }
 0x2d9   :  { %v2828_v6 = vpop.eup %2827 }
 0x2da   :  { %v1798_v7 = vmul.f32 0.6931472, %v2828_v6 }
 0x2dc   :  { %v1799_v8 = vsub.f32 %v1791_v63, %v1798_v7 }
 0x2de   :  { %1800 = vst.msk [vmem:[#allocation2] sm:$0x3] %vm1787_vm3, %v1799_v8 }
 0x2df   :  { %1811 = dma.vmem_to_hbm [thread:$0]  %s1807_s14, 32, %s1809_s16, [#allocation3]  }
 0x2e0   :  { %2853 = dma.done.wait [#allocation3], 32  }
 0x2e1   :  { %2854 = vsyncadd [#allocation3], 4294967264 }
 0x2e2   :  { %1816 = vsyncpa [#allocation3], 1 }

</bundles_post_ra>
